<compile_context>
chip_gen: v6e
topology: v6e:2x2x1
jax: 0.10.0
libtpu: 0.0.40
codegen_flags: <defaults>
</compile_context>

<pallas_src>
import functools

import jax
import jax.numpy as jnp
from jax.experimental import pallas as pl
from jax.experimental.pallas import tpu as pltpu

KH = KW = 3
C_PAD = 128  # pad channels 64 -> 128: one full lane-tile for loads/stores/DMAs


def _round_up(x, m):
    return (x + m - 1) // m * m


def _fused_conv_chain_kernel(x_ref, w_ref, b_ref, o_ref, buf_a, buf_b,
                             *, m_pad, taps, n_layers, cp):
    """Five chained 3x3 VALID convs over one image, fully VMEM-resident.

    x_ref : (R, Cp) f32        flattened NHWC image (row stride = input width W),
                               rows [H*W, R) are zero padding
    w_ref : (L, 9*Cp, Cp) bf16 per-layer im2col weight slabs, rows ordered (kh,kw,cin)
    b_ref : (L, 1, Cp) f32     per-layer bias (channel-padded with zeros)
    o_ref : (M_pad, Cp) f32    last-layer output slab, same W row stride
    buf_a, buf_b : (R, Cp) f32 VMEM ping-pong buffers for the intermediates
    """
    r = buf_a.shape[0]
    bufs = (buf_a, buf_b)

    # Zero the tail rows: the next layer's taps read rows [m_pad, m_pad+2W+2)
    # of the previous layer's buffer, which the conv never writes.  (Those rows
    # never reach a valid final output, but keep the buffers deterministic.)
    tail = jnp.zeros((r - m_pad, cp), jnp.float32)
    buf_a[m_pad:, :] = tail
    buf_b[m_pad:, :] = tail

    for l in range(n_layers):
        src = x_ref if l == 0 else bufs[(l - 1) % 2]

        def tap_dot(t, off, l=l, src=src):
            lhs = src[off:off + m_pad, :].astype(jnp.bfloat16)    # bf16 MXU input
            rhs = w_ref[l, t * cp:(t + 1) * cp, :]                # (Cp, Cp) bf16
            return jnp.dot(lhs, rhs, preferred_element_type=jnp.float32)

        # 9 accumulated tap dots: tap (kh,kw) of a VALID 3x3 conv is the
        # row-major flattened image shifted by the constant offset kh*W+kw.
        acc = tap_dot(0, taps[0])
        for t in range(1, len(taps)):
            acc = acc + tap_dot(t, taps[t])
        acc = acc + b_ref[l]                                      # f32 bias once

        if l == n_layers - 1:
            o_ref[...] = acc.astype(o_ref.dtype)                  # full unmasked store
        else:
            bufs[l % 2][:m_pad, :] = acc                          # f32 intermediate


def prepare_params(params_oihw):
    """Static weight prep (outside jit): OIHW -> stacked lane-dense bf16 slabs."""
    w_slabs, b_rows = [], []
    for w_oihw, b in params_oihw:
        cout, cin, kh, kw = w_oihw.shape
        w_hwio = jnp.transpose(w_oihw, (2, 3, 1, 0))              # (KH,KW,Cin,Cout)
        w_padc = jnp.pad(w_hwio, ((0, 0), (0, 0),
                                  (0, C_PAD - cin), (0, C_PAD - cout)))
        w_slabs.append(
            w_padc.reshape(kh * kw * C_PAD, C_PAD).astype(jnp.bfloat16))
        b_rows.append(
            jnp.pad(b, (0, C_PAD - cout)).reshape(1, C_PAD).astype(jnp.float32))
    return jnp.stack(w_slabs), jnp.stack(b_rows)   # (L,1152,128) bf16, (L,1,128) f32


def model_b_forward(x_nchw, w_all, b_all):
    """Forward of module B: five chained 3x3 VALID convs, one fused kernel."""
    n, c, h, w_in = x_nchw.shape
    n_layers = w_all.shape[0]
    ho = h - n_layers * (KH - 1)
    wo = w_in - n_layers * (KW - 1)

    # First-layer output row count (row stride stays the input width W through
    # the whole chain); padded to a multiple of 8 so all stores are unmasked.
    m0 = (h - KH) * w_in + (w_in - KW + 1)
    m_pad = _round_up(m0, 8)
    max_off = (KH - 1) * w_in + (KW - 1)
    r = _round_up(m_pad + max_off, 8)          # rows each layer may read

    taps = tuple(kh * w_in + kw for kh in range(KH) for kw in range(KW))
    cp = C_PAD

    # Layout plumbing once per chain (not per layer): NCHW->NHWC, channel pad
    # to 128 lanes, flatten (H,W), zero-pad rows up to R.
    x = jnp.transpose(x_nchw, (0, 2, 3, 1))
    x = jnp.pad(x, ((0, 0), (0, 0), (0, 0), (0, cp - c)))
    x = x.reshape(n, h * w_in, cp)
    x = jnp.pad(x, ((0, 0), (0, r - h * w_in), (0, 0)))

    kernel = functools.partial(_fused_conv_chain_kernel, m_pad=m_pad,
                               taps=taps, n_layers=n_layers, cp=cp)

    out_flat = pl.pallas_call(
        kernel,
        out_shape=jax.ShapeDtypeStruct((n, m_pad, cp), jnp.float32),
        grid_spec=pltpu.PrefetchScalarGridSpec(
            num_scalar_prefetch=0,
            grid=(n,),
            in_specs=[
                pl.BlockSpec((None, r, cp), lambda i: (i, 0, 0)),
                # weights/bias: same block every grid step -> fetched once.
                # TODO(synk): single-buffer them (pl.Buffered(1)) or park them
                # in a persistent VMEM scratch when image tiles grow (v7x 64 MiB).
                pl.BlockSpec((n_layers, KH * KW * cp, cp), lambda i: (0, 0, 0)),
                pl.BlockSpec((n_layers, 1, cp), lambda i: (0, 0, 0)),
            ],
            out_specs=pl.BlockSpec((None, m_pad, cp), lambda i: (i, 0, 0)),
            scratch_shapes=[pltpu.VMEM((r, cp), jnp.float32),
                            pltpu.VMEM((r, cp), jnp.float32)],
        ),
        # TODO(synk): if N==1 is a real case on v7x, add a parallel grid axis
        # over output-row bands (with a 2-row halo per remaining layer) so both
        # TensorCores get work.
        compiler_params=pltpu.CompilerParams(
            dimension_semantics=("parallel",)),
    )(x, w_all, b_all)

    # Single valid-window extraction for the whole chain: row p = hh*W + ww is
    # a real output for hh < Ho, ww < Wo; then drop the channel pad.
    out = out_flat[:, :ho * w_in, :].reshape(n, ho, w_in, cp)[:, :, :wo, :c]
    return jnp.transpose(out, (0, 3, 1, 2))                       # NHWC -> NCHW


if __name__ == "__main__":
    key = jax.random.PRNGKey(0)
    N, C, H, W, K, L = 2, 64, 16, 16, 3, 5

    keys = jax.random.split(key, 2 * L + 1)
    x = jax.random.normal(keys[0], (N, C, H, W), dtype=jnp.float32)

    # deterministic PyTorch-style uniform fan-in init, one set per layer
    fan_in = C * K * K
    bound = 1.0 / (fan_in ** 0.5)
    params = []
    for layer in range(L):
        wl = jax.random.uniform(keys[1 + 2 * layer], (C, C, K, K),
                                minval=-bound, maxval=bound, dtype=jnp.float32)
        bl = jax.random.uniform(keys[2 + 2 * layer], (C,),
                                minval=-bound, maxval=bound, dtype=jnp.float32)
        params.append((wl, bl))

    w_all, b_all = prepare_params(params)        # static, hoisted out of jit
    out = jax.jit(model_b_forward)(x, w_all, b_all)
    out = jax.block_until_ready(out)
    assert out.shape == (N, C, H - L * (K - 1), W - L * (K - 1))

    # reference: chain of 5 VALID convs via XLA at full f32 precision
    ref = x
    for wl, bl in params:
        ref = jax.lax.conv_general_dilated(
            ref, wl, window_strides=(1, 1), padding="VALID",
            dimension_numbers=("NCHW", "OIHW", "NCHW"),
            precision=jax.lax.Precision.HIGHEST)
        ref = ref + bl[None, :, None, None]

    # bf16 MXU operands (f32 accumulate/intermediates) through 5 chained
    # layers: allow a slightly looser tolerance than the pure-f32 version.
    if not jnp.allclose(out, ref, atol=3e-3, rtol=3e-3):
        max_err = jnp.max(jnp.abs(out - ref))
        raise AssertionError(
            f"Pallas conv chain mismatch vs reference (max abs err {max_err})")

    print("KERNEL_OK")
</pallas_src>

<mosaic_0001>
module attributes {stable_mosaic.version = 11 : i64} {
  func.func @_fused_conv_chain_kernel(%arg0: i32, %arg1: memref<1x264x128xf32, #tpu.memory_space<vmem>>, %arg2: memref<5x1152x128xbf16, #tpu.memory_space<vmem>>, %arg3: memref<5x1x128xf32, #tpu.memory_space<vmem>>, %arg4: memref<1x224x128xf32, #tpu.memory_space<vmem>>, %arg5: memref<264x128xf32, #tpu.memory_space<vmem>>, %arg6: memref<264x128xf32, #tpu.memory_space<vmem>>) attributes {dimension_semantics = [#tpu.dimension_semantics<parallel>], iteration_bounds = array<i64: 2>, scalar_prefetch = 0 : i64, scratch_operands = 2 : i64, tpu.core_type = #tpu.core_type<tc>, window_params = [{transform_indices = @transform_0, window_bounds = array<i64: 1, 264, 128>}, {pipeline_mode = #tpu.pipeline_mode<synchronous>, transform_indices = @transform_1, window_bounds = array<i64: 5, 1152, 128>}, {pipeline_mode = #tpu.pipeline_mode<synchronous>, transform_indices = @transform_2, window_bounds = array<i64: 5, 1, 128>}, {transform_indices = @transform_3, window_bounds = array<i64: 1, 224, 128>}]} {
    %cst = arith.constant 0.000000e+00 : f32
    %0 = vector.broadcast %cst : f32 to vector<40x128xf32>
    %c224 = arith.constant 224 : index
    %c0 = arith.constant 0 : index
    %1 = vector.load %arg5[%c224, %c0] : memref<264x128xf32, #tpu.memory_space<vmem>>, vector<40x128xf32>
    tpu.vector_store %arg5[%c224, %c0], %0 {strides = array<i32>} : memref<264x128xf32, #tpu.memory_space<vmem>>, vector<40x128xf32>,
    %c224_0 = arith.constant 224 : index
    %c0_1 = arith.constant 0 : index
    %2 = vector.load %arg6[%c224_0, %c0_1] : memref<264x128xf32, #tpu.memory_space<vmem>>, vector<40x128xf32>
    tpu.vector_store %arg6[%c224_0, %c0_1], %0 {strides = array<i32>} : memref<264x128xf32, #tpu.memory_space<vmem>>, vector<40x128xf32>,
    %c0_2 = arith.constant 0 : index
    %c0_3 = arith.constant 0 : index
    %c0_4 = arith.constant 0 : index
    %3 = vector.load %arg1[%c0_2, %c0_3, %c0_4] : memref<1x264x128xf32, #tpu.memory_space<vmem>>, vector<1x224x128xf32>
    %4 = vector.shape_cast %3 : vector<1x224x128xf32> to vector<224x128xf32>
    %5 = arith.truncf %4 : vector<224x128xf32> to vector<224x128xbf16>
    %c0_5 = arith.constant 0 : index
    %c0_6 = arith.constant 0 : index
    %c0_7 = arith.constant 0 : index
    %6 = vector.load %arg2[%c0_5, %c0_6, %c0_7] : memref<5x1152x128xbf16, #tpu.memory_space<vmem>>, vector<1x128x128xbf16>
    %7 = vector.shape_cast %6 : vector<1x128x128xbf16> to vector<128x128xbf16>
    %cst_8 = arith.constant dense<0.000000e+00> : vector<224x128xf32>
    %8 = tpu.matmul %5, %7, %cst_8 {dimension_numbers = #tpu.dot_dimension_numbers<[1], [0], [0], [1], [0, 0, 1, 1], [], []>} : vector<224x128xbf16>, vector<128x128xbf16>, vector<224x128xf32> -> vector<224x128xf32>
    %c0_9 = arith.constant 0 : index
    %c1 = arith.constant 1 : index
    %c0_10 = arith.constant 0 : index
    %9 = vector.load %arg1[%c0_9, %c1, %c0_10] : memref<1x264x128xf32, #tpu.memory_space<vmem>>, vector<1x224x128xf32>
    %10 = vector.shape_cast %9 : vector<1x224x128xf32> to vector<224x128xf32>
    %11 = arith.truncf %10 : vector<224x128xf32> to vector<224x128xbf16>
    %c0_11 = arith.constant 0 : index
    %c128 = arith.constant 128 : index
    %c0_12 = arith.constant 0 : index
    %12 = vector.load %arg2[%c0_11, %c128, %c0_12] : memref<5x1152x128xbf16, #tpu.memory_space<vmem>>, vector<1x128x128xbf16>
    %13 = vector.shape_cast %12 : vector<1x128x128xbf16> to vector<128x128xbf16>
    %cst_13 = arith.constant dense<0.000000e+00> : vector<224x128xf32>
    %14 = tpu.matmul %11, %13, %cst_13 {dimension_numbers = #tpu.dot_dimension_numbers<[1], [0], [0], [1], [0, 0, 1, 1], [], []>} : vector<224x128xbf16>, vector<128x128xbf16>, vector<224x128xf32> -> vector<224x128xf32>
    %15 = arith.addf %8, %14 : vector<224x128xf32>
    %c0_14 = arith.constant 0 : index
    %c2 = arith.constant 2 : index
    %c0_15 = arith.constant 0 : index
    %16 = vector.load %arg1[%c0_14, %c2, %c0_15] : memref<1x264x128xf32, #tpu.memory_space<vmem>>, vector<1x224x128xf32>
    %17 = vector.shape_cast %16 : vector<1x224x128xf32> to vector<224x128xf32>
    %18 = arith.truncf %17 : vector<224x128xf32> to vector<224x128xbf16>
    %c0_16 = arith.constant 0 : index
    %c256 = arith.constant 256 : index
    %c0_17 = arith.constant 0 : index
    %19 = vector.load %arg2[%c0_16, %c256, %c0_17] : memref<5x1152x128xbf16, #tpu.memory_space<vmem>>, vector<1x128x128xbf16>
    %20 = vector.shape_cast %19 : vector<1x128x128xbf16> to vector<128x128xbf16>
    %cst_18 = arith.constant dense<0.000000e+00> : vector<224x128xf32>
    %21 = tpu.matmul %18, %20, %cst_18 {dimension_numbers = #tpu.dot_dimension_numbers<[1], [0], [0], [1], [0, 0, 1, 1], [], []>} : vector<224x128xbf16>, vector<128x128xbf16>, vector<224x128xf32> -> vector<224x128xf32>
    %22 = arith.addf %15, %21 : vector<224x128xf32>
    %c0_19 = arith.constant 0 : index
    %c16 = arith.constant 16 : index
    %c0_20 = arith.constant 0 : index
    %23 = vector.load %arg1[%c0_19, %c16, %c0_20] : memref<1x264x128xf32, #tpu.memory_space<vmem>>, vector<1x224x128xf32>
    %24 = vector.shape_cast %23 : vector<1x224x128xf32> to vector<224x128xf32>
    %25 = arith.truncf %24 : vector<224x128xf32> to vector<224x128xbf16>
    %c0_21 = arith.constant 0 : index
    %c384 = arith.constant 384 : index
    %c0_22 = arith.constant 0 : index
    %26 = vector.load %arg2[%c0_21, %c384, %c0_22] : memref<5x1152x128xbf16, #tpu.memory_space<vmem>>, vector<1x128x128xbf16>
    %27 = vector.shape_cast %26 : vector<1x128x128xbf16> to vector<128x128xbf16>
    %cst_23 = arith.constant dense<0.000000e+00> : vector<224x128xf32>
    %28 = tpu.matmul %25, %27, %cst_23 {dimension_numbers = #tpu.dot_dimension_numbers<[1], [0], [0], [1], [0, 0, 1, 1], [], []>} : vector<224x128xbf16>, vector<128x128xbf16>, vector<224x128xf32> -> vector<224x128xf32>
    %29 = arith.addf %22, %28 : vector<224x128xf32>
    %c0_24 = arith.constant 0 : index
    %c17 = arith.constant 17 : index
    %c0_25 = arith.constant 0 : index
    %30 = vector.load %arg1[%c0_24, %c17, %c0_25] : memref<1x264x128xf32, #tpu.memory_space<vmem>>, vector<1x224x128xf32>
    %31 = vector.shape_cast %30 : vector<1x224x128xf32> to vector<224x128xf32>
    %32 = arith.truncf %31 : vector<224x128xf32> to vector<224x128xbf16>
    %c0_26 = arith.constant 0 : index
    %c512 = arith.constant 512 : index
    %c0_27 = arith.constant 0 : index
    %33 = vector.load %arg2[%c0_26, %c512, %c0_27] : memref<5x1152x128xbf16, #tpu.memory_space<vmem>>, vector<1x128x128xbf16>
    %34 = vector.shape_cast %33 : vector<1x128x128xbf16> to vector<128x128xbf16>
    %cst_28 = arith.constant dense<0.000000e+00> : vector<224x128xf32>
    %35 = tpu.matmul %32, %34, %cst_28 {dimension_numbers = #tpu.dot_dimension_numbers<[1], [0], [0], [1], [0, 0, 1, 1], [], []>} : vector<224x128xbf16>, vector<128x128xbf16>, vector<224x128xf32> -> vector<224x128xf32>
    %36 = arith.addf %29, %35 : vector<224x128xf32>
    %c0_29 = arith.constant 0 : index
    %c18 = arith.constant 18 : index
    %c0_30 = arith.constant 0 : index
    %37 = vector.load %arg1[%c0_29, %c18, %c0_30] : memref<1x264x128xf32, #tpu.memory_space<vmem>>, vector<1x224x128xf32>
    %38 = vector.shape_cast %37 : vector<1x224x128xf32> to vector<224x128xf32>
    %39 = arith.truncf %38 : vector<224x128xf32> to vector<224x128xbf16>
    %c0_31 = arith.constant 0 : index
    %c640 = arith.constant 640 : index
    %c0_32 = arith.constant 0 : index
    %40 = vector.load %arg2[%c0_31, %c640, %c0_32] : memref<5x1152x128xbf16, #tpu.memory_space<vmem>>, vector<1x128x128xbf16>
    %41 = vector.shape_cast %40 : vector<1x128x128xbf16> to vector<128x128xbf16>
    %cst_33 = arith.constant dense<0.000000e+00> : vector<224x128xf32>
    %42 = tpu.matmul %39, %41, %cst_33 {dimension_numbers = #tpu.dot_dimension_numbers<[1], [0], [0], [1], [0, 0, 1, 1], [], []>} : vector<224x128xbf16>, vector<128x128xbf16>, vector<224x128xf32> -> vector<224x128xf32>
    %43 = arith.addf %36, %42 : vector<224x128xf32>
    %c0_34 = arith.constant 0 : index
    %c32 = arith.constant 32 : index
    %c0_35 = arith.constant 0 : index
    %44 = vector.load %arg1[%c0_34, %c32, %c0_35] : memref<1x264x128xf32, #tpu.memory_space<vmem>>, vector<1x224x128xf32>
    %45 = vector.shape_cast %44 : vector<1x224x128xf32> to vector<224x128xf32>
    %46 = arith.truncf %45 : vector<224x128xf32> to vector<224x128xbf16>
    %c0_36 = arith.constant 0 : index
    %c768 = arith.constant 768 : index
    %c0_37 = arith.constant 0 : index
    %47 = vector.load %arg2[%c0_36, %c768, %c0_37] : memref<5x1152x128xbf16, #tpu.memory_space<vmem>>, vector<1x128x128xbf16>
    %48 = vector.shape_cast %47 : vector<1x128x128xbf16> to vector<128x128xbf16>
    %cst_38 = arith.constant dense<0.000000e+00> : vector<224x128xf32>
    %49 = tpu.matmul %46, %48, %cst_38 {dimension_numbers = #tpu.dot_dimension_numbers<[1], [0], [0], [1], [0, 0, 1, 1], [], []>} : vector<224x128xbf16>, vector<128x128xbf16>, vector<224x128xf32> -> vector<224x128xf32>
    %50 = arith.addf %43, %49 : vector<224x128xf32>
    %c0_39 = arith.constant 0 : index
    %c33 = arith.constant 33 : index
    %c0_40 = arith.constant 0 : index
    %51 = vector.load %arg1[%c0_39, %c33, %c0_40] : memref<1x264x128xf32, #tpu.memory_space<vmem>>, vector<1x224x128xf32>
    %52 = vector.shape_cast %51 : vector<1x224x128xf32> to vector<224x128xf32>
    %53 = arith.truncf %52 : vector<224x128xf32> to vector<224x128xbf16>
    %c0_41 = arith.constant 0 : index
    %c896 = arith.constant 896 : index
    %c0_42 = arith.constant 0 : index
    %54 = vector.load %arg2[%c0_41, %c896, %c0_42] : memref<5x1152x128xbf16, #tpu.memory_space<vmem>>, vector<1x128x128xbf16>
    %55 = vector.shape_cast %54 : vector<1x128x128xbf16> to vector<128x128xbf16>
    %cst_43 = arith.constant dense<0.000000e+00> : vector<224x128xf32>
    %56 = tpu.matmul %53, %55, %cst_43 {dimension_numbers = #tpu.dot_dimension_numbers<[1], [0], [0], [1], [0, 0, 1, 1], [], []>} : vector<224x128xbf16>, vector<128x128xbf16>, vector<224x128xf32> -> vector<224x128xf32>
    %57 = arith.addf %50, %56 : vector<224x128xf32>
    %c0_44 = arith.constant 0 : index
    %c34 = arith.constant 34 : index
    %c0_45 = arith.constant 0 : index
    %58 = vector.load %arg1[%c0_44, %c34, %c0_45] : memref<1x264x128xf32, #tpu.memory_space<vmem>>, vector<1x224x128xf32>
    %59 = vector.shape_cast %58 : vector<1x224x128xf32> to vector<224x128xf32>
    %60 = arith.truncf %59 : vector<224x128xf32> to vector<224x128xbf16>
    %c0_46 = arith.constant 0 : index
    %c1024 = arith.constant 1024 : index
    %c0_47 = arith.constant 0 : index
    %61 = vector.load %arg2[%c0_46, %c1024, %c0_47] : memref<5x1152x128xbf16, #tpu.memory_space<vmem>>, vector<1x128x128xbf16>
    %62 = vector.shape_cast %61 : vector<1x128x128xbf16> to vector<128x128xbf16>
    %cst_48 = arith.constant dense<0.000000e+00> : vector<224x128xf32>
    %63 = tpu.matmul %60, %62, %cst_48 {dimension_numbers = #tpu.dot_dimension_numbers<[1], [0], [0], [1], [0, 0, 1, 1], [], []>} : vector<224x128xbf16>, vector<128x128xbf16>, vector<224x128xf32> -> vector<224x128xf32>
    %64 = arith.addf %57, %63 : vector<224x128xf32>
    %c0_49 = arith.constant 0 : index
    %c0_50 = arith.constant 0 : index
    %c0_51 = arith.constant 0 : index
    %65 = vector.load %arg3[%c0_49, %c0_50, %c0_51] : memref<5x1x128xf32, #tpu.memory_space<vmem>>, vector<1x1x128xf32>
    %66 = vector.shape_cast %65 : vector<1x1x128xf32> to vector<1x128xf32>
    %67 = vector.broadcast %66 : vector<1x128xf32> to vector<224x128xf32>
    %68 = arith.addf %64, %67 : vector<224x128xf32>
    %c0_52 = arith.constant 0 : index
    %c0_53 = arith.constant 0 : index
    %69 = vector.load %arg5[%c0_52, %c0_53] : memref<264x128xf32, #tpu.memory_space<vmem>>, vector<224x128xf32>
    tpu.vector_store %arg5[%c0_52, %c0_53], %68 {strides = array<i32>} : memref<264x128xf32, #tpu.memory_space<vmem>>, vector<224x128xf32>,
    %c0_54 = arith.constant 0 : index
    %c0_55 = arith.constant 0 : index
    %70 = vector.load %arg5[%c0_54, %c0_55] : memref<264x128xf32, #tpu.memory_space<vmem>>, vector<224x128xf32>
    %71 = arith.truncf %70 : vector<224x128xf32> to vector<224x128xbf16>
    %c1_56 = arith.constant 1 : index
    %c0_57 = arith.constant 0 : index
    %c0_58 = arith.constant 0 : index
    %72 = vector.load %arg2[%c1_56, %c0_57, %c0_58] : memref<5x1152x128xbf16, #tpu.memory_space<vmem>>, vector<1x128x128xbf16>
    %73 = vector.shape_cast %72 : vector<1x128x128xbf16> to vector<128x128xbf16>
    %cst_59 = arith.constant dense<0.000000e+00> : vector<224x128xf32>
    %74 = tpu.matmul %71, %73, %cst_59 {dimension_numbers = #tpu.dot_dimension_numbers<[1], [0], [0], [1], [0, 0, 1, 1], [], []>} : vector<224x128xbf16>, vector<128x128xbf16>, vector<224x128xf32> -> vector<224x128xf32>
    %c1_60 = arith.constant 1 : index
    %c0_61 = arith.constant 0 : index
    %75 = vector.load %arg5[%c1_60, %c0_61] : memref<264x128xf32, #tpu.memory_space<vmem>>, vector<224x128xf32>
    %76 = arith.truncf %75 : vector<224x128xf32> to vector<224x128xbf16>
    %c1_62 = arith.constant 1 : index
    %c128_63 = arith.constant 128 : index
    %c0_64 = arith.constant 0 : index
    %77 = vector.load %arg2[%c1_62, %c128_63, %c0_64] : memref<5x1152x128xbf16, #tpu.memory_space<vmem>>, vector<1x128x128xbf16>
    %78 = vector.shape_cast %77 : vector<1x128x128xbf16> to vector<128x128xbf16>
    %cst_65 = arith.constant dense<0.000000e+00> : vector<224x128xf32>
    %79 = tpu.matmul %76, %78, %cst_65 {dimension_numbers = #tpu.dot_dimension_numbers<[1], [0], [0], [1], [0, 0, 1, 1], [], []>} : vector<224x128xbf16>, vector<128x128xbf16>, vector<224x128xf32> -> vector<224x128xf32>
    %80 = arith.addf %74, %79 : vector<224x128xf32>
    %c2_66 = arith.constant 2 : index
    %c0_67 = arith.constant 0 : index
    %81 = vector.load %arg5[%c2_66, %c0_67] : memref<264x128xf32, #tpu.memory_space<vmem>>, vector<224x128xf32>
    %82 = arith.truncf %81 : vector<224x128xf32> to vector<224x128xbf16>
    %c1_68 = arith.constant 1 : index
    %c256_69 = arith.constant 256 : index
    %c0_70 = arith.constant 0 : index
    %83 = vector.load %arg2[%c1_68, %c256_69, %c0_70] : memref<5x1152x128xbf16, #tpu.memory_space<vmem>>, vector<1x128x128xbf16>
    %84 = vector.shape_cast %83 : vector<1x128x128xbf16> to vector<128x128xbf16>
    %cst_71 = arith.constant dense<0.000000e+00> : vector<224x128xf32>
    %85 = tpu.matmul %82, %84, %cst_71 {dimension_numbers = #tpu.dot_dimension_numbers<[1], [0], [0], [1], [0, 0, 1, 1], [], []>} : vector<224x128xbf16>, vector<128x128xbf16>, vector<224x128xf32> -> vector<224x128xf32>
    %86 = arith.addf %80, %85 : vector<224x128xf32>
    %c16_72 = arith.constant 16 : index
    %c0_73 = arith.constant 0 : index
    %87 = vector.load %arg5[%c16_72, %c0_73] : memref<264x128xf32, #tpu.memory_space<vmem>>, vector<224x128xf32>
    %88 = arith.truncf %87 : vector<224x128xf32> to vector<224x128xbf16>
    %c1_74 = arith.constant 1 : index
    %c384_75 = arith.constant 384 : index
    %c0_76 = arith.constant 0 : index
    %89 = vector.load %arg2[%c1_74, %c384_75, %c0_76] : memref<5x1152x128xbf16, #tpu.memory_space<vmem>>, vector<1x128x128xbf16>
    %90 = vector.shape_cast %89 : vector<1x128x128xbf16> to vector<128x128xbf16>
    %cst_77 = arith.constant dense<0.000000e+00> : vector<224x128xf32>
    %91 = tpu.matmul %88, %90, %cst_77 {dimension_numbers = #tpu.dot_dimension_numbers<[1], [0], [0], [1], [0, 0, 1, 1], [], []>} : vector<224x128xbf16>, vector<128x128xbf16>, vector<224x128xf32> -> vector<224x128xf32>
    %92 = arith.addf %86, %91 : vector<224x128xf32>
    %c17_78 = arith.constant 17 : index
    %c0_79 = arith.constant 0 : index
    %93 = vector.load %arg5[%c17_78, %c0_79] : memref<264x128xf32, #tpu.memory_space<vmem>>, vector<224x128xf32>
    %94 = arith.truncf %93 : vector<224x128xf32> to vector<224x128xbf16>
    %c1_80 = arith.constant 1 : index
    %c512_81 = arith.constant 512 : index
    %c0_82 = arith.constant 0 : index
    %95 = vector.load %arg2[%c1_80, %c512_81, %c0_82] : memref<5x1152x128xbf16, #tpu.memory_space<vmem>>, vector<1x128x128xbf16>
    %96 = vector.shape_cast %95 : vector<1x128x128xbf16> to vector<128x128xbf16>
    %cst_83 = arith.constant dense<0.000000e+00> : vector<224x128xf32>
    %97 = tpu.matmul %94, %96, %cst_83 {dimension_numbers = #tpu.dot_dimension_numbers<[1], [0], [0], [1], [0, 0, 1, 1], [], []>} : vector<224x128xbf16>, vector<128x128xbf16>, vector<224x128xf32> -> vector<224x128xf32>
    %98 = arith.addf %92, %97 : vector<224x128xf32>
    %c18_84 = arith.constant 18 : index
    %c0_85 = arith.constant 0 : index
    %99 = vector.load %arg5[%c18_84, %c0_85] : memref<264x128xf32, #tpu.memory_space<vmem>>, vector<224x128xf32>
    %100 = arith.truncf %99 : vector<224x128xf32> to vector<224x128xbf16>
    %c1_86 = arith.constant 1 : index
    %c640_87 = arith.constant 640 : index
    %c0_88 = arith.constant 0 : index
    %101 = vector.load %arg2[%c1_86, %c640_87, %c0_88] : memref<5x1152x128xbf16, #tpu.memory_space<vmem>>, vector<1x128x128xbf16>
    %102 = vector.shape_cast %101 : vector<1x128x128xbf16> to vector<128x128xbf16>
    %cst_89 = arith.constant dense<0.000000e+00> : vector<224x128xf32>
    %103 = tpu.matmul %100, %102, %cst_89 {dimension_numbers = #tpu.dot_dimension_numbers<[1], [0], [0], [1], [0, 0, 1, 1], [], []>} : vector<224x128xbf16>, vector<128x128xbf16>, vector<224x128xf32> -> vector<224x128xf32>
    %104 = arith.addf %98, %103 : vector<224x128xf32>
    %c32_90 = arith.constant 32 : index
    %c0_91 = arith.constant 0 : index
    %105 = vector.load %arg5[%c32_90, %c0_91] : memref<264x128xf32, #tpu.memory_space<vmem>>, vector<224x128xf32>
    %106 = arith.truncf %105 : vector<224x128xf32> to vector<224x128xbf16>
    %c1_92 = arith.constant 1 : index
    %c768_93 = arith.constant 768 : index
    %c0_94 = arith.constant 0 : index
    %107 = vector.load %arg2[%c1_92, %c768_93, %c0_94] : memref<5x1152x128xbf16, #tpu.memory_space<vmem>>, vector<1x128x128xbf16>
    %108 = vector.shape_cast %107 : vector<1x128x128xbf16> to vector<128x128xbf16>
    %cst_95 = arith.constant dense<0.000000e+00> : vector<224x128xf32>
    %109 = tpu.matmul %106, %108, %cst_95 {dimension_numbers = #tpu.dot_dimension_numbers<[1], [0], [0], [1], [0, 0, 1, 1], [], []>} : vector<224x128xbf16>, vector<128x128xbf16>, vector<224x128xf32> -> vector<224x128xf32>
    %110 = arith.addf %104, %109 : vector<224x128xf32>
    %c33_96 = arith.constant 33 : index
    %c0_97 = arith.constant 0 : index
    %111 = vector.load %arg5[%c33_96, %c0_97] : memref<264x128xf32, #tpu.memory_space<vmem>>, vector<224x128xf32>
    %112 = arith.truncf %111 : vector<224x128xf32> to vector<224x128xbf16>
    %c1_98 = arith.constant 1 : index
    %c896_99 = arith.constant 896 : index
    %c0_100 = arith.constant 0 : index
    %113 = vector.load %arg2[%c1_98, %c896_99, %c0_100] : memref<5x1152x128xbf16, #tpu.memory_space<vmem>>, vector<1x128x128xbf16>
    %114 = vector.shape_cast %113 : vector<1x128x128xbf16> to vector<128x128xbf16>
    %cst_101 = arith.constant dense<0.000000e+00> : vector<224x128xf32>
    %115 = tpu.matmul %112, %114, %cst_101 {dimension_numbers = #tpu.dot_dimension_numbers<[1], [0], [0], [1], [0, 0, 1, 1], [], []>} : vector<224x128xbf16>, vector<128x128xbf16>, vector<224x128xf32> -> vector<224x128xf32>
    %116 = arith.addf %110, %115 : vector<224x128xf32>
    %c34_102 = arith.constant 34 : index
    %c0_103 = arith.constant 0 : index
    %117 = vector.load %arg5[%c34_102, %c0_103] : memref<264x128xf32, #tpu.memory_space<vmem>>, vector<224x128xf32>
    %118 = arith.truncf %117 : vector<224x128xf32> to vector<224x128xbf16>
    %c1_104 = arith.constant 1 : index
    %c1024_105 = arith.constant 1024 : index
    %c0_106 = arith.constant 0 : index
    %119 = vector.load %arg2[%c1_104, %c1024_105, %c0_106] : memref<5x1152x128xbf16, #tpu.memory_space<vmem>>, vector<1x128x128xbf16>
    %120 = vector.shape_cast %119 : vector<1x128x128xbf16> to vector<128x128xbf16>
    %cst_107 = arith.constant dense<0.000000e+00> : vector<224x128xf32>
    %121 = tpu.matmul %118, %120, %cst_107 {dimension_numbers = #tpu.dot_dimension_numbers<[1], [0], [0], [1], [0, 0, 1, 1], [], []>} : vector<224x128xbf16>, vector<128x128xbf16>, vector<224x128xf32> -> vector<224x128xf32>
    %122 = arith.addf %116, %121 : vector<224x128xf32>
    %c1_108 = arith.constant 1 : index
    %c0_109 = arith.constant 0 : index
    %c0_110 = arith.constant 0 : index
    %123 = vector.load %arg3[%c1_108, %c0_109, %c0_110] : memref<5x1x128xf32, #tpu.memory_space<vmem>>, vector<1x1x128xf32>
    %124 = vector.shape_cast %123 : vector<1x1x128xf32> to vector<1x128xf32>
    %125 = vector.broadcast %124 : vector<1x128xf32> to vector<224x128xf32>
    %126 = arith.addf %122, %125 : vector<224x128xf32>
    %c0_111 = arith.constant 0 : index
    %c0_112 = arith.constant 0 : index
    %127 = vector.load %arg6[%c0_111, %c0_112] : memref<264x128xf32, #tpu.memory_space<vmem>>, vector<224x128xf32>
    tpu.vector_store %arg6[%c0_111, %c0_112], %126 {strides = array<i32>} : memref<264x128xf32, #tpu.memory_space<vmem>>, vector<224x128xf32>,
    %c0_113 = arith.constant 0 : index
    %c0_114 = arith.constant 0 : index
    %128 = vector.load %arg6[%c0_113, %c0_114] : memref<264x128xf32, #tpu.memory_space<vmem>>, vector<224x128xf32>
    %129 = arith.truncf %128 : vector<224x128xf32> to vector<224x128xbf16>
    %c2_115 = arith.constant 2 : index
    %c0_116 = arith.constant 0 : index
    %c0_117 = arith.constant 0 : index
    %130 = vector.load %arg2[%c2_115, %c0_116, %c0_117] : memref<5x1152x128xbf16, #tpu.memory_space<vmem>>, vector<1x128x128xbf16>
    %131 = vector.shape_cast %130 : vector<1x128x128xbf16> to vector<128x128xbf16>
    %cst_118 = arith.constant dense<0.000000e+00> : vector<224x128xf32>
    %132 = tpu.matmul %129, %131, %cst_118 {dimension_numbers = #tpu.dot_dimension_numbers<[1], [0], [0], [1], [0, 0, 1, 1], [], []>} : vector<224x128xbf16>, vector<128x128xbf16>, vector<224x128xf32> -> vector<224x128xf32>
    %c1_119 = arith.constant 1 : index
    %c0_120 = arith.constant 0 : index
    %133 = vector.load %arg6[%c1_119, %c0_120] : memref<264x128xf32, #tpu.memory_space<vmem>>, vector<224x128xf32>
    %134 = arith.truncf %133 : vector<224x128xf32> to vector<224x128xbf16>
    %c2_121 = arith.constant 2 : index
    %c128_122 = arith.constant 128 : index
    %c0_123 = arith.constant 0 : index
    %135 = vector.load %arg2[%c2_121, %c128_122, %c0_123] : memref<5x1152x128xbf16, #tpu.memory_space<vmem>>, vector<1x128x128xbf16>
    %136 = vector.shape_cast %135 : vector<1x128x128xbf16> to vector<128x128xbf16>
    %cst_124 = arith.constant dense<0.000000e+00> : vector<224x128xf32>
    %137 = tpu.matmul %134, %136, %cst_124 {dimension_numbers = #tpu.dot_dimension_numbers<[1], [0], [0], [1], [0, 0, 1, 1], [], []>} : vector<224x128xbf16>, vector<128x128xbf16>, vector<224x128xf32> -> vector<224x128xf32>
    %138 = arith.addf %132, %137 : vector<224x128xf32>
    %c2_125 = arith.constant 2 : index
    %c0_126 = arith.constant 0 : index
    %139 = vector.load %arg6[%c2_125, %c0_126] : memref<264x128xf32, #tpu.memory_space<vmem>>, vector<224x128xf32>
    %140 = arith.truncf %139 : vector<224x128xf32> to vector<224x128xbf16>
    %c2_127 = arith.constant 2 : index
    %c256_128 = arith.constant 256 : index
    %c0_129 = arith.constant 0 : index
    %141 = vector.load %arg2[%c2_127, %c256_128, %c0_129] : memref<5x1152x128xbf16, #tpu.memory_space<vmem>>, vector<1x128x128xbf16>
    %142 = vector.shape_cast %141 : vector<1x128x128xbf16> to vector<128x128xbf16>
    %cst_130 = arith.constant dense<0.000000e+00> : vector<224x128xf32>
    %143 = tpu.matmul %140, %142, %cst_130 {dimension_numbers = #tpu.dot_dimension_numbers<[1], [0], [0], [1], [0, 0, 1, 1], [], []>} : vector<224x128xbf16>, vector<128x128xbf16>, vector<224x128xf32> -> vector<224x128xf32>
    %144 = arith.addf %138, %143 : vector<224x128xf32>
    %c16_131 = arith.constant 16 : index
    %c0_132 = arith.constant 0 : index
    %145 = vector.load %arg6[%c16_131, %c0_132] : memref<264x128xf32, #tpu.memory_space<vmem>>, vector<224x128xf32>
    %146 = arith.truncf %145 : vector<224x128xf32> to vector<224x128xbf16>
    %c2_133 = arith.constant 2 : index
    %c384_134 = arith.constant 384 : index
    %c0_135 = arith.constant 0 : index
    %147 = vector.load %arg2[%c2_133, %c384_134, %c0_135] : memref<5x1152x128xbf16, #tpu.memory_space<vmem>>, vector<1x128x128xbf16>
    %148 = vector.shape_cast %147 : vector<1x128x128xbf16> to vector<128x128xbf16>
    %cst_136 = arith.constant dense<0.000000e+00> : vector<224x128xf32>
    %149 = tpu.matmul %146, %148, %cst_136 {dimension_numbers = #tpu.dot_dimension_numbers<[1], [0], [0], [1], [0, 0, 1, 1], [], []>} : vector<224x128xbf16>, vector<128x128xbf16>, vector<224x128xf32> -> vector<224x128xf32>
    %150 = arith.addf %144, %149 : vector<224x128xf32>
    %c17_137 = arith.constant 17 : index
    %c0_138 = arith.constant 0 : index
    %151 = vector.load %arg6[%c17_137, %c0_138] : memref<264x128xf32, #tpu.memory_space<vmem>>, vector<224x128xf32>
    %152 = arith.truncf %151 : vector<224x128xf32> to vector<224x128xbf16>
    %c2_139 = arith.constant 2 : index
    %c512_140 = arith.constant 512 : index
    %c0_141 = arith.constant 0 : index
    %153 = vector.load %arg2[%c2_139, %c512_140, %c0_141] : memref<5x1152x128xbf16, #tpu.memory_space<vmem>>, vector<1x128x128xbf16>
    %154 = vector.shape_cast %153 : vector<1x128x128xbf16> to vector<128x128xbf16>
    %cst_142 = arith.constant dense<0.000000e+00> : vector<224x128xf32>
    %155 = tpu.matmul %152, %154, %cst_142 {dimension_numbers = #tpu.dot_dimension_numbers<[1], [0], [0], [1], [0, 0, 1, 1], [], []>} : vector<224x128xbf16>, vector<128x128xbf16>, vector<224x128xf32> -> vector<224x128xf32>
    %156 = arith.addf %150, %155 : vector<224x128xf32>
    %c18_143 = arith.constant 18 : index
    %c0_144 = arith.constant 0 : index
    %157 = vector.load %arg6[%c18_143, %c0_144] : memref<264x128xf32, #tpu.memory_space<vmem>>, vector<224x128xf32>
    %158 = arith.truncf %157 : vector<224x128xf32> to vector<224x128xbf16>
    %c2_145 = arith.constant 2 : index
    %c640_146 = arith.constant 640 : index
    %c0_147 = arith.constant 0 : index
    %159 = vector.load %arg2[%c2_145, %c640_146, %c0_147] : memref<5x1152x128xbf16, #tpu.memory_space<vmem>>, vector<1x128x128xbf16>
    %160 = vector.shape_cast %159 : vector<1x128x128xbf16> to vector<128x128xbf16>
    %cst_148 = arith.constant dense<0.000000e+00> : vector<224x128xf32>
    %161 = tpu.matmul %158, %160, %cst_148 {dimension_numbers = #tpu.dot_dimension_numbers<[1], [0], [0], [1], [0, 0, 1, 1], [], []>} : vector<224x128xbf16>, vector<128x128xbf16>, vector<224x128xf32> -> vector<224x128xf32>
    %162 = arith.addf %156, %161 : vector<224x128xf32>
    %c32_149 = arith.constant 32 : index
    %c0_150 = arith.constant 0 : index
    %163 = vector.load %arg6[%c32_149, %c0_150] : memref<264x128xf32, #tpu.memory_space<vmem>>, vector<224x128xf32>
    %164 = arith.truncf %163 : vector<224x128xf32> to vector<224x128xbf16>
    %c2_151 = arith.constant 2 : index
    %c768_152 = arith.constant 768 : index
    %c0_153 = arith.constant 0 : index
    %165 = vector.load %arg2[%c2_151, %c768_152, %c0_153] : memref<5x1152x128xbf16, #tpu.memory_space<vmem>>, vector<1x128x128xbf16>
    %166 = vector.shape_cast %165 : vector<1x128x128xbf16> to vector<128x128xbf16>
    %cst_154 = arith.constant dense<0.000000e+00> : vector<224x128xf32>
    %167 = tpu.matmul %164, %166, %cst_154 {dimension_numbers = #tpu.dot_dimension_numbers<[1], [0], [0], [1], [0, 0, 1, 1], [], []>} : vector<224x128xbf16>, vector<128x128xbf16>, vector<224x128xf32> -> vector<224x128xf32>
    %168 = arith.addf %162, %167 : vector<224x128xf32>
    %c33_155 = arith.constant 33 : index
    %c0_156 = arith.constant 0 : index
    %169 = vector.load %arg6[%c33_155, %c0_156] : memref<264x128xf32, #tpu.memory_space<vmem>>, vector<224x128xf32>
    %170 = arith.truncf %169 : vector<224x128xf32> to vector<224x128xbf16>
    %c2_157 = arith.constant 2 : index
    %c896_158 = arith.constant 896 : index
    %c0_159 = arith.constant 0 : index
    %171 = vector.load %arg2[%c2_157, %c896_158, %c0_159] : memref<5x1152x128xbf16, #tpu.memory_space<vmem>>, vector<1x128x128xbf16>
    %172 = vector.shape_cast %171 : vector<1x128x128xbf16> to vector<128x128xbf16>
    %cst_160 = arith.constant dense<0.000000e+00> : vector<224x128xf32>
    %173 = tpu.matmul %170, %172, %cst_160 {dimension_numbers = #tpu.dot_dimension_numbers<[1], [0], [0], [1], [0, 0, 1, 1], [], []>} : vector<224x128xbf16>, vector<128x128xbf16>, vector<224x128xf32> -> vector<224x128xf32>
    %174 = arith.addf %168, %173 : vector<224x128xf32>
    %c34_161 = arith.constant 34 : index
    %c0_162 = arith.constant 0 : index
    %175 = vector.load %arg6[%c34_161, %c0_162] : memref<264x128xf32, #tpu.memory_space<vmem>>, vector<224x128xf32>
    %176 = arith.truncf %175 : vector<224x128xf32> to vector<224x128xbf16>
    %c2_163 = arith.constant 2 : index
    %c1024_164 = arith.constant 1024 : index
    %c0_165 = arith.constant 0 : index
    %177 = vector.load %arg2[%c2_163, %c1024_164, %c0_165] : memref<5x1152x128xbf16, #tpu.memory_space<vmem>>, vector<1x128x128xbf16>
    %178 = vector.shape_cast %177 : vector<1x128x128xbf16> to vector<128x128xbf16>
    %cst_166 = arith.constant dense<0.000000e+00> : vector<224x128xf32>
    %179 = tpu.matmul %176, %178, %cst_166 {dimension_numbers = #tpu.dot_dimension_numbers<[1], [0], [0], [1], [0, 0, 1, 1], [], []>} : vector<224x128xbf16>, vector<128x128xbf16>, vector<224x128xf32> -> vector<224x128xf32>
    %180 = arith.addf %174, %179 : vector<224x128xf32>
    %c2_167 = arith.constant 2 : index
    %c0_168 = arith.constant 0 : index
    %c0_169 = arith.constant 0 : index
    %181 = vector.load %arg3[%c2_167, %c0_168, %c0_169] : memref<5x1x128xf32, #tpu.memory_space<vmem>>, vector<1x1x128xf32>
    %182 = vector.shape_cast %181 : vector<1x1x128xf32> to vector<1x128xf32>
    %183 = vector.broadcast %182 : vector<1x128xf32> to vector<224x128xf32>
    %184 = arith.addf %180, %183 : vector<224x128xf32>
    %c0_170 = arith.constant 0 : index
    %c0_171 = arith.constant 0 : index
    %185 = vector.load %arg5[%c0_170, %c0_171] : memref<264x128xf32, #tpu.memory_space<vmem>>, vector<224x128xf32>
    tpu.vector_store %arg5[%c0_170, %c0_171], %184 {strides = array<i32>} : memref<264x128xf32, #tpu.memory_space<vmem>>, vector<224x128xf32>,
    %c0_172 = arith.constant 0 : index
    %c0_173 = arith.constant 0 : index
    %186 = vector.load %arg5[%c0_172, %c0_173] : memref<264x128xf32, #tpu.memory_space<vmem>>, vector<224x128xf32>
    %187 = arith.truncf %186 : vector<224x128xf32> to vector<224x128xbf16>
    %c3 = arith.constant 3 : index
    %c0_174 = arith.constant 0 : index
    %c0_175 = arith.constant 0 : index
    %188 = vector.load %arg2[%c3, %c0_174, %c0_175] : memref<5x1152x128xbf16, #tpu.memory_space<vmem>>, vector<1x128x128xbf16>
    %189 = vector.shape_cast %188 : vector<1x128x128xbf16> to vector<128x128xbf16>
    %cst_176 = arith.constant dense<0.000000e+00> : vector<224x128xf32>
    %190 = tpu.matmul %187, %189, %cst_176 {dimension_numbers = #tpu.dot_dimension_numbers<[1], [0], [0], [1], [0, 0, 1, 1], [], []>} : vector<224x128xbf16>, vector<128x128xbf16>, vector<224x128xf32> -> vector<224x128xf32>
    %c1_177 = arith.constant 1 : index
    %c0_178 = arith.constant 0 : index
    %191 = vector.load %arg5[%c1_177, %c0_178] : memref<264x128xf32, #tpu.memory_space<vmem>>, vector<224x128xf32>
    %192 = arith.truncf %191 : vector<224x128xf32> to vector<224x128xbf16>
    %c3_179 = arith.constant 3 : index
    %c128_180 = arith.constant 128 : index
    %c0_181 = arith.constant 0 : index
    %193 = vector.load %arg2[%c3_179, %c128_180, %c0_181] : memref<5x1152x128xbf16, #tpu.memory_space<vmem>>, vector<1x128x128xbf16>
    %194 = vector.shape_cast %193 : vector<1x128x128xbf16> to vector<128x128xbf16>
    %cst_182 = arith.constant dense<0.000000e+00> : vector<224x128xf32>
    %195 = tpu.matmul %192, %194, %cst_182 {dimension_numbers = #tpu.dot_dimension_numbers<[1], [0], [0], [1], [0, 0, 1, 1], [], []>} : vector<224x128xbf16>, vector<128x128xbf16>, vector<224x128xf32> -> vector<224x128xf32>
    %196 = arith.addf %190, %195 : vector<224x128xf32>
    %c2_183 = arith.constant 2 : index
    %c0_184 = arith.constant 0 : index
    %197 = vector.load %arg5[%c2_183, %c0_184] : memref<264x128xf32, #tpu.memory_space<vmem>>, vector<224x128xf32>
    %198 = arith.truncf %197 : vector<224x128xf32> to vector<224x128xbf16>
    %c3_185 = arith.constant 3 : index
    %c256_186 = arith.constant 256 : index
    %c0_187 = arith.constant 0 : index
    %199 = vector.load %arg2[%c3_185, %c256_186, %c0_187] : memref<5x1152x128xbf16, #tpu.memory_space<vmem>>, vector<1x128x128xbf16>
    %200 = vector.shape_cast %199 : vector<1x128x128xbf16> to vector<128x128xbf16>
    %cst_188 = arith.constant dense<0.000000e+00> : vector<224x128xf32>
    %201 = tpu.matmul %198, %200, %cst_188 {dimension_numbers = #tpu.dot_dimension_numbers<[1], [0], [0], [1], [0, 0, 1, 1], [], []>} : vector<224x128xbf16>, vector<128x128xbf16>, vector<224x128xf32> -> vector<224x128xf32>
    %202 = arith.addf %196, %201 : vector<224x128xf32>
    %c16_189 = arith.constant 16 : index
    %c0_190 = arith.constant 0 : index
    %203 = vector.load %arg5[%c16_189, %c0_190] : memref<264x128xf32, #tpu.memory_space<vmem>>, vector<224x128xf32>
    %204 = arith.truncf %203 : vector<224x128xf32> to vector<224x128xbf16>
    %c3_191 = arith.constant 3 : index
    %c384_192 = arith.constant 384 : index
    %c0_193 = arith.constant 0 : index
    %205 = vector.load %arg2[%c3_191, %c384_192, %c0_193] : memref<5x1152x128xbf16, #tpu.memory_space<vmem>>, vector<1x128x128xbf16>
    %206 = vector.shape_cast %205 : vector<1x128x128xbf16> to vector<128x128xbf16>
    %cst_194 = arith.constant dense<0.000000e+00> : vector<224x128xf32>
    %207 = tpu.matmul %204, %206, %cst_194 {dimension_numbers = #tpu.dot_dimension_numbers<[1], [0], [0], [1], [0, 0, 1, 1], [], []>} : vector<224x128xbf16>, vector<128x128xbf16>, vector<224x128xf32> -> vector<224x128xf32>
    %208 = arith.addf %202, %207 : vector<224x128xf32>
    %c17_195 = arith.constant 17 : index
    %c0_196 = arith.constant 0 : index
    %209 = vector.load %arg5[%c17_195, %c0_196] : memref<264x128xf32, #tpu.memory_space<vmem>>, vector<224x128xf32>
    %210 = arith.truncf %209 : vector<224x128xf32> to vector<224x128xbf16>
    %c3_197 = arith.constant 3 : index
    %c512_198 = arith.constant 512 : index
    %c0_199 = arith.constant 0 : index
    %211 = vector.load %arg2[%c3_197, %c512_198, %c0_199] : memref<5x1152x128xbf16, #tpu.memory_space<vmem>>, vector<1x128x128xbf16>
    %212 = vector.shape_cast %211 : vector<1x128x128xbf16> to vector<128x128xbf16>
    %cst_200 = arith.constant dense<0.000000e+00> : vector<224x128xf32>
    %213 = tpu.matmul %210, %212, %cst_200 {dimension_numbers = #tpu.dot_dimension_numbers<[1], [0], [0], [1], [0, 0, 1, 1], [], []>} : vector<224x128xbf16>, vector<128x128xbf16>, vector<224x128xf32> -> vector<224x128xf32>
    %214 = arith.addf %208, %213 : vector<224x128xf32>
    %c18_201 = arith.constant 18 : index
    %c0_202 = arith.constant 0 : index
    %215 = vector.load %arg5[%c18_201, %c0_202] : memref<264x128xf32, #tpu.memory_space<vmem>>, vector<224x128xf32>
    %216 = arith.truncf %215 : vector<224x128xf32> to vector<224x128xbf16>
    %c3_203 = arith.constant 3 : index
    %c640_204 = arith.constant 640 : index
    %c0_205 = arith.constant 0 : index
    %217 = vector.load %arg2[%c3_203, %c640_204, %c0_205] : memref<5x1152x128xbf16, #tpu.memory_space<vmem>>, vector<1x128x128xbf16>
    %218 = vector.shape_cast %217 : vector<1x128x128xbf16> to vector<128x128xbf16>
    %cst_206 = arith.constant dense<0.000000e+00> : vector<224x128xf32>
    %219 = tpu.matmul %216, %218, %cst_206 {dimension_numbers = #tpu.dot_dimension_numbers<[1], [0], [0], [1], [0, 0, 1, 1], [], []>} : vector<224x128xbf16>, vector<128x128xbf16>, vector<224x128xf32> -> vector<224x128xf32>
    %220 = arith.addf %214, %219 : vector<224x128xf32>
    %c32_207 = arith.constant 32 : index
    %c0_208 = arith.constant 0 : index
    %221 = vector.load %arg5[%c32_207, %c0_208] : memref<264x128xf32, #tpu.memory_space<vmem>>, vector<224x128xf32>
    %222 = arith.truncf %221 : vector<224x128xf32> to vector<224x128xbf16>
    %c3_209 = arith.constant 3 : index
    %c768_210 = arith.constant 768 : index
    %c0_211 = arith.constant 0 : index
    %223 = vector.load %arg2[%c3_209, %c768_210, %c0_211] : memref<5x1152x128xbf16, #tpu.memory_space<vmem>>, vector<1x128x128xbf16>
    %224 = vector.shape_cast %223 : vector<1x128x128xbf16> to vector<128x128xbf16>
    %cst_212 = arith.constant dense<0.000000e+00> : vector<224x128xf32>
    %225 = tpu.matmul %222, %224, %cst_212 {dimension_numbers = #tpu.dot_dimension_numbers<[1], [0], [0], [1], [0, 0, 1, 1], [], []>} : vector<224x128xbf16>, vector<128x128xbf16>, vector<224x128xf32> -> vector<224x128xf32>
    %226 = arith.addf %220, %225 : vector<224x128xf32>
    %c33_213 = arith.constant 33 : index
    %c0_214 = arith.constant 0 : index
    %227 = vector.load %arg5[%c33_213, %c0_214] : memref<264x128xf32, #tpu.memory_space<vmem>>, vector<224x128xf32>
    %228 = arith.truncf %227 : vector<224x128xf32> to vector<224x128xbf16>
    %c3_215 = arith.constant 3 : index
    %c896_216 = arith.constant 896 : index
    %c0_217 = arith.constant 0 : index
    %229 = vector.load %arg2[%c3_215, %c896_216, %c0_217] : memref<5x1152x128xbf16, #tpu.memory_space<vmem>>, vector<1x128x128xbf16>
    %230 = vector.shape_cast %229 : vector<1x128x128xbf16> to vector<128x128xbf16>
    %cst_218 = arith.constant dense<0.000000e+00> : vector<224x128xf32>
    %231 = tpu.matmul %228, %230, %cst_218 {dimension_numbers = #tpu.dot_dimension_numbers<[1], [0], [0], [1], [0, 0, 1, 1], [], []>} : vector<224x128xbf16>, vector<128x128xbf16>, vector<224x128xf32> -> vector<224x128xf32>
    %232 = arith.addf %226, %231 : vector<224x128xf32>
    %c34_219 = arith.constant 34 : index
    %c0_220 = arith.constant 0 : index
    %233 = vector.load %arg5[%c34_219, %c0_220] : memref<264x128xf32, #tpu.memory_space<vmem>>, vector<224x128xf32>
    %234 = arith.truncf %233 : vector<224x128xf32> to vector<224x128xbf16>
    %c3_221 = arith.constant 3 : index
    %c1024_222 = arith.constant 1024 : index
    %c0_223 = arith.constant 0 : index
    %235 = vector.load %arg2[%c3_221, %c1024_222, %c0_223] : memref<5x1152x128xbf16, #tpu.memory_space<vmem>>, vector<1x128x128xbf16>
    %236 = vector.shape_cast %235 : vector<1x128x128xbf16> to vector<128x128xbf16>
    %cst_224 = arith.constant dense<0.000000e+00> : vector<224x128xf32>
    %237 = tpu.matmul %234, %236, %cst_224 {dimension_numbers = #tpu.dot_dimension_numbers<[1], [0], [0], [1], [0, 0, 1, 1], [], []>} : vector<224x128xbf16>, vector<128x128xbf16>, vector<224x128xf32> -> vector<224x128xf32>
    %238 = arith.addf %232, %237 : vector<224x128xf32>
    %c3_225 = arith.constant 3 : index
    %c0_226 = arith.constant 0 : index
    %c0_227 = arith.constant 0 : index
    %239 = vector.load %arg3[%c3_225, %c0_226, %c0_227] : memref<5x1x128xf32, #tpu.memory_space<vmem>>, vector<1x1x128xf32>
    %240 = vector.shape_cast %239 : vector<1x1x128xf32> to vector<1x128xf32>
    %241 = vector.broadcast %240 : vector<1x128xf32> to vector<224x128xf32>
    %242 = arith.addf %238, %241 : vector<224x128xf32>
    %c0_228 = arith.constant 0 : index
    %c0_229 = arith.constant 0 : index
    %243 = vector.load %arg6[%c0_228, %c0_229] : memref<264x128xf32, #tpu.memory_space<vmem>>, vector<224x128xf32>
    tpu.vector_store %arg6[%c0_228, %c0_229], %242 {strides = array<i32>} : memref<264x128xf32, #tpu.memory_space<vmem>>, vector<224x128xf32>,
    %c0_230 = arith.constant 0 : index
    %c0_231 = arith.constant 0 : index
    %244 = vector.load %arg6[%c0_230, %c0_231] : memref<264x128xf32, #tpu.memory_space<vmem>>, vector<224x128xf32>
    %245 = arith.truncf %244 : vector<224x128xf32> to vector<224x128xbf16>
    %c4 = arith.constant 4 : index
    %c0_232 = arith.constant 0 : index
    %c0_233 = arith.constant 0 : index
    %246 = vector.load %arg2[%c4, %c0_232, %c0_233] : memref<5x1152x128xbf16, #tpu.memory_space<vmem>>, vector<1x128x128xbf16>
    %247 = vector.shape_cast %246 : vector<1x128x128xbf16> to vector<128x128xbf16>
    %cst_234 = arith.constant dense<0.000000e+00> : vector<224x128xf32>
    %248 = tpu.matmul %245, %247, %cst_234 {dimension_numbers = #tpu.dot_dimension_numbers<[1], [0], [0], [1], [0, 0, 1, 1], [], []>} : vector<224x128xbf16>, vector<128x128xbf16>, vector<224x128xf32> -> vector<224x128xf32>
    %c1_235 = arith.constant 1 : index
    %c0_236 = arith.constant 0 : index
    %249 = vector.load %arg6[%c1_235, %c0_236] : memref<264x128xf32, #tpu.memory_space<vmem>>, vector<224x128xf32>
    %250 = arith.truncf %249 : vector<224x128xf32> to vector<224x128xbf16>
    %c4_237 = arith.constant 4 : index
    %c128_238 = arith.constant 128 : index
    %c0_239 = arith.constant 0 : index
    %251 = vector.load %arg2[%c4_237, %c128_238, %c0_239] : memref<5x1152x128xbf16, #tpu.memory_space<vmem>>, vector<1x128x128xbf16>
    %252 = vector.shape_cast %251 : vector<1x128x128xbf16> to vector<128x128xbf16>
    %cst_240 = arith.constant dense<0.000000e+00> : vector<224x128xf32>
    %253 = tpu.matmul %250, %252, %cst_240 {dimension_numbers = #tpu.dot_dimension_numbers<[1], [0], [0], [1], [0, 0, 1, 1], [], []>} : vector<224x128xbf16>, vector<128x128xbf16>, vector<224x128xf32> -> vector<224x128xf32>
    %254 = arith.addf %248, %253 : vector<224x128xf32>
    %c2_241 = arith.constant 2 : index
    %c0_242 = arith.constant 0 : index
    %255 = vector.load %arg6[%c2_241, %c0_242] : memref<264x128xf32, #tpu.memory_space<vmem>>, vector<224x128xf32>
    %256 = arith.truncf %255 : vector<224x128xf32> to vector<224x128xbf16>
    %c4_243 = arith.constant 4 : index
    %c256_244 = arith.constant 256 : index
    %c0_245 = arith.constant 0 : index
    %257 = vector.load %arg2[%c4_243, %c256_244, %c0_245] : memref<5x1152x128xbf16, #tpu.memory_space<vmem>>, vector<1x128x128xbf16>
    %258 = vector.shape_cast %257 : vector<1x128x128xbf16> to vector<128x128xbf16>
    %cst_246 = arith.constant dense<0.000000e+00> : vector<224x128xf32>
    %259 = tpu.matmul %256, %258, %cst_246 {dimension_numbers = #tpu.dot_dimension_numbers<[1], [0], [0], [1], [0, 0, 1, 1], [], []>} : vector<224x128xbf16>, vector<128x128xbf16>, vector<224x128xf32> -> vector<224x128xf32>
    %260 = arith.addf %254, %259 : vector<224x128xf32>
    %c16_247 = arith.constant 16 : index
    %c0_248 = arith.constant 0 : index
    %261 = vector.load %arg6[%c16_247, %c0_248] : memref<264x128xf32, #tpu.memory_space<vmem>>, vector<224x128xf32>
    %262 = arith.truncf %261 : vector<224x128xf32> to vector<224x128xbf16>
    %c4_249 = arith.constant 4 : index
    %c384_250 = arith.constant 384 : index
    %c0_251 = arith.constant 0 : index
    %263 = vector.load %arg2[%c4_249, %c384_250, %c0_251] : memref<5x1152x128xbf16, #tpu.memory_space<vmem>>, vector<1x128x128xbf16>
    %264 = vector.shape_cast %263 : vector<1x128x128xbf16> to vector<128x128xbf16>
    %cst_252 = arith.constant dense<0.000000e+00> : vector<224x128xf32>
    %265 = tpu.matmul %262, %264, %cst_252 {dimension_numbers = #tpu.dot_dimension_numbers<[1], [0], [0], [1], [0, 0, 1, 1], [], []>} : vector<224x128xbf16>, vector<128x128xbf16>, vector<224x128xf32> -> vector<224x128xf32>
    %266 = arith.addf %260, %265 : vector<224x128xf32>
    %c17_253 = arith.constant 17 : index
    %c0_254 = arith.constant 0 : index
    %267 = vector.load %arg6[%c17_253, %c0_254] : memref<264x128xf32, #tpu.memory_space<vmem>>, vector<224x128xf32>
    %268 = arith.truncf %267 : vector<224x128xf32> to vector<224x128xbf16>
    %c4_255 = arith.constant 4 : index
    %c512_256 = arith.constant 512 : index
    %c0_257 = arith.constant 0 : index
    %269 = vector.load %arg2[%c4_255, %c512_256, %c0_257] : memref<5x1152x128xbf16, #tpu.memory_space<vmem>>, vector<1x128x128xbf16>
    %270 = vector.shape_cast %269 : vector<1x128x128xbf16> to vector<128x128xbf16>
    %cst_258 = arith.constant dense<0.000000e+00> : vector<224x128xf32>
    %271 = tpu.matmul %268, %270, %cst_258 {dimension_numbers = #tpu.dot_dimension_numbers<[1], [0], [0], [1], [0, 0, 1, 1], [], []>} : vector<224x128xbf16>, vector<128x128xbf16>, vector<224x128xf32> -> vector<224x128xf32>
    %272 = arith.addf %266, %271 : vector<224x128xf32>
    %c18_259 = arith.constant 18 : index
    %c0_260 = arith.constant 0 : index
    %273 = vector.load %arg6[%c18_259, %c0_260] : memref<264x128xf32, #tpu.memory_space<vmem>>, vector<224x128xf32>
    %274 = arith.truncf %273 : vector<224x128xf32> to vector<224x128xbf16>
    %c4_261 = arith.constant 4 : index
    %c640_262 = arith.constant 640 : index
    %c0_263 = arith.constant 0 : index
    %275 = vector.load %arg2[%c4_261, %c640_262, %c0_263] : memref<5x1152x128xbf16, #tpu.memory_space<vmem>>, vector<1x128x128xbf16>
    %276 = vector.shape_cast %275 : vector<1x128x128xbf16> to vector<128x128xbf16>
    %cst_264 = arith.constant dense<0.000000e+00> : vector<224x128xf32>
    %277 = tpu.matmul %274, %276, %cst_264 {dimension_numbers = #tpu.dot_dimension_numbers<[1], [0], [0], [1], [0, 0, 1, 1], [], []>} : vector<224x128xbf16>, vector<128x128xbf16>, vector<224x128xf32> -> vector<224x128xf32>
    %278 = arith.addf %272, %277 : vector<224x128xf32>
    %c32_265 = arith.constant 32 : index
    %c0_266 = arith.constant 0 : index
    %279 = vector.load %arg6[%c32_265, %c0_266] : memref<264x128xf32, #tpu.memory_space<vmem>>, vector<224x128xf32>
    %280 = arith.truncf %279 : vector<224x128xf32> to vector<224x128xbf16>
    %c4_267 = arith.constant 4 : index
    %c768_268 = arith.constant 768 : index
    %c0_269 = arith.constant 0 : index
    %281 = vector.load %arg2[%c4_267, %c768_268, %c0_269] : memref<5x1152x128xbf16, #tpu.memory_space<vmem>>, vector<1x128x128xbf16>
    %282 = vector.shape_cast %281 : vector<1x128x128xbf16> to vector<128x128xbf16>
    %cst_270 = arith.constant dense<0.000000e+00> : vector<224x128xf32>
    %283 = tpu.matmul %280, %282, %cst_270 {dimension_numbers = #tpu.dot_dimension_numbers<[1], [0], [0], [1], [0, 0, 1, 1], [], []>} : vector<224x128xbf16>, vector<128x128xbf16>, vector<224x128xf32> -> vector<224x128xf32>
    %284 = arith.addf %278, %283 : vector<224x128xf32>
    %c33_271 = arith.constant 33 : index
    %c0_272 = arith.constant 0 : index
    %285 = vector.load %arg6[%c33_271, %c0_272] : memref<264x128xf32, #tpu.memory_space<vmem>>, vector<224x128xf32>
    %286 = arith.truncf %285 : vector<224x128xf32> to vector<224x128xbf16>
    %c4_273 = arith.constant 4 : index
    %c896_274 = arith.constant 896 : index
    %c0_275 = arith.constant 0 : index
    %287 = vector.load %arg2[%c4_273, %c896_274, %c0_275] : memref<5x1152x128xbf16, #tpu.memory_space<vmem>>, vector<1x128x128xbf16>
    %288 = vector.shape_cast %287 : vector<1x128x128xbf16> to vector<128x128xbf16>
    %cst_276 = arith.constant dense<0.000000e+00> : vector<224x128xf32>
    %289 = tpu.matmul %286, %288, %cst_276 {dimension_numbers = #tpu.dot_dimension_numbers<[1], [0], [0], [1], [0, 0, 1, 1], [], []>} : vector<224x128xbf16>, vector<128x128xbf16>, vector<224x128xf32> -> vector<224x128xf32>
    %290 = arith.addf %284, %289 : vector<224x128xf32>
    %c34_277 = arith.constant 34 : index
    %c0_278 = arith.constant 0 : index
    %291 = vector.load %arg6[%c34_277, %c0_278] : memref<264x128xf32, #tpu.memory_space<vmem>>, vector<224x128xf32>
    %292 = arith.truncf %291 : vector<224x128xf32> to vector<224x128xbf16>
    %c4_279 = arith.constant 4 : index
    %c1024_280 = arith.constant 1024 : index
    %c0_281 = arith.constant 0 : index
    %293 = vector.load %arg2[%c4_279, %c1024_280, %c0_281] : memref<5x1152x128xbf16, #tpu.memory_space<vmem>>, vector<1x128x128xbf16>
    %294 = vector.shape_cast %293 : vector<1x128x128xbf16> to vector<128x128xbf16>
    %cst_282 = arith.constant dense<0.000000e+00> : vector<224x128xf32>
    %295 = tpu.matmul %292, %294, %cst_282 {dimension_numbers = #tpu.dot_dimension_numbers<[1], [0], [0], [1], [0, 0, 1, 1], [], []>} : vector<224x128xbf16>, vector<128x128xbf16>, vector<224x128xf32> -> vector<224x128xf32>
    %296 = arith.addf %290, %295 : vector<224x128xf32>
    %c4_283 = arith.constant 4 : index
    %c0_284 = arith.constant 0 : index
    %c0_285 = arith.constant 0 : index
    %297 = vector.load %arg3[%c4_283, %c0_284, %c0_285] : memref<5x1x128xf32, #tpu.memory_space<vmem>>, vector<1x1x128xf32>
    %298 = vector.shape_cast %297 : vector<1x1x128xf32> to vector<1x128xf32>
    %299 = vector.broadcast %298 : vector<1x128xf32> to vector<224x128xf32>
    %300 = arith.addf %296, %299 : vector<224x128xf32>
    %c0_286 = arith.constant 0 : index
    %c0_287 = arith.constant 0 : index
    %c0_288 = arith.constant 0 : index
    %301 = vector.load %arg4[%c0_286, %c0_287, %c0_288] : memref<1x224x128xf32, #tpu.memory_space<vmem>>, vector<1x224x128xf32>
    %302 = vector.shape_cast %301 : vector<1x224x128xf32> to vector<224x128xf32>
    %303 = vector.shape_cast %300 : vector<224x128xf32> to vector<1x224x128xf32>
    tpu.vector_store %arg4[%c0_286, %c0_287, %c0_288], %303 {strides = array<i32>} : memref<1x224x128xf32, #tpu.memory_space<vmem>>, vector<1x224x128xf32>,
    return
  }
  func.func @transform_0(%arg0: i32) -> (i32, i32, i32) {
    %c0_i32 = arith.constant 0 : i32
    %c0_i32_0 = arith.constant 0 : i32
    %c0_i32_1 = arith.constant 0 : i32
    return %arg0, %c0_i32, %c0_i32_0 : i32, i32, i32
  }
  func.func @transform_1(%arg0: i32) -> (i32, i32, i32) {
    %c0_i32 = arith.constant 0 : i32
    %c0_i32_0 = arith.constant 0 : i32
    %c0_i32_1 = arith.constant 0 : i32
    %c0_i32_2 = arith.constant 0 : i32
    return %c0_i32, %c0_i32_0, %c0_i32_1 : i32, i32, i32
  }
  func.func @transform_2(%arg0: i32) -> (i32, i32, i32) {
    %c0_i32 = arith.constant 0 : i32
    %c0_i32_0 = arith.constant 0 : i32
    %c0_i32_1 = arith.constant 0 : i32
    %c0_i32_2 = arith.constant 0 : i32
    return %c0_i32, %c0_i32_0, %c0_i32_1 : i32, i32, i32
  }
  func.func @transform_3(%arg0: i32) -> (i32, i32, i32) {
    %c0_i32 = arith.constant 0 : i32
    %c0_i32_0 = arith.constant 0 : i32
    %c0_i32_1 = arith.constant 0 : i32
    return %arg0, %c0_i32, %c0_i32_0 : i32, i32, i32
  }
}

</mosaic_0001>

<bundles_post_ra>
// kernel: model_b_forward.1
= control target key start
LH: loop header
LB: loop body
LE: loop exit
PB: predicated region body
PF: predicated region fallthrough
CT: control target
= control target key end

     0   :  { %8 = vsyncpa [#allocation5], 0  ;;  %s20509_s0 = inlined_call_operand.vmem [shape: f32[2,264,128], index: 0, kind: input, shape index: {}]   ;;  %s20510_s1 = inlined_call_operand.hbm [shape: bf16[5,1152,128], index: 1, kind: input, shape index: {}]   ;;  %s20511_s2 = inlined_call_operand.hbm [shape: f32[5,1,128], index: 2, kind: input, shape index: {}]   ;;  %s20512_s3 = inlined_call_operand.vmem [shape: f32[2,224,128], index: 3, kind: output, shape index: {}]  }
   0x1   :  { %9 = vsyncpa [#allocation7], 0  ;;  %s16746_s12 = smov 0  }
   0x2 LB: > { %s16719_s13 = smov [#allocation4]   ;;  %s16752_s15 = sadd.s32 4294967295, %s16717_s12   ;;  %s16717_s12 = sphi %s16746_s12, %s15_s12  }
   0x3   : > { %s126_s14 = sshll.u32 %s16719_s13, 4  ;;  %p12889_p0 = scmp.ge.s32.totalorder %s16717_s12, 1  ;;  %s127_s14 = int_to_ptr.vmem [resolvable:$true] %s126_s14 }
   0x4   : > { %p114_p1 = scmp.lt.s32.totalorder %s16717_s12, 3  ;;  %p16268_p3 = scmp.eq.s32.totalorder %s16752_s15, 0 }
   0x5   : > { %s16720_s17 = smov [#allocation6]   ;;  %s16662_s20 = scalar_lea.vmem %s127_s14, 46080 }
   0x6   : > { %p16756_p2 = pnand %p12889_p0, %p114_p1  ;;  %s139_s18 = sshll.u32 %s16720_s17, 4  ;;  %s16769_s18 = int_to_ptr.vmem [resolvable:$true] %s139_s18 }
   0x7   : > { %p16663_p7 = scmp.ne.s32.totalorder %s127_s14, %s16662_s20  ;;  %p16670_p10 = scmp.lt.s32.totalorder %s127_s14, %s127_s14 }
   0x8   : > { %p16261_p4 = pneg %p16756_p2  ;;  %p16671_p11 = scmp.lt.s32.totalorder %s16662_s20, %s16662_s20 }
   0xa   : > { %p16765_p5 = pnand %p16268_p3, %p16261_p4  ;;  %p16672_p12 = por %p16671_p11, %p16670_p10 }
   0xc   : > { %p16653_p6 = pneg %p16765_p5 }
   0xe   : > { %p16665_p8 = pnand %p16663_p7, %p16653_p6 }
  0x10   : > { %p16666_p9 = pneg %p16665_p8 }
  0x12   : > { %p16673_p13 = pnand %p16672_p12, %p16666_p9 }
  0x14   : > { %16676 = shalt.err (!%p16673_p13)
}
  0x15   : > { %s16721_s21 = smov 64   ;;  %s16722_s22 = smov 4  }
  0x16   : > { %16264 = dma.hbm_to_vmem [thread:$0]  (!%p16765_p5), %s20510_s1, 46080, %s127_s14, [#allocation5], %s16721_s21, %s16721_s21, %s16722_s22  }
  0x17   : > { %s16688_s25 = scalar_lea.vmem %s16769_s18, 80  ;;  %s16695_s26 = scalar_lea.vmem %s16769_s18, 96 }
  0x18   : > { %p16689_p0 = scmp.ne.s32.totalorder %s16769_s18, %s16688_s25  ;;  %p16696_p7 = scmp.lt.s32.totalorder %s16769_s18, %s16769_s18 }
  0x19   : > { %p16697_p8 = scmp.lt.s32.totalorder %s16695_s26, %s16688_s25 }
  0x1a   : > { %p16691_p1 = pnand %p16689_p0, %p16653_p6 }
  0x1b   : > { %p16698_p9 = por %p16697_p8, %p16696_p7 }
  0x1c   : > { %p16692_p4 = pneg %p16691_p1 }
  0x1e   : > { %p16699_p10 = pnand %p16698_p9, %p16692_p4 }
  0x20   : > { %16702 = shalt.err (!%p16699_p10)
}
  0x21   : > { %s16723_s27 = smov 16   ;;  %s16724_s28 = smov 1  }
  0x22   : > { %16267 = dma.hbm_to_vmem [thread:$0]  (!%p16765_p5), %s20511_s2, 80, %s16769_s18, [#allocation7], %s16723_s27, %s16723_s27, %s16724_s28  }
  0x23   : > { %163 = sbr.rel (%p16756_p2) target bundleno = 2299 (0x8fb), region = 32 }
  0x28   : > { %16708 = dma.done.wait (%p16268_p3), [#allocation5], 46080  }
  0x29   : > { %16710 = vsyncadd (%p16268_p3), [#allocation5], 4294921216 }
  0x2a   : > { %16712 = dma.done.wait (%p16268_p3), [#allocation7], 80  }
  0x2b   : > { %16714 = vsyncadd (%p16268_p3), [#allocation7], 4294967216  ;;  %p191_p6 = scmp.lt.s32.totalorder %s16752_s15, 1  ;;  %v16287_v0 = vld [vmem:[#allocation4 + $0x78] sm:$0xff]   ;;  %v16288_v1 = vld [vmem:[#allocation4 + $0x70] sm:$0xff]  }
  0x2c   : > { %14255 = vmatprep.subr.bf16.mxu0 %v16287_v0  ;;  %16235 = vmatprep.subr.bf16.mxu1 %v16287_v0  ;;  %v16289_v2 = vld [vmem:[#allocation4 + $0x68] sm:$0xff]   ;;  %v16290_v3 = vld [vmem:[#allocation4 + $0x60] sm:$0xff]   ;;  %v16291_v10 = vld [vmem:[#allocation4 + $0x58] sm:$0xff]  }
  0x2d   : > { %s21125_s15 = smov (!%p191_p6, %s16752_s15), 1  ;;  %14256 = vmatpush3.bf16.msra.mxu0 %v16287_v0  ;;  %16243 = vmatpush3.bf16.msra.mxu1 %v16287_v0  ;;  %v16292_v11 = vld [vmem:[#allocation4 + $0x50] sm:$0xff]   ;;  %v16293_v12 = vld [vmem:[#allocation4 + $0x48] sm:$0xff]   ;;  %v16294_v13 = vld [vmem:[#allocation4 + $0x40] sm:$0xff]  }
  0x2e   : > { %s16251_s4 = smul.u32 264, %s21125_s15  ;;  %14257 = vmatprep.subr.bf16.mxu0 %v16288_v1  ;;  %16236 = vmatprep.subr.bf16.mxu1 %v16288_v1  ;;  %v16295_v18 = vld [vmem:[#allocation4 + $0x38] sm:$0xff]   ;;  %v16297_v26 = vld [vmem:[#allocation4 + $0x30] sm:$0xff]   ;;  %v16299_v32 = vld [vmem:[#allocation4 + $0x28] sm:$0xff]  }
  0x2f   : > { %v16296_v19 = vld [vmem:[#allocation4 + $0xb8] sm:$0xff]   ;;  %v16298_v27 = vld [vmem:[#allocation4 + $0xb0] sm:$0xff]   ;;  %v16300_v35 = vld [vmem:[#allocation4 + $0xa8] sm:$0xff]   ;;  %s16252_s8 = smul.u32 224, %s21125_s15 }
  0x30   : > { %s16813_s7 = scalar_lea.vmem %s20509_s0, %s16251_s4  ;;  %v16301_v42 = vld [vmem:[#allocation4 + $0x20] sm:$0xff]   ;;  %v16303_v50 = vld [vmem:[#allocation4 + $0x18] sm:$0xff]   ;;  %v16305_v58 = vld [vmem:[#allocation4 + $0x10] sm:$0xff]  }
  0x31   : > { %14258 = vmatpush3.bf16.msra.mxu0 %v16288_v1  ;;  %16244 = vmatpush3.bf16.msra.mxu1 %v16288_v1  ;;  %v270_v4 = vld [vmem:[%s16813_s7 + $0x1] sm:$0xff]  ;;  %v271_v5 = vld [vmem:[%s16813_s7 + $0x9] sm:$0xff]  ;;  %v272_v14 = vld [vmem:[%s16813_s7 + $0x11] sm:$0xff]  ;;  %s20355_s11 = scalar_lea.vmem %s20512_s3, %s16252_s8 }
  0x32   : > { %14259 = vmatprep.subr.bf16.mxu0 %v16289_v2  ;;  %16237 = vmatprep.subr.bf16.mxu1 %v16289_v2  ;;  %v286_v6 = vld [vmem:[%s16813_s7 + $0x81] sm:$0xff]  ;;  %v298_v7 = vpack.c.bf16 %v271_v5, %v270_v4  ;;  %v287_v8 = vld [vmem:[%s16813_s7 + $0x89] sm:$0xff]  ;;  %v273_v15 = vld [vmem:[%s16813_s7 + $0x19] sm:$0xff] }
  0x33   : > { %v16819_v9 = vpack.c.bf16 %v287_v8, %v286_v6  ;;  %v288_v16 = vld [vmem:[%s16813_s7 + $0x91] sm:$0xff]  ;;  %v289_v17 = vld [vmem:[%s16813_s7 + $0x99] sm:$0xff]  ;;  %v274_v20 = vld [vmem:[%s16813_s7 + $0x21] sm:$0xff]  ;;  %v16829_v23 = vpack.c.bf16 %v273_v15, %v272_v14 }
  0x34   : > { %14271 = vmatprep.mubr.bf16.mxu0 %v298_v7  ;;  %v275_v21 = vld [vmem:[%s16813_s7 + $0x29] sm:$0xff]  ;;  %v290_v22 = vld [vmem:[%s16813_s7 + $0xa1] sm:$0xff]  ;;  %v16831_v24 = vpack.c.bf16 %v289_v17, %v288_v16  ;;  %v276_v30 = vld [vmem:[%s16813_s7 + $0x31] sm:$0xff] }
  0x35   : > { %14260 = vmatpush3.bf16.msra.mxu0 %v16289_v2  ;;  %16245 = vmatpush3.bf16.msra.mxu1 %v16289_v2  ;;  %v291_v25 = vld [vmem:[%s16813_s7 + $0xa9] sm:$0xff]  ;;  %v16834_v28 = vpack.c.bf16 %v275_v21, %v274_v20  ;;  %v277_v31 = vld [vmem:[%s16813_s7 + $0x39] sm:$0xff]  ;;  %v292_v33 = vld [vmem:[%s16813_s7 + $0xb1] sm:$0xff] }
  0x36   : > { %14261 = vmatprep.subr.bf16.mxu0 %v16290_v3  ;;  %16238 = vmatprep.subr.bf16.mxu1 %v16290_v3  ;;  %v16836_v29 = vpack.c.bf16 %v291_v25, %v290_v22  ;;  %v293_v34 = vld [vmem:[%s16813_s7 + $0xb9] sm:$0xff]  ;;  %v278_v36 = vld [vmem:[%s16813_s7 + $0x41] sm:$0xff]  ;;  %v16847_v37 = vpack.c.bf16 %v277_v31, %v276_v30  ;;  %v279_v39 = vld [vmem:[%s16813_s7 + $0x49] sm:$0xff] }
  0x37   : > { %14287 = vmatprep.mubr.bf16.mxu1 %v16819_v9  ;;  %v16849_v38 = vpack.c.bf16 %v293_v34, %v292_v33  ;;  %v294_v40 = vld [vmem:[%s16813_s7 + $0xc1] sm:$0xff]  ;;  %v295_v41 = vld [vmem:[%s16813_s7 + $0xc9] sm:$0xff]  ;;  %v16854_v44 = vpack.c.bf16 %v279_v39, %v278_v36  ;;  %v280_v45 = vld [vmem:[%s16813_s7 + $0x51] sm:$0xff] }
  0x38   : > { %v16302_v43 = vld [vmem:[#allocation4 + $0xa0] sm:$0xff]   ;;  %v16857_v46 = vpack.c.bf16 %v295_v41, %v294_v40  ;;  %v281_v47 = vld [vmem:[%s16813_s7 + $0x59] sm:$0xff]  ;;  %v16304_v51 = vld [vmem:[#allocation4 + $0x98] sm:$0xff]  }
  0x39   : > { %14262 = vmatpush3.bf16.msra.mxu0 %v16290_v3  ;;  %16246 = vmatpush3.bf16.msra.mxu1 %v16290_v3  ;;  %v296_v48 = vld [vmem:[%s16813_s7 + $0xd1] sm:$0xff]  ;;  %v297_v49 = vld [vmem:[%s16813_s7 + $0xd9] sm:$0xff]  ;;  %v282_v52 = vld [vmem:[%s16813_s7 + $0x61] sm:$0xff]  ;;  %v16869_v55 = vpack.c.bf16 %v281_v47, %v280_v45 }
  0x3a   : > { %14263 = vmatprep.subr.bf16.mxu0 %v16291_v10  ;;  %16239 = vmatprep.subr.bf16.mxu1 %v16291_v10  ;;  %v283_v53 = vld [vmem:[%s16813_s7 + $0x69] sm:$0xff]  ;;  %v212_v54 = vld [vmem:[%s16813_s7] sm:$0xff]  ;;  %v16871_v56 = vpack.c.bf16 %v297_v49, %v296_v48  ;;  %v284_v62 = vld [vmem:[%s16813_s7 + $0x71] sm:$0xff] }
  0x3b   : > { %v213_v57 = vld [vmem:[%s16813_s7 + $0x8] sm:$0xff]  ;;  %v16306_v59 = vld [vmem:[#allocation4 + $0x90] sm:$0xff]   ;;  %v16874_v60 = vpack.c.bf16 %v283_v53, %v282_v52  ;;  %v16307_v0 = vld [vmem:[#allocation4 + $0x8] sm:$0xff]  }
  0x3c   : > { %v240_v61 = vpack.c.bf16 %v213_v57, %v212_v54  ;;  %v285_v63 = vld [vmem:[%s16813_s7 + $0x79] sm:$0xff]  ;;  %v714_v3 = vld [vmem:[%s16813_s7 + $0x2] sm:$0xff]  ;;  %v715_v4 = vld [vmem:[%s16813_s7 + $0xa] sm:$0xff] }
  0x3d   : > { %14264 = vmatpush3.bf16.msra.mxu0 %v16291_v10  ;;  %16247 = vmatpush3.bf16.msra.mxu1 %v16291_v10  ;;  %v16308_v1 = vld [vmem:[#allocation4 + $0x88] sm:$0xff]   ;;  %v16881_v2 = vpack.c.bf16 %v285_v63, %v284_v62  ;;  %v16309_v5 = vld [vmem:[#allocation4] sm:$0xff]   ;;  %v742_v7 = vpack.c.bf16 %v715_v4, %v714_v3  ;;  %v16312_v14 = vld [vmem:[#allocation4 + $0x138] sm:$0xff]  }
  0x3e   : > { %14265 = vmatprep.subr.bf16.mxu0 %v16292_v11  ;;  %16240 = vmatprep.subr.bf16.mxu1 %v16292_v11  ;;  %v16310_v6 = vld [vmem:[#allocation4 + $0x80] sm:$0xff]   ;;  %v215_v10 = vld [vmem:[%s16813_s7 + $0x18] sm:$0xff]  ;;  %v216_v15 = vld [vmem:[%s16813_s7 + $0x20] sm:$0xff] }
  0x3f   : > { %v214_v8 = vld [vmem:[%s16813_s7 + $0x10] sm:$0xff]  ;;  %v217_v16 = vld [vmem:[%s16813_s7 + $0x28] sm:$0xff]  ;;  %v16313_v25 = vld [vmem:[#allocation4 + $0xf0] sm:$0xff]  }
  0x40   : > { %v718_v17 = vld [vmem:[%s16813_s7 + $0x22] sm:$0xff]  ;;  %v16898_v21 = vpack.c.bf16 %v217_v16, %v216_v15  ;;  %v720_v30 = vld [vmem:[%s16813_s7 + $0x32] sm:$0xff]  ;;  %v721_v31 = vld [vmem:[%s16813_s7 + $0x3a] sm:$0xff] }
  0x41   : > { %14266 = vmatpush3.bf16.msra.mxu0 %v16292_v11  ;;  %16248 = vmatpush3.bf16.msra.mxu1 %v16292_v11  ;;  %v716_v11 = vld [vmem:[%s16813_s7 + $0x12] sm:$0xff]  ;;  %v220_v34 = vld [vmem:[%s16813_s7 + $0x40] sm:$0xff]  ;;  %v723_v39 = vld [vmem:[%s16813_s7 + $0x4a] sm:$0xff] }
  0x42   : > { %14267 = vmatprep.subr.bf16.mxu0 %v16293_v12  ;;  %16241 = vmatprep.subr.bf16.mxu1 %v16293_v12  ;;  %v16315_v33 = vld [vmem:[#allocation4 + $0xe8] sm:$0xff]   ;;  %v722_v36 = vld [vmem:[%s16813_s7 + $0x42] sm:$0xff]  ;;  %v16317_v47 = vld [vmem:[#allocation4 + $0xe0] sm:$0xff]  }
  0x43   : > { %v16316_v40 = vld [vmem:[#allocation4 + $0x128] sm:$0xff]   ;;  %v16920_v45 = vpack.c.bf16 %v723_v39, %v722_v36  ;;  %v222_v48 = vld [vmem:[%s16813_s7 + $0x50] sm:$0xff]  ;;  %v224_v53 = vld [vmem:[%s16813_s7 + $0x60] sm:$0xff] }
  0x44   : > { %v223_v49 = vld [vmem:[%s16813_s7 + $0x58] sm:$0xff]  ;;  %v16318_v52 = vld [vmem:[#allocation4 + $0x120] sm:$0xff]   ;;  %v225_v54 = vld [vmem:[%s16813_s7 + $0x68] sm:$0xff] }
  0x45   : > { %14268 = vmatpush3.bf16.msra.mxu0 %v16293_v12  ;;  %16249 = vmatpush3.bf16.msra.mxu1 %v16293_v12  ;;  %v717_v12 = vld [vmem:[%s16813_s7 + $0x1a] sm:$0xff]  ;;  %v726_v57 = vld [vmem:[%s16813_s7 + $0x62] sm:$0xff]  ;;  %v16934_v62 = vpack.c.bf16 %v223_v49, %v222_v48  ;;  %v226_v4 = vld [vmem:[%s16813_s7 + $0x70] sm:$0xff] }
  0x46   : > { %14269 = vmatprep.subr.bf16.mxu0 %v16294_v13  ;;  %16242 = vmatprep.subr.bf16.mxu1 %v16294_v13  ;;  %v16896_v20 = vpack.c.bf16 %v717_v12, %v716_v11  ;;  %v16321_v3 = vld [vmem:[#allocation4 + $0xd0] sm:$0xff]   ;;  %v229_v11 = vld [vmem:[%s16813_s7 + $0x88] sm:$0xff]  ;;  %v16324_v15 = vld [vmem:[#allocation4 + $0x108] sm:$0xff]  }
  0x47   : > { %v730_v12 = vld [vmem:[%s16813_s7 + $0x82] sm:$0xff]  ;;  %v735_v39 = vld [vmem:[%s16813_s7 + $0xaa] sm:$0xff] }
  0x48   : > { %v734_v36 = vld [vmem:[%s16813_s7 + $0xa2] sm:$0xff] }
  0x49   : > { %14270 = vmatpush3.bf16.msra.mxu0 %v16294_v13  ;;  %16250 = vmatpush3.bf16.msra.mxu1 %v16294_v13  ;;  %v16311_v13 = vld [vmem:[#allocation4 + $0xf8] sm:$0xff]  }
  0x4a   : > { %14299 = vmatprep.subr.bf16.mxu1 %v16295_v18  ;;  %14343 = vmatprep.subr.bf16.mxu0 %v16296_v19 }
  0x4c   : > { %14272 = vmatmul.mubr.bf16.vlgmr.msra.gmra.mxu0 %v16829_v23  ;;  %14288 = vmatmul.mubr.bf16.vlgmr.msra.gmra.mxu1 %v16831_v24 }
  0x4d   : > { %14300 = vmatpush3.bf16.msra.mxu1 %v16295_v18  ;;  %14344 = vmatpush3.bf16.msra.mxu0 %v16296_v19  ;;  %v719_v18 = vld [vmem:[%s16813_s7 + $0x2a] sm:$0xff]  ;;  %v16894_v19 = vpack.c.bf16 %v215_v10, %v214_v8  ;;  %v16322_v8 = vld [vmem:[#allocation4 + $0x110] sm:$0xff]  }
  0x4e   : > { %14301 = vmatprep.subr.bf16.mxu1 %v16297_v26  ;;  %14345 = vmatprep.subr.bf16.mxu0 %v16298_v27  ;;  %v16900_v22 = vpack.c.bf16 %v719_v18, %v718_v17  ;;  %v228_v10 = vld [vmem:[%s16813_s7 + $0x80] sm:$0xff] }
  0x4f   : > { %14275 = vmatprep.mubr.bf16.mxu0 %v16834_v28  ;;  %14291 = vmatprep.mubr.bf16.mxu1 %v16836_v29  ;;  %v16958_v18 = vpack.c.bf16 %v229_v11, %v228_v10  ;;  %v239_v10 = vld [vmem:[%s16813_s7 + $0xd8] sm:$0xff] }
  0x50   : > { %v740_v11 = vld [vmem:[%s16813_s7 + $0xd2] sm:$0xff] }
  0x51   : > { %14302 = vmatpush3.bf16.msra.mxu1 %v16297_v26  ;;  %14346 = vmatpush3.bf16.msra.mxu0 %v16298_v27  ;;  %v218_v26 = vld [vmem:[%s16813_s7 + $0x30] sm:$0xff]  ;;  %v219_v27 = vld [vmem:[%s16813_s7 + $0x38] sm:$0xff] }
  0x52   : > { %14303 = vmatprep.subr.bf16.mxu1 %v16299_v32  ;;  %14347 = vmatprep.subr.bf16.mxu0 %v16300_v35  ;;  %v16914_v41 = vpack.c.bf16 %v219_v27, %v218_v26  ;;  %v16325_v26 = vld [vmem:[#allocation4 + $0xc0] sm:$0xff]  }
  0x53   : > { %v230_v27 = vld [vmem:[%s16813_s7 + $0x90] sm:$0xff] }
  0x54   : > { %14276 = vmatmul.mubr.bf16.gmra.mxu0 %v16847_v37  ;;  %14292 = vmatmul.mubr.bf16.gmra.mxu1 %v16849_v38 }
  0x55   : > { %14304 = vmatpush3.bf16.msra.mxu1 %v16299_v32  ;;  %14348 = vmatpush3.bf16.msra.mxu0 %v16300_v35  ;;  %v16314_v32 = vld [vmem:[#allocation4 + $0x130] sm:$0xff]   ;;  %v221_v35 = vld [vmem:[%s16813_s7 + $0x48] sm:$0xff] }
  0x56   : > { %14305 = vmatprep.subr.bf16.mxu1 %v16301_v42  ;;  %14349 = vmatprep.subr.bf16.mxu0 %v16302_v43 }
  0x57   : > { %14279 = vmatprep.mubr.bf16.mxu0 %v16854_v44  ;;  %14295 = vmatprep.mubr.bf16.mxu1 %v16857_v46 }
  0x59   : > { %14306 = vmatpush3.bf16.msra.mxu1 %v16301_v42  ;;  %14350 = vmatpush3.bf16.msra.mxu0 %v16302_v43  ;;  %v16916_v42 = vpack.c.bf16 %v721_v31, %v720_v30  ;;  %v16918_v43 = vpack.c.bf16 %v221_v35, %v220_v34  ;;  %v231_v30 = vld [vmem:[%s16813_s7 + $0x98] sm:$0xff]  ;;  %v232_v34 = vld [vmem:[%s16813_s7 + $0xa0] sm:$0xff]  ;;  %v233_v35 = vld [vmem:[%s16813_s7 + $0xa8] sm:$0xff] }
  0x5a   : > { %14307 = vmatprep.subr.bf16.mxu1 %v16303_v50  ;;  %14351 = vmatprep.subr.bf16.mxu0 %v16304_v51  ;;  %v732_v31 = vld [vmem:[%s16813_s7 + $0x92] sm:$0xff]  ;;  %v16974_v48 = vpack.c.bf16 %v231_v30, %v230_v27 }
  0x5b   : > { %v16331_v27 = vld [vmem:[#allocation4 + $0x168] sm:$0xff]  }
  0x5c   : > { %14280 = vmatmul.mubr.bf16.gmra.mxu0 %v16869_v55  ;;  %14296 = vmatmul.mubr.bf16.gmra.mxu1 %v16871_v56  ;;  %v16332_v30 = vld [vmem:[#allocation4 + $0x1a8] sm:$0xff]  }
  0x5d   : > { %14308 = vmatpush3.bf16.msra.mxu1 %v16303_v50  ;;  %14352 = vmatpush3.bf16.msra.mxu0 %v16304_v51  ;;  %v724_v50 = vld [vmem:[%s16813_s7 + $0x52] sm:$0xff]  ;;  %v725_v51 = vld [vmem:[%s16813_s7 + $0x5a] sm:$0xff] }
  0x5e   : > { %14309 = vmatprep.subr.bf16.mxu1 %v16305_v58  ;;  %14353 = vmatprep.subr.bf16.mxu0 %v16306_v59  ;;  %v16936_v63 = vpack.c.bf16 %v725_v51, %v724_v50  ;;  %v16978_v50 = vpack.c.bf16 %v233_v35, %v232_v34  ;;  %v16980_v51 = vpack.c.bf16 %v735_v39, %v734_v36  ;;  %v16342_v34 = vld [vmem:[#allocation4 + $0x180] sm:$0xff]   ;;  %v1298_v35 = vld [vmem:[%s16813_s7 + $0xe1] sm:$0xff] }
  0x5f   : > { %14283 = vmatprep.mubr.bf16.mxu0 %v16874_v60  ;;  %14315 = vmatprep.mubr.bf16.mxu1 %v240_v61  ;;  %v16320_v61 = vld [vmem:[#allocation4 + $0x118] sm:$0xff]  }
  0x60   : > { %v1299_v36 = vld [vmem:[%s16813_s7 + $0xe9] sm:$0xff] }
  0x61   : > { %14310 = vmatpush3.bf16.msra.mxu1 %v16305_v58  ;;  %14354 = vmatpush3.bf16.msra.mxu0 %v16306_v59  ;;  %v727_v58 = vld [vmem:[%s16813_s7 + $0x6a] sm:$0xff] }
  0x62   : > { %14311 = vmatprep.subr.bf16.mxu1 %v16307_v0  ;;  %14355 = vmatprep.subr.bf16.mxu0 %v16308_v1  ;;  %v16319_v59 = vld [vmem:[#allocation4 + $0xd8] sm:$0xff]  }
  0x64   : > { %14284 = vmatmul.mubr.bf16.gmra.mxu0 %v16881_v2 }
  0x65   : > { %14312 = vmatpush3.bf16.msra.mxu1 %v16307_v0  ;;  %14356 = vmatpush3.bf16.msra.mxu0 %v16308_v1  ;;  %v16938_v0 = vpack.c.bf16 %v225_v54, %v224_v53  ;;  %v16940_v1 = vpack.c.bf16 %v727_v58, %v726_v57  ;;  %v235_v53 = vld [vmem:[%s16813_s7 + $0xb8] sm:$0xff]  ;;  %v236_v58 = vld [vmem:[%s16813_s7 + $0xc0] sm:$0xff] }
  0x66   : > { %14313 = vmatprep.subr.bf16.mxu1 %v16309_v5  ;;  %14357 = vmatprep.subr.bf16.mxu0 %v16310_v6  ;;  %v736_v54 = vld [vmem:[%s16813_s7 + $0xb2] sm:$0xff]  ;;  %v737_v57 = vld [vmem:[%s16813_s7 + $0xba] sm:$0xff] }
  0x67   : > { %14359 = vmatprep.mubr.bf16.mxu0 %v742_v7  ;;  %v729_v7 = vld [vmem:[%s16813_s7 + $0x7a] sm:$0xff] }
  0x69   : > { %14314 = vmatpush3.bf16.msra.mxu1 %v16309_v5  ;;  %14358 = vmatpush3.bf16.msra.mxu0 %v16310_v6  ;;  %v227_v5 = vld [vmem:[%s16813_s7 + $0x78] sm:$0xff] }
  0x6a   : > { %14387 = vmatprep.subr.bf16.mxu1 %v16311_v13  ;;  %14431 = vmatprep.subr.bf16.mxu0 %v16312_v14  ;;  %v728_v6 = vld [vmem:[%s16813_s7 + $0x72] sm:$0xff]  ;;  %v16954_v16 = vpack.c.bf16 %v227_v5, %v226_v4  ;;  %v16996_v5 = vpack.c.bf16 %v737_v57, %v736_v54 }
  0x6b   : > { %v16956_v17 = vpack.c.bf16 %v729_v7, %v728_v6  ;;  %v2111_v54 = vld [vmem:[%s16813_s7 + $0x31] sm:$0xff]  ;;  %v2112_v57 = vld [vmem:[%s16813_s7 + $0x39] sm:$0xff] }
  0x6c   : > { %14316 = vmatmul.mubr.bf16.vlgmr.msra.gmra.mxu1 %v16894_v19  ;;  %14360 = vmatmul.mubr.bf16.vlgmr.msra.gmra.mxu0 %v16896_v20 }
  0x6d   : > { %14388 = vmatpush3.bf16.msra.mxu1 %v16311_v13  ;;  %14432 = vmatpush3.bf16.msra.mxu0 %v16312_v14  ;;  %v731_v13 = vld [vmem:[%s16813_s7 + $0x8a] sm:$0xff]  ;;  %v16323_v14 = vld [vmem:[#allocation4 + $0xc8] sm:$0xff]  }
  0x6e   : > { %14319 = vmatprep.mubr.bf16.mxu1 %v16898_v21  ;;  %14363 = vmatprep.mubr.bf16.mxu0 %v16900_v22 }
  0x6f   : > { %14389 = vmatprep.subr.bf16.mxu1 %v16313_v25  ;;  %14433 = vmatprep.subr.bf16.mxu0 %v16314_v32 }
  0x71   : > { %14390 = vmatpush3.bf16.msra.mxu1 %v16313_v25  ;;  %14434 = vmatpush3.bf16.msra.mxu0 %v16314_v32  ;;  %v16960_v25 = vpack.c.bf16 %v731_v13, %v730_v12  ;;  %v733_v32 = vld [vmem:[%s16813_s7 + $0x9a] sm:$0xff] }
  0x72   : > { %14391 = vmatprep.subr.bf16.mxu1 %v16315_v33  ;;  %14435 = vmatprep.subr.bf16.mxu0 %v16316_v40  ;;  %v16976_v49 = vpack.c.bf16 %v733_v32, %v732_v31  ;;  %v741_v12 = vld [vmem:[%s16813_s7 + $0xda] sm:$0xff]  ;;  %v16336_v31 = vld [vmem:[#allocation4 + $0x198] sm:$0xff]  }
  0x73   : > { %v16338_v32 = vld [vmem:[#allocation4 + $0x190] sm:$0xff]  }
  0x74   : > { %14320 = vmatmul.mubr.bf16.gmra.mxu1 %v16914_v41  ;;  %14364 = vmatmul.mubr.bf16.gmra.mxu0 %v16916_v42 }
  0x75   : > { %14323 = vmatprep.mubr.bf16.mxu1 %v16918_v43  ;;  %14367 = vmatprep.mubr.bf16.mxu0 %v16920_v45 }
  0x76   : > { %14392 = vmatpush3.bf16.msra.mxu1 %v16315_v33  ;;  %14436 = vmatpush3.bf16.msra.mxu0 %v16316_v40  ;;  %v16326_v33 = vld [vmem:[#allocation4 + $0x100] sm:$0xff]   ;;  %v16327_v40 = vld [vmem:[#allocation4 + $0x178] sm:$0xff]  }
  0x77   : > { %14393 = vmatprep.subr.bf16.mxu1 %v16317_v47  ;;  %14437 = vmatprep.subr.bf16.mxu0 %v16318_v52 }
  0x7a   : > { %14394 = vmatpush3.bf16.msra.mxu1 %v16317_v47  ;;  %14438 = vmatpush3.bf16.msra.mxu0 %v16318_v52  ;;  %v16328_v47 = vld [vmem:[#allocation4 + $0x1b8] sm:$0xff]   ;;  %v234_v52 = vld [vmem:[%s16813_s7 + $0xb0] sm:$0xff] }
  0x7b   : > { %14395 = vmatprep.subr.bf16.mxu1 %v16319_v59  ;;  %14439 = vmatprep.subr.bf16.mxu0 %v16320_v61  ;;  %v16994_v4 = vpack.c.bf16 %v235_v53, %v234_v52 }
  0x7c   : > { %14324 = vmatmul.mubr.bf16.gmra.mxu1 %v16934_v62  ;;  %14368 = vmatmul.mubr.bf16.gmra.mxu0 %v16936_v63 }
  0x7d   : > { %14327 = vmatprep.mubr.bf16.mxu1 %v16938_v0  ;;  %14371 = vmatprep.mubr.bf16.mxu0 %v16940_v1 }
  0x7e   : > { %14396 = vmatpush3.bf16.msra.mxu1 %v16319_v59  ;;  %14440 = vmatpush3.bf16.msra.mxu0 %v16320_v61  ;;  %v237_v59 = vld [vmem:[%s16813_s7 + $0xc8] sm:$0xff] }
  0x7f   : > { %14397 = vmatprep.subr.bf16.mxu1 %v16321_v3  ;;  %14441 = vmatprep.subr.bf16.mxu0 %v16322_v8  ;;  %v738_v61 = vld [vmem:[%s16813_s7 + $0xc2] sm:$0xff]  ;;  %v16998_v6 = vpack.c.bf16 %v237_v59, %v236_v58  ;;  %v2390_v58 = vld [vmem:[%s16813_s7 + $0x32] sm:$0xff]  ;;  %v2391_v59 = vld [vmem:[%s16813_s7 + $0x3a] sm:$0xff] }
  0x82   : > { %14398 = vmatpush3.bf16.msra.mxu1 %v16321_v3  ;;  %14442 = vmatpush3.bf16.msra.mxu0 %v16322_v8  ;;  %v739_v3 = vld [vmem:[%s16813_s7 + $0xca] sm:$0xff] }
  0x83   : > { %14399 = vmatprep.subr.bf16.mxu1 %v16323_v14  ;;  %14443 = vmatprep.subr.bf16.mxu0 %v16324_v15  ;;  %v17000_v7 = vpack.c.bf16 %v739_v3, %v738_v61  ;;  %v238_v8 = vld [vmem:[%s16813_s7 + $0xd0] sm:$0xff] }
  0x84   : > { %14328 = vmatmul.mubr.bf16.gmra.mxu1 %v16954_v16  ;;  %14372 = vmatmul.mubr.bf16.gmra.mxu0 %v16956_v17  ;;  %v17010_v13 = vpack.c.bf16 %v239_v10, %v238_v8 }
  0x85   : > { %14331 = vmatprep.mubr.bf16.mxu1 %v16958_v18  ;;  %14375 = vmatprep.mubr.bf16.mxu0 %v16960_v25 }
  0x86   : > { %14400 = vmatpush3.bf16.msra.mxu1 %v16323_v14  ;;  %14444 = vmatpush3.bf16.msra.mxu0 %v16324_v15  ;;  %v17012_v14 = vpack.c.bf16 %v741_v12, %v740_v11  ;;  %v16329_v15 = vld [vmem:[#allocation4 + $0x170] sm:$0xff]  }
  0x87   : > { %14401 = vmatprep.subr.bf16.mxu1 %v16325_v26  ;;  %14445 = vmatprep.subr.bf16.mxu0 %v16326_v33 }
  0x8a   : > { %14402 = vmatpush3.bf16.msra.mxu1 %v16325_v26  ;;  %14446 = vmatpush3.bf16.msra.mxu0 %v16326_v33  ;;  %v16330_v26 = vld [vmem:[#allocation4 + $0x1b0] sm:$0xff]   ;;  %v16341_v33 = vld [vmem:[#allocation4 + $0x140] sm:$0xff]  }
  0x8b   : > { %14475 = vmatprep.subr.bf16.mxu1 %v16327_v40  ;;  %14519 = vmatprep.subr.bf16.mxu0 %v16328_v47 }
  0x8c   : > { %14332 = vmatmul.mubr.bf16.gmra.mxu1 %v16974_v48  ;;  %14376 = vmatmul.mubr.bf16.gmra.mxu0 %v16976_v49 }
  0x8d   : > { %14335 = vmatprep.mubr.bf16.mxu1 %v16978_v50  ;;  %14379 = vmatprep.mubr.bf16.mxu0 %v16980_v51 }
  0x94   : > { %14336 = vmatmul.mubr.bf16.gmra.mxu1 %v16994_v4  ;;  %14380 = vmatmul.mubr.bf16.gmra.mxu0 %v16996_v5 }
  0x95   : > { %14339 = vmatprep.mubr.bf16.mxu1 %v16998_v6  ;;  %14383 = vmatprep.mubr.bf16.mxu0 %v17000_v7 }
  0x9c   : > { %14340 = vmatmul.mubr.bf16.gmra.mxu1 %v17010_v13  ;;  %14384 = vmatmul.mubr.bf16.gmra.mxu0 %v17012_v14 }
  0x9d   : > { %14403 = vmatprep.mubr.bf16.mxu1 %v16894_v19  ;;  %14447 = vmatprep.mubr.bf16.mxu0 %v16829_v23  ;;  %v16333_v23 = vld [vmem:[#allocation4 + $0x160] sm:$0xff]  }
  0x9e   : > { %v16334_v19 = vld [vmem:[#allocation4 + $0x1a0] sm:$0xff]  }
  0xa4   : > { %14404 = vmatmul.mubr.bf16.vlgmr.msra.gmra.mxu1 %v16898_v21  ;;  %14448 = vmatmul.mubr.bf16.vlgmr.msra.gmra.mxu0 %v16834_v28  ;;  %v16335_v28 = vld [vmem:[#allocation4 + $0x158] sm:$0xff]  }
  0xa5   : > { %14476 = vmatpush3.bf16.msra.mxu1 %v16327_v40  ;;  %14520 = vmatpush3.bf16.msra.mxu0 %v16328_v47  ;;  %v17048_v40 = vpack.c.bf16 %v1299_v36, %v1298_v35  ;;  %v2110_v47 = vld [vmem:[%s16813_s7 + $0x29] sm:$0xff] }
  0xa6   : > { %14407 = vmatprep.mubr.bf16.mxu1 %v16914_v41  ;;  %14451 = vmatprep.mubr.bf16.mxu0 %v16847_v37  ;;  %v16337_v37 = vld [vmem:[#allocation4 + $0x150] sm:$0xff]  }
  0xa7   : > { %14477 = vmatprep.subr.bf16.mxu1 %v16329_v15  ;;  %14521 = vmatprep.subr.bf16.mxu0 %v16330_v26 }
  0xa9   : > { %14478 = vmatpush3.bf16.msra.mxu1 %v16329_v15  ;;  %14522 = vmatpush3.bf16.msra.mxu0 %v16330_v26 }
  0xaa   : > { %14479 = vmatprep.subr.bf16.mxu1 %v16331_v27  ;;  %14523 = vmatprep.subr.bf16.mxu0 %v16332_v30 }
  0xac   : > { %14408 = vmatmul.mubr.bf16.gmra.mxu1 %v16918_v43  ;;  %14452 = vmatmul.mubr.bf16.gmra.mxu0 %v16854_v44  ;;  %v16339_v44 = vld [vmem:[#allocation4 + $0x148] sm:$0xff]  }
  0xad   : > { %14411 = vmatprep.mubr.bf16.mxu1 %v16934_v62  ;;  %14455 = vmatprep.mubr.bf16.mxu0 %v16869_v55  ;;  %v16340_v55 = vld [vmem:[#allocation4 + $0x188] sm:$0xff]  }
  0xae   : > { %14480 = vmatpush3.bf16.msra.mxu1 %v16331_v27  ;;  %14524 = vmatpush3.bf16.msra.mxu0 %v16332_v30 }
  0xaf   : > { %14481 = vmatprep.subr.bf16.mxu1 %v16333_v23  ;;  %14525 = vmatprep.subr.bf16.mxu0 %v16334_v19 }
  0xb2   : > { %14482 = vmatpush3.bf16.msra.mxu1 %v16333_v23  ;;  %14526 = vmatpush3.bf16.msra.mxu0 %v16334_v19  ;;  %v2115_v23 = vld [vmem:[%s16813_s7 + $0x51] sm:$0xff]  ;;  %v2116_v19 = vld [vmem:[%s16813_s7 + $0x59] sm:$0xff] }
  0xb3   : > { %14483 = vmatprep.subr.bf16.mxu1 %v16335_v28  ;;  %14527 = vmatprep.subr.bf16.mxu0 %v16336_v31  ;;  %v2140_v35 = vpack.c.bf16 %v2116_v19, %v2115_v23 }
  0xb4   : > { %14412 = vmatmul.mubr.bf16.gmra.mxu1 %v16938_v0  ;;  %14456 = vmatmul.mubr.bf16.gmra.mxu0 %v16874_v60  ;;  %v16343_v60 = vld [vmem:[#allocation4 + $0x1f8] sm:$0xff]  }
  0xb5   : > { %14415 = vmatprep.mubr.bf16.mxu1 %v16954_v16  ;;  %14459 = vmatprep.mubr.bf16.mxu0 %v16881_v2  ;;  %v16344_v2 = vld [vmem:[#allocation4 + $0x238] sm:$0xff]  }
  0xb6   : > { %14484 = vmatpush3.bf16.msra.mxu1 %v16335_v28  ;;  %14528 = vmatpush3.bf16.msra.mxu0 %v16336_v31  ;;  %v2394_v28 = vld [vmem:[%s16813_s7 + $0x52] sm:$0xff]  ;;  %v2395_v31 = vld [vmem:[%s16813_s7 + $0x5a] sm:$0xff] }
  0xb7   : > { %14485 = vmatprep.subr.bf16.mxu1 %v16337_v37  ;;  %14529 = vmatprep.subr.bf16.mxu0 %v16338_v32  ;;  %v2419_v36 = vpack.c.bf16 %v2395_v31, %v2394_v28  ;;  %v2127_v28 = vld [vmem:[%s16813_s7 + $0xb1] sm:$0xff]  ;;  %v2128_v31 = vld [vmem:[%s16813_s7 + $0xb9] sm:$0xff] }
  0xba   : > { %14486 = vmatpush3.bf16.msra.mxu1 %v16337_v37  ;;  %14530 = vmatpush3.bf16.msra.mxu0 %v16338_v32 }
  0xbb   : > { %14487 = vmatprep.subr.bf16.mxu1 %v16339_v44  ;;  %14531 = vmatprep.subr.bf16.mxu0 %v16340_v55 }
  0xbc   : > { %14416 = vmatmul.mubr.bf16.gmra.mxu1 %v16958_v18  ;;  %14460 = vmatmul.mubr.bf16.gmra.mxu0 %v16819_v9  ;;  %v1019_v9 = vld [vmem:[%s16813_s7 + $0xe0] sm:$0xff] }
  0xbd   : > { %14419 = vmatprep.mubr.bf16.mxu1 %v16974_v48  ;;  %14463 = vmatprep.mubr.bf16.mxu0 %v16831_v24  ;;  %v1020_v24 = vld [vmem:[%s16813_s7 + $0xe8] sm:$0xff] }
  0xbe   : > { %14488 = vmatpush3.bf16.msra.mxu1 %v16339_v44  ;;  %14532 = vmatpush3.bf16.msra.mxu0 %v16340_v55  ;;  %v17046_v39 = vpack.c.bf16 %v1020_v24, %v1019_v9  ;;  %v2117_v44 = vld [vmem:[%s16813_s7 + $0x61] sm:$0xff]  ;;  %v2118_v55 = vld [vmem:[%s16813_s7 + $0x69] sm:$0xff] }
  0xbf   : > { %14489 = vmatprep.subr.bf16.mxu1 %v16341_v33  ;;  %14533 = vmatprep.subr.bf16.mxu0 %v16342_v34 }
  0xc2   : > { %14490 = vmatpush3.bf16.msra.mxu1 %v16341_v33  ;;  %14534 = vmatpush3.bf16.msra.mxu0 %v16342_v34  ;;  %v2396_v33 = vld [vmem:[%s16813_s7 + $0x62] sm:$0xff]  ;;  %v2397_v34 = vld [vmem:[%s16813_s7 + $0x6a] sm:$0xff] }
  0xc3   : > { %14563 = vmatprep.subr.bf16.mxu1 %v16343_v60  ;;  %14607 = vmatprep.subr.bf16.mxu0 %v16344_v2 }
  0xc4   : > { %14420 = vmatmul.mubr.bf16.gmra.mxu1 %v16978_v50  ;;  %14464 = vmatmul.mubr.bf16.gmra.mxu0 %v16836_v29  ;;  %v16345_v29 = vld [vmem:[#allocation4 + $0x1f0] sm:$0xff]  }
  0xc5   : > { %14423 = vmatprep.mubr.bf16.mxu1 %v16994_v4  ;;  %14467 = vmatprep.mubr.bf16.mxu0 %v16849_v38  ;;  %v16346_v38 = vld [vmem:[#allocation4 + $0x230] sm:$0xff]  }
  0xcc   : > { %14424 = vmatmul.mubr.bf16.gmra.mxu1 %v16998_v6  ;;  %14468 = vmatmul.mubr.bf16.gmra.mxu0 %v16857_v46  ;;  %v16347_v46 = vld [vmem:[#allocation4 + $0x1e8] sm:$0xff]  }
  0xcd   : > { %14427 = vmatprep.mubr.bf16.mxu1 %v17010_v13  ;;  %14471 = vmatprep.mubr.bf16.mxu0 %v16871_v56  ;;  %v16348_v56 = vld [vmem:[#allocation4 + $0x228] sm:$0xff]  }
  0xd4   : > { %14428 = vmatmul.mubr.bf16.gmra.mxu1 %v17046_v39  ;;  %14472 = vmatmul.mubr.bf16.gmra.mxu0 %v17048_v40 }
  0xd5   : > { %14491 = vmatprep.mubr.bf16.mxu1 %v16896_v20  ;;  %14535 = vmatprep.mubr.bf16.mxu0 %v16898_v21  ;;  %v16349_v20 = vld [vmem:[#allocation4 + $0x1e0] sm:$0xff]  }
  0xd6   : > { %v16350_v21 = vld [vmem:[#allocation4 + $0x220] sm:$0xff]  }
  0xdc   : > { %14492 = vmatmul.mubr.bf16.vlgmr.msra.gmra.mxu1 %v16900_v22  ;;  %14536 = vmatmul.mubr.bf16.vlgmr.msra.gmra.mxu0 %v16914_v41  ;;  %v16351_v22 = vld [vmem:[#allocation4 + $0x1d8] sm:$0xff]  }
  0xdd   : > { %14564 = vmatpush3.bf16.msra.mxu1 %v16343_v60  ;;  %14608 = vmatpush3.bf16.msra.mxu0 %v16344_v2  ;;  %v16352_v41 = vld [vmem:[#allocation4 + $0x218] sm:$0xff]  }
  0xde   : > { %14495 = vmatprep.mubr.bf16.mxu1 %v16916_v42  ;;  %14539 = vmatprep.mubr.bf16.mxu0 %v16918_v43  ;;  %v16353_v42 = vld [vmem:[#allocation4 + $0x1d0] sm:$0xff]  }
  0xdf   : > { %14565 = vmatprep.subr.bf16.mxu1 %v16345_v29  ;;  %14609 = vmatprep.subr.bf16.mxu0 %v16346_v38  ;;  %v16354_v43 = vld [vmem:[#allocation4 + $0x210] sm:$0xff]  }
  0xe1   : > { %14566 = vmatpush3.bf16.msra.mxu1 %v16345_v29  ;;  %14610 = vmatpush3.bf16.msra.mxu0 %v16346_v38  ;;  %v2420_v29 = vpack.c.bf16 %v2397_v34, %v2396_v33 }
  0xe2   : > { %14567 = vmatprep.subr.bf16.mxu1 %v16347_v46  ;;  %14611 = vmatprep.subr.bf16.mxu0 %v16348_v56 }
  0xe4   : > { %14496 = vmatmul.mubr.bf16.gmra.mxu1 %v16920_v45  ;;  %14540 = vmatmul.mubr.bf16.gmra.mxu0 %v16934_v62  ;;  %v16355_v45 = vld [vmem:[#allocation4 + $0x1c8] sm:$0xff]  }
  0xe5   : > { %14499 = vmatprep.mubr.bf16.mxu1 %v16936_v63  ;;  %14543 = vmatprep.mubr.bf16.mxu0 %v16938_v0  ;;  %v16356_v62 = vld [vmem:[#allocation4 + $0x208] sm:$0xff]   ;;  %v16357_v63 = vld [vmem:[#allocation4 + $0x1c0] sm:$0xff]  }
  0xe6   : > { %14568 = vmatpush3.bf16.msra.mxu1 %v16347_v46  ;;  %14612 = vmatpush3.bf16.msra.mxu0 %v16348_v56  ;;  %v16358_v0 = vld [vmem:[#allocation4 + $0x200] sm:$0xff]  }
  0xe7   : > { %14569 = vmatprep.subr.bf16.mxu1 %v16349_v20  ;;  %14613 = vmatprep.subr.bf16.mxu0 %v16350_v21  ;;  %v2119_v56 = vld [vmem:[%s16813_s7 + $0x71] sm:$0xff] }
  0xea   : > { %14570 = vmatpush3.bf16.msra.mxu1 %v16349_v20  ;;  %14614 = vmatpush3.bf16.msra.mxu0 %v16350_v21  ;;  %v2120_v20 = vld [vmem:[%s16813_s7 + $0x79] sm:$0xff] }
  0xeb   : > { %14571 = vmatprep.subr.bf16.mxu1 %v16351_v22  ;;  %14615 = vmatprep.subr.bf16.mxu0 %v16352_v41  ;;  %v2398_v21 = vld [vmem:[%s16813_s7 + $0x72] sm:$0xff] }
  0xec   : > { %14500 = vmatmul.mubr.bf16.gmra.mxu1 %v16940_v1  ;;  %14544 = vmatmul.mubr.bf16.gmra.mxu0 %v16954_v16  ;;  %v1577_v1 = vld [vmem:[%s16813_s7 + $0xe2] sm:$0xff]  ;;  %v1578_v16 = vld [vmem:[%s16813_s7 + $0xea] sm:$0xff] }
  0xed   : > { %14503 = vmatprep.mubr.bf16.mxu1 %v16956_v17  ;;  %14547 = vmatprep.mubr.bf16.mxu0 %v16958_v18  ;;  %v1856_v17 = vld [vmem:[%s16813_s7 + $0xf0] sm:$0xff]  ;;  %v1857_v18 = vld [vmem:[%s16813_s7 + $0xf8] sm:$0xff] }
  0xee   : > { %14572 = vmatpush3.bf16.msra.mxu1 %v16351_v22  ;;  %14616 = vmatpush3.bf16.msra.mxu0 %v16352_v41  ;;  %v2399_v22 = vld [vmem:[%s16813_s7 + $0x7a] sm:$0xff] }
  0xef   : > { %14573 = vmatprep.subr.bf16.mxu1 %v16353_v42  ;;  %14617 = vmatprep.subr.bf16.mxu0 %v16354_v43 }
  0xf2   : > { %14574 = vmatpush3.bf16.msra.mxu1 %v16353_v42  ;;  %14618 = vmatpush3.bf16.msra.mxu0 %v16354_v43  ;;  %v2121_v42 = vld [vmem:[%s16813_s7 + $0x81] sm:$0xff]  ;;  %v2122_v43 = vld [vmem:[%s16813_s7 + $0x89] sm:$0xff] }
  0xf3   : > { %14575 = vmatprep.subr.bf16.mxu1 %v16355_v45  ;;  %14619 = vmatprep.subr.bf16.mxu0 %v16356_v62 }
  0xf4   : > { %14504 = vmatmul.mubr.bf16.gmra.mxu1 %v16960_v25  ;;  %14548 = vmatmul.mubr.bf16.gmra.mxu0 %v16974_v48  ;;  %v2109_v25 = vld [vmem:[%s16813_s7 + $0x21] sm:$0xff] }
  0xf5   : > { %14507 = vmatprep.mubr.bf16.mxu1 %v16976_v49  ;;  %14551 = vmatprep.mubr.bf16.mxu0 %v16978_v50  ;;  %v2388_v48 = vld [vmem:[%s16813_s7 + $0x22] sm:$0xff]  ;;  %v2389_v49 = vld [vmem:[%s16813_s7 + $0x2a] sm:$0xff]  ;;  %v17086_v50 = vpack.c.bf16 %v1578_v16, %v1577_v1  ;;  %v2137_v52 = vpack.c.bf16 %v2110_v47, %v2109_v25  ;;  %v2142_v16 = vpack.c.bf16 %v2120_v20, %v2119_v56 }
  0xf6   : > { %14576 = vmatpush3.bf16.msra.mxu1 %v16355_v45  ;;  %14620 = vmatpush3.bf16.msra.mxu0 %v16356_v62  ;;  %v2416_v53 = vpack.c.bf16 %v2389_v49, %v2388_v48  ;;  %v2400_v45 = vld [vmem:[%s16813_s7 + $0x82] sm:$0xff]  ;;  %v2401_v62 = vld [vmem:[%s16813_s7 + $0x8a] sm:$0xff] }
  0xf7   : > { %14577 = vmatprep.subr.bf16.mxu1 %v16357_v63  ;;  %14621 = vmatprep.subr.bf16.mxu0 %v16358_v0  ;;  %v2422_v25 = vpack.c.bf16 %v2401_v62, %v2400_v45  ;;  %v2123_v49 = vld [vmem:[%s16813_s7 + $0x91] sm:$0xff]  ;;  %v2146_v62 = vpack.c.bf16 %v2128_v31, %v2127_v28 }
  0xfa   : > { %14578 = vmatpush3.bf16.msra.mxu1 %v16357_v63  ;;  %14622 = vmatpush3.bf16.msra.mxu0 %v16358_v0 }
  0xfc   : > { %14508 = vmatmul.mubr.bf16.gmra.mxu1 %v16980_v51  ;;  %14552 = vmatmul.mubr.bf16.gmra.mxu0 %v16994_v4  ;;  %v1871_v51 = vpack.c.bf16 %v1857_v18, %v1856_v17  ;;  %v2113_v4 = vld [vmem:[%s16813_s7 + $0x41] sm:$0xff]  ;;  %v2421_v17 = vpack.c.bf16 %v2399_v22, %v2398_v21  ;;  %v2143_v18 = vpack.c.bf16 %v2122_v43, %v2121_v42 }
  0xfd   : > { %14511 = vmatprep.mubr.bf16.mxu1 %v16996_v5  ;;  %14555 = vmatprep.mubr.bf16.mxu0 %v16998_v6  ;;  %v2114_v5 = vld [vmem:[%s16813_s7 + $0x49] sm:$0xff] }
  0xfe   : > { %v2392_v6 = vld [vmem:[%s16813_s7 + $0x42] sm:$0xff]  ;;  %v2139_v15 = vpack.c.bf16 %v2114_v5, %v2113_v4  ;;  %v2405_v4 = vld [vmem:[%s16813_s7 + $0xaa] sm:$0xff] }
 0x104   : > { %14512 = vmatmul.mubr.bf16.gmra.mxu1 %v17000_v7  ;;  %14556 = vmatmul.mubr.bf16.gmra.mxu0 %v17010_v13  ;;  %v2393_v7 = vld [vmem:[%s16813_s7 + $0x4a] sm:$0xff]  ;;  %v2138_v13 = vpack.c.bf16 %v2112_v57, %v2111_v54  ;;  %v2125_v57 = vld [vmem:[%s16813_s7 + $0xa1] sm:$0xff] }
 0x105   : > { %14515 = vmatprep.mubr.bf16.mxu1 %v17012_v14  ;;  %14559 = vmatprep.mubr.bf16.mxu0 %v17046_v39  ;;  %v2417_v14 = vpack.c.bf16 %v2391_v59, %v2390_v58  ;;  %v2418_v26 = vpack.c.bf16 %v2393_v7, %v2392_v6  ;;  %v2141_v39 = vpack.c.bf16 %v2118_v55, %v2117_v44  ;;  %v2126_v58 = vld [vmem:[%s16813_s7 + $0xa9] sm:$0xff]  ;;  %v2406_v44 = vld [vmem:[%s16813_s7 + $0xb2] sm:$0xff]  ;;  %v2407_v55 = vld [vmem:[%s16813_s7 + $0xba] sm:$0xff] }
 0x106   : > { %v2404_v59 = vld [vmem:[%s16813_s7 + $0xa2] sm:$0xff] }
 0x10c   : > { %v17092_v61 = vpop.f32.mrf.mxu0  ;;  %v17094_v3 = vpop.f32.mrf.mxu1  ;;  %14516 = vmatmul.mubr.bf16.gmra.mxu1 %v17086_v50  ;;  %14560 = vmatmul.mubr.bf16.gmra.mxu0 %v1871_v51  ;;  %v2124_v51 = vld [vmem:[%s16813_s7 + $0x99] sm:$0xff] }
 0x10d   : > { %14579 = vmatprep.mubr.bf16.mxu1 %v2137_v52  ;;  %14623 = vmatprep.mubr.bf16.mxu0 %v2416_v53  ;;  %v2402_v52 = vld [vmem:[%s16813_s7 + $0x92] sm:$0xff]  ;;  %v2403_v53 = vld [vmem:[%s16813_s7 + $0x9a] sm:$0xff] }
 0x10e   : > { %v17101_v8 = vpop.f32.mrf.mxu0  ;;  %v17103_v10 = vpop.f32.mrf.mxu1 }
 0x110   : > { %v17105_v11 = vpop.f32.mrf.mxu0  ;;  %v17107_v12 = vpop.f32.mrf.mxu1 }
 0x112   : > { %v17109_v27 = vpop.f32.mrf.mxu0  ;;  %v17111_v30 = vpop.f32.mrf.mxu1 }
 0x113   : > { %20522 = vst [vmem:[#allocation10_spill] sm:$0xff] %v17111_v30 }
 0x114   : > { %v17117_v37 = vpop.f32.mrf.mxu0  ;;  %14580 = vmatmul.mubr.bf16.vlgmr.msra.gmra.mxu1 %v2138_v13  ;;  %14624 = vmatmul.mubr.bf16.vlgmr.msra.gmra.mxu0 %v2417_v14  ;;  %v17119_v32 = vpop.f32.mrf.mxu1  ;;  %v2144_v13 = vpack.c.bf16 %v2124_v51, %v2123_v49  ;;  %v2423_v14 = vpack.c.bf16 %v2403_v53, %v2402_v52  ;;  %v2131_v53 = vld [vmem:[%s16813_s7 + $0xd1] sm:$0xff] }
 0x115   : > { %14583 = vmatprep.mubr.bf16.mxu1 %v2139_v15  ;;  %14627 = vmatprep.mubr.bf16.mxu0 %v2418_v26  ;;  %v2145_v15 = vpack.c.bf16 %v2126_v58, %v2125_v57  ;;  %v2424_v26 = vpack.c.bf16 %v2405_v4, %v2404_v59  ;;  %v2132_v57 = vld [vmem:[%s16813_s7 + $0xd9] sm:$0xff] }
 0x116   : > { %v17125_v60 = vpop.f32.mrf.mxu0  ;;  %v17127_v2 = vpop.f32.mrf.mxu1  ;;  %v2410_v58 = vld [vmem:[%s16813_s7 + $0xd2] sm:$0xff] }
 0x118   : > { %v17129_v9 = vpop.f32.mrf.mxu0  ;;  %v17131_v24 = vpop.f32.mrf.mxu1 }
 0x11a   : > { %v17133_v38 = vpop.f32.mrf.mxu0  ;;  %v17135_v46 = vpop.f32.mrf.mxu1 }
 0x11b   : > { %20523 = vst [vmem:[#allocation11_spill] sm:$0xff] %v17135_v46 }
 0x11c   : > { %v17141_v41 = vpop.f32.mrf.mxu0  ;;  %14584 = vmatmul.mubr.bf16.gmra.mxu1 %v2140_v35  ;;  %14628 = vmatmul.mubr.bf16.gmra.mxu0 %v2419_v36  ;;  %v17149_v0 = vpop.f32.mrf.mxu1  ;;  %v2129_v35 = vld [vmem:[%s16813_s7 + $0xc1] sm:$0xff]  ;;  %v2130_v36 = vld [vmem:[%s16813_s7 + $0xc9] sm:$0xff] }
 0x11d   : > { %14587 = vmatprep.mubr.bf16.mxu1 %v2141_v39  ;;  %14631 = vmatprep.mubr.bf16.mxu0 %v2420_v29  ;;  %v2408_v39 = vld [vmem:[%s16813_s7 + $0xc2] sm:$0xff]  ;;  %v2409_v29 = vld [vmem:[%s16813_s7 + $0xca] sm:$0xff] }
 0x11e   : > { %v17147_v63 = vpop.f32.mrf.mxu0  ;;  %v17153_v47 = vpop.f32.mrf.mxu1 }
 0x120   : > { %v17151_v1 = vpop.f32.mrf.mxu0  ;;  %v17167_v5 = vpop.f32.mrf.mxu1 }
 0x122   : > { %v17155_v48 = vpop.f32.mrf.mxu0  ;;  %v17173_v23 = vpop.f32.mrf.mxu1 }
 0x123   : > { %20524 = vst [vmem:[#allocation12_spill] sm:$0xff] %v17173_v23 }
 0x124   : > { %v17161_v54 = vpop.f32.mrf.mxu0  ;;  %14588 = vmatmul.mubr.bf16.gmra.mxu1 %v2142_v16  ;;  %14632 = vmatmul.mubr.bf16.gmra.mxu0 %v2421_v17  ;;  %v2425_v16 = vpack.c.bf16 %v2407_v55, %v2406_v44  ;;  %v2148_v44 = vpack.c.bf16 %v2132_v57, %v2131_v53 }
 0x125   : > { %14591 = vmatprep.mubr.bf16.mxu1 %v2143_v18  ;;  %14635 = vmatprep.mubr.bf16.mxu0 %v2422_v25  ;;  %v2147_v18 = vpack.c.bf16 %v2130_v36, %v2129_v35  ;;  %v2426_v25 = vpack.c.bf16 %v2409_v29, %v2408_v39  ;;  %v2135_v29 = vld [vmem:[%s16813_s7 + $0xf1] sm:$0xff] }
 0x126   : > { %v17169_v6 = vpop.f32.mrf.mxu0 }
 0x128   : > { %v17171_v7 = vpop.f32.mrf.mxu0 }
 0x12a   : > { %v17175_v19 = vpop.f32.mrf.mxu0 }
 0x12c   : > { %v14317_v33 = vpop.f32.mrf.mxu1  ;;  %v14361_v34 = vpop.f32.mrf.mxu0  ;;  %14592 = vmatmul.mubr.bf16.gmra.mxu1 %v2144_v13  ;;  %14636 = vmatmul.mubr.bf16.gmra.mxu0 %v2423_v14 }
 0x12d   : > { %v612_v56 = vadd.f32 %v14317_v33, %v17092_v61  ;;  %14595 = vmatprep.mubr.bf16.mxu1 %v2145_v15  ;;  %14639 = vmatprep.mubr.bf16.mxu0 %v2424_v26 }
 0x12e   : > { %v603_v20 = vpop.f32.mrf.mxu1  ;;  %v854_v21 = vpop.f32.mrf.mxu0 }
 0x12f   : > { %v17186_v22 = vadd.f32 %v14361_v34, %v612_v56  ;;  %v604_v42 = vadd.f32 %v603_v20, %v17101_v8  ;;  %v2411_v8 = vld [vmem:[%s16813_s7 + $0xda] sm:$0xff]  ;;  %v16359_v34 = vld [vmem:[#allocation4 + $0x2b8] sm:$0xff]   ;;  %v2414_v20 = vld [vmem:[%s16813_s7 + $0xf2] sm:$0xff] }
 0x130   : > { %v14318_v43 = vpop.f32.mrf.mxu1  ;;  %v14362_v45 = vpop.f32.mrf.mxu0  ;;  %v2427_v55 = vpack.c.bf16 %v2411_v8, %v2410_v58  ;;  %v2136_v56 = vld [vmem:[%s16813_s7 + $0xf9] sm:$0xff]  ;;  %14651 = vmatprep.subr.bf16.mxu1 %v16359_v34 }
 0x131   : > { %v17189_v17 = vadd.f32 %v854_v21, %v604_v42  ;;  %v615_v61 = vadd.f32 %v14318_v43, %v17105_v11  ;;  %v2415_v21 = vld [vmem:[%s16813_s7 + $0xfa] sm:$0xff]  ;;  %14652 = vmatpush3.bf16.msra.mxu1 %v16359_v34 }
 0x132   : > { %v17192_v49 = vpop.f32.mrf.mxu1  ;;  %v17194_v51 = vpop.f32.mrf.mxu0  ;;  %v2429_v53 = vpack.c.bf16 %v2415_v21, %v2414_v20 }
 0x133   : > { %v17196_v52 = vadd.f32 %v14362_v45, %v615_v61 }
 0x134   : > { %v14321_v59 = vpop.f32.mrf.mxu1  ;;  %v14365_v4 = vpop.f32.mrf.mxu0  ;;  %14596 = vmatmul.mubr.bf16.gmra.mxu1 %v2146_v62  ;;  %14640 = vmatmul.mubr.bf16.gmra.mxu0 %v2425_v16 }
 0x135   : > { %v628_v13 = vadd.f32 %v14321_v59, %v17117_v37  ;;  %14599 = vmatprep.mubr.bf16.mxu1 %v2147_v18  ;;  %14643 = vmatprep.mubr.bf16.mxu0 %v2426_v25  ;;  %v2150_v25 = vpack.c.bf16 %v2136_v56, %v2135_v29  ;;  %v16366_v56 = vld [vmem:[#allocation4 + $0x268] sm:$0xff]  }
 0x136   : > { %v619_v11 = vpop.f32.mrf.mxu1  ;;  %v870_v14 = vpop.f32.mrf.mxu0 }
 0x137   : > { %v17203_v15 = vadd.f32 %v14365_v4, %v628_v13  ;;  %v620_v26 = vadd.f32 %v619_v11, %v17125_v60 }
 0x138   : > { %v14322_v28 = vpop.f32.mrf.mxu1  ;;  %v14366_v31 = vpop.f32.mrf.mxu0 }
 0x139   : > { %v17206_v33 = vadd.f32 %v870_v14, %v620_v26  ;;  %v631_v37 = vadd.f32 %v14322_v28, %v17129_v9 }
 0x13a   : > { %v17209_v35 = vpop.f32.mrf.mxu1  ;;  %v17211_v36 = vpop.f32.mrf.mxu0 }
 0x13b   : > { %v17213_v39 = vadd.f32 %v14366_v31, %v631_v37  ;;  %v16361_v31 = vld [vmem:[#allocation4 + $0x2a8] sm:$0xff]  }
 0x13c   : > { %v14325_v60 = vpop.f32.mrf.mxu1  ;;  %v14369_v42 = vpop.f32.mrf.mxu0  ;;  %14600 = vmatmul.mubr.bf16.gmra.mxu1 %v2148_v44  ;;  %14644 = vmatmul.mubr.bf16.gmra.mxu0 %v2427_v55 }
 0x13d   : > { %v644_v43 = vadd.f32 %v14325_v60, %v17141_v41  ;;  %14603 = vmatprep.mubr.bf16.mxu1 %v17048_v40  ;;  %14647 = vmatprep.mubr.bf16.mxu0 %v17086_v50  ;;  %v16360_v41 = vld [vmem:[#allocation4 + $0x2b0] sm:$0xff]   ;;  %v16363_v50 = vld [vmem:[#allocation4 + $0x278] sm:$0xff]  }
 0x13e   : > { %v635_v9 = vpop.f32.mrf.mxu1  ;;  %v886_v45 = vpop.f32.mrf.mxu0  ;;  %14653 = vmatprep.subr.bf16.mxu1 %v16360_v41  ;;  %14695 = vmatprep.subr.bf16.mxu0 %v16363_v50 }
 0x13f   : > { %v17222_v62 = vadd.f32 %v14369_v42, %v644_v43  ;;  %v636_v16 = vadd.f32 %v635_v9, %v17147_v63  ;;  %14654 = vmatpush3.bf16.msra.mxu1 %v16360_v41  ;;  %14696 = vmatpush3.bf16.msra.mxu0 %v16363_v50  ;;  %v16367_v9 = vld [vmem:[#allocation4 + $0x260] sm:$0xff]   ;;  %v16369_v41 = vld [vmem:[#allocation4 + $0x258] sm:$0xff]  }
 0x140   : > { %v14326_v61 = vpop.f32.mrf.mxu1  ;;  %v14370_v18 = vpop.f32.mrf.mxu0  ;;  %14655 = vmatprep.subr.bf16.mxu1 %v16361_v31 }
 0x141   : > { %v17225_v57 = vadd.f32 %v886_v45, %v636_v16  ;;  %v647_v58 = vadd.f32 %v14326_v61, %v17151_v1  ;;  %v16364_v1 = vld [vmem:[#allocation4 + $0x270] sm:$0xff]   ;;  %v16362_v16 = vld [vmem:[#allocation4 + $0x2a0] sm:$0xff]  }
 0x142   : > { %v17228_v8 = vpop.f32.mrf.mxu1  ;;  %v17230_v40 = vpop.f32.mrf.mxu0  ;;  %14697 = vmatprep.subr.bf16.mxu0 %v16364_v1 }
 0x143   : > { %v17232_v59 = vadd.f32 %v14370_v18, %v647_v58  ;;  %14656 = vmatpush3.bf16.msra.mxu1 %v16361_v31  ;;  %14698 = vmatpush3.bf16.msra.mxu0 %v16364_v1 }
 0x144   : > { %v14329_v4 = vpop.f32.mrf.mxu1  ;;  %v14373_v13 = vpop.f32.mrf.mxu0  ;;  %14604 = vmatmul.mubr.bf16.gmra.mxu1 %v2150_v25  ;;  %14648 = vmatmul.mubr.bf16.gmra.mxu0 %v2429_v53 }
 0x145   : > { %v660_v63 = vadd.f32 %v14329_v4, %v17161_v54  ;;  %14699 = vmatprep.subr.bf16.mxu0 %v16366_v56  ;;  %14657 = vmatprep.subr.bf16.mxu1 %v16362_v16 }
 0x146   : > { %v651_v11 = vpop.f32.mrf.mxu1  ;;  %v902_v14 = vpop.f32.mrf.mxu0 }
 0x147   : > { %v17235_v26 = vadd.f32 %v14373_v13, %v660_v63  ;;  %v652_v28 = vadd.f32 %v651_v11, %v17169_v6  ;;  %14700 = vmatpush3.bf16.msra.mxu0 %v16366_v56  ;;  %14658 = vmatpush3.bf16.msra.mxu1 %v16362_v16  ;;  %v16365_v63 = vld [vmem:[#allocation4 + $0x298] sm:$0xff]  }
 0x148   : > { %v14330_v44 = vpop.f32.mrf.mxu1  ;;  %v14374_v55 = vpop.f32.mrf.mxu0  ;;  %14701 = vmatprep.subr.bf16.mxu0 %v16367_v9  ;;  %14659 = vmatprep.subr.bf16.mxu1 %v16365_v63 }
 0x149   : > { %v17238_v37 = vadd.f32 %v902_v14, %v652_v28  ;;  %v663_v34 = vadd.f32 %v14330_v44, %v17171_v7 }
 0x14a   : > { %v17241_v54 = vpop.f32.mrf.mxu1  ;;  %v17243_v29 = vpop.f32.mrf.mxu0 }
 0x14b   : > { %v17245_v20 = vadd.f32 %v14374_v55, %v663_v34  ;;  %14702 = vmatpush3.bf16.msra.mxu0 %v16367_v9  ;;  %14660 = vmatpush3.bf16.msra.mxu1 %v16365_v63 }
 0x14c   : > { %v14333_v21 = vpop.f32.mrf.mxu1  ;;  %v14377_v6 = vpop.f32.mrf.mxu0  ;;  %14703 = vmatprep.subr.bf16.mxu0 %v16369_v41 }
 0x14d   : > { %v676_v60 = vadd.f32 %v14333_v21, %v17094_v3  ;;  %v16372_v21 = vld [vmem:[#allocation4 + $0x248] sm:$0xff]  }
 0x14e   : > { %v667_v42 = vpop.f32.mrf.mxu1  ;;  %v918_v43 = vpop.f32.mrf.mxu0 }
 0x14f   : > { %v17248_v7 = vadd.f32 %v14377_v6, %v676_v60  ;;  %v668_v45 = vadd.f32 %v667_v42, %v17103_v10  ;;  %14704 = vmatpush3.bf16.msra.mxu0 %v16369_v41 }
 0x150   : > { %v14334_v61 = vpop.f32.mrf.mxu1  ;;  %v14378_v18 = vpop.f32.mrf.mxu0 }
 0x151   : > { %v17251_v25 = vadd.f32 %v918_v43, %v668_v45  ;;  %v679_v53 = vadd.f32 %v14334_v61, %v17107_v12  ;;  %v16370_v12 = vld [vmem:[#allocation4 + $0x250] sm:$0xff]   ;;  %v16374_v45 = vld [vmem:[#allocation4 + $0x240] sm:$0xff]  }
 0x152   : > { %v17254_v58 = vpop.f32.mrf.mxu1  ;;  %v17256_v3 = vpop.f32.mrf.mxu0  ;;  %14705 = vmatprep.subr.bf16.mxu0 %v16370_v12 }
 0x153   : > { %20525 = vst [vmem:[#allocation13_spill] sm:$0xff] %v17254_v58  ;;  %20526 = vst [vmem:[#allocation14_spill] sm:$0xff] %v17256_v3  ;;  %v17258_v50 = vadd.f32 %v14378_v18, %v679_v53  ;;  %14706 = vmatpush3.bf16.msra.mxu0 %v16370_v12 }
 0x154   : > { %v14337_v4 = vpop.f32.mrf.mxu1  ;;  %v14381_v10 = vpop.f32.mrf.mxu0  ;;  %14707 = vmatprep.subr.bf16.mxu0 %v16372_v21 }
 0x155   : > { %v692_v13 = vadd.f32 %v14337_v4, %v17119_v32  ;;  %v16368_v4 = vld [vmem:[#allocation4 + $0x290] sm:$0xff]  }
 0x156   : > { %v683_v11 = vpop.f32.mrf.mxu1  ;;  %v934_v14 = vpop.f32.mrf.mxu0  ;;  %14661 = vmatprep.subr.bf16.mxu1 %v16368_v4 }
 0x157   : > { %v17261_v1 = vadd.f32 %v14381_v10, %v692_v13  ;;  %v684_v28 = vadd.f32 %v683_v11, %v17127_v2  ;;  %14708 = vmatpush3.bf16.msra.mxu0 %v16372_v21  ;;  %14662 = vmatpush3.bf16.msra.mxu1 %v16368_v4 }
 0x158   : > { %v14338_v31 = vpop.f32.mrf.mxu1  ;;  %v14382_v44 = vpop.f32.mrf.mxu0  ;;  %14709 = vmatprep.subr.bf16.mxu0 %v16374_v45 }
 0x159   : > { %v17264_v55 = vadd.f32 %v934_v14, %v684_v28  ;;  %v695_v34 = vadd.f32 %v14338_v31, %v17131_v24  ;;  %v16371_v14 = vld [vmem:[#allocation4 + $0x288] sm:$0xff]  }
 0x15a   : > { %v17267_v56 = vpop.f32.mrf.mxu1  ;;  %v17269_v32 = vpop.f32.mrf.mxu0  ;;  %14663 = vmatprep.subr.bf16.mxu1 %v16371_v14 }
 0x15b   : > { %20527 = vst [vmem:[#allocation15_spill] sm:$0xff] %v17267_v56  ;;  %20528 = vst [vmem:[#allocation16_spill] sm:$0xff] %v17269_v32  ;;  %v17271_v6 = vadd.f32 %v14382_v44, %v695_v34  ;;  %14710 = vmatpush3.bf16.msra.mxu0 %v16374_v45  ;;  %14664 = vmatpush3.bf16.msra.mxu1 %v16371_v14 }
 0x15c   : > { %v14341_v60 = vpop.f32.mrf.mxu1  ;;  %v14385_v42 = vpop.f32.mrf.mxu0 }
 0x15d   : > { %v708_v2 = vadd.f32 %v14341_v60, %v17149_v0 }
 0x15e   : > { %v699_v43 = vpop.f32.mrf.mxu1  ;;  %v950_v9 = vpop.f32.mrf.mxu0 }
 0x15f   : > { %v17274_v16 = vadd.f32 %v14385_v42, %v708_v2  ;;  %v700_v24 = vadd.f32 %v699_v43, %v17153_v47  ;;  %v16373_v42 = vld [vmem:[#allocation4 + $0x280] sm:$0xff]  }
 0x160   : > { %v14342_v61 = vpop.f32.mrf.mxu1  ;;  %v14386_v18 = vpop.f32.mrf.mxu0  ;;  %14665 = vmatprep.subr.bf16.mxu1 %v16373_v42 }
 0x161   : > { %v17277_v53 = vadd.f32 %v950_v9, %v700_v24  ;;  %v711_v41 = vadd.f32 %v14342_v61, %v17167_v5  ;;  %14666 = vmatpush3.bf16.msra.mxu1 %v16373_v42 }
 0x162   : > { %v17280_v10 = vpop.f32.mrf.mxu1  ;;  %v17282_v13 = vpop.f32.mrf.mxu0 }
 0x163   : > { %20529 = vst [vmem:[#allocation17_spill] sm:$0xff] %v17280_v10  ;;  %20530 = vst [vmem:[#allocation18_spill] sm:$0xff] %v17282_v13  ;;  %v17284_v0 = vadd.f32 %v14386_v18, %v711_v41 }
 0x164   : > { %v14405_v63 = vpop.f32.mrf.mxu1  ;;  %v14449_v11 = vpop.f32.mrf.mxu0 }
 0x165   : > { %v1246_v47 = vadd.f32 %v14405_v63, %v17186_v22 }
 0x166   : > { %v1133_v12 = vpop.f32.mrf.mxu1  ;;  %v1412_v28 = vpop.f32.mrf.mxu0 }
 0x167   : > { %v17287_v31 = vadd.f32 %v14449_v11, %v1246_v47  ;;  %v1244_v5 = vadd.f32 %v1133_v12, %v17189_v17 }
 0x168   : > { %v14406_v44 = vpop.f32.mrf.mxu1  ;;  %v14450_v34 = vpop.f32.mrf.mxu0 }
 0x169   : > { %v17290_v21 = vadd.f32 %v1412_v28, %v1244_v5  ;;  %v1247_v60 = vadd.f32 %v14406_v44, %v17196_v52  ;;  %v17313_v44 = vld [vmem:[#allocation4 + $0x2f8] sm:$0xff]  }
 0x16a   : > { %v17293_v2 = vpop.f32.mrf.mxu1  ;;  %v17295_v43 = vpop.f32.mrf.mxu0  ;;  %20531 = vst [vmem:[#allocation19_spill] sm:$0xff] %v17313_v44  ;;  %14739 = vmatprep.subr.bf16.mxu1 %v17313_v44 }
 0x16b   : > { %v17297_v22 = vadd.f32 %v14450_v34, %v1247_v60 }
 0x16c   : > { %v14409_v9 = vpop.f32.mrf.mxu1  ;;  %v14453_v45 = vpop.f32.mrf.mxu0 }
 0x16d   : > { %v1250_v17 = vadd.f32 %v14409_v9, %v17203_v15 }
 0x16e   : > { %v1149_v24 = vpop.f32.mrf.mxu1  ;;  %v1428_v61 = vpop.f32.mrf.mxu0 }
 0x16f   : > { %v17300_v18 = vadd.f32 %v14453_v45, %v1250_v17  ;;  %v1248_v41 = vadd.f32 %v1149_v24, %v17206_v33 }
 0x170   : > { %v14410_v52 = vpop.f32.mrf.mxu1  ;;  %v14454_v4 = vpop.f32.mrf.mxu0 }
 0x171   : > { %v17303_v63 = vadd.f32 %v1428_v61, %v1248_v41  ;;  %v1251_v11 = vadd.f32 %v14410_v52, %v17213_v39  ;;  %v17328_v41 = vld [vmem:[#allocation4 + $0x338] sm:$0xff]  }
 0x172   : > { %v17306_v47 = vpop.f32.mrf.mxu1  ;;  %v17308_v14 = vpop.f32.mrf.mxu0  ;;  %14783 = vmatprep.subr.bf16.mxu0 %v17328_v41 }
 0x173   : > { %v17310_v12 = vadd.f32 %v14454_v4, %v1251_v11 }
 0x174   : > { %v14413_v28 = vpop.f32.mrf.mxu1  ;;  %v14457_v15 = vpop.f32.mrf.mxu0 }
 0x175   : > { %v1254_v5 = vadd.f32 %v14413_v28, %v17222_v62 }
 0x176   : > { %v1165_v34 = vpop.f32.mrf.mxu1  ;;  %v1444_v33 = vpop.f32.mrf.mxu0 }
 0x177   : > { %v17315_v60 = vadd.f32 %v14457_v15, %v1254_v5  ;;  %v1252_v42 = vadd.f32 %v1165_v34, %v17225_v57 }
 0x178   : > { %v14414_v39 = vpop.f32.mrf.mxu1  ;;  %v14458_v9 = vpop.f32.mrf.mxu0 }
 0x179   : > { %v17319_v45 = vadd.f32 %v1444_v33, %v1252_v42  ;;  %v1255_v17 = vadd.f32 %v14414_v39, %v17232_v59 }
 0x17a   : > { %v17322_v24 = vpop.f32.mrf.mxu1  ;;  %v17324_v61 = vpop.f32.mrf.mxu0 }
 0x17b   : > { %v17326_v62 = vadd.f32 %v14458_v9, %v1255_v17 }
 0x17c   : > { %v14417_v52 = vpop.f32.mrf.mxu1  ;;  %v14461_v4 = vpop.f32.mrf.mxu0 }
 0x17d   : > { %v1258_v57 = vadd.f32 %v14417_v52, %v17235_v26 }
 0x17e   : > { %v1181_v11 = vpop.f32.mrf.mxu1  ;;  %v1460_v28 = vpop.f32.mrf.mxu0 }
 0x17f   : > { %v17332_v15 = vadd.f32 %v14461_v4, %v1258_v57  ;;  %v1256_v59 = vadd.f32 %v1181_v11, %v17238_v37 }
 0x180   : > { %v14418_v5 = vpop.f32.mrf.mxu1  ;;  %v14462_v34 = vpop.f32.mrf.mxu0 }
 0x181   : > { %v17335_v33 = vadd.f32 %v1460_v28, %v1256_v59  ;;  %v1259_v42 = vadd.f32 %v14418_v5, %v17245_v20 }
 0x182   : > { %v17338_v39 = vpop.f32.mrf.mxu1  ;;  %v17340_v9 = vpop.f32.mrf.mxu0 }
 0x183   : > { %20532 = vst [vmem:[#allocation20_spill] sm:$0xff] %v17335_v33  ;;  %20533 = vst [vmem:[#allocation21_spill] sm:$0xff] %v17340_v9  ;;  %v17342_v17 = vadd.f32 %v14462_v34, %v1259_v42 }
 0x184   : > { %v14421_v26 = vpop.f32.mrf.mxu1  ;;  %v14465_v52 = vpop.f32.mrf.mxu0 }
 0x185   : > { %20534 = vst [vmem:[#allocation22_spill] sm:$0xff] %v17342_v17  ;;  %v1262_v13 = vadd.f32 %v14421_v26, %v17248_v7 }
 0x186   : > { %v1197_v4 = vpop.f32.mrf.mxu1  ;;  %v1476_v57 = vpop.f32.mrf.mxu0 }
 0x187   : > { %v17345_v10 = vadd.f32 %v14465_v52, %v1262_v13  ;;  %v1260_v37 = vadd.f32 %v1197_v4, %v17251_v25 }
 0x188   : > { %v14422_v11 = vpop.f32.mrf.mxu1  ;;  %v14466_v28 = vpop.f32.mrf.mxu0 }
 0x189   : > { %20535 = vst [vmem:[#allocation23_spill] sm:$0xff] %v17345_v10  ;;  %v17348_v59 = vadd.f32 %v1476_v57, %v1260_v37  ;;  %v1263_v20 = vadd.f32 %v14422_v11, %v17258_v50  ;;  %v16725_v37 = vmov 0.0  }
 0x18a   : > { %v17351_v5 = vpop.f32.mrf.mxu1  ;;  %v17353_v34 = vpop.f32.mrf.mxu0  ;;  %202 = vst [vmem:[#allocation2 + $0xe0] sm:$0xff] %v16725_v37  ;;  %203 = vst [vmem:[#allocation2 + $0xe8] sm:$0xff] %v16725_v37 }
 0x18b   : > { %20536 = vst [vmem:[#allocation24_spill] sm:$0xff] %v17348_v59  ;;  %20537 = vst [vmem:[#allocation25_spill] sm:$0xff] %v17351_v5  ;;  %v17355_v42 = vadd.f32 %v14466_v28, %v1263_v20 }
 0x18c   : > { %20538 = vst [vmem:[#allocation26_spill] sm:$0xff] %v17353_v34  ;;  %v14425_v23 = vpop.f32.mrf.mxu1  ;;  %v14469_v7 = vpop.f32.mrf.mxu0  ;;  %204 = vst [vmem:[#allocation2 + $0xf0] sm:$0xff] %v16725_v37 }
 0x18d   : > { %20539 = vst [vmem:[#allocation27_spill] sm:$0xff] %v17355_v42  ;;  %v1266_v26 = vadd.f32 %v14425_v23, %v17261_v1  ;;  %205 = vst [vmem:[#allocation2 + $0xf8] sm:$0xff] %v16725_v37 }
 0x18e   : > { %v1213_v13 = vpop.f32.mrf.mxu1  ;;  %v1492_v52 = vpop.f32.mrf.mxu0  ;;  %206 = vst [vmem:[#allocation2 + $0x100] sm:$0xff] %v16725_v37  ;;  %207 = vst [vmem:[#allocation3 + $0xe0] sm:$0xff] %v16725_v37 }
 0x18f   : > { %v17358_v32 = vadd.f32 %v14469_v7, %v1266_v26  ;;  %v1264_v25 = vadd.f32 %v1213_v13, %v17264_v55  ;;  %208 = vst [vmem:[#allocation3 + $0xe8] sm:$0xff] %v16725_v37  ;;  %209 = vst [vmem:[#allocation3 + $0xf0] sm:$0xff] %v16725_v37 }
 0x190   : > { %v14426_v4 = vpop.f32.mrf.mxu1  ;;  %v14470_v57 = vpop.f32.mrf.mxu0  ;;  %210 = vst [vmem:[#allocation3 + $0xf8] sm:$0xff] %v16725_v37  ;;  %211 = vst [vmem:[#allocation3 + $0x100] sm:$0xff] %v16725_v37 }
 0x191   : > { %20540 = vst [vmem:[#allocation28_spill] sm:$0xff] %v17358_v32  ;;  %v17361_v23 = vadd.f32 %v1492_v52, %v1264_v25  ;;  %v1267_v50 = vadd.f32 %v14426_v4, %v17271_v6 }
 0x192   : > { %v17364_v1 = vpop.f32.mrf.mxu1  ;;  %v17366_v55 = vpop.f32.mrf.mxu0 }
 0x193   : > { %20541 = vst [vmem:[#allocation29_spill] sm:$0xff] %v17361_v23  ;;  %20542 = vst [vmem:[#allocation30_spill] sm:$0xff] %v17364_v1  ;;  %v17368_v11 = vadd.f32 %v14470_v57, %v1267_v50 }
 0x194   : > { %20543 = vst [vmem:[#allocation31_spill] sm:$0xff] %v17366_v55  ;;  %v14429_v28 = vpop.f32.mrf.mxu1  ;;  %v14473_v20 = vpop.f32.mrf.mxu0 }
 0x195   : > { %20544 = vst [vmem:[#allocation32_spill] sm:$0xff] %v17368_v11  ;;  %v1270_v7 = vadd.f32 %v14429_v28, %v17274_v16 }
 0x196   : > { %v1229_v26 = vpop.f32.mrf.mxu1  ;;  %v1508_v13 = vpop.f32.mrf.mxu0 }
 0x197   : > { %v17371_v32 = vadd.f32 %v14473_v20, %v1270_v7  ;;  %v1268_v37 = vadd.f32 %v1229_v26, %v17277_v53 }
 0x198   : > { %v14430_v52 = vpop.f32.mrf.mxu1  ;;  %v14474_v25 = vpop.f32.mrf.mxu0 }
 0x199   : > { %20545 = vst [vmem:[#allocation33_spill] sm:$0xff] %v17371_v32  ;;  %v17374_v23 = vadd.f32 %v1508_v13, %v1268_v37  ;;  %v1271_v6 = vadd.f32 %v14430_v52, %v17284_v0 }
 0x19a   : > { %v17377_v4 = vpop.f32.mrf.mxu1  ;;  %v17379_v57 = vpop.f32.mrf.mxu0 }
 0x19b   : > { %20546 = vst [vmem:[#allocation34_spill] sm:$0xff] %v17374_v23  ;;  %20547 = vst [vmem:[#allocation35_spill] sm:$0xff] %v17377_v4  ;;  %v17381_v50 = vadd.f32 %v14474_v25, %v1271_v6 }
 0x19c   : > { %20548 = vst [vmem:[#allocation36_spill] sm:$0xff] %v17379_v57  ;;  %v14493_v11 = vpop.f32.mrf.mxu1  ;;  %v14537_v16 = vpop.f32.mrf.mxu0 }
 0x19d   : > { %20549 = vst [vmem:[#allocation37_spill] sm:$0xff] %v17381_v50 }
 0x19e   : > { %v1691_v28 = vpop.f32.mrf.mxu1  ;;  %v17383_v55 = vpop.f32.mrf.mxu0 }
 0x1a0   : > { %v14494_v20 = vpop.f32.mrf.mxu1  ;;  %v17385_v7 = vpop.f32.mrf.mxu0 }
 0x1a2   : > { %v1694_v53 = vpop.f32.mrf.mxu1  ;;  %v17387_v26 = vpop.f32.mrf.mxu0 }
 0x1a4   : > { %v17389_v13 = vpop.f32.mrf.mxu1  ;;  %v17391_v0 = vpop.f32.mrf.mxu0 }
 0x1a6   : > { %v17393_v37 = vpop.f32.mrf.mxu1  ;;  %v17395_v52 = vpop.f32.mrf.mxu0 }
 0x1a8   : > { %v17397_v25 = vpop.f32.mrf.mxu1  ;;  %v17399_v6 = vpop.f32.mrf.mxu0 }
 0x1aa   : > { %v17401_v50 = vpop.f32.mrf.mxu1  ;;  %v17403_v57 = vpop.f32.mrf.mxu0 }
 0x1ac   : > { %v17405_v23 = vpop.f32.mrf.mxu1  ;;  %v17407_v32 = vpop.f32.mrf.mxu0 }
 0x1ae   : > { %v17409_v4 = vpop.f32.mrf.mxu1  ;;  %v17411_v1 = vpop.f32.mrf.mxu0 }
 0x1b0   : > { %v17413_v42 = vpop.f32.mrf.mxu1  ;;  %v17415_v34 = vpop.f32.mrf.mxu0 }
 0x1b2   : > { %v17417_v44 = vpop.f32.mrf.mxu1  ;;  %v17419_v59 = vpop.f32.mrf.mxu0 }
 0x1b3   : > { %20550 = vst [vmem:[#allocation38_spill] sm:$0xff] %v17419_v59 }
 0x1b4   : > { %v17421_v56 = vpop.f32.mrf.mxu1  ;;  %v17423_v46 = vpop.f32.mrf.mxu0 }
 0x1b5   : > { %20551 = vst [vmem:[#allocation39_spill] sm:$0xff] %v17421_v56  ;;  %20552 = vst [vmem:[#allocation40_spill] sm:$0xff] %v17423_v46 }
 0x1b6   : > { %v17425_v10 = vpop.f32.mrf.mxu1  ;;  %v17427_v5 = vpop.f32.mrf.mxu0 }
 0x1b7   : > { %20553 = vst [vmem:[#allocation41_spill] sm:$0xff] %v17425_v10  ;;  %20554 = vst [vmem:[#allocation42_spill] sm:$0xff] %v17427_v5 }
 0x1b8   : > { %v17429_v3 = vpop.f32.mrf.mxu1  ;;  %v17431_v17 = vpop.f32.mrf.mxu0 }
 0x1b9   : > { %20555 = vst [vmem:[#allocation43_spill] sm:$0xff] %v17429_v3  ;;  %20556 = vst [vmem:[#allocation44_spill] sm:$0xff] %v17431_v17 }
 0x1ba   : > { %v17433_v9 = vpop.f32.mrf.mxu1  ;;  %v17435_v33 = vpop.f32.mrf.mxu0 }
 0x1bb   : > { %20557 = vst [vmem:[#allocation45_spill] sm:$0xff] %v17433_v9  ;;  %20558 = vst [vmem:[#allocation46_spill] sm:$0xff] %v17435_v33 }
 0x1bc   : > { %v17437_v58 = vpop.f32.mrf.mxu1  ;;  %v17439_v30 = vpop.f32.mrf.mxu0 }
 0x1bd   : > { %20559 = vst [vmem:[#allocation47_spill] sm:$0xff] %v17437_v58  ;;  %20560 = vst [vmem:[#allocation48_spill] sm:$0xff] %v17439_v30  ;;  %v607_v30 = vadd.f32 %v17192_v49, %v17109_v27  ;;  %v1804_v27 = vadd.f32 %v14493_v11, %v17287_v31  ;;  %v623_v49 = vadd.f32 %v17209_v35, %v17133_v38 }
 0x1be   : > { %v17441_v59 = vpop.f32.mrf.mxu1  ;;  %v17443_v56 = vpop.f32.mrf.mxu0 }
 0x1bf   : > { %20561 = vst [vmem:[#allocation49_spill] sm:$0xff] %v17441_v59  ;;  %20562 = vst [vmem:[#allocation50_spill] sm:$0xff] %v17443_v56  ;;  %v970_v31 = vadd.f32 %v17211_v36, %v623_v49  ;;  %v639_v36 = vadd.f32 %v17228_v8, %v17155_v48 }
 0x1c0   : > { %v17445_v46 = vpop.f32.mrf.mxu1  ;;  %v17447_v10 = vpop.f32.mrf.mxu0 }
 0x1c1   : > { %20563 = vst [vmem:[#allocation51_spill] sm:$0xff] %v17445_v46  ;;  %20564 = vst [vmem:[#allocation52_spill] sm:$0xff] %v17447_v10 }
 0x1c2   : > { %v17449_v5 = vpop.f32.mrf.mxu1  ;;  %v17451_v3 = vpop.f32.mrf.mxu0 }
 0x1c3   : > { %20565 = vst [vmem:[#allocation53_spill] sm:$0xff] %v17449_v5  ;;  %20566 = vst [vmem:[#allocation54_spill] sm:$0xff] %v17451_v3  ;;  %v966_v3 = vadd.f32 %v17194_v51, %v607_v30  ;;  %v1802_v30 = vadd.f32 %v1691_v28, %v17290_v21  ;;  %v17498_v21 = vld [vmem:[#allocation6] ss:$0 sm:$0xff] }
 0x1c4   : > { %v17453_v17 = vpop.f32.mrf.mxu1  ;;  %v17455_v9 = vpop.f32.mrf.mxu0 }
 0x1c5   : > { %20567 = vst [vmem:[#allocation55_spill] sm:$0xff] %v17453_v17  ;;  %20568 = vst [vmem:[#allocation56_spill] sm:$0xff] %v17455_v9  ;;  %v2081_v35 = vadd.f32 %v17383_v55, %v1802_v30 }
 0x1c6   : > { %v17457_v33 = vpop.f32.mrf.mxu1  ;;  %v17459_v58 = vpop.f32.mrf.mxu0 }
 0x1c7   : > { %20569 = vst [vmem:[#allocation57_spill] sm:$0xff] %v17457_v33  ;;  %20570 = vst [vmem:[#allocation58_spill] sm:$0xff] %v17459_v58  ;;  %v1245_v33 = vadd.f32 %v17293_v2, %v966_v3  ;;  %v2083_v2 = vadd.f32 %v14537_v16, %v1804_v27  ;;  %v1808_v16 = vadd.f32 %v17389_v13, %v17300_v18 }
 0x1c8   : > { %v17463_v56 = vpop.f32.mrf.mxu1  ;;  %v17465_v46 = vpop.f32.mrf.mxu0 }
 0x1c9   : > { %20571 = vst [vmem:[#allocation59_spill] sm:$0xff] %v17465_v46  ;;  %v1524_v51 = vadd.f32 %v17295_v43, %v1245_v33  ;;  %v2087_v48 = vadd.f32 %v17391_v0, %v1808_v16 }
 0x1ca   : > { %v17467_v10 = vpop.f32.mrf.mxu1  ;;  %v17469_v5 = vpop.f32.mrf.mxu0 }
 0x1cb   : > { %20572 = vst [vmem:[#allocation60_spill] sm:$0xff] %v17469_v5  ;;  %v1803_v11 = vadd.f32 %v1694_v53, %v1524_v51 }
 0x1cc   : > { %v17472_v17 = vpop.f32.mrf.mxu1  ;;  %v17474_v9 = vpop.f32.mrf.mxu0 }
 0x1cd   : > { %20573 = vst [vmem:[#allocation61_spill] sm:$0xff] %v17474_v9  ;;  %v2082_v53 = vadd.f32 %v17387_v26, %v1803_v11  ;;  %v1812_v11 = vadd.f32 %v17405_v23, %v17315_v60 }
 0x1ce   : > { %v17477_v58 = vpop.f32.mrf.mxu1  ;;  %v17479_v59 = vpop.f32.mrf.mxu0 }
 0x1cf   : > { %20574 = vst [vmem:[#allocation62_spill] sm:$0xff] %v17477_v58  ;;  %20575 = vst [vmem:[#allocation63_spill] sm:$0xff] %v17479_v59  ;;  %v1805_v59 = vadd.f32 %v14494_v20, %v17297_v22 }
 0x1d0   : > { %v17484_v46 = vpop.f32.mrf.mxu1  ;;  %v17486_v5 = vpop.f32.mrf.mxu0 }
 0x1d1   : > { %20576 = vst [vmem:[#allocation64_spill] sm:$0xff] %v17484_v46  ;;  %20577 = vst [vmem:[#allocation65_spill] sm:$0xff] %v17486_v5  ;;  %v1249_v5 = vadd.f32 %v17306_v47, %v970_v31  ;;  %v2084_v28 = vadd.f32 %v17385_v7, %v1805_v59  ;;  %v1806_v47 = vadd.f32 %v17393_v37, %v17303_v63 }
 0x1d2   : > { %v17490_v9 = vpop.f32.mrf.mxu1  ;;  %v17492_v3 = vpop.f32.mrf.mxu0  ;;  %v974_v63 = vadd.f32 %v17230_v40, %v639_v36 }
 0x1d3   : > { %v1528_v59 = vadd.f32 %v17308_v14, %v1249_v5  ;;  %v2085_v14 = vadd.f32 %v17395_v52, %v1806_v47 }
 0x1d4   : > { %v14581_v58 = vpop.f32.mrf.mxu1  ;;  %v14625_v38 = vpop.f32.mrf.mxu0  ;;  %v1253_v0 = vadd.f32 %v17322_v24, %v974_v63  ;;  %v1810_v24 = vadd.f32 %v17409_v4, %v17319_v45  ;;  %v20579_v63 = vld [vmem:[#allocation10_spill] sm:$0xff] }
 0x1d5   : > { %v2362_v46 = vadd.f32 %v14581_v58, %v2083_v2  ;;  %v1807_v37 = vadd.f32 %v17401_v50, %v1528_v59 }
 0x1d6   : > { %v2249_v43 = vpop.f32.mrf.mxu1  ;;  %v2528_v33 = vpop.f32.mrf.mxu0  ;;  %v1532_v36 = vadd.f32 %v17324_v61, %v1253_v0 }
 0x1d7   : > { %v2641_v22 = vadd.f32 %v14625_v38, %v2362_v46  ;;  %v2360_v20 = vadd.f32 %v2249_v43, %v2081_v35  ;;  %v1809_v46 = vadd.f32 %v17397_v25, %v17310_v12 }
 0x1d8   : > { %v14582_v55 = vpop.f32.mrf.mxu1  ;;  %v14626_v58 = vpop.f32.mrf.mxu0 }
 0x1d9   : > { %v2676_v27 = vadd.f32 %v17498_v21, %v2641_v22  ;;  %v2639_v49 = vadd.f32 %v2528_v33, %v2360_v20  ;;  %v2363_v30 = vadd.f32 %v14582_v55, %v2084_v28  ;;  %v2088_v31 = vadd.f32 %v17399_v6, %v1809_v46 }
 0x1da   : > { %v2252_v18 = vpop.f32.mrf.mxu1  ;;  %v2531_v7 = vpop.f32.mrf.mxu0  ;;  %v655_v33 = vadd.f32 %v17241_v54, %v17175_v19  ;;  %v2086_v28 = vadd.f32 %v17403_v57, %v1807_v37  ;;  %v16380_v54 = vld [vmem:[#allocation4 + $0x330] sm:$0xff]   ;;  %v2091_v57 = vadd.f32 %v17407_v32, %v1812_v11 }
 0x1db   : > { %2704 = vst [vmem:[#allocation2 + $0x10] sm:$0xff] %v2676_v27  ;;  %v2674_v8 = vadd.f32 %v17498_v21, %v2639_v49  ;;  %v2642_v26 = vadd.f32 %v14626_v58, %v2363_v30  ;;  %v2361_v13 = vadd.f32 %v2252_v18, %v2082_v53  ;;  %v1813_v53 = vadd.f32 %v17413_v42, %v17326_v62 }
 0x1dc   : > { %v14585_v51 = vpop.f32.mrf.mxu1  ;;  %v14629_v2 = vpop.f32.mrf.mxu0  ;;  %v978_v47 = vadd.f32 %v17243_v29, %v655_v33  ;;  %v2089_v62 = vadd.f32 %v17411_v1, %v1810_v24  ;;  %v20578_v29 = vld [vmem:[#allocation39_spill] sm:$0xff] }
 0x1dd   : > { %2702 = vst [vmem:[#allocation2] sm:$0xff] %v2674_v8  ;;  %v2677_v12 = vadd.f32 %v17498_v21, %v2642_v26  ;;  %v2640_v5 = vadd.f32 %v2531_v7, %v2361_v13  ;;  %v2366_v25 = vadd.f32 %v14585_v51, %v2087_v48  ;;  %v2092_v46 = vadd.f32 %v17415_v34, %v1813_v53  ;;  %v16382_v48 = vld [vmem:[#allocation4 + $0x328] sm:$0xff]   ;;  %v20582_v34 = vld [vmem:[#allocation20_spill] sm:$0xff] }
 0x1de   : > { %v2265_v38 = vpop.f32.mrf.mxu1  ;;  %v2544_v40 = vpop.f32.mrf.mxu0  ;;  %v1257_v59 = vadd.f32 %v17338_v39, %v978_v47  ;;  %v20581_v39 = vld [vmem:[#allocation38_spill] sm:$0xff] }
 0x1df   : > { %2705 = vst [vmem:[#allocation2 + $0x18] sm:$0xff] %v2677_v12  ;;  %v2675_v50 = vadd.f32 %v17498_v21, %v2640_v5  ;;  %v2645_v35 = vadd.f32 %v14629_v2, %v2366_v25  ;;  %v2364_v43 = vadd.f32 %v2265_v38, %v2085_v14  ;;  %v17523_v52 = vpack.c.bf16 %v2677_v12, %v2676_v27  ;;  %v20583_v2 = vld [vmem:[#allocation41_spill] sm:$0xff] }
 0x1e0   : > { %v14586_v6 = vpop.f32.mrf.mxu1  ;;  %v14630_v16 = vpop.f32.mrf.mxu0  ;;  %v1811_v27 = vadd.f32 %v17417_v44, %v1532_v36  ;;  %v1816_v44 = vadd.f32 %v20578_v29, %v17332_v15  ;;  %v1814_v14 = vadd.f32 %v20583_v2, %v20582_v34  ;;  %v20588_v36 = vld [vmem:[#allocation14_spill] sm:$0xff]  ;;  %v20596_v34 = vld [vmem:[#allocation15_spill] sm:$0xff] }
 0x1e1   : > { %2703 = vst [vmem:[#allocation2 + $0x8] sm:$0xff] %v2675_v50  ;;  %v2680_v60 = vadd.f32 %v17498_v21, %v2645_v35  ;;  %v2643_v23 = vadd.f32 %v2544_v40, %v2364_v43  ;;  %v2367_v22 = vadd.f32 %v14586_v6, %v2088_v31  ;;  %v2758_v20 = vpack.c.bf16 %v2675_v50, %v2674_v8  ;;  %v20584_v40 = vld [vmem:[#allocation21_spill] sm:$0xff]  ;;  %v20585_v35 = vld [vmem:[#allocation22_spill] sm:$0xff]  ;;  %v20586_v43 = vld [vmem:[#allocation43_spill] sm:$0xff] }
 0x1e2   : > { %v2268_v55 = vpop.f32.mrf.mxu1  ;;  %v2547_v19 = vpop.f32.mrf.mxu0  ;;  %v2090_v51 = vadd.f32 %v20581_v39, %v1811_v27  ;;  %v1536_v50 = vadd.f32 %v20584_v40, %v1257_v59  ;;  %v1817_v33 = vadd.f32 %v20586_v43, %v20585_v35  ;;  %v16383_v27 = vld [vmem:[#allocation4 + $0x320] sm:$0xff]   ;;  %v16385_v39 = vld [vmem:[#allocation4 + $0x318] sm:$0xff]  }
 0x1e3   : > { %2708 = vst [vmem:[#allocation2 + $0x30] sm:$0xff] %v2680_v60  ;;  %v2678_v45 = vadd.f32 %v17498_v21, %v2643_v23  ;;  %v2646_v4 = vadd.f32 %v14630_v16, %v2367_v22  ;;  %v2365_v58 = vadd.f32 %v2268_v55, %v2086_v28  ;;  %14711 = vmatprep.mubr.bf16.mxu0 %v2758_v20  ;;  %v20587_v16 = vld [vmem:[#allocation40_spill] sm:$0xff]  ;;  %v20589_v55 = vld [vmem:[#allocation42_spill] sm:$0xff] }
 0x1e4   : > { %v14589_v49 = vpop.f32.mrf.mxu1  ;;  %v14633_v61 = vpop.f32.mrf.mxu0  ;;  %14712 = vmatmul.mubr.bf16.vlgmr.msra.gmra.mxu0 %v17523_v52 }
 0x1e5   : > { %2706 = vst [vmem:[#allocation2 + $0x20] sm:$0xff] %v2678_v45  ;;  %v2681_v42 = vadd.f32 %v17498_v21, %v2646_v4  ;;  %v2644_v32 = vadd.f32 %v2547_v19, %v2365_v58  ;;  %v2370_v30 = vadd.f32 %v14589_v49, %v2091_v57  ;;  %14784 = vmatpush3.bf16.msra.mxu0 %v17328_v41  ;;  %v20580_v41 = vld [vmem:[#allocation13_spill] sm:$0xff] }
 0x1e6   : > { %v2281_v18 = vpop.f32.mrf.mxu1  ;;  %v2560_v7 = vpop.f32.mrf.mxu0  ;;  %14785 = vmatprep.subr.bf16.mxu0 %v16380_v54  ;;  %v671_v37 = vadd.f32 %v20580_v41, %v20579_v63  ;;  %v2093_v19 = vadd.f32 %v20589_v55, %v1814_v14  ;;  %v2791_v47 = vld [vmem:[#allocation2 + $0x11] sm:$0xff] }
 0x1e7   : > { %2709 = vst [vmem:[#allocation2 + $0x38] sm:$0xff] %v2681_v42  ;;  %v2679_v1 = vadd.f32 %v17498_v21, %v2644_v32  ;;  %v2649_v8 = vadd.f32 %v14633_v61, %v2370_v30  ;;  %v2368_v26 = vadd.f32 %v2281_v18, %v2089_v62  ;;  %v17547_v13 = vpack.c.bf16 %v2681_v42, %v2680_v60  ;;  %v16376_v32 = vld [vmem:[#allocation4 + $0x2f0] sm:$0xff]   ;;  %v20591_v30 = vld [vmem:[#allocation25_spill] sm:$0xff]  ;;  %v20597_v14 = vld [vmem:[#allocation46_spill] sm:$0xff] }
 0x1e8   : > { %v14590_v15 = vpop.f32.mrf.mxu1  ;;  %v14634_v12 = vpop.f32.mrf.mxu0  ;;  %v2789_v5 = vld [vmem:[#allocation2 + $0x1] sm:$0xff]  ;;  %v2790_v25 = vld [vmem:[#allocation2 + $0x9] sm:$0xff]  ;;  %v2095_v60 = vadd.f32 %v20587_v16, %v1816_v44  ;;  %v982_v53 = vadd.f32 %v20588_v36, %v671_v37 }
 0x1e9   : > { %2707 = vst [vmem:[#allocation2 + $0x28] sm:$0xff] %v2679_v1  ;;  %v2684_v0 = vadd.f32 %v17498_v21, %v2649_v8  ;;  %v2647_v31 = vadd.f32 %v2560_v7, %v2368_v26  ;;  %v2371_v11 = vadd.f32 %v14590_v15, %v2092_v46  ;;  %v2817_v38 = vpack.c.bf16 %v2790_v25, %v2789_v5  ;;  %v20592_v46 = vld [vmem:[#allocation44_spill] sm:$0xff]  ;;  %v20593_v44 = vld [vmem:[#allocation23_spill] sm:$0xff]  ;;  %v20599_v5 = vld [vmem:[#allocation49_spill] sm:$0xff] }
 0x1ea   : > { %14786 = vmatpush3.bf16.msra.mxu0 %v16380_v54  ;;  %v2284_v28 = vpop.f32.mrf.mxu1  ;;  %v2563_v24 = vpop.f32.mrf.mxu0  ;;  %v17558_v6 = vpack.c.bf16 %v2679_v1, %v2678_v45  ;;  %v20590_v54 = vld [vmem:[#allocation45_spill] sm:$0xff]  ;;  %v1261_v59 = vadd.f32 %v20591_v30, %v982_v53  ;;  %v2096_v29 = vadd.f32 %v20592_v46, %v1817_v33  ;;  %v20594_v18 = vld [vmem:[#allocation47_spill] sm:$0xff]  ;;  %v20601_v33 = vld [vmem:[#allocation26_spill] sm:$0xff] }
 0x1eb   : > { %14787 = vmatprep.subr.bf16.mxu0 %v16382_v48  ;;  %2712 = vst [vmem:[#allocation2 + $0x50] sm:$0xff] %v2684_v0  ;;  %v2682_v23 = vadd.f32 %v17498_v21, %v2647_v31  ;;  %v2650_v22 = vadd.f32 %v14634_v12, %v2371_v11  ;;  %v2369_v20 = vadd.f32 %v2284_v28, %v2090_v51  ;;  %v20595_v51 = vld [vmem:[#allocation11_spill] sm:$0xff]  ;;  %v20598_v12 = vld [vmem:[#allocation24_spill] sm:$0xff] }
 0x1ec   : > { %14667 = vmatprep.mubr.bf16.mxu1 %v2817_v38  ;;  %v1815_v57 = vadd.f32 %v20590_v54, %v1536_v50  ;;  %v14593_v4 = vpop.f32.mrf.mxu1  ;;  %v14637_v58 = vpop.f32.mrf.mxu0  ;;  %v2792_v45 = vld [vmem:[#allocation2 + $0x19] sm:$0xff]  ;;  %14715 = vmatprep.mubr.bf16.mxu0 %v17558_v6  ;;  %v1820_v7 = vadd.f32 %v20594_v18, %v20593_v44  ;;  %v687_v2 = vadd.f32 %v20596_v34, %v20595_v51  ;;  %v20610_v51 = vld [vmem:[#allocation28_spill] sm:$0xff] }
 0x1ed   : > { %2710 = vst [vmem:[#allocation2 + $0x40] sm:$0xff] %v2682_v23  ;;  %v2685_v49 = vadd.f32 %v17498_v21, %v2650_v22  ;;  %v2648_v61 = vadd.f32 %v2563_v24, %v2369_v20  ;;  %v2374_v62 = vadd.f32 %v14593_v4, %v2095_v60  ;;  %v17567_v42 = vpack.c.bf16 %v2792_v45, %v2791_v47  ;;  %v20600_v11 = vld [vmem:[#allocation19_spill] sm:$0xff]  ;;  %v20602_v24 = vld [vmem:[#allocation48_spill] sm:$0xff]  ;;  %v20606_v45 = vld [vmem:[#allocation50_spill] sm:$0xff] }
 0x1ee   : > { %14716 = vmatmul.mubr.bf16.gmra.mxu0 %v17547_v13  ;;  %v2297_v1 = vpop.f32.mrf.mxu1  ;;  %v2576_v8 = vpop.f32.mrf.mxu0  ;;  %v2094_v15 = vadd.f32 %v20597_v14, %v1815_v57  ;;  %v1818_v25 = vadd.f32 %v20599_v5, %v20598_v12  ;;  %v1540_v28 = vadd.f32 %v20601_v33, %v1261_v59  ;;  %v2099_v16 = vadd.f32 %v20602_v24, %v1820_v7  ;;  %v20603_v60 = vld [vmem:[#allocation27_spill] sm:$0xff]  ;;  %v20616_v33 = vld [vmem:[#allocation57_spill] sm:$0xff] }
 0x1ef   : > { %14788 = vmatpush3.bf16.msra.mxu0 %v16382_v48  ;;  %2713 = vst [vmem:[#allocation2 + $0x58] sm:$0xff] %v2685_v49  ;;  %v2683_v26 = vadd.f32 %v17498_v21, %v2648_v61  ;;  %v2653_v63 = vadd.f32 %v14637_v58, %v2374_v62  ;;  %v2372_v41 = vadd.f32 %v2297_v1, %v2093_v19  ;;  %v20604_v22 = vld [vmem:[#allocation51_spill] sm:$0xff]  ;;  %v20605_v58 = vld [vmem:[#allocation16_spill] sm:$0xff]  ;;  %v20607_v61 = vld [vmem:[#allocation53_spill] sm:$0xff] }
 0x1f0   : > { %14668 = vmatmul.mubr.bf16.vlgmr.msra.gmra.mxu1 %v17567_v42  ;;  %v17576_v37 = vpack.c.bf16 %v2685_v49, %v2684_v0  ;;  %v14594_v31 = vpop.f32.mrf.mxu1  ;;  %v14638_v48 = vpop.f32.mrf.mxu0  ;;  %v2793_v38 = vld [vmem:[#allocation2 + $0x21] sm:$0xff]  ;;  %v2794_v40 = vld [vmem:[#allocation2 + $0x29] sm:$0xff]  ;;  %14789 = vmatprep.subr.bf16.mxu0 %v16383_v27  ;;  %v1821_v20 = vadd.f32 %v20604_v22, %v20603_v60  ;;  %v16377_v19 = vld [vmem:[#allocation4 + $0x2e8] sm:$0xff]   ;;  %v986_v47 = vadd.f32 %v20605_v58, %v687_v2 }
 0x1f1   : > { %14740 = vmatpush3.bf16.msra.mxu1 %v20600_v11  ;;  %2711 = vst [vmem:[#allocation2 + $0x48] sm:$0xff] %v2683_v26  ;;  %v2688_v0 = vadd.f32 %v17498_v21, %v2653_v63  ;;  %v2651_v50 = vadd.f32 %v2576_v8, %v2372_v41  ;;  %v2375_v35 = vadd.f32 %v14594_v31, %v2096_v29  ;;  %v16378_v1 = vld [vmem:[#allocation4 + $0x2e0] sm:$0xff]   ;;  %v20609_v63 = vld [vmem:[#allocation52_spill] sm:$0xff]  ;;  %v20611_v34 = vld [vmem:[#allocation55_spill] sm:$0xff] }
 0x1f2   : > { %v17585_v43 = vpack.c.bf16 %v2794_v40, %v2793_v38  ;;  %14741 = vmatprep.subr.bf16.mxu1 %v16376_v32  ;;  %v2300_v36 = vpop.f32.mrf.mxu1  ;;  %v2579_v53 = vpop.f32.mrf.mxu0  ;;  %v17591_v55 = vpack.c.bf16 %v2683_v26, %v2682_v23  ;;  %v2097_v49 = vadd.f32 %v20606_v45, %v1818_v25  ;;  %v1819_v62 = vadd.f32 %v20607_v61, %v1540_v28  ;;  %v2795_v23 = vld [vmem:[#allocation2 + $0x31] sm:$0xff] }
 0x1f3   : > { %14790 = vmatpush3.bf16.msra.mxu0 %v16383_v27  ;;  %2716 = vst [vmem:[#allocation2 + $0x70] sm:$0xff] %v2688_v0  ;;  %v2686_v54 = vadd.f32 %v17498_v21, %v2651_v50  ;;  %v2654_v57 = vadd.f32 %v14638_v48, %v2375_v35  ;;  %v2373_v4 = vadd.f32 %v2300_v36, %v2094_v15  ;;  %v16386_v27 = vld [vmem:[#allocation4 + $0x310] sm:$0xff]   ;;  %v20608_v8 = vld [vmem:[#allocation30_spill] sm:$0xff]  ;;  %v20613_v11 = vld [vmem:[#allocation17_spill] sm:$0xff] }
 0x1f4   : > { %14671 = vmatprep.mubr.bf16.mxu1 %v17585_v43  ;;  %14791 = vmatprep.subr.bf16.mxu0 %v16385_v39  ;;  %v14597_v30 = vpop.f32.mrf.mxu1  ;;  %v14641_v59 = vpop.f32.mrf.mxu0  ;;  %v2796_v46 = vld [vmem:[#allocation2 + $0x39] sm:$0xff]  ;;  %v1265_v26 = vadd.f32 %v20608_v8, %v986_v47  ;;  %v2100_v41 = vadd.f32 %v20609_v63, %v1821_v20  ;;  %v20612_v48 = vld [vmem:[#allocation12_spill] sm:$0xff]  ;;  %v20615_v35 = vld [vmem:[#allocation29_spill] sm:$0xff] }
 0x1f5   : > { %14742 = vmatpush3.bf16.msra.mxu1 %v16376_v32  ;;  %14719 = vmatprep.mubr.bf16.mxu0 %v17591_v55  ;;  %2714 = vst [vmem:[#allocation2 + $0x60] sm:$0xff] %v2686_v54  ;;  %v2689_v29 = vadd.f32 %v17498_v21, %v2654_v57  ;;  %v2652_v44 = vadd.f32 %v2579_v53, %v2373_v4  ;;  %v16388_v31 = vld [vmem:[#allocation4 + $0x308] sm:$0xff]   ;;  %v20618_v4 = vld [vmem:[#allocation56_spill] sm:$0xff] }
 0x1f6   : > { %v2378_v18 = vadd.f32 %v14597_v30, %v2099_v16  ;;  %v17600_v7 = vpack.c.bf16 %v2796_v46, %v2795_v23  ;;  %14720 = vmatmul.mubr.bf16.gmra.mxu0 %v17576_v37  ;;  %v1824_v32 = vadd.f32 %v20611_v34, %v20610_v51  ;;  %v2313_v2 = vpop.f32.mrf.mxu1  ;;  %v2592_v14 = vpop.f32.mrf.mxu0  ;;  %14743 = vmatprep.subr.bf16.mxu1 %v16377_v19  ;;  %v20614_v40 = vld [vmem:[#allocation54_spill] sm:$0xff]  ;;  %v20617_v53 = vld [vmem:[#allocation31_spill] sm:$0xff]  ;;  %v20619_v47 = vld [vmem:[#allocation32_spill] sm:$0xff] }
 0x1f7   : > { %14792 = vmatpush3.bf16.msra.mxu0 %v16385_v39  ;;  %2717 = vst [vmem:[#allocation2 + $0x78] sm:$0xff] %v2689_v29  ;;  %v2687_v15 = vadd.f32 %v17498_v21, %v2652_v44  ;;  %v2376_v5 = vadd.f32 %v2313_v2, %v2097_v49  ;;  %v17609_v25 = vpack.c.bf16 %v2689_v29, %v2688_v0  ;;  %v20620_v46 = vld [vmem:[#allocation18_spill] sm:$0xff]  ;;  %v16384_v2 = vld [vmem:[#allocation4 + $0x2d0] sm:$0xff]  }
 0x1f8   : > { %v2657_v12 = vadd.f32 %v14641_v59, %v2378_v18  ;;  %14672 = vmatmul.mubr.bf16.gmra.mxu1 %v17600_v7  ;;  %v703_v38 = vadd.f32 %v20613_v11, %v20612_v48  ;;  %v2098_v50 = vadd.f32 %v20614_v40, %v1819_v62  ;;  %v1822_v28 = vadd.f32 %v20616_v33, %v20615_v35  ;;  %v14598_v24 = vpop.f32.mrf.mxu1  ;;  %v14642_v39 = vpop.f32.mrf.mxu0  ;;  %v2797_v16 = vld [vmem:[#allocation2 + $0x41] sm:$0xff]  ;;  %v2798_v60 = vld [vmem:[#allocation2 + $0x49] sm:$0xff]  ;;  %v20621_v44 = vld [vmem:[#allocation58_spill] sm:$0xff] }
 0x1f9   : > { %14744 = vmatpush3.bf16.msra.mxu1 %v16377_v19  ;;  %14793 = vmatprep.subr.bf16.mxu0 %v16386_v27  ;;  %2715 = vst [vmem:[#allocation2 + $0x68] sm:$0xff] %v2687_v15  ;;  %v2655_v0 = vadd.f32 %v2592_v14, %v2376_v5  ;;  %v2379_v20 = vadd.f32 %v14598_v24, %v2100_v41  ;;  %v16381_v19 = vld [vmem:[#allocation4 + $0x2d8] sm:$0xff]   ;;  %v20622_v14 = vld [vmem:[#allocation35_spill] sm:$0xff] }
 0x1fa   : > { %v2692_v22 = vadd.f32 %v17498_v21, %v2657_v12  ;;  %v17617_v36 = vpack.c.bf16 %v2798_v60, %v2797_v16  ;;  %14745 = vmatprep.subr.bf16.mxu1 %v16378_v1  ;;  %v1544_v57 = vadd.f32 %v20617_v53, %v1265_v26  ;;  %v2103_v58 = vadd.f32 %v20618_v4, %v1824_v32  ;;  %v2316_v49 = vpop.f32.mrf.mxu1  ;;  %v2595_v61 = vpop.f32.mrf.mxu0  ;;  %v20624_v5 = vld [vmem:[#allocation33_spill] sm:$0xff]  ;;  %v20627_v16 = vld [vmem:[#allocation62_spill] sm:$0xff] }
 0x1fb   : > { %v1825_v45 = vadd.f32 %v17463_v56, %v20619_v47  ;;  %v17623_v62 = vpack.c.bf16 %v2687_v15, %v2686_v54  ;;  %14794 = vmatpush3.bf16.msra.mxu0 %v16386_v27  ;;  %v2690_v30 = vadd.f32 %v17498_v21, %v2655_v0  ;;  %v2658_v59 = vadd.f32 %v14642_v39, %v2379_v20  ;;  %v2799_v54 = vld [vmem:[#allocation2 + $0x51] sm:$0xff]  ;;  %v20623_v15 = vld [vmem:[#allocation59_spill] sm:$0xff]  ;;  %v17643_v33 = vld [vmem:[#allocation4 + $0x3b8] sm:$0xff]  }
 0x1fc   : > { %2720 = vst [vmem:[#allocation2 + $0x90] sm:$0xff] %v2692_v22  ;;  %v2377_v23 = vadd.f32 %v2316_v49, %v2098_v50  ;;  %14675 = vmatprep.mubr.bf16.mxu1 %v17617_v36  ;;  %14795 = vmatprep.subr.bf16.mxu0 %v16388_v31  ;;  %v990_v29 = vadd.f32 %v20620_v46, %v703_v38  ;;  %v14601_v8 = vpop.f32.mrf.mxu1  ;;  %v14645_v26 = vpop.f32.mrf.mxu0  ;;  %v2800_v63 = vld [vmem:[#allocation2 + $0x59] sm:$0xff]  ;;  %v16390_v27 = vld [vmem:[#allocation4 + $0x300] sm:$0xff]  }
 0x1fd   : > { %v2101_v18 = vadd.f32 %v20621_v44, %v1822_v28  ;;  %v1823_v56 = vadd.f32 %v17467_v10, %v1544_v57  ;;  %14723 = vmatprep.mubr.bf16.mxu0 %v17623_v62  ;;  %14746 = vmatpush3.bf16.msra.mxu1 %v16378_v1  ;;  %2718 = vst [vmem:[#allocation2 + $0x80] sm:$0xff] %v2690_v30  ;;  %v20625_v28 = vld [vmem:[#allocation60_spill] sm:$0xff]  ;;  %v20626_v39 = vld [vmem:[#allocation34_spill] sm:$0xff] }
 0x1fe   : > { %v2693_v41 = vadd.f32 %v17498_v21, %v2658_v59  ;;  %v2656_v51 = vadd.f32 %v2595_v61, %v2377_v23  ;;  %v2382_v34 = vadd.f32 %v14601_v8, %v2103_v58  ;;  %v17632_v32 = vpack.c.bf16 %v2800_v63, %v2799_v54  ;;  %14724 = vmatmul.mubr.bf16.gmra.mxu0 %v17609_v25  ;;  %v2329_v11 = vpop.f32.mrf.mxu1  ;;  %v2608_v1 = vpop.f32.mrf.mxu0  ;;  %v20628_v58 = vld [vmem:[#allocation36_spill] sm:$0xff]  ;;  %v20630_v61 = vld [vmem:[#allocation37_spill] sm:$0xff] }
 0x1ff   : > { %v1269_v10 = vadd.f32 %v20622_v14, %v990_v29  ;;  %v2104_v12 = vadd.f32 %v20623_v15, %v1825_v45  ;;  %v1828_v48 = vadd.f32 %v17472_v17, %v20624_v5  ;;  %14747 = vmatprep.subr.bf16.mxu1 %v16381_v19  ;;  %14796 = vmatpush3.bf16.msra.mxu0 %v16388_v31  ;;  %v20629_v45 = vld [vmem:[#allocation61_spill] sm:$0xff]  ;;  %v20631_v59 = vld [vmem:[#allocation64_spill] sm:$0xff] }
 0x200   : > { %2721 = vst [vmem:[#allocation2 + $0x98] sm:$0xff] %v2693_v41  ;;  %v2691_v38 = vadd.f32 %v17498_v21, %v2656_v51  ;;  %v2661_v40 = vadd.f32 %v14645_v26, %v2382_v34  ;;  %v2380_v50 = vadd.f32 %v2329_v11, %v2101_v18  ;;  %14676 = vmatmul.mubr.bf16.gmra.mxu1 %v17632_v32  ;;  %v14602_v60 = vpop.f32.mrf.mxu1  ;;  %v14646_v0 = vpop.f32.mrf.mxu0  ;;  %v2801_v20 = vld [vmem:[#allocation2 + $0x61] sm:$0xff]  ;;  %v2802_v31 = vld [vmem:[#allocation2 + $0x69] sm:$0xff]  ;;  %v2803_v34 = vld [vmem:[#allocation2 + $0x71] sm:$0xff] }
 0x201   : > { %v17641_v35 = vpack.c.bf16 %v2693_v41, %v2692_v22  ;;  %v2102_v24 = vadd.f32 %v20625_v28, %v1823_v56  ;;  %v1826_v17 = vadd.f32 %v20627_v16, %v20626_v39  ;;  %14748 = vmatpush3.bf16.msra.mxu1 %v16381_v19  ;;  %14797 = vmatprep.subr.bf16.mxu0 %v16390_v27  ;;  %v16387_v19 = vld [vmem:[#allocation4 + $0x2c8] sm:$0xff]   ;;  %v20633_v5 = vld [vmem:[#allocation65_spill] sm:$0xff] }
 0x202   : > { %2719 = vst [vmem:[#allocation2 + $0x88] sm:$0xff] %v2691_v38  ;;  %v2696_v53 = vadd.f32 %v17498_v21, %v2661_v40  ;;  %v2659_v57 = vadd.f32 %v2608_v1, %v2380_v50  ;;  %v2383_v4 = vadd.f32 %v14602_v60, %v2104_v12  ;;  %v17649_v22 = vpack.c.bf16 %v2802_v31, %v2801_v20  ;;  %v2332_v46 = vpop.f32.mrf.mxu1  ;;  %v2611_v29 = vpop.f32.mrf.mxu0  ;;  %v20632_v26 = vld [vmem:[#allocation63_spill] sm:$0xff]  ;;  %v16389_v12 = vld [vmem:[#allocation4 + $0x2c0] sm:$0xff]   ;;  %v17676_v31 = vld [vmem:[#allocation4 + $0x378] sm:$0xff]  }
 0x203   : > { %14749 = vmatprep.subr.bf16.mxu1 %v16384_v2  ;;  %v1548_v47 = vadd.f32 %v20628_v58, %v1269_v10  ;;  %v2107_v49 = vadd.f32 %v20629_v45, %v1828_v48  ;;  %v1829_v23 = vadd.f32 %v20631_v59, %v20630_v61  ;;  %v17655_v44 = vpack.c.bf16 %v2691_v38, %v2690_v30 }
 0x204   : > { %14798 = vmatpush3.bf16.msra.mxu0 %v16390_v27  ;;  %2724 = vst [vmem:[#allocation2 + $0xb0] sm:$0xff] %v2696_v53  ;;  %v2694_v18 = vadd.f32 %v17498_v21, %v2659_v57  ;;  %v2662_v56 = vadd.f32 %v14646_v0, %v2383_v4  ;;  %v2381_v8 = vadd.f32 %v2332_v46, %v2102_v24  ;;  %v14605_v41 = vpop.f32.mrf.mxu1  ;;  %v14649_v51 = vpop.f32.mrf.mxu0  ;;  %v2804_v30 = vld [vmem:[#allocation2 + $0x79] sm:$0xff] }
 0x205   : > { %14679 = vmatprep.mubr.bf16.mxu1 %v17649_v22  ;;  %14871 = vmatprep.subr.bf16.mxu0 %v17643_v33  ;;  %v2105_v54 = vadd.f32 %v20632_v26, %v1826_v17  ;;  %v1827_v63 = vadd.f32 %v17490_v9, %v1548_v47  ;;  %v2386_v10 = vadd.f32 %v14605_v41, %v2107_v49 }
 0x206   : > { %14727 = vmatprep.mubr.bf16.mxu0 %v17655_v44  ;;  %14750 = vmatpush3.bf16.msra.mxu1 %v16384_v2  ;;  %2722 = vst [vmem:[#allocation2 + $0xa0] sm:$0xff] %v2694_v18  ;;  %v2697_v27 = vadd.f32 %v17498_v21, %v2662_v56  ;;  %v2660_v14 = vadd.f32 %v2611_v29, %v2381_v8  ;;  %v2345_v9 = vpop.f32.mrf.mxu1  ;;  %v2624_v11 = vpop.f32.mrf.mxu0 }
 0x207   : > { %v17664_v15 = vpack.c.bf16 %v2804_v30, %v2803_v34  ;;  %14728 = vmatmul.mubr.bf16.gmra.mxu0 %v17641_v35  ;;  %v2108_v48 = vadd.f32 %v20633_v5, %v1829_v23  ;;  %14751 = vmatprep.subr.bf16.mxu1 %v16387_v19  ;;  %v2665_v38 = vadd.f32 %v14649_v51, %v2386_v10  ;;  %v2807_v45 = vld [vmem:[#allocation2 + $0x91] sm:$0xff]  ;;  %v16396_v10 = vld [vmem:[#allocation4 + $0x3b0] sm:$0xff]  }
 0x208   : > { %2725 = vst [vmem:[#allocation2 + $0xb8] sm:$0xff] %v2697_v27  ;;  %v2695_v1 = vadd.f32 %v17498_v21, %v2660_v14  ;;  %v2384_v2 = vadd.f32 %v2345_v9, %v2105_v54  ;;  %v17670_v40 = vpack.c.bf16 %v2697_v27, %v2696_v53  ;;  %v2106_v50 = vadd.f32 %v17492_v3, %v1827_v63  ;;  %v14606_v28 = vpop.f32.mrf.mxu1  ;;  %v14650_v24 = vpop.f32.mrf.mxu0  ;;  %v3233_v27 = vld [vmem:[#allocation2 + $0x2] sm:$0xff]  ;;  %v3234_v14 = vld [vmem:[#allocation2 + $0xa] sm:$0xff] }
 0x209   : > { %14680 = vmatmul.mubr.bf16.gmra.mxu1 %v17664_v15  ;;  %v2805_v39 = vld [vmem:[#allocation2 + $0x81] sm:$0xff]  ;;  %v2806_v16 = vld [vmem:[#allocation2 + $0x89] sm:$0xff]  ;;  %v2700_v17 = vadd.f32 %v17498_v21, %v2665_v38  ;;  %v2387_v0 = vadd.f32 %v14606_v28, %v2108_v48  ;;  %v3261_v5 = vpack.c.bf16 %v3234_v14, %v3233_v27  ;;  %v3235_v38 = vld [vmem:[#allocation2 + $0x12] sm:$0xff] }
 0x20a   : > { %14752 = vmatpush3.bf16.msra.mxu1 %v16387_v19  ;;  %2723 = vst [vmem:[#allocation2 + $0xa8] sm:$0xff] %v2695_v1  ;;  %v2663_v60 = vadd.f32 %v2624_v11, %v2384_v2  ;;  %v17674_v20 = vpack.c.bf16 %v2806_v16, %v2805_v39  ;;  %v2348_v57 = vpop.f32.mrf.mxu1  ;;  %v17678_v53 = vpack.c.bf16 %v2695_v1, %v2694_v18  ;;  %v2627_v47 = vpop.f32.mrf.mxu0  ;;  %v3236_v48 = vld [vmem:[#allocation2 + $0x1a] sm:$0xff]  ;;  %v3237_v9 = vld [vmem:[#allocation2 + $0x22] sm:$0xff]  ;;  %v3238_v11 = vld [vmem:[#allocation2 + $0x2a] sm:$0xff] }
 0x20b   : > { %14753 = vmatprep.subr.bf16.mxu1 %v16389_v12  ;;  %2728 = vst [vmem:[#allocation2 + $0xd0] sm:$0xff] %v2700_v17  ;;  %v2666_v4 = vadd.f32 %v14650_v24, %v2387_v0  ;;  %v2385_v58 = vadd.f32 %v2348_v57, %v2106_v50  ;;  %v16399_v1 = vld [vmem:[#allocation4 + $0x3a0] sm:$0xff]   ;;  %v17712_v2 = vpack.c.bf16 %v3236_v48, %v3235_v38  ;;  %v16393_v50 = vld [vmem:[#allocation4 + $0x368] sm:$0xff]   ;;  %v3241_v24 = vld [vmem:[#allocation2 + $0x42] sm:$0xff] }
 0x20c   : > { %v2698_v3 = vadd.f32 %v17498_v21, %v2663_v60  ;;  %14683 = vmatprep.mubr.bf16.mxu1 %v17674_v20  ;;  %14731 = vmatprep.mubr.bf16.mxu0 %v17678_v53  ;;  %v3240_v28 = vld [vmem:[#allocation2 + $0x3a] sm:$0xff]  ;;  %v3239_v16 = vld [vmem:[#allocation2 + $0x32] sm:$0xff] }
 0x20d   : > { %v2808_v49 = vld [vmem:[#allocation2 + $0x99] sm:$0xff]  ;;  %v2701_v61 = vadd.f32 %v17498_v21, %v2666_v4  ;;  %v2664_v59 = vadd.f32 %v2627_v47, %v2385_v58  ;;  %v16406_v4 = vld [vmem:[#allocation4 + $0x380] sm:$0xff]  }
 0x20e   : > { %14754 = vmatpush3.bf16.msra.mxu1 %v16389_v12  ;;  %2726 = vst [vmem:[#allocation2 + $0xc0] sm:$0xff] %v2698_v3  ;;  %v17684_v23 = vpack.c.bf16 %v2808_v49, %v2807_v45  ;;  %v16402_v39 = vld [vmem:[#allocation4 + $0x390] sm:$0xff]   ;;  %v16404_v0 = vld [vmem:[#allocation4 + $0x388] sm:$0xff]   ;;  %v16411_v49 = vld [vmem:[#allocation4 + $0x438] sm:$0xff]  }
 0x20f   : > { %14732 = vmatmul.mubr.bf16.gmra.mxu0 %v17670_v40  ;;  %14827 = vmatprep.subr.bf16.mxu1 %v17676_v31  ;;  %2729 = vst [vmem:[#allocation2 + $0xd8] sm:$0xff] %v2701_v61  ;;  %v2699_v46 = vadd.f32 %v17498_v21, %v2664_v59  ;;  %v17690_v29 = vpack.c.bf16 %v2701_v61, %v2700_v17  ;;  %v2811_v26 = vld [vmem:[#allocation2 + $0xb1] sm:$0xff]  ;;  %v3244_v57 = vld [vmem:[#allocation2 + $0x5a] sm:$0xff] }
 0x210   : > { %v16394_v17 = vld [vmem:[#allocation4 + $0x360] sm:$0xff]   ;;  %v16403_v61 = vld [vmem:[#allocation4 + $0x348] sm:$0xff]  }
 0x211   : > { %14684 = vmatmul.mubr.bf16.gmra.mxu1 %v17684_v23  ;;  %v2809_v19 = vld [vmem:[#allocation2 + $0xa1] sm:$0xff]  ;;  %v2810_v18 = vld [vmem:[#allocation2 + $0xa9] sm:$0xff]  ;;  %2727 = vst [vmem:[#allocation2 + $0xc8] sm:$0xff] %v2699_v46  ;;  %v17694_v8 = vpack.c.bf16 %v2699_v46, %v2698_v3  ;;  %v3243_v58 = vld [vmem:[#allocation2 + $0x52] sm:$0xff] }
 0x212   : > { %v17692_v56 = vpack.c.bf16 %v2810_v18, %v2809_v19  ;;  %v3245_v3 = vld [vmem:[#allocation2 + $0x62] sm:$0xff]  ;;  %v17729_v47 = vpack.c.bf16 %v3244_v57, %v3243_v58  ;;  %v3248_v59 = vld [vmem:[#allocation2 + $0x7a] sm:$0xff]  ;;  %v3247_v19 = vld [vmem:[#allocation2 + $0x72] sm:$0xff] }
 0x213   : > { %14735 = vmatprep.mubr.bf16.mxu0 %v17694_v8  ;;  %v3249_v46 = vld [vmem:[#allocation2 + $0x82] sm:$0xff]  ;;  %v17737_v18 = vpack.c.bf16 %v3248_v59, %v3247_v19  ;;  %v3255_v48 = vld [vmem:[#allocation2 + $0xb2] sm:$0xff] }
 0x214   : > { %14687 = vmatprep.mubr.bf16.mxu1 %v17692_v56  ;;  %v4633_v57 = vld [vmem:[#allocation2 + $0x49] sm:$0xff]  ;;  %v4349_v58 = vld [vmem:[#allocation2 + $0x20] sm:$0xff] }
 0x215   : > { %v2812_v54 = vld [vmem:[#allocation2 + $0xb9] sm:$0xff] }
 0x216   : > { %v17698_v63 = vpack.c.bf16 %v2812_v54, %v2811_v26  ;;  %v2815_v34 = vld [vmem:[#allocation2 + $0xd1] sm:$0xff]  ;;  %v2816_v30 = vld [vmem:[#allocation2 + $0xd9] sm:$0xff]  ;;  %v16407_v54 = vld [vmem:[#allocation4 + $0x3f8] sm:$0xff]  }
 0x217   : > { %14736 = vmatmul.mubr.bf16.gmra.mxu0 %v17690_v29  ;;  %v17706_v12 = vpack.c.bf16 %v2816_v30, %v2815_v34  ;;  %v3254_v34 = vld [vmem:[#allocation2 + $0xaa] sm:$0xff]  ;;  %v3251_v30 = vld [vmem:[#allocation2 + $0x92] sm:$0xff] }
 0x218   : > { %14799 = vmatprep.mubr.bf16.mxu0 %v17523_v52  ;;  %v2813_v21 = vld [vmem:[#allocation2 + $0xc1] sm:$0xff]  ;;  %v2814_v41 = vld [vmem:[#allocation2 + $0xc9] sm:$0xff]  ;;  %v16398_v52 = vld [vmem:[#allocation4 + $0x3a8] sm:$0xff]  }
 0x219   : > { %14688 = vmatmul.mubr.bf16.gmra.mxu1 %v17698_v63  ;;  %v17703_v51 = vpack.c.bf16 %v2814_v41, %v2813_v21  ;;  %v3252_v21 = vld [vmem:[#allocation2 + $0x9a] sm:$0xff]  ;;  %v3253_v41 = vld [vmem:[#allocation2 + $0xa2] sm:$0xff] }
 0x21a   : > { %v17745_v27 = vpack.c.bf16 %v3252_v21, %v3251_v30  ;;  %v4640_v21 = vld [vmem:[#allocation2 + $0x81] sm:$0xff]  ;;  %v4356_v30 = vld [vmem:[#allocation2 + $0x58] sm:$0xff] }
 0x21b   : > { %14691 = vmatprep.mubr.bf16.mxu1 %v17703_v51 }
 0x21f   : > { %14800 = vmatmul.mubr.bf16.vlgmr.msra.gmra.mxu0 %v17558_v6  ;;  %v16392_v6 = vld [vmem:[#allocation4 + $0x370] sm:$0xff]  }
 0x220   : > { %14803 = vmatprep.mubr.bf16.mxu0 %v17547_v13  ;;  %14872 = vmatpush3.bf16.msra.mxu0 %v17643_v33  ;;  %v17715_v13 = vpack.c.bf16 %v3238_v11, %v3237_v9  ;;  %v16401_v33 = vld [vmem:[#allocation4 + $0x398] sm:$0xff]   ;;  %v3260_v11 = vld [vmem:[#allocation2 + $0xda] sm:$0xff] }
 0x221   : > { %14692 = vmatmul.mubr.bf16.gmra.mxu1 %v17706_v12  ;;  %14873 = vmatprep.subr.bf16.mxu0 %v16396_v10 }
 0x222   : > { %14755 = vmatprep.mubr.bf16.mxu1 %v3261_v5  ;;  %v3257_v5 = vld [vmem:[#allocation2 + $0xc2] sm:$0xff] }
 0x224   : > { %14874 = vmatpush3.bf16.msra.mxu0 %v16396_v10  ;;  %v3256_v10 = vld [vmem:[#allocation2 + $0xba] sm:$0xff] }
 0x225   : > { %14875 = vmatprep.subr.bf16.mxu0 %v16398_v52  ;;  %v17755_v9 = vpack.c.bf16 %v3256_v10, %v3255_v48  ;;  %v4355_v10 = vld [vmem:[#allocation2 + $0x50] sm:$0xff]  ;;  %v4357_v48 = vld [vmem:[#allocation2 + $0x60] sm:$0xff] }
 0x227   : > { %14804 = vmatmul.mubr.bf16.gmra.mxu0 %v17591_v55  ;;  %v3242_v55 = vld [vmem:[#allocation2 + $0x4a] sm:$0xff] }
 0x228   : > { %14807 = vmatprep.mubr.bf16.mxu0 %v17576_v37  ;;  %14876 = vmatpush3.bf16.msra.mxu0 %v16398_v52  ;;  %v17721_v37 = vpack.c.bf16 %v3240_v28, %v3239_v16  ;;  %v17724_v60 = vpack.c.bf16 %v3242_v55, %v3241_v24  ;;  %v3258_v52 = vld [vmem:[#allocation2 + $0xca] sm:$0xff]  ;;  %v16416_v55 = vld [vmem:[#allocation4 + $0x3d0] sm:$0xff]  }
 0x229   : > { %14756 = vmatmul.mubr.bf16.vlgmr.msra.gmra.mxu1 %v17712_v2  ;;  %14877 = vmatprep.subr.bf16.mxu0 %v16399_v1  ;;  %v16410_v28 = vld [vmem:[#allocation4 + $0x3e0] sm:$0xff]  }
 0x22a   : > { %14759 = vmatprep.mubr.bf16.mxu1 %v17715_v13  ;;  %14828 = vmatpush3.bf16.msra.mxu1 %v17676_v31  ;;  %v16397_v31 = vld [vmem:[#allocation4 + $0x358] sm:$0xff]   ;;  %v16422_v24 = vld [vmem:[#allocation4 + $0x400] sm:$0xff]  }
 0x22b   : > { %14829 = vmatprep.subr.bf16.mxu1 %v16392_v6 }
 0x22c   : > { %14878 = vmatpush3.bf16.msra.mxu0 %v16399_v1  ;;  %v16412_v1 = vld [vmem:[#allocation4 + $0x430] sm:$0xff]  }
 0x22d   : > { %14879 = vmatprep.subr.bf16.mxu0 %v16401_v33 }
 0x22e   : > { %14830 = vmatpush3.bf16.msra.mxu1 %v16392_v6  ;;  %v16414_v6 = vld [vmem:[#allocation4 + $0x428] sm:$0xff]  }
 0x22f   : > { %14808 = vmatmul.mubr.bf16.gmra.mxu0 %v17623_v62  ;;  %14831 = vmatprep.subr.bf16.mxu1 %v16393_v50  ;;  %v3246_v62 = vld [vmem:[#allocation2 + $0x6a] sm:$0xff] }
 0x230   : > { %14811 = vmatprep.mubr.bf16.mxu0 %v17609_v25  ;;  %14880 = vmatpush3.bf16.msra.mxu0 %v16401_v33  ;;  %v16400_v25 = vld [vmem:[#allocation4 + $0x350] sm:$0xff]   ;;  %v17732_v45 = vpack.c.bf16 %v3246_v62, %v3245_v3 }
 0x231   : > { %14760 = vmatmul.mubr.bf16.gmra.mxu1 %v17721_v37  ;;  %14881 = vmatprep.subr.bf16.mxu0 %v16402_v39  ;;  %v16408_v33 = vld [vmem:[#allocation4 + $0x3f0] sm:$0xff]  }
 0x232   : > { %14763 = vmatprep.mubr.bf16.mxu1 %v17724_v60  ;;  %14832 = vmatpush3.bf16.msra.mxu1 %v16393_v50  ;;  %v16409_v50 = vld [vmem:[#allocation4 + $0x3e8] sm:$0xff]  }
 0x233   : > { %14833 = vmatprep.subr.bf16.mxu1 %v16394_v17 }
 0x234   : > { %14882 = vmatpush3.bf16.msra.mxu0 %v16402_v39  ;;  %v4097_v39 = vld [vmem:[#allocation2 + $0xea] sm:$0xff] }
 0x235   : > { %14883 = vmatprep.subr.bf16.mxu0 %v16404_v0 }
 0x236   : > { %14834 = vmatpush3.bf16.msra.mxu1 %v16394_v17  ;;  %v3817_v17 = vld [vmem:[#allocation2 + $0xe1] sm:$0xff] }
 0x237   : > { %14812 = vmatmul.mubr.bf16.gmra.mxu0 %v17655_v44  ;;  %14835 = vmatprep.subr.bf16.mxu1 %v16397_v31  ;;  %v3250_v44 = vld [vmem:[#allocation2 + $0x8a] sm:$0xff] }
 0x238   : > { %14815 = vmatprep.mubr.bf16.mxu0 %v17641_v35  ;;  %14884 = vmatpush3.bf16.msra.mxu0 %v16404_v0  ;;  %v16405_v35 = vld [vmem:[#allocation4 + $0x340] sm:$0xff]   ;;  %v17740_v26 = vpack.c.bf16 %v3250_v44, %v3249_v46  ;;  %v4631_v0 = vld [vmem:[#allocation2 + $0x39] sm:$0xff] }
 0x239   : > { %14764 = vmatmul.mubr.bf16.gmra.mxu1 %v17729_v47  ;;  %14885 = vmatprep.subr.bf16.mxu0 %v16406_v4  ;;  %v4351_v46 = vld [vmem:[#allocation2 + $0x30] sm:$0xff] }
 0x23a   : > { %14767 = vmatprep.mubr.bf16.mxu1 %v17732_v45  ;;  %14836 = vmatpush3.bf16.msra.mxu1 %v16397_v31  ;;  %v4632_v31 = vld [vmem:[#allocation2 + $0x41] sm:$0xff] }
 0x23b   : > { %14837 = vmatprep.subr.bf16.mxu1 %v16400_v25 }
 0x23c   : > { %14886 = vmatpush3.bf16.msra.mxu0 %v16406_v4  ;;  %v4658_v4 = vpack.c.bf16 %v4633_v57, %v4632_v31  ;;  %v4363_v57 = vld [vmem:[#allocation2 + $0x90] sm:$0xff] }
 0x23d   : > { %14959 = vmatprep.subr.bf16.mxu0 %v16411_v49 }
 0x23e   : > { %14838 = vmatpush3.bf16.msra.mxu1 %v16400_v25  ;;  %v4637_v25 = vld [vmem:[#allocation2 + $0x69] sm:$0xff] }
 0x23f   : > { %14816 = vmatmul.mubr.bf16.gmra.mxu0 %v17678_v53  ;;  %14839 = vmatprep.subr.bf16.mxu1 %v16403_v61  ;;  %v17748_v53 = vpack.c.bf16 %v3254_v34, %v3253_v41  ;;  %v4641_v41 = vld [vmem:[#allocation2 + $0x89] sm:$0xff]  ;;  %v16425_v34 = vld [vmem:[#allocation4 + $0x468] sm:$0xff]  }
 0x240   : > { %14819 = vmatprep.mubr.bf16.mxu0 %v17670_v40  ;;  %v16647_v40 = vld [vmem:[#allocation2 + $0xe0] sm:$0xff] }
 0x241   : > { %14768 = vmatmul.mubr.bf16.gmra.mxu1 %v17737_v18  ;;  %v17753_v14 = vpack.c.bf16 %v16647_v40, %v16647_v40 }
 0x242   : > { %14771 = vmatprep.mubr.bf16.mxu1 %v17740_v26  ;;  %14840 = vmatpush3.bf16.msra.mxu1 %v16403_v61  ;;  %v4354_v61 = vld [vmem:[#allocation2 + $0x48] sm:$0xff] }
 0x243   : > { %14841 = vmatprep.subr.bf16.mxu1 %v16405_v35 }
 0x246   : > { %14842 = vmatpush3.bf16.msra.mxu1 %v16405_v35  ;;  %v16424_v35 = vld [vmem:[#allocation4 + $0x470] sm:$0xff]  }
 0x247   : > { %14820 = vmatmul.mubr.bf16.gmra.mxu0 %v17694_v8  ;;  %14915 = vmatprep.subr.bf16.mxu1 %v16407_v54  ;;  %v17758_v8 = vpack.c.bf16 %v3258_v52, %v3257_v5  ;;  %v4662_v5 = vpack.c.bf16 %v4641_v41, %v4640_v21  ;;  %v4380_v52 = vpack.c.bf16 %v4356_v30, %v4355_v10  ;;  %v4367_v21 = vld [vmem:[#allocation2 + $0xb0] sm:$0xff]  ;;  %v4369_v30 = vld [vmem:[#allocation2 + $0xc0] sm:$0xff] }
 0x248   : > { %14823 = vmatprep.mubr.bf16.mxu0 %v17690_v29  ;;  %v3259_v29 = vld [vmem:[#allocation2 + $0xd2] sm:$0xff] }
 0x249   : > { %14772 = vmatmul.mubr.bf16.gmra.mxu1 %v17745_v27  ;;  %v17763_v38 = vpack.c.bf16 %v3260_v11, %v3259_v29  ;;  %v4643_v29 = vld [vmem:[#allocation2 + $0x99] sm:$0xff]  ;;  %v4644_v11 = vld [vmem:[#allocation2 + $0xa1] sm:$0xff] }
 0x24a   : > { %14775 = vmatprep.mubr.bf16.mxu1 %v17748_v53  ;;  %v4655_v10 = vld [vmem:[#allocation2 + $0xf9] sm:$0xff] }
 0x24f   : > { %14824 = vmatmul.mubr.bf16.gmra.mxu0 %v17753_v14 }
 0x250   : > { %14887 = vmatprep.mubr.bf16.mxu0 %v17712_v2  ;;  %v16415_v2 = vld [vmem:[#allocation4 + $0x420] sm:$0xff]  }
 0x251   : > { %14776 = vmatmul.mubr.bf16.gmra.mxu1 %v17755_v9 }
 0x252   : > { %14779 = vmatprep.mubr.bf16.mxu1 %v17758_v8 }
 0x257   : > { %14888 = vmatmul.mubr.bf16.vlgmr.msra.gmra.mxu0 %v17715_v13  ;;  %v16417_v13 = vld [vmem:[#allocation4 + $0x418] sm:$0xff]  }
 0x258   : > { %14891 = vmatprep.mubr.bf16.mxu0 %v17721_v37  ;;  %14960 = vmatpush3.bf16.msra.mxu0 %v16411_v49  ;;  %v4629_v37 = vld [vmem:[#allocation2 + $0x29] sm:$0xff]  ;;  %v4634_v49 = vld [vmem:[#allocation2 + $0x51] sm:$0xff] }
 0x259   : > { %14780 = vmatmul.mubr.bf16.gmra.mxu1 %v17763_v38  ;;  %14961 = vmatprep.subr.bf16.mxu0 %v16412_v1 }
 0x25a   : > { %14843 = vmatprep.mubr.bf16.mxu1 %v17567_v42  ;;  %v16418_v42 = vld [vmem:[#allocation4 + $0x410] sm:$0xff]  }
 0x25c   : > { %14962 = vmatpush3.bf16.msra.mxu0 %v16412_v1  ;;  %v4645_v1 = vld [vmem:[#allocation2 + $0xa9] sm:$0xff] }
 0x25d   : > { %14963 = vmatprep.subr.bf16.mxu0 %v16414_v6 }
 0x25f   : > { %14892 = vmatmul.mubr.bf16.gmra.mxu0 %v17724_v60  ;;  %v3818_v60 = vld [vmem:[#allocation2 + $0xe9] sm:$0xff] }
 0x260   : > { %14895 = vmatprep.mubr.bf16.mxu0 %v17729_v47  ;;  %14964 = vmatpush3.bf16.msra.mxu0 %v16414_v6  ;;  %v17794_v3 = vpack.c.bf16 %v3818_v60, %v3817_v17  ;;  %v16427_v6 = vld [vmem:[#allocation4 + $0x458] sm:$0xff]   ;;  %v4646_v60 = vld [vmem:[#allocation2 + $0xb1] sm:$0xff] }
 0x261   : > { %14844 = vmatmul.mubr.bf16.vlgmr.msra.gmra.mxu1 %v17585_v43  ;;  %14965 = vmatprep.subr.bf16.mxu0 %v16415_v2  ;;  %v16420_v43 = vld [vmem:[#allocation4 + $0x408] sm:$0xff]  }
 0x262   : > { %14847 = vmatprep.mubr.bf16.mxu1 %v17600_v7  ;;  %14916 = vmatpush3.bf16.msra.mxu1 %v16407_v54  ;;  %v16413_v7 = vld [vmem:[#allocation4 + $0x3d8] sm:$0xff]   ;;  %v4639_v54 = vld [vmem:[#allocation2 + $0x79] sm:$0xff] }
 0x263   : > { %14917 = vmatprep.subr.bf16.mxu1 %v16408_v33 }
 0x264   : > { %14966 = vmatpush3.bf16.msra.mxu0 %v16415_v2  ;;  %v4360_v2 = vld [vmem:[#allocation2 + $0x78] sm:$0xff] }
 0x265   : > { %14967 = vmatprep.subr.bf16.mxu0 %v16417_v13 }
 0x266   : > { %14918 = vmatpush3.bf16.msra.mxu1 %v16408_v33  ;;  %v4642_v33 = vld [vmem:[#allocation2 + $0x91] sm:$0xff] }
 0x267   : > { %14896 = vmatmul.mubr.bf16.gmra.mxu0 %v17732_v45  ;;  %14919 = vmatprep.subr.bf16.mxu1 %v16409_v50  ;;  %v4352_v45 = vld [vmem:[#allocation2 + $0x38] sm:$0xff] }
 0x268   : > { %14899 = vmatprep.mubr.bf16.mxu0 %v17737_v18  ;;  %14968 = vmatpush3.bf16.msra.mxu0 %v16417_v13  ;;  %v4378_v19 = vpack.c.bf16 %v4352_v45, %v4351_v46  ;;  %v4353_v18 = vld [vmem:[#allocation2 + $0x40] sm:$0xff]  ;;  %v4362_v13 = vld [vmem:[#allocation2 + $0x88] sm:$0xff]  ;;  %v4650_v45 = vld [vmem:[#allocation2 + $0xd1] sm:$0xff] }
 0x269   : > { %14848 = vmatmul.mubr.bf16.gmra.mxu1 %v17617_v36  ;;  %14969 = vmatprep.subr.bf16.mxu0 %v16418_v42  ;;  %v16419_v36 = vld [vmem:[#allocation4 + $0x3c8] sm:$0xff]  }
 0x26a   : > { %14851 = vmatprep.mubr.bf16.mxu1 %v17632_v32  ;;  %14920 = vmatpush3.bf16.msra.mxu1 %v16409_v50  ;;  %v16421_v32 = vld [vmem:[#allocation4 + $0x3c0] sm:$0xff]   ;;  %v4663_v50 = vpack.c.bf16 %v4643_v29, %v4642_v33 }
 0x26b   : > { %14921 = vmatprep.subr.bf16.mxu1 %v16410_v28 }
 0x26c   : > { %14970 = vmatpush3.bf16.msra.mxu0 %v16418_v42  ;;  %v4359_v42 = vld [vmem:[#allocation2 + $0x70] sm:$0xff] }
 0x26d   : > { %14971 = vmatprep.subr.bf16.mxu0 %v16420_v43 }
 0x26e   : > { %14922 = vmatpush3.bf16.msra.mxu1 %v16410_v28 }
 0x26f   : > { %14900 = vmatmul.mubr.bf16.gmra.mxu0 %v17740_v26  ;;  %14923 = vmatprep.subr.bf16.mxu1 %v16413_v7  ;;  %v4379_v26 = vpack.c.bf16 %v4354_v61, %v4353_v18  ;;  %v4370_v18 = vld [vmem:[#allocation2 + $0xc8] sm:$0xff] }
 0x270   : > { %14903 = vmatprep.mubr.bf16.mxu0 %v17745_v27  ;;  %14972 = vmatpush3.bf16.msra.mxu0 %v16420_v43  ;;  %v4638_v27 = vld [vmem:[#allocation2 + $0x71] sm:$0xff]  ;;  %v4664_v43 = vpack.c.bf16 %v4645_v1, %v4644_v11 }
 0x271   : > { %14852 = vmatmul.mubr.bf16.gmra.mxu1 %v17649_v22  ;;  %14973 = vmatprep.subr.bf16.mxu0 %v16422_v24  ;;  %v16423_v22 = vld [vmem:[#allocation4 + $0x478] sm:$0xff]   ;;  %v4661_v40 = vpack.c.bf16 %v4639_v54, %v4638_v27  ;;  %v4372_v1 = vld [vmem:[#allocation2 + $0xd8] sm:$0xff] }
 0x272   : > { %14855 = vmatprep.mubr.bf16.mxu1 %v17664_v15  ;;  %14924 = vmatpush3.bf16.msra.mxu1 %v16413_v7  ;;  %v4096_v15 = vld [vmem:[#allocation2 + $0xe2] sm:$0xff]  ;;  %v4382_v7 = vpack.c.bf16 %v4360_v2, %v4359_v42 }
 0x273   : > { %14925 = vmatprep.subr.bf16.mxu1 %v16416_v55  ;;  %v17789_v16 = vpack.c.bf16 %v4097_v39, %v4096_v15  ;;  %v4647_v15 = vld [vmem:[#allocation2 + $0xb9] sm:$0xff]  ;;  %v4648_v39 = vld [vmem:[#allocation2 + $0xc1] sm:$0xff] }
 0x274   : > { %14974 = vmatpush3.bf16.msra.mxu0 %v16422_v24  ;;  %v4361_v24 = vld [vmem:[#allocation2 + $0x80] sm:$0xff]  ;;  %v4665_v31 = vpack.c.bf16 %v4647_v15, %v4646_v60  ;;  %v4908_v15 = vld [vmem:[#allocation2 + $0x2a] sm:$0xff] }
 0x276   : > { %14926 = vmatpush3.bf16.msra.mxu1 %v16416_v55  ;;  %v16428_v55 = vld [vmem:[#allocation4 + $0x450] sm:$0xff]  }
 0x277   : > { %14904 = vmatmul.mubr.bf16.gmra.mxu0 %v17748_v53  ;;  %14927 = vmatprep.subr.bf16.mxu1 %v16419_v36  ;;  %v4358_v53 = vld [vmem:[#allocation2 + $0x68] sm:$0xff] }
 0x278   : > { %14907 = vmatprep.mubr.bf16.mxu0 %v17755_v9  ;;  %v16426_v9 = vld [vmem:[#allocation4 + $0x460] sm:$0xff]  }
 0x279   : > { %14856 = vmatmul.mubr.bf16.gmra.mxu1 %v17674_v20  ;;  %v4628_v20 = vld [vmem:[#allocation2 + $0x21] sm:$0xff] }
 0x27a   : > { %14859 = vmatprep.mubr.bf16.mxu1 %v17684_v23  ;;  %14928 = vmatpush3.bf16.msra.mxu1 %v16419_v36  ;;  %v4656_v23 = vpack.c.bf16 %v4629_v37, %v4628_v20  ;;  %v4383_v36 = vpack.c.bf16 %v4362_v13, %v4361_v24  ;;  %v4649_v20 = vld [vmem:[#allocation2 + $0xc9] sm:$0xff]  ;;  %v16429_v37 = vld [vmem:[#allocation4 + $0x448] sm:$0xff]  }
 0x27b   : > { %14929 = vmatprep.subr.bf16.mxu1 %v16421_v32 }
 0x27e   : > { %14930 = vmatpush3.bf16.msra.mxu1 %v16421_v32 }
 0x27f   : > { %14908 = vmatmul.mubr.bf16.gmra.mxu0 %v17758_v8  ;;  %15003 = vmatprep.subr.bf16.mxu1 %v16423_v22  ;;  %v4381_v8 = vpack.c.bf16 %v4358_v53, %v4357_v48  ;;  %v4387_v53 = vpack.c.bf16 %v4370_v18, %v4369_v30 }
 0x280   : > { %14911 = vmatprep.mubr.bf16.mxu0 %v17763_v38 }
 0x281   : > { %14860 = vmatmul.mubr.bf16.gmra.mxu1 %v17692_v56  ;;  %v4630_v56 = vld [vmem:[#allocation2 + $0x31] sm:$0xff] }
 0x282   : > { %14863 = vmatprep.mubr.bf16.mxu1 %v17698_v63  ;;  %v4350_v63 = vld [vmem:[#allocation2 + $0x28] sm:$0xff]  ;;  %v4657_v62 = vpack.c.bf16 %v4631_v0, %v4630_v56  ;;  %v4666_v56 = vpack.c.bf16 %v4649_v20, %v4648_v39 }
 0x283   : > { %v4377_v47 = vpack.c.bf16 %v4350_v63, %v4349_v58  ;;  %v4366_v0 = vld [vmem:[#allocation2 + $0xa8] sm:$0xff]  ;;  %v16430_v58 = vld [vmem:[#allocation4 + $0x440] sm:$0xff]  }
 0x287   : > { %14912 = vmatmul.mubr.bf16.gmra.mxu0 %v17789_v16 }
 0x288   : > { %14975 = vmatprep.mubr.bf16.mxu0 %v4656_v23  ;;  %v4364_v23 = vld [vmem:[#allocation2 + $0x98] sm:$0xff] }
 0x289   : > { %14864 = vmatmul.mubr.bf16.gmra.mxu1 %v17703_v51  ;;  %v4635_v51 = vld [vmem:[#allocation2 + $0x59] sm:$0xff]  ;;  %v4384_v63 = vpack.c.bf16 %v4364_v23, %v4363_v57 }
 0x28a   : > { %14867 = vmatprep.mubr.bf16.mxu1 %v17706_v12  ;;  %v4636_v12 = vld [vmem:[#allocation2 + $0x61] sm:$0xff]  ;;  %v4659_v59 = vpack.c.bf16 %v4635_v51, %v4634_v49  ;;  %v4651_v49 = vld [vmem:[#allocation2 + $0xd9] sm:$0xff] }
 0x28b   : > { %v4660_v44 = vpack.c.bf16 %v4637_v25, %v4636_v12 }
 0x28f   : > { %14976 = vmatmul.mubr.bf16.vlgmr.msra.gmra.mxu0 %v4657_v62  ;;  %v4365_v62 = vld [vmem:[#allocation2 + $0xa0] sm:$0xff] }
 0x290   : > { %14979 = vmatprep.mubr.bf16.mxu0 %v4658_v4 }
 0x291   : > { %14868 = vmatmul.mubr.bf16.gmra.mxu1 %v17794_v3 }
 0x292   : > { %14931 = vmatprep.mubr.bf16.mxu1 %v4377_v47  ;;  %v4385_v47 = vpack.c.bf16 %v4366_v0, %v4365_v62 }
 0x297   : > { %14980 = vmatmul.mubr.bf16.gmra.mxu0 %v4659_v59 }
 0x298   : > { %14983 = vmatprep.mubr.bf16.mxu0 %v4660_v44  ;;  %v4368_v44 = vld [vmem:[#allocation2 + $0xb8] sm:$0xff] }
 0x299   : > { %14932 = vmatmul.mubr.bf16.vlgmr.msra.gmra.mxu1 %v4378_v19 }
 0x29a   : > { %14935 = vmatprep.mubr.bf16.mxu1 %v4379_v26  ;;  %15004 = vmatpush3.bf16.msra.mxu1 %v16423_v22  ;;  %v4667_v26 = vpack.c.bf16 %v4651_v49, %v4650_v45  ;;  %v4909_v49 = vld [vmem:[#allocation2 + $0x32] sm:$0xff] }
 0x29b   : > { %15005 = vmatprep.subr.bf16.mxu1 %v16424_v35 }
 0x29e   : > { %15006 = vmatpush3.bf16.msra.mxu1 %v16424_v35 }
 0x29f   : > { %14984 = vmatmul.mubr.bf16.gmra.mxu0 %v4661_v40  ;;  %15007 = vmatprep.subr.bf16.mxu1 %v16425_v34  ;;  %v4654_v40 = vld [vmem:[#allocation2 + $0xf1] sm:$0xff] }
 0x2a0   : > { %14987 = vmatprep.mubr.bf16.mxu0 %v4662_v5  ;;  %v4669_v29 = vpack.c.bf16 %v4655_v10, %v4654_v40  ;;  %v4915_v40 = vld [vmem:[#allocation2 + $0x62] sm:$0xff]  ;;  %v4916_v10 = vld [vmem:[#allocation2 + $0x6a] sm:$0xff] }
 0x2a1   : > { %14936 = vmatmul.mubr.bf16.gmra.mxu1 %v4380_v52 }
 0x2a2   : > { %14939 = vmatprep.mubr.bf16.mxu1 %v4381_v8  ;;  %15008 = vmatpush3.bf16.msra.mxu1 %v16425_v34  ;;  %v4386_v34 = vpack.c.bf16 %v4368_v44, %v4367_v21 }
 0x2a3   : > { %15009 = vmatprep.subr.bf16.mxu1 %v16426_v9 }
 0x2a4   : > { %v14713_v28 = vpop.f32.mrf.mxu0 }
 0x2a6   : > { %15010 = vmatpush3.bf16.msra.mxu1 %v16426_v9  ;;  %v3122_v32 = vpop.f32.mrf.mxu0 }
 0x2a7   : > { %14988 = vmatmul.mubr.bf16.gmra.mxu0 %v4663_v50  ;;  %15011 = vmatprep.subr.bf16.mxu1 %v16427_v6 }
 0x2a8   : > { %14991 = vmatprep.mubr.bf16.mxu0 %v4664_v43  ;;  %v14714_v22 = vpop.f32.mrf.mxu0 }
 0x2a9   : > { %14940 = vmatmul.mubr.bf16.gmra.mxu1 %v4382_v7 }
 0x2aa   : > { %14943 = vmatprep.mubr.bf16.mxu1 %v4383_v36  ;;  %15012 = vmatpush3.bf16.msra.mxu1 %v16427_v6  ;;  %v17797_v17 = vpop.f32.mrf.mxu0 }
 0x2ab   : > { %15013 = vmatprep.subr.bf16.mxu1 %v16428_v55 }
 0x2ae   : > { %15014 = vmatpush3.bf16.msra.mxu1 %v16428_v55  ;;  %v14717_v4 = vpop.f32.mrf.mxu0 }
 0x2af   : > { %14992 = vmatmul.mubr.bf16.gmra.mxu0 %v4665_v31  ;;  %15015 = vmatprep.subr.bf16.mxu1 %v16429_v37 }
 0x2b0   : > { %14995 = vmatprep.mubr.bf16.mxu0 %v4666_v56  ;;  %v14669_v51 = vpop.f32.mrf.mxu1  ;;  %v3138_v12 = vpop.f32.mrf.mxu0 }
 0x2b1   : > { %14944 = vmatmul.mubr.bf16.gmra.mxu1 %v4384_v63  ;;  %v17799_v25 = vadd.f32 %v14713_v28, %v14669_v51  ;;  %v4912_v51 = vld [vmem:[#allocation2 + $0x4a] sm:$0xff] }
 0x2b2   : > { %14947 = vmatprep.mubr.bf16.mxu1 %v4385_v47  ;;  %15016 = vmatpush3.bf16.msra.mxu1 %v16429_v37  ;;  %v2929_v61 = vpop.f32.mrf.mxu1  ;;  %v14718_v59 = vpop.f32.mrf.mxu0  ;;  %v4911_v47 = vld [vmem:[#allocation2 + $0x42] sm:$0xff] }
 0x2b3   : > { %15017 = vmatprep.subr.bf16.mxu1 %v16430_v58  ;;  %v17801_v46 = vadd.f32 %v3122_v32, %v2929_v61  ;;  %v4937_v44 = vpack.c.bf16 %v4912_v51, %v4911_v47 }
 0x2b4   : > { %v14670_v19 = vpop.f32.mrf.mxu1  ;;  %v17803_v35 = vpop.f32.mrf.mxu0 }
 0x2b5   : > { %v17805_v54 = vadd.f32 %v14714_v22, %v14670_v19  ;;  %v4907_v22 = vld [vmem:[#allocation2 + $0x22] sm:$0xff] }
 0x2b6   : > { %15018 = vmatpush3.bf16.msra.mxu1 %v16430_v58  ;;  %v17807_v41 = vpop.f32.mrf.mxu1  ;;  %v14721_v27 = vpop.f32.mrf.mxu0  ;;  %v4935_v60 = vpack.c.bf16 %v4908_v15, %v4907_v22  ;;  %v4919_v22 = vld [vmem:[#allocation2 + $0x82] sm:$0xff]  ;;  %v4920_v15 = vld [vmem:[#allocation2 + $0x8a] sm:$0xff] }
 0x2b7   : > { %14996 = vmatmul.mubr.bf16.gmra.mxu0 %v4667_v26 }
 0x2b8   : > { %14999 = vmatprep.mubr.bf16.mxu0 %v17794_v3  ;;  %v14673_v5 = vpop.f32.mrf.mxu1  ;;  %v3154_v52 = vpop.f32.mrf.mxu0  ;;  %v4371_v3 = vld [vmem:[#allocation2 + $0xd0] sm:$0xff] }
 0x2b9   : > { %14948 = vmatmul.mubr.bf16.gmra.mxu1 %v4386_v34  ;;  %v17810_v48 = vadd.f32 %v14717_v4, %v14673_v5  ;;  %v4388_v50 = vpack.c.bf16 %v4372_v1, %v4371_v3  ;;  %v4910_v4 = vld [vmem:[#allocation2 + $0x3a] sm:$0xff] }
 0x2ba   : > { %14951 = vmatprep.mubr.bf16.mxu1 %v4387_v53  ;;  %v2945_v9 = vpop.f32.mrf.mxu1  ;;  %v14722_v8 = vpop.f32.mrf.mxu0 }
 0x2bb   : > { %v17812_v11 = vadd.f32 %v3138_v12, %v2945_v9  ;;  %v4913_v9 = vld [vmem:[#allocation2 + $0x52] sm:$0xff] }
 0x2bc   : > { %v14674_v6 = vpop.f32.mrf.mxu1  ;;  %v17814_v2 = vpop.f32.mrf.mxu0 }
 0x2bd   : > { %v17816_v33 = vadd.f32 %v14718_v59, %v14674_v6  ;;  %v4939_v6 = vpack.c.bf16 %v4916_v10, %v4915_v40 }
 0x2be   : > { %v17818_v13 = vpop.f32.mrf.mxu1  ;;  %v14725_v42 = vpop.f32.mrf.mxu0 }
 0x2bf   : > { %15000 = vmatmul.mubr.bf16.gmra.mxu0 %v4669_v29 }
 0x2c0   : > { %v14677_v28 = vpop.f32.mrf.mxu1  ;;  %v3170_v43 = vpop.f32.mrf.mxu0 }
 0x2c1   : > { %14952 = vmatmul.mubr.bf16.gmra.mxu1 %v4388_v50  ;;  %v17820_v7 = vadd.f32 %v14721_v27, %v14677_v28  ;;  %v4914_v27 = vld [vmem:[#allocation2 + $0x5a] sm:$0xff] }
 0x2c2   : > { %14955 = vmatprep.mubr.bf16.mxu1 %v17753_v14  ;;  %v2961_v24 = vpop.f32.mrf.mxu1  ;;  %v14726_v55 = vpop.f32.mrf.mxu0  ;;  %v4938_v29 = vpack.c.bf16 %v4914_v27, %v4913_v9 }
 0x2c3   : > { %v17823_v36 = vadd.f32 %v3154_v52, %v2961_v24 }
 0x2c4   : > { %v14678_v32 = vpop.f32.mrf.mxu1  ;;  %v17825_v39 = vpop.f32.mrf.mxu0 }
 0x2c5   : > { %v17827_v20 = vadd.f32 %v14722_v8, %v14678_v32 }
 0x2c6   : > { %v17829_v37 = vpop.f32.mrf.mxu1 }
 0x2c7   : > { %v14729_v23 = vpop.f32.mrf.mxu0 }
 0x2c9   : > { %v14681_v0 = vpop.f32.mrf.mxu1  ;;  %14956 = vmatmul.mubr.bf16.gmra.mxu1 %v17753_v14  ;;  %v3186_v31 = vpop.f32.mrf.mxu0  ;;  %v4936_v14 = vpack.c.bf16 %v4910_v4, %v4909_v49  ;;  %v4941_v4 = vpack.c.bf16 %v4920_v15, %v4919_v22  ;;  %v4927_v15 = vld [vmem:[#allocation2 + $0xc2] sm:$0xff] }
 0x2ca   : > { %v17832_v57 = vadd.f32 %v14725_v42, %v14681_v0  ;;  %15019 = vmatprep.mubr.bf16.mxu1 %v4935_v60  ;;  %v4917_v0 = vld [vmem:[#allocation2 + $0x72] sm:$0xff] }
 0x2cb   : > { %v2977_v56 = vpop.f32.mrf.mxu1  ;;  %v14730_v63 = vpop.f32.mrf.mxu0 }
 0x2cc   : > { %v17834_v62 = vadd.f32 %v3170_v43, %v2977_v56 }
 0x2cd   : > { %v14682_v58 = vpop.f32.mrf.mxu1  ;;  %v17836_v12 = vpop.f32.mrf.mxu0 }
 0x2ce   : > { %20634 = vst [vmem:[#allocation39_spill] sm:$0xff] %v17836_v12  ;;  %v17838_v45 = vadd.f32 %v14726_v55, %v14682_v58  ;;  %v4918_v55 = vld [vmem:[#allocation2 + $0x7a] sm:$0xff] }
 0x2cf   : > { %v17840_v61 = vpop.f32.mrf.mxu1  ;;  %v14733_v59 = vpop.f32.mrf.mxu0  ;;  %v4940_v56 = vpack.c.bf16 %v4918_v55, %v4917_v0  ;;  %v4928_v0 = vld [vmem:[#allocation2 + $0xca] sm:$0xff] }
 0x2d1   : > { %v14685_v19 = vpop.f32.mrf.mxu1  ;;  %15020 = vmatmul.mubr.bf16.vlgmr.msra.gmra.mxu1 %v4936_v14  ;;  %v3202_v18 = vpop.f32.mrf.mxu0 }
 0x2d2   : > { %v17842_v26 = vadd.f32 %v14729_v23, %v14685_v19  ;;  %15023 = vmatprep.mubr.bf16.mxu1 %v4937_v44  ;;  %v4922_v44 = vld [vmem:[#allocation2 + $0x9a] sm:$0xff] }
 0x2d3   : > { %v2993_v21 = vpop.f32.mrf.mxu1  ;;  %v14734_v34 = vpop.f32.mrf.mxu0 }
 0x2d4   : > { %v17844_v30 = vadd.f32 %v3186_v31, %v2993_v21  ;;  %v4924_v21 = vld [vmem:[#allocation2 + $0xaa] sm:$0xff] }
 0x2d5   : > { %v14686_v53 = vpop.f32.mrf.mxu1  ;;  %v17846_v5 = vpop.f32.mrf.mxu0 }
 0x2d6   : > { %20635 = vst [vmem:[#allocation10_spill] sm:$0xff] %v17846_v5  ;;  %v17848_v52 = vadd.f32 %v14730_v63, %v14686_v53  ;;  %v4921_v53 = vld [vmem:[#allocation2 + $0x92] sm:$0xff] }
 0x2d7   : > { %v17850_v8 = vpop.f32.mrf.mxu1  ;;  %v14737_v1 = vpop.f32.mrf.mxu0  ;;  %v4942_v10 = vpack.c.bf16 %v4922_v44, %v4921_v53 }
 0x2d8   : > { %20636 = vst [vmem:[#allocation13_spill] sm:$0xff] %v17850_v8 }
 0x2d9   : > { %v14689_v3 = vpop.f32.mrf.mxu1  ;;  %15024 = vmatmul.mubr.bf16.gmra.mxu1 %v4938_v29  ;;  %v3218_v50 = vpop.f32.mrf.mxu0 }
 0x2da   : > { %v17852_v42 = vadd.f32 %v14733_v59, %v14689_v3  ;;  %15027 = vmatprep.mubr.bf16.mxu1 %v4939_v6 }
 0x2db   : > { %v3009_v28 = vpop.f32.mrf.mxu1  ;;  %v14738_v43 = vpop.f32.mrf.mxu0 }
 0x2dc   : > { %v17854_v24 = vadd.f32 %v3202_v18, %v3009_v28  ;;  %v4923_v18 = vld [vmem:[#allocation2 + $0xa2] sm:$0xff] }
 0x2dd   : > { %v14690_v32 = vpop.f32.mrf.mxu1  ;;  %v17856_v23 = vpop.f32.mrf.mxu0  ;;  %v4943_v29 = vpack.c.bf16 %v4924_v21, %v4923_v18  ;;  %v4945_v18 = vpack.c.bf16 %v4928_v0, %v4927_v15  ;;  %v4933_v0 = vld [vmem:[#allocation2 + $0xf2] sm:$0xff] }
 0x2de   : > { %20637 = vst [vmem:[#allocation38_spill] sm:$0xff] %v17856_v23  ;;  %v17858_v60 = vadd.f32 %v14734_v34, %v14690_v32  ;;  %v4926_v32 = vld [vmem:[#allocation2 + $0xba] sm:$0xff] }
 0x2df   : > { %v17860_v31 = vpop.f32.mrf.mxu1  ;;  %v14801_v63 = vpop.f32.mrf.mxu0 }
 0x2e0   : > { %20638 = vst [vmem:[#allocation20_spill] sm:$0xff] %v17860_v31 }
 0x2e1   : > { %v14693_v58 = vpop.f32.mrf.mxu1  ;;  %15028 = vmatmul.mubr.bf16.gmra.mxu1 %v4940_v56  ;;  %v3652_v47 = vpop.f32.mrf.mxu0 }
 0x2e2   : > { %v17862_v51 = vadd.f32 %v14737_v1, %v14693_v58  ;;  %15031 = vmatprep.mubr.bf16.mxu1 %v4941_v4  ;;  %v4925_v58 = vld [vmem:[#allocation2 + $0xb2] sm:$0xff] }
 0x2e3   : > { %v3025_v49 = vpop.f32.mrf.mxu1  ;;  %v14802_v14 = vpop.f32.mrf.mxu0 }
 0x2e4   : > { %v17864_v59 = vadd.f32 %v3218_v50, %v3025_v49 }
 0x2e5   : > { %v14694_v19 = vpop.f32.mrf.mxu1  ;;  %v17866_v34 = vpop.f32.mrf.mxu0 }
 0x2e6   : > { %v17868_v27 = vadd.f32 %v14738_v43, %v14694_v19 }
 0x2e7   : > { %v17870_v40 = vpop.f32.mrf.mxu1  ;;  %v14805_v9 = vpop.f32.mrf.mxu0 }
 0x2e8   : > { %20639 = vst [vmem:[#allocation41_spill] sm:$0xff] %v17870_v40  ;;  %v18007_v40 = vld [vmem:[#allocation4 + $0x538] sm:$0xff]  }
 0x2e9   : > { %v14757_v1 = vpop.f32.mrf.mxu1  ;;  %15032 = vmatmul.mubr.bf16.gmra.mxu1 %v4942_v10  ;;  %v3668_v6 = vpop.f32.mrf.mxu0  ;;  %v16431_v10 = vld [vmem:[#allocation4 + $0x4f8] sm:$0xff]   ;;  %20649 = vst [vmem:[#allocation23_spill] sm:$0xff] %v18007_v40 }
 0x2ea   : > { %v3486_v3 = vadd.f32 %v14757_v1, %v17799_v25  ;;  %15035 = vmatprep.mubr.bf16.mxu1 %v4943_v29  ;;  %v4944_v25 = vpack.c.bf16 %v4926_v32, %v4925_v58  ;;  %15047 = vmatprep.subr.bf16.mxu0 %v16431_v10  ;;  %v16432_v58 = vld [vmem:[#allocation4 + $0x4f0] sm:$0xff]  }
 0x2eb   : > { %v3373_v50 = vpop.f32.mrf.mxu1  ;;  %v14806_v28 = vpop.f32.mrf.mxu0  ;;  %15048 = vmatpush3.bf16.msra.mxu0 %v16431_v10 }
 0x2ec   : > { %v3484_v55 = vadd.f32 %v3373_v50, %v17801_v46  ;;  %v17874_v22 = vadd.f32 %v14801_v63, %v3486_v3  ;;  %15049 = vmatprep.subr.bf16.mxu0 %v16432_v58 }
 0x2ed   : > { %v14758_v43 = vpop.f32.mrf.mxu1  ;;  %v17876_v56 = vpop.f32.mrf.mxu0 }
 0x2ee   : > { %v3487_v4 = vadd.f32 %v14758_v43, %v17805_v54  ;;  %v17879_v49 = vadd.f32 %v3652_v47, %v3484_v55 }
 0x2ef   : > { %v17881_v44 = vpop.f32.mrf.mxu1  ;;  %v14809_v19 = vpop.f32.mrf.mxu0  ;;  %15050 = vmatpush3.bf16.msra.mxu0 %v16432_v58 }
 0x2f0   : > { %v17883_v21 = vadd.f32 %v14802_v14, %v3487_v4  ;;  %v4934_v4 = vld [vmem:[#allocation2 + $0xfa] sm:$0xff] }
 0x2f1   : > { %v14761_v46 = vpop.f32.mrf.mxu1  ;;  %15036 = vmatmul.mubr.bf16.gmra.mxu1 %v4944_v25  ;;  %v3684_v63 = vpop.f32.mrf.mxu0 }
 0x2f2   : > { %v3490_v53 = vadd.f32 %v14761_v46, %v17810_v48  ;;  %15039 = vmatprep.mubr.bf16.mxu1 %v4945_v18  ;;  %v4948_v46 = vpack.c.bf16 %v4934_v4, %v4933_v0 }
 0x2f3   : > { %v3389_v29 = vpop.f32.mrf.mxu1  ;;  %v14810_v1 = vpop.f32.mrf.mxu0 }
 0x2f4   : > { %v3488_v54 = vadd.f32 %v3389_v29, %v17812_v11  ;;  %v17887_v47 = vadd.f32 %v14805_v9, %v3490_v53 }
 0x2f5   : > { %v14762_v3 = vpop.f32.mrf.mxu1  ;;  %v17889_v50 = vpop.f32.mrf.mxu0 }
 0x2f6   : > { %v3491_v14 = vadd.f32 %v14762_v3, %v17816_v33  ;;  %v17892_v55 = vadd.f32 %v3668_v6, %v3488_v54  ;;  %v16433_v54 = vld [vmem:[#allocation4 + $0x4e8] sm:$0xff]  }
 0x2f7   : > { %v17894_v32 = vpop.f32.mrf.mxu1  ;;  %v14813_v48 = vpop.f32.mrf.mxu0  ;;  %15051 = vmatprep.subr.bf16.mxu0 %v16433_v54 }
 0x2f8   : > { %v17896_v43 = vadd.f32 %v14806_v28, %v3491_v14  ;;  %v16435_v14 = vld [vmem:[#allocation4 + $0x4b8] sm:$0xff]   ;;  %15052 = vmatpush3.bf16.msra.mxu0 %v16433_v54  ;;  %v16438_v54 = vld [vmem:[#allocation4 + $0x4a8] sm:$0xff]  }
 0x2f9   : > { %v14765_v15 = vpop.f32.mrf.mxu1  ;;  %15040 = vmatmul.mubr.bf16.gmra.mxu1 %v17763_v38  ;;  %v3700_v11 = vpop.f32.mrf.mxu0  ;;  %15091 = vmatprep.subr.bf16.mxu1 %v16435_v14 }
 0x2fa   : > { %v3494_v9 = vadd.f32 %v14765_v15, %v17820_v7  ;;  %15043 = vmatprep.mubr.bf16.mxu1 %v17789_v16  ;;  %15092 = vmatpush3.bf16.msra.mxu1 %v16435_v14 }
 0x2fb   : > { %v3405_v25 = vpop.f32.mrf.mxu1  ;;  %v14814_v33 = vpop.f32.mrf.mxu0 }
 0x2fc   : > { %v3492_v6 = vadd.f32 %v3405_v25, %v17823_v36  ;;  %v17902_v18 = vadd.f32 %v14809_v19, %v3494_v9  ;;  %v16436_v25 = vld [vmem:[#allocation4 + $0x4b0] sm:$0xff]  }
 0x2fd   : > { %v14766_v28 = vpop.f32.mrf.mxu1  ;;  %v17904_v53 = vpop.f32.mrf.mxu0  ;;  %15093 = vmatprep.subr.bf16.mxu1 %v16436_v25 }
 0x2fe   : > { %20640 = vst [vmem:[#allocation21_spill] sm:$0xff] %v17904_v53  ;;  %v3495_v38 = vadd.f32 %v14766_v28, %v17827_v20  ;;  %v17907_v7 = vadd.f32 %v3684_v63, %v3492_v6  ;;  %15094 = vmatpush3.bf16.msra.mxu1 %v16436_v25 }
 0x2ff   : > { %v17909_v16 = vpop.f32.mrf.mxu1  ;;  %v14817_v10 = vpop.f32.mrf.mxu0  ;;  %15095 = vmatprep.subr.bf16.mxu1 %v16438_v54 }
 0x300   : > { %v17911_v29 = vadd.f32 %v14810_v1, %v3495_v38 }
 0x301   : > { %v14769_v3 = vpop.f32.mrf.mxu1  ;;  %15044 = vmatmul.mubr.bf16.gmra.mxu1 %v4948_v46  ;;  %v3716_v36 = vpop.f32.mrf.mxu0  ;;  %v16434_v46 = vld [vmem:[#allocation4 + $0x4e0] sm:$0xff]  }
 0x302   : > { %v3498_v19 = vadd.f32 %v14769_v3, %v17832_v57  ;;  %15053 = vmatprep.subr.bf16.mxu0 %v16434_v46  ;;  %15096 = vmatpush3.bf16.msra.mxu1 %v16438_v54 }
 0x303   : > { %v3421_v15 = vpop.f32.mrf.mxu1  ;;  %v14818_v9 = vpop.f32.mrf.mxu0  ;;  %15054 = vmatpush3.bf16.msra.mxu0 %v16434_v46 }
 0x304   : > { %v3496_v20 = vadd.f32 %v3421_v15, %v17834_v62  ;;  %v17915_v63 = vadd.f32 %v14813_v48, %v3498_v19 }
 0x305   : > { %v14770_v0 = vpop.f32.mrf.mxu1  ;;  %v17917_v4 = vpop.f32.mrf.mxu0 }
 0x306   : > { %20641 = vst [vmem:[#allocation22_spill] sm:$0xff] %v17917_v4  ;;  %v3499_v1 = vadd.f32 %v14770_v0, %v17838_v45  ;;  %v17920_v58 = vadd.f32 %v3700_v11, %v3496_v20  ;;  %v16437_v0 = vld [vmem:[#allocation4 + $0x4d8] sm:$0xff]  }
 0x307   : > { %v17922_v57 = vpop.f32.mrf.mxu1  ;;  %v14821_v6 = vpop.f32.mrf.mxu0  ;;  %15055 = vmatprep.subr.bf16.mxu0 %v16437_v0 }
 0x308   : > { %v17924_v28 = vadd.f32 %v14814_v33, %v3499_v1  ;;  %15056 = vmatpush3.bf16.msra.mxu0 %v16437_v0  ;;  %v16442_v0 = vld [vmem:[#allocation4 + $0x490] sm:$0xff]  }
 0x309   : > { %v14773_v62 = vpop.f32.mrf.mxu1  ;;  %v3732_v48 = vpop.f32.mrf.mxu0 }
 0x30a   : > { %v3502_v38 = vadd.f32 %v14773_v62, %v17842_v26  ;;  %v16439_v26 = vld [vmem:[#allocation4 + $0x4a0] sm:$0xff]  }
 0x30b   : > { %v3437_v3 = vpop.f32.mrf.mxu1  ;;  %v14822_v19 = vpop.f32.mrf.mxu0  ;;  %15097 = vmatprep.subr.bf16.mxu1 %v16439_v26 }
 0x30c   : > { %v3500_v45 = vadd.f32 %v3437_v3, %v17844_v30  ;;  %v17928_v11 = vadd.f32 %v14817_v10, %v3502_v38  ;;  %15098 = vmatpush3.bf16.msra.mxu1 %v16439_v26  ;;  %v16441_v38 = vld [vmem:[#allocation4 + $0x498] sm:$0xff]  }
 0x30d   : > { %v14774_v14 = vpop.f32.mrf.mxu1  ;;  %v17930_v33 = vpop.f32.mrf.mxu0  ;;  %15099 = vmatprep.subr.bf16.mxu1 %v16441_v38 }
 0x30e   : > { %20642 = vst [vmem:[#allocation43_spill] sm:$0xff] %v17930_v33  ;;  %v3503_v15 = vadd.f32 %v14774_v14, %v17848_v52  ;;  %v17933_v20 = vadd.f32 %v3716_v36, %v3500_v45 }
 0x30f   : > { %v17935_v1 = vpop.f32.mrf.mxu1  ;;  %v14825_v25 = vpop.f32.mrf.mxu0 }
 0x310   : > { %20643 = vst [vmem:[#allocation40_spill] sm:$0xff] %v17935_v1  ;;  %v17937_v62 = vadd.f32 %v14818_v9, %v3503_v15  ;;  %15100 = vmatpush3.bf16.msra.mxu1 %v16441_v38  ;;  %v16444_v38 = vld [vmem:[#allocation4 + $0x488] sm:$0xff]  }
 0x311   : > { %v14777_v30 = vpop.f32.mrf.mxu1  ;;  %v3748_v10 = vpop.f32.mrf.mxu0  ;;  %15101 = vmatprep.subr.bf16.mxu1 %v16442_v0 }
 0x312   : > { %v3506_v46 = vadd.f32 %v14777_v30, %v17852_v42 }
 0x313   : > { %v3453_v54 = vpop.f32.mrf.mxu1  ;;  %v14826_v52 = vpop.f32.mrf.mxu0 }
 0x314   : > { %v3504_v36 = vadd.f32 %v3453_v54, %v17854_v24  ;;  %v17941_v3 = vadd.f32 %v14821_v6, %v3506_v46  ;;  %15102 = vmatpush3.bf16.msra.mxu1 %v16442_v0  ;;  %v16440_v54 = vld [vmem:[#allocation4 + $0x4d0] sm:$0xff]  }
 0x315   : > { %v14778_v45 = vpop.f32.mrf.mxu1  ;;  %v17943_v14 = vpop.f32.mrf.mxu0  ;;  %15057 = vmatprep.subr.bf16.mxu0 %v16440_v54  ;;  %15103 = vmatprep.subr.bf16.mxu1 %v16444_v38 }
 0x316   : > { %20644 = vst [vmem:[#allocation14_spill] sm:$0xff] %v17943_v14  ;;  %v3507_v9 = vadd.f32 %v14778_v45, %v17858_v60  ;;  %v17946_v15 = vadd.f32 %v3732_v48, %v3504_v36  ;;  %15058 = vmatpush3.bf16.msra.mxu0 %v16440_v54 }
 0x317   : > { %v17948_v26 = vpop.f32.mrf.mxu1  ;;  %v17950_v42 = vpop.f32.mrf.mxu0 }
 0x318   : > { %20645 = vst [vmem:[#allocation42_spill] sm:$0xff] %v17948_v26  ;;  %v17952_v30 = vadd.f32 %v14822_v19, %v3507_v9  ;;  %15104 = vmatpush3.bf16.msra.mxu1 %v16444_v38 }
 0x319   : > { %v14781_v24 = vpop.f32.mrf.mxu1  ;;  %v17954_v6 = vpop.f32.mrf.mxu0 }
 0x31a   : > { %v3510_v46 = vadd.f32 %v14781_v24, %v17862_v51  ;;  %v16446_v51 = vld [vmem:[#allocation4 + $0x480] sm:$0xff]  }
 0x31b   : > { %v3469_v14 = vpop.f32.mrf.mxu1  ;;  %v17957_v60 = vpop.f32.mrf.mxu0  ;;  %15105 = vmatprep.subr.bf16.mxu1 %v16446_v51 }
 0x31c   : > { %v3508_v48 = vadd.f32 %v3469_v14, %v17864_v59  ;;  %v17960_v36 = vadd.f32 %v14825_v25, %v3510_v46  ;;  %v16443_v59 = vld [vmem:[#allocation4 + $0x4c8] sm:$0xff]   ;;  %15106 = vmatpush3.bf16.msra.mxu1 %v16446_v51 }
 0x31d   : > { %v14782_v19 = vpop.f32.mrf.mxu1  ;;  %v17962_v45 = vpop.f32.mrf.mxu0  ;;  %15059 = vmatprep.subr.bf16.mxu0 %v16443_v59 }
 0x31e   : > { %v3511_v9 = vadd.f32 %v14782_v19, %v17868_v27  ;;  %v17965_v0 = vadd.f32 %v3748_v10, %v3508_v48  ;;  %15060 = vmatpush3.bf16.msra.mxu0 %v16443_v59 }
 0x31f   : > { %v17967_v24 = vpop.f32.mrf.mxu1  ;;  %v17969_v33 = vpop.f32.mrf.mxu0 }
 0x320   : > { %20646 = vst [vmem:[#allocation45_spill] sm:$0xff] %v17967_v24  ;;  %v17971_v26 = vadd.f32 %v14826_v52, %v3511_v9 }
 0x321   : > { %v14845_v25 = vpop.f32.mrf.mxu1  ;;  %v17973_v14 = vpop.f32.mrf.mxu0 }
 0x322   : > { %v17976_v46 = vadd.f32 %v14845_v25, %v17874_v22  ;;  %v16445_v22 = vld [vmem:[#allocation4 + $0x4c0] sm:$0xff]  }
 0x323   : > { %v3931_v27 = vpop.f32.mrf.mxu1  ;;  %v17978_v10 = vpop.f32.mrf.mxu0  ;;  %15061 = vmatprep.subr.bf16.mxu0 %v16445_v22 }
 0x324   : > { %v17981_v54 = vadd.f32 %v3931_v27, %v17879_v49  ;;  %15062 = vmatpush3.bf16.msra.mxu0 %v16445_v22 }
 0x325   : > { %v14846_v38 = vpop.f32.mrf.mxu1  ;;  %v17983_v52 = vpop.f32.mrf.mxu0  ;;  %15135 = vmatprep.subr.bf16.mxu0 %v18007_v40 }
 0x326   : > { %v17986_v48 = vadd.f32 %v14846_v38, %v17883_v21 }
 0x327   : > { %v17988_v19 = vpop.f32.mrf.mxu1  ;;  %v17990_v9 = vpop.f32.mrf.mxu0 }
 0x329   : > { %v14849_v51 = vpop.f32.mrf.mxu1  ;;  %v17992_v25 = vpop.f32.mrf.mxu0 }
 0x32a   : > { %v17995_v24 = vadd.f32 %v14849_v51, %v17887_v47 }
 0x32b   : > { %v3947_v49 = vpop.f32.mrf.mxu1  ;;  %v17997_v59 = vpop.f32.mrf.mxu0 }
 0x32c   : > { %20647 = vst [vmem:[#allocation25_spill] sm:$0xff] %v17997_v59  ;;  %v18000_v27 = vadd.f32 %v3947_v49, %v17892_v55 }
 0x32d   : > { %v14850_v21 = vpop.f32.mrf.mxu1  ;;  %v18002_v38 = vpop.f32.mrf.mxu0 }
 0x32e   : > { %20648 = vst [vmem:[#allocation44_spill] sm:$0xff] %v18002_v38  ;;  %v18005_v23 = vadd.f32 %v14850_v21, %v17896_v43 }
 0x32f   : > { %v18009_v4 = vpop.f32.mrf.mxu1  ;;  %v18011_v47 = vpop.f32.mrf.mxu0 }
 0x330   : > { %20650 = vst [vmem:[#allocation47_spill] sm:$0xff] %v18011_v47 }
 0x331   : > { %v14853_v51 = vpop.f32.mrf.mxu1  ;;  %v18014_v5 = vpop.f32.mrf.mxu0 }
 0x332   : > { %20651 = vst [vmem:[#allocation11_spill] sm:$0xff] %v18014_v5  ;;  %v18017_v55 = vadd.f32 %v14853_v51, %v17902_v18  ;;  %v18038_v51 = vld [vmem:[#allocation4 + $0x578] sm:$0xff]  }
 0x333   : > { %v3963_v22 = vpop.f32.mrf.mxu1  ;;  %v18019_v49 = vpop.f32.mrf.mxu0  ;;  %20658 = vst [vmem:[#allocation48_spill] sm:$0xff] %v18038_v51  ;;  %15179 = vmatprep.subr.bf16.mxu1 %v18038_v51 }
 0x334   : > { %20652 = vst [vmem:[#allocation15_spill] sm:$0xff] %v18019_v49  ;;  %v18022_v43 = vadd.f32 %v3963_v22, %v17907_v7 }
 0x335   : > { %v14854_v21 = vpop.f32.mrf.mxu1  ;;  %v18024_v31 = vpop.f32.mrf.mxu0 }
 0x336   : > { %20653 = vst [vmem:[#allocation46_spill] sm:$0xff] %v18024_v31  ;;  %v18027_v1 = vadd.f32 %v14854_v21, %v17911_v29 }
 0x337   : > { %v18029_v47 = vpop.f32.mrf.mxu1  ;;  %v18031_v40 = vpop.f32.mrf.mxu0 }
 0x338   : > { %20654 = vst [vmem:[#allocation24_spill] sm:$0xff] %v18027_v1  ;;  %20655 = vst [vmem:[#allocation49_spill] sm:$0xff] %v18031_v40 }
 0x339   : > { %v14857_v5 = vpop.f32.mrf.mxu1  ;;  %v18033_v53 = vpop.f32.mrf.mxu0 }
 0x33a   : > { %20656 = vst [vmem:[#allocation19_spill] sm:$0xff] %v18033_v53  ;;  %v18036_v18 = vadd.f32 %v14857_v5, %v17915_v63 }
 0x33b   : > { %v3979_v7 = vpop.f32.mrf.mxu1  ;;  %v18040_v22 = vpop.f32.mrf.mxu0 }
 0x33c   : > { %20657 = vst [vmem:[#allocation26_spill] sm:$0xff] %v18036_v18  ;;  %20659 = vst [vmem:[#allocation27_spill] sm:$0xff] %v18040_v22  ;;  %v18043_v31 = vadd.f32 %v3979_v7, %v17920_v58 }
 0x33d   : > { %v14858_v29 = vpop.f32.mrf.mxu1  ;;  %v18046_v21 = vpop.f32.mrf.mxu0 }
 0x33e   : > { %20660 = vst [vmem:[#allocation51_spill] sm:$0xff] %v18043_v31  ;;  %20661 = vst [vmem:[#allocation16_spill] sm:$0xff] %v18046_v21  ;;  %v18049_v40 = vadd.f32 %v14858_v29, %v17924_v28 }
 0x33f   : > { %v18051_v53 = vpop.f32.mrf.mxu1  ;;  %v18053_v5 = vpop.f32.mrf.mxu0 }
 0x340   : > { %20662 = vst [vmem:[#allocation50_spill] sm:$0xff] %v18049_v40  ;;  %20663 = vst [vmem:[#allocation53_spill] sm:$0xff] %v18051_v53 }
 0x341   : > { %20664 = vst [vmem:[#allocation30_spill] sm:$0xff] %v18053_v5  ;;  %v14861_v63 = vpop.f32.mrf.mxu1  ;;  %v18055_v49 = vpop.f32.mrf.mxu0 }
 0x342   : > { %20665 = vst [vmem:[#allocation52_spill] sm:$0xff] %v18055_v49  ;;  %v18058_v22 = vadd.f32 %v14861_v63, %v17928_v11 }
 0x343   : > { %v3995_v58 = vpop.f32.mrf.mxu1  ;;  %v18060_v7 = vpop.f32.mrf.mxu0 }
 0x344   : > { %20666 = vst [vmem:[#allocation28_spill] sm:$0xff] %v18058_v22  ;;  %20667 = vst [vmem:[#allocation55_spill] sm:$0xff] %v18060_v7  ;;  %v18063_v31 = vadd.f32 %v3995_v58, %v17933_v20 }
 0x345   : > { %v14862_v21 = vpop.f32.mrf.mxu1  ;;  %v18065_v18 = vpop.f32.mrf.mxu0 }
 0x346   : > { %20668 = vst [vmem:[#allocation12_spill] sm:$0xff] %v18063_v31  ;;  %20669 = vst [vmem:[#allocation17_spill] sm:$0xff] %v18065_v18  ;;  %v18068_v28 = vadd.f32 %v14862_v21, %v17937_v62 }
 0x347   : > { %v18070_v29 = vpop.f32.mrf.mxu1  ;;  %v18072_v40 = vpop.f32.mrf.mxu0 }
 0x348   : > { %20670 = vst [vmem:[#allocation54_spill] sm:$0xff] %v18068_v28  ;;  %20671 = vst [vmem:[#allocation29_spill] sm:$0xff] %v18070_v29 }
 0x349   : > { %v14865_v5 = vpop.f32.mrf.mxu1  ;;  %20672 = vst [vmem:[#allocation57_spill] sm:$0xff] %v18072_v40  ;;  %v18080_v58 = vpop.f32.mrf.mxu0 }
 0x34a   : > { %v18075_v11 = vadd.f32 %v14865_v5, %v17941_v3  ;;  %20675 = vst [vmem:[#allocation32_spill] sm:$0xff] %v18080_v58 }
 0x34b   : > { %v4011_v63 = vpop.f32.mrf.mxu1  ;;  %v18087_v49 = vpop.f32.mrf.mxu0 }
 0x34c   : > { %20673 = vst [vmem:[#allocation31_spill] sm:$0xff] %v18075_v11  ;;  %v18078_v7 = vadd.f32 %v4011_v63, %v17946_v15  ;;  %20678 = vst [vmem:[#allocation35_spill] sm:$0xff] %v18087_v49 }
 0x34d   : > { %v14866_v20 = vpop.f32.mrf.mxu1  ;;  %v18095_v15 = vpop.f32.mrf.mxu0 }
 0x34e   : > { %20674 = vst [vmem:[#allocation56_spill] sm:$0xff] %v18078_v7  ;;  %v18083_v18 = vadd.f32 %v14866_v20, %v17952_v30  ;;  %20681 = vst [vmem:[#allocation60_spill] sm:$0xff] %v18095_v15 }
 0x34f   : > { %v18085_v62 = vpop.f32.mrf.mxu1  ;;  %v14977_v20 = vpop.f32.mrf.mxu0 }
 0x350   : > { %20676 = vst [vmem:[#allocation18_spill] sm:$0xff] %v18083_v18  ;;  %20677 = vst [vmem:[#allocation58_spill] sm:$0xff] %v18085_v62 }
 0x351   : > { %v14869_v21 = vpop.f32.mrf.mxu1  ;;  %v4768_v62 = vpop.f32.mrf.mxu0 }
 0x352   : > { %v18090_v40 = vadd.f32 %v14869_v21, %v17960_v36 }
 0x353   : > { %v4027_v3 = vpop.f32.mrf.mxu1  ;;  %v18102_v36 = vpop.f32.mrf.mxu0 }
 0x354   : > { %20679 = vst [vmem:[#allocation59_spill] sm:$0xff] %v18090_v40  ;;  %v18093_v5 = vadd.f32 %v4027_v3, %v17965_v0 }
 0x355   : > { %v14870_v63 = vpop.f32.mrf.mxu1  ;;  %v18106_v0 = vpop.f32.mrf.mxu0 }
 0x356   : > { %20680 = vst [vmem:[#allocation33_spill] sm:$0xff] %v18093_v5  ;;  %v18098_v58 = vadd.f32 %v14870_v63, %v17971_v26 }
 0x357   : > { %v18100_v30 = vpop.f32.mrf.mxu1  ;;  %v18112_v26 = vpop.f32.mrf.mxu0 }
 0x358   : > { %20682 = vst [vmem:[#allocation34_spill] sm:$0xff] %v18098_v58  ;;  %20683 = vst [vmem:[#allocation62_spill] sm:$0xff] %v18100_v30 }
 0x359   : > { %v14933_v18 = vpop.f32.mrf.mxu1  ;;  %v18118_v5 = vpop.f32.mrf.mxu0 }
 0x35b   : > { %v4489_v7 = vpop.f32.mrf.mxu1  ;;  %v18124_v31 = vpop.f32.mrf.mxu0 }
 0x35d   : > { %v14934_v49 = vpop.f32.mrf.mxu1  ;;  %v18130_v53 = vpop.f32.mrf.mxu0 }
 0x35e   : > { %20688 = vst [vmem:[#allocation63_spill] sm:$0xff] %v18130_v53 }
 0x35f   : > { %v4492_v11 = vpop.f32.mrf.mxu1  ;;  %v18136_v51 = vpop.f32.mrf.mxu0 }
 0x361   : > { %v14937_v21 = vpop.f32.mrf.mxu1 }
 0x363   : > { %v18104_v40 = vpop.f32.mrf.mxu1 }
 0x365   : > { %v18108_v3 = vpop.f32.mrf.mxu1 }
 0x367   : > { %v18110_v15 = vpop.f32.mrf.mxu1 }
 0x369   : > { %v18114_v63 = vpop.f32.mrf.mxu1 }
 0x36b   : > { %v18116_v58 = vpop.f32.mrf.mxu1 }
 0x36d   : > { %v18120_v30 = vpop.f32.mrf.mxu1 }
 0x36e   : > { %20684 = vst [vmem:[#allocation36_spill] sm:$0xff] %v18120_v30  ;;  %v18142_v30 = vpop.f32.mrf.mxu0 }
 0x36f   : > { %v18122_v28 = vpop.f32.mrf.mxu1  ;;  %20693 = vst [vmem:[#allocation69_spill] sm:$0xff] %v18142_v30 }
 0x370   : > { %20685 = vst [vmem:[#allocation61_spill] sm:$0xff] %v18122_v28 }
 0x371   : > { %v18126_v29 = vpop.f32.mrf.mxu1 }
 0x372   : > { %20686 = vst [vmem:[#allocation37_spill] sm:$0xff] %v18126_v29  ;;  %v18148_v29 = vpop.f32.mrf.mxu0 }
 0x373   : > { %v18128_v22 = vpop.f32.mrf.mxu1  ;;  %20696 = vst [vmem:[#allocation72_spill] sm:$0xff] %v18148_v29 }
 0x374   : > { %20687 = vst [vmem:[#allocation64_spill] sm:$0xff] %v18128_v22 }
 0x375   : > { %v18132_v12 = vpop.f32.mrf.mxu1 }
 0x376   : > { %20689 = vst [vmem:[#allocation65_spill] sm:$0xff] %v18132_v12  ;;  %v18156_v12 = vpop.f32.mrf.mxu0 }
 0x377   : > { %v18134_v8 = vpop.f32.mrf.mxu1 }
 0x378   : > { %20690 = vst [vmem:[#allocation66_spill] sm:$0xff] %v18134_v8  ;;  %v3126_v8 = vadd.f32 %v17797_v17, %v17807_v41  ;;  %v3142_v17 = vadd.f32 %v17803_v35, %v17818_v13 }
 0x379   : > { %v18138_v38 = vpop.f32.mrf.mxu1 }
 0x37a   : > { %20691 = vst [vmem:[#allocation67_spill] sm:$0xff] %v18138_v38 }
 0x37b   : > { %v18140_v59 = vpop.f32.mrf.mxu1 }
 0x37c   : > { %20692 = vst [vmem:[#allocation68_spill] sm:$0xff] %v18140_v59  ;;  %v3485_v59 = vadd.f32 %v17881_v44, %v3126_v8  ;;  %v4321_v8 = vadd.f32 %v17954_v6, %v17981_v54  ;;  %v3489_v44 = vadd.f32 %v17894_v32, %v3142_v17  ;;  %v18190_v32 = vld [vmem:[#allocation6 + $0x1] ss:$0 sm:$0xff]  ;;  %v4331_v17 = vadd.f32 %v17990_v9, %v18017_v55 }
 0x37d   : > { %v18144_v28 = vpop.f32.mrf.mxu1  ;;  %v4329_v9 = vadd.f32 %v17992_v25, %v18022_v43  ;;  %v16452_v43 = vld [vmem:[#allocation4 + $0x570] sm:$0xff]  }
 0x37e   : > { %20694 = vst [vmem:[#allocation70_spill] sm:$0xff] %v18144_v28  ;;  %v18163_v28 = vpop.f32.mrf.mxu0  ;;  %v3764_v29 = vadd.f32 %v17866_v34, %v3485_v59  ;;  %v4600_v34 = vadd.f32 %v4489_v7, %v4321_v8 }
 0x37f   : > { %v18146_v1 = vpop.f32.mrf.mxu1 }
 0x380   : > { %20695 = vst [vmem:[#allocation71_spill] sm:$0xff] %v18146_v1 }
 0x381   : > { %v18150_v22 = vpop.f32.mrf.mxu1 }
 0x382   : > { %20697 = vst [vmem:[#allocation73_spill] sm:$0xff] %v18150_v22 }
 0x383   : > { %v18152_v53 = vpop.f32.mrf.mxu1 }
 0x384   : > { %20698 = vst [vmem:[#allocation74_spill] sm:$0xff] %v18152_v53  ;;  %v4323_v53 = vadd.f32 %v17950_v42, %v17976_v46  ;;  %v4324_v42 = vadd.f32 %v17957_v60, %v17986_v48  ;;  %v3158_v60 = vadd.f32 %v17814_v2, %v17829_v37 }
 0x385   : > { %v18158_v38 = vpop.f32.mrf.mxu1 }
 0x386   : > { %20699 = vst [vmem:[#allocation75_spill] sm:$0xff] %v18158_v38  ;;  %v4043_v38 = vadd.f32 %v17988_v19, %v3764_v29  ;;  %v4602_v22 = vadd.f32 %v14933_v18, %v4323_v53  ;;  %v4603_v35 = vadd.f32 %v14934_v49, %v4324_v42  ;;  %v3768_v53 = vadd.f32 %v17876_v56, %v3489_v44 }
 0x387   : > { %v18161_v30 = vpop.f32.mrf.mxu1  ;;  %v4327_v18 = vadd.f32 %v17969_v33, %v17995_v24  ;;  %v4879_v29 = vadd.f32 %v4768_v62, %v4600_v34  ;;  %v4328_v24 = vadd.f32 %v17978_v10, %v18005_v23 }
 0x388   : > { %20700 = vst [vmem:[#allocation76_spill] sm:$0xff] %v18161_v30  ;;  %v18178_v30 = vpop.f32.mrf.mxu0  ;;  %v4322_v13 = vadd.f32 %v17962_v45, %v4043_v38  ;;  %v4881_v19 = vadd.f32 %v14977_v20, %v4602_v22  ;;  %v4047_v48 = vadd.f32 %v18009_v4, %v3768_v53  ;;  %v4325_v45 = vadd.f32 %v17973_v14, %v18000_v27 }
 0x389   : > { %v18165_v1 = vpop.f32.mrf.mxu1  ;;  %v4606_v38 = vadd.f32 %v14937_v21, %v4327_v18  ;;  %v3493_v20 = vadd.f32 %v17909_v16, %v3158_v60  ;;  %v4607_v62 = vadd.f32 %v18108_v3, %v4328_v24  ;;  %v20704_v18 = vld [vmem:[#allocation63_spill] sm:$0xff] }
 0x38a   : > { %20701 = vst [vmem:[#allocation77_spill] sm:$0xff] %v18165_v1  ;;  %v18188_v59 = vpop.f32.mrf.mxu0  ;;  %v4601_v54 = vadd.f32 %v4492_v11, %v4322_v13  ;;  %v4882_v11 = vadd.f32 %v18102_v36, %v4603_v35  ;;  %v4604_v33 = vadd.f32 %v18104_v40, %v4325_v45  ;;  %v4326_v36 = vadd.f32 %v17983_v52, %v4047_v48 }
 0x38b   : > { %v18172_v41 = vpop.f32.mrf.mxu1  ;;  %v4885_v23 = vadd.f32 %v18112_v26, %v4606_v38  ;;  %v3772_v10 = vadd.f32 %v17889_v50, %v3493_v20  ;;  %v3174_v26 = vadd.f32 %v17825_v39, %v17840_v61  ;;  %v4886_v35 = vadd.f32 %v18124_v31, %v4607_v62  ;;  %v20702_v39 = vld [vmem:[#allocation24_spill] sm:$0xff]  ;;  %v20703_v61 = vld [vmem:[#allocation25_spill] sm:$0xff] }
 0x38c   : > { %v18205_v2 = vpop.f32.mrf.mxu0  ;;  %v4880_v27 = vadd.f32 %v18106_v0, %v4601_v54  ;;  %v4883_v0 = vadd.f32 %v18118_v5, %v4604_v33  ;;  %v4605_v3 = vadd.f32 %v18110_v15, %v4326_v36  ;;  %v4610_v5 = vadd.f32 %v18114_v63, %v4331_v17  ;;  %v20710_v33 = vld [vmem:[#allocation21_spill] sm:$0xff] }
 0x38d   : > { %v18180_v1 = vpop.f32.mrf.mxu1  ;;  %v4051_v50 = vadd.f32 %v18029_v47, %v3772_v10  ;;  %v3497_v53 = vadd.f32 %v17922_v57, %v3174_v26  ;;  %v4332_v47 = vadd.f32 %v20703_v61, %v20702_v39  ;;  %v20706_v57 = vld [vmem:[#allocation44_spill] sm:$0xff]  ;;  %v20718_v26 = vld [vmem:[#allocation11_spill] sm:$0xff] }
 0x38e   : > { %v18216_v8 = vpop.f32.mrf.mxu0  ;;  %v4889_v38 = vadd.f32 %v18136_v51, %v4610_v5 }
 0x38f   : > { %v18184_v46 = vpop.f32.mrf.mxu1  ;;  %v3776_v24 = vadd.f32 %v20710_v33, %v3497_v53 }
 0x390   : > { %v18235_v54 = vpop.f32.mrf.mxu0 }
 0x391   : > { %v15021_v6 = vpop.f32.mrf.mxu1 }
 0x392   : > { %v5160_v7 = vadd.f32 %v15021_v6, %v4881_v19  ;;  %v4608_v6 = vadd.f32 %v18116_v58, %v4329_v9  ;;  %v4330_v58 = vadd.f32 %v20706_v57, %v4051_v50 }
 0x393   : > { %v5047_v56 = vpop.f32.mrf.mxu1 }
 0x394   : > { %v5196_v49 = vadd.f32 %v18190_v32, %v5160_v7  ;;  %v5158_v22 = vadd.f32 %v5047_v56, %v4879_v29  ;;  %v4884_v7 = vadd.f32 %v20704_v18, %v4605_v3  ;;  %v20705_v29 = vld [vmem:[#allocation36_spill] sm:$0xff]  ;;  %v20716_v3 = vld [vmem:[#allocation37_spill] sm:$0xff]  ;;  %v20723_v18 = vld [vmem:[#allocation15_spill] sm:$0xff] }
 0x395   : > { %v15022_v37 = vpop.f32.mrf.mxu1  ;;  %v4611_v60 = vadd.f32 %v20705_v29, %v4332_v47  ;;  %v20721_v47 = vld [vmem:[#allocation64_spill] sm:$0xff] }
 0x396   : > { %5224 = vst [vmem:[#allocation3 + $0x10] sm:$0xff] %v5196_v49  ;;  %v5194_v4 = vadd.f32 %v18190_v32, %v5158_v22  ;;  %v5161_v14 = vadd.f32 %v15022_v37, %v4882_v11  ;;  %v20708_v22 = vld [vmem:[#allocation13_spill] sm:$0xff]  ;;  %v20709_v11 = vld [vmem:[#allocation39_spill] sm:$0xff]  ;;  %v20711_v37 = vld [vmem:[#allocation26_spill] sm:$0xff] }
 0x397   : > { %v5050_v21 = vpop.f32.mrf.mxu1  ;;  %v3190_v20 = vadd.f32 %v20709_v11, %v20708_v22 }
 0x398   : > { %5222 = vst [vmem:[#allocation3] sm:$0xff] %v5194_v4  ;;  %v5197_v40 = vadd.f32 %v18190_v32, %v5161_v14  ;;  %v5159_v16 = vadd.f32 %v5050_v21, %v4880_v27  ;;  %v18250_v27 = vpop.f32.mrf.mxu0  ;;  %v20713_v21 = vld [vmem:[#allocation69_spill] sm:$0xff] }
 0x399   : > { %v15025_v44 = vpop.f32.mrf.mxu1  ;;  %v4887_v36 = vadd.f32 %v20713_v21, %v4608_v6  ;;  %v20728_v21 = vld [vmem:[#allocation22_spill] sm:$0xff] }
 0x39a   : > { %5225 = vst [vmem:[#allocation3 + $0x18] sm:$0xff] %v5197_v40  ;;  %v5195_v52 = vadd.f32 %v18190_v32, %v5159_v16  ;;  %v5164_v34 = vadd.f32 %v15025_v44, %v4885_v23  ;;  %v18221_v42 = vpack.c.bf16 %v5197_v40, %v5196_v49  ;;  %v20707_v49 = vld [vmem:[#allocation48_spill] sm:$0xff]  ;;  %v16454_v40 = vld [vmem:[#allocation4 + $0x568] sm:$0xff]   ;;  %v20714_v16 = vld [vmem:[#allocation61_spill] sm:$0xff]  ;;  %v18269_v29 = vpop.f32.mrf.mxu0 }
 0x39b   : > { %v5063_v55 = vpop.f32.mrf.mxu1  ;;  %v4609_v23 = vadd.f32 %v20714_v16, %v4330_v58  ;;  %v20715_v44 = vld [vmem:[#allocation53_spill] sm:$0xff]  ;;  %v20729_v16 = vld [vmem:[#allocation28_spill] sm:$0xff] }
 0x39c   : > { %5223 = vst [vmem:[#allocation3 + $0x8] sm:$0xff] %v5195_v52  ;;  %v5200_v15 = vadd.f32 %v18190_v32, %v5164_v34  ;;  %v5162_v13 = vadd.f32 %v5063_v55, %v4883_v0  ;;  %v5278_v19 = vpack.c.bf16 %v5195_v52, %v5194_v4  ;;  %v20712_v4 = vld [vmem:[#allocation47_spill] sm:$0xff]  ;;  %v4055_v0 = vadd.f32 %v20715_v44, %v3776_v24  ;;  %v20719_v55 = vld [vmem:[#allocation72_spill] sm:$0xff] }
 0x39d   : > { %v15026_v25 = vpop.f32.mrf.mxu1  ;;  %v4335_v14 = vadd.f32 %v20712_v4, %v20711_v37  ;;  %v20717_v34 = vld [vmem:[#allocation51_spill] sm:$0xff]  ;;  %v20726_v4 = vld [vmem:[#allocation20_spill] sm:$0xff] }
 0x39e   : > { %5228 = vst [vmem:[#allocation3 + $0x30] sm:$0xff] %v5200_v15  ;;  %v5198_v31 = vadd.f32 %v18190_v32, %v5162_v13  ;;  %v5165_v63 = vadd.f32 %v15026_v25, %v4886_v35  ;;  %15107 = vmatprep.mubr.bf16.mxu1 %v5278_v19  ;;  %v4333_v50 = vadd.f32 %v20718_v26, %v20717_v34  ;;  %v20732_v26 = vld [vmem:[#allocation29_spill] sm:$0xff] }
 0x39f   : > { %v5066_v48 = vpop.f32.mrf.mxu1  ;;  %15108 = vmatmul.mubr.bf16.vlgmr.msra.gmra.mxu1 %v18221_v42  ;;  %v4614_v52 = vadd.f32 %v20716_v3, %v4335_v14  ;;  %v4890_v35 = vadd.f32 %v20719_v55, %v4611_v60  ;;  %v20727_v14 = vld [vmem:[#allocation10_spill] sm:$0xff] }
 0x3a0   : > { %5226 = vst [vmem:[#allocation3 + $0x20] sm:$0xff] %v5198_v31  ;;  %v5201_v45 = vadd.f32 %v18190_v32, %v5165_v63  ;;  %v5163_v56 = vadd.f32 %v5066_v48, %v4884_v7  ;;  %15180 = vmatpush3.bf16.msra.mxu1 %v20707_v49  ;;  %v4612_v25 = vadd.f32 %v20721_v47, %v4333_v50  ;;  %v20722_v63 = vld [vmem:[#allocation50_spill] sm:$0xff] }
 0x3a1   : > { %v15029_v62 = vpop.f32.mrf.mxu1  ;;  %15181 = vmatprep.subr.bf16.mxu1 %v16452_v43  ;;  %v4336_v7 = vadd.f32 %v20723_v18, %v20722_v63  ;;  %v16455_v48 = vld [vmem:[#allocation4 + $0x560] sm:$0xff]   ;;  %v5311_v22 = vld [vmem:[#allocation3 + $0x11] sm:$0xff]  ;;  %v4893_v24 = vadd.f32 %v18163_v28, %v4614_v52 }
 0x3a2   : > { %5229 = vst [vmem:[#allocation3 + $0x38] sm:$0xff] %v5201_v45  ;;  %v5199_v51 = vadd.f32 %v18190_v32, %v5163_v56  ;;  %v5168_v10 = vadd.f32 %v15029_v62, %v4889_v38  ;;  %v18255_v17 = vpack.c.bf16 %v5201_v45, %v5200_v15  ;;  %v20720_v15 = vld [vmem:[#allocation40_spill] sm:$0xff]  ;;  %v20725_v56 = vld [vmem:[#allocation46_spill] sm:$0xff]  ;;  %v3206_v62 = vadd.f32 %v20727_v14, %v20726_v4 }
 0x3a3   : > { %v5079_v9 = vpop.f32.mrf.mxu1  ;;  %v5309_v5 = vld [vmem:[#allocation3 + $0x1] sm:$0xff]  ;;  %v5310_v13 = vld [vmem:[#allocation3 + $0x9] sm:$0xff]  ;;  %v3501_v61 = vadd.f32 %v20720_v15, %v3190_v20  ;;  %v4334_v38 = vadd.f32 %v20725_v56, %v4055_v0  ;;  %v4891_v0 = vadd.f32 %v18178_v30, %v4612_v25  ;;  %v20736_v30 = vld [vmem:[#allocation23_spill] sm:$0xff] }
 0x3a4   : > { %5227 = vst [vmem:[#allocation3 + $0x28] sm:$0xff] %v5199_v51  ;;  %v5204_v19 = vadd.f32 %v18190_v32, %v5168_v10  ;;  %v5166_v53 = vadd.f32 %v5079_v9, %v4887_v36  ;;  %v5337_v6 = vpack.c.bf16 %v5310_v13, %v5309_v5  ;;  %v18263_v39 = vpack.c.bf16 %v5199_v51, %v5198_v31  ;;  %v18286_v10 = vpop.f32.mrf.mxu0  ;;  %v20731_v3 = vld [vmem:[#allocation66_spill] sm:$0xff]  ;;  %v20733_v9 = vld [vmem:[#allocation67_spill] sm:$0xff] }
 0x3a5   : > { %15182 = vmatpush3.bf16.msra.mxu1 %v16452_v43  ;;  %v15030_v60 = vpop.f32.mrf.mxu1  ;;  %v4888_v31 = vadd.f32 %v18156_v12, %v4609_v23  ;;  %v20724_v43 = vld [vmem:[#allocation65_spill] sm:$0xff]  ;;  %v16448_v12 = vld [vmem:[#allocation4 + $0x530] sm:$0xff]   ;;  %v3780_v36 = vadd.f32 %v20728_v21, %v3501_v61  ;;  %v4613_v28 = vadd.f32 %v20731_v3, %v4334_v38  ;;  %v16449_v18 = vld [vmem:[#allocation4 + $0x528] sm:$0xff]  }
 0x3a6   : > { %15183 = vmatprep.subr.bf16.mxu1 %v16454_v40  ;;  %5232 = vst [vmem:[#allocation3 + $0x50] sm:$0xff] %v5204_v19  ;;  %v5202_v57 = vadd.f32 %v18190_v32, %v5166_v53  ;;  %v5169_v58 = vadd.f32 %v15030_v60, %v4890_v35  ;;  %15063 = vmatprep.mubr.bf16.mxu0 %v5337_v6  ;;  %v20730_v23 = vld [vmem:[#allocation49_spill] sm:$0xff]  ;;  %v20734_v35 = vld [vmem:[#allocation12_spill] sm:$0xff]  ;;  %v20735_v5 = vld [vmem:[#allocation19_spill] sm:$0xff] }
 0x3a7   : > { %15111 = vmatprep.mubr.bf16.mxu1 %v18263_v39  ;;  %v4615_v45 = vadd.f32 %v20724_v43, %v4336_v7  ;;  %v5082_v49 = vpop.f32.mrf.mxu1  ;;  %v5312_v11 = vld [vmem:[#allocation3 + $0x19] sm:$0xff]  ;;  %v4339_v51 = vadd.f32 %v20730_v23, %v20729_v16  ;;  %v4059_v50 = vadd.f32 %v20732_v26, %v3780_v36  ;;  %v4337_v13 = vadd.f32 %v20735_v5, %v20734_v35  ;;  %v20737_v60 = vld [vmem:[#allocation41_spill] sm:$0xff]  ;;  %v20739_v43 = vld [vmem:[#allocation42_spill] sm:$0xff] }
 0x3a8   : > { %15112 = vmatmul.mubr.bf16.gmra.mxu1 %v18255_v17  ;;  %5230 = vst [vmem:[#allocation3 + $0x40] sm:$0xff] %v5202_v57  ;;  %v5205_v20 = vadd.f32 %v18190_v32, %v5169_v58  ;;  %v5167_v33 = vadd.f32 %v5082_v49, %v4888_v31  ;;  %v18279_v37 = vpack.c.bf16 %v5312_v11, %v5311_v22  ;;  %v16457_v7 = vld [vmem:[#allocation4 + $0x558] sm:$0xff]   ;;  %v20738_v58 = vld [vmem:[#allocation38_spill] sm:$0xff]  ;;  %v20742_v49 = vld [vmem:[#allocation27_spill] sm:$0xff]  ;;  %v18311_v11 = vpop.f32.mrf.mxu0 }
 0x3a9   : > { %15184 = vmatpush3.bf16.msra.mxu1 %v16454_v40  ;;  %v15033_v44 = vpop.f32.mrf.mxu1  ;;  %v4618_v55 = vadd.f32 %v20733_v9, %v4339_v51  ;;  %v4894_v6 = vadd.f32 %v18188_v59, %v4615_v45  ;;  %v3222_v31 = vadd.f32 %v20738_v58, %v20737_v60  ;;  %v3505_v56 = vadd.f32 %v20739_v43, %v3206_v62  ;;  %v20740_v38 = vld [vmem:[#allocation68_spill] sm:$0xff]  ;;  %v20741_v45 = vld [vmem:[#allocation54_spill] sm:$0xff] }
 0x3aa   : > { %15185 = vmatprep.subr.bf16.mxu1 %v16455_v48  ;;  %5233 = vst [vmem:[#allocation3 + $0x58] sm:$0xff] %v5205_v20  ;;  %v5203_v52 = vadd.f32 %v18190_v32, %v5167_v33  ;;  %v5172_v40 = vadd.f32 %v15033_v44, %v4893_v24  ;;  %15064 = vmatmul.mubr.bf16.vlgmr.msra.gmra.mxu0 %v18279_v37  ;;  %v16458_v4 = vld [vmem:[#allocation4 + $0x550] sm:$0xff]   ;;  %v20743_v14 = vld [vmem:[#allocation70_spill] sm:$0xff] }
 0x3ab   : > { %v18292_v34 = vpack.c.bf16 %v5205_v20, %v5204_v19  ;;  %v5095_v53 = vpop.f32.mrf.mxu1  ;;  %15136 = vmatpush3.bf16.msra.mxu0 %v20736_v30  ;;  %v5313_v15 = vld [vmem:[#allocation3 + $0x21] sm:$0xff]  ;;  %v5314_v61 = vld [vmem:[#allocation3 + $0x29] sm:$0xff]  ;;  %v4616_v59 = vadd.f32 %v20740_v38, %v4337_v13  ;;  %v4340_v22 = vadd.f32 %v20742_v49, %v20741_v45  ;;  %v4892_v24 = vadd.f32 %v18205_v2, %v4613_v28  ;;  %v5315_v51 = vld [vmem:[#allocation3 + $0x31] sm:$0xff] }
 0x3ac   : > { %5231 = vst [vmem:[#allocation3 + $0x48] sm:$0xff] %v5203_v52  ;;  %v5208_v47 = vadd.f32 %v18190_v32, %v5172_v40  ;;  %v5170_v25 = vadd.f32 %v5095_v53, %v4891_v0  ;;  %v18301_v19 = vpack.c.bf16 %v5314_v61, %v5313_v15  ;;  %15137 = vmatprep.subr.bf16.mxu0 %v16448_v12  ;;  %v20744_v21 = vld [vmem:[#allocation16_spill] sm:$0xff]  ;;  %v16450_v3 = vld [vmem:[#allocation4 + $0x520] sm:$0xff]   ;;  %v20745_v28 = vld [vmem:[#allocation43_spill] sm:$0xff] }
 0x3ad   : > { %v18303_v63 = vpack.c.bf16 %v5203_v52, %v5202_v57  ;;  %v15034_v20 = vpop.f32.mrf.mxu1  ;;  %15186 = vmatpush3.bf16.msra.mxu1 %v16455_v48  ;;  %v4619_v62 = vadd.f32 %v20743_v14, %v4340_v22  ;;  %v4338_v36 = vadd.f32 %v20744_v21, %v4059_v50  ;;  %v4897_v23 = vadd.f32 %v18216_v8, %v4618_v55  ;;  %v20746_v40 = vld [vmem:[#allocation71_spill] sm:$0xff]  ;;  %v20748_v8 = vld [vmem:[#allocation30_spill] sm:$0xff]  ;;  %v18328_v55 = vpop.f32.mrf.mxu0  ;;  %v20750_v15 = vld [vmem:[#allocation73_spill] sm:$0xff] }
 0x3ae   : > { %5236 = vst [vmem:[#allocation3 + $0x70] sm:$0xff] %v5208_v47  ;;  %v5206_v57 = vadd.f32 %v18190_v32, %v5170_v25  ;;  %v5173_v33 = vadd.f32 %v15034_v20, %v4894_v6  ;;  %15067 = vmatprep.mubr.bf16.mxu0 %v18301_v19  ;;  %15187 = vmatprep.subr.bf16.mxu1 %v16457_v7  ;;  %v20747_v50 = vld [vmem:[#allocation31_spill] sm:$0xff]  ;;  %v20749_v30 = vld [vmem:[#allocation58_spill] sm:$0xff]  ;;  %v20751_v25 = vld [vmem:[#allocation56_spill] sm:$0xff] }
 0x3af   : > { %15115 = vmatprep.mubr.bf16.mxu1 %v18303_v63  ;;  %v5098_v16 = vpop.f32.mrf.mxu1  ;;  %v5316_v48 = vld [vmem:[#allocation3 + $0x39] sm:$0xff]  ;;  %15138 = vmatpush3.bf16.msra.mxu0 %v16448_v12  ;;  %v3784_v52 = vadd.f32 %v20745_v28, %v3505_v56  ;;  %v4617_v26 = vadd.f32 %v20746_v40, %v4338_v36  ;;  %v4343_v9 = vadd.f32 %v20748_v8, %v20747_v50  ;;  %v16460_v22 = vld [vmem:[#allocation4 + $0x548] sm:$0xff]   ;;  %v20753_v20 = vld [vmem:[#allocation45_spill] sm:$0xff]  ;;  %v18347_v21 = vpop.f32.mrf.mxu0 }
 0x3b0   : > { %15116 = vmatmul.mubr.bf16.gmra.mxu1 %v18292_v34  ;;  %5234 = vst [vmem:[#allocation3 + $0x60] sm:$0xff] %v5206_v57  ;;  %v5209_v44 = vadd.f32 %v18190_v32, %v5173_v33  ;;  %v5171_v0 = vadd.f32 %v5098_v16, %v4892_v24  ;;  %v18322_v2 = vpack.c.bf16 %v5316_v48, %v5315_v51  ;;  %v20752_v60 = vld [vmem:[#allocation52_spill] sm:$0xff]  ;;  %v20754_v24 = vld [vmem:[#allocation74_spill] sm:$0xff]  ;;  %v20757_v51 = vld [vmem:[#allocation75_spill] sm:$0xff] }
 0x3b1   : > { %15139 = vmatprep.subr.bf16.mxu0 %v16449_v18  ;;  %v15037_v12 = vpop.f32.mrf.mxu1  ;;  %v4895_v35 = vadd.f32 %v18235_v54, %v4616_v59  ;;  %15188 = vmatpush3.bf16.msra.mxu1 %v16457_v7  ;;  %v4063_v6 = vadd.f32 %v20749_v30, %v3784_v52  ;;  %v4622_v61 = vadd.f32 %v20750_v15, %v4343_v9  ;;  %v16453_v49 = vld [vmem:[#allocation4 + $0x518] sm:$0xff]   ;;  %v15001_v28 = vpop.f32.mrf.mxu0  ;;  %v16456_v9 = vld [vmem:[#allocation4 + $0x510] sm:$0xff]  }
 0x3b2   : > { %5237 = vst [vmem:[#allocation3 + $0x78] sm:$0xff] %v5209_v44  ;;  %v5207_v5 = vadd.f32 %v18190_v32, %v5171_v0  ;;  %v5176_v13 = vadd.f32 %v15037_v12, %v4897_v23  ;;  %15068 = vmatmul.mubr.bf16.gmra.mxu0 %v18322_v2  ;;  %v18333_v53 = vpack.c.bf16 %v5209_v44, %v5208_v47  ;;  %v20758_v44 = vld [vmem:[#allocation17_spill] sm:$0xff]  ;;  %v20759_v12 = vld [vmem:[#allocation14_spill] sm:$0xff]  ;;  %v20761_v30 = vld [vmem:[#allocation59_spill] sm:$0xff] }
 0x3b3   : > { %15189 = vmatprep.subr.bf16.mxu1 %v16458_v4  ;;  %v4341_v58 = vadd.f32 %v20752_v60, %v20751_v25  ;;  %v5111_v43 = vpop.f32.mrf.mxu1  ;;  %v4898_v54 = vadd.f32 %v18250_v27, %v4619_v62  ;;  %v5317_v7 = vld [vmem:[#allocation3 + $0x41] sm:$0xff]  ;;  %v5318_v56 = vld [vmem:[#allocation3 + $0x49] sm:$0xff]  ;;  %15140 = vmatpush3.bf16.msra.mxu0 %v16449_v18  ;;  %v3509_v33 = vadd.f32 %v20753_v20, %v3222_v31  ;;  %v20756_v62 = vld [vmem:[#allocation55_spill] sm:$0xff] }
 0x3b4   : > { %5235 = vst [vmem:[#allocation3 + $0x68] sm:$0xff] %v5207_v5  ;;  %v5212_v38 = vadd.f32 %v18190_v32, %v5176_v13  ;;  %v5174_v59 = vadd.f32 %v5111_v43, %v4895_v35  ;;  %v18341_v47 = vpack.c.bf16 %v5318_v56, %v5317_v7  ;;  %v18343_v45 = vpack.c.bf16 %v5207_v5, %v5206_v57  ;;  %v20755_v27 = vld [vmem:[#allocation18_spill] sm:$0xff]  ;;  %v20760_v5 = vld [vmem:[#allocation76_spill] sm:$0xff]  ;;  %v20765_v56 = vld [vmem:[#allocation33_spill] sm:$0xff] }
 0x3b5   : > { %15141 = vmatprep.subr.bf16.mxu0 %v16450_v3  ;;  %v4620_v14 = vadd.f32 %v20754_v24, %v4341_v58  ;;  %v4344_v18 = vadd.f32 %v20756_v62, %v20755_v27  ;;  %v15038_v36 = vpop.f32.mrf.mxu1  ;;  %15190 = vmatpush3.bf16.msra.mxu1 %v16458_v4  ;;  %v4896_v57 = vadd.f32 %v18269_v29, %v4617_v26  ;;  %v16462_v31 = vld [vmem:[#allocation4 + $0x540] sm:$0xff]   ;;  %v5319_v4 = vld [vmem:[#allocation3 + $0x51] sm:$0xff] }
 0x3b6   : > { %5240 = vst [vmem:[#allocation3 + $0x90] sm:$0xff] %v5212_v38  ;;  %v5210_v16 = vadd.f32 %v18190_v32, %v5174_v59  ;;  %v5177_v23 = vadd.f32 %v15038_v36, %v4898_v54  ;;  %15071 = vmatprep.mubr.bf16.mxu0 %v18341_v47  ;;  %15119 = vmatprep.mubr.bf16.mxu1 %v18343_v45  ;;  %v20763_v58 = vld [vmem:[#allocation62_spill] sm:$0xff]  ;;  %v20764_v54 = vld [vmem:[#allocation77_spill] sm:$0xff]  ;;  %v20766_v59 = vld [vmem:[#allocation32_spill] sm:$0xff] }
 0x3b7   : > { %v4623_v48 = vadd.f32 %v20757_v51, %v4344_v18  ;;  %v4342_v0 = vadd.f32 %v20758_v44, %v4063_v6  ;;  %v5114_v52 = vpop.f32.mrf.mxu1  ;;  %v4901_v40 = vadd.f32 %v18286_v10, %v4622_v61  ;;  %v5320_v50 = vld [vmem:[#allocation3 + $0x59] sm:$0xff]  ;;  %15142 = vmatpush3.bf16.msra.mxu0 %v16450_v3  ;;  %15191 = vmatprep.subr.bf16.mxu1 %v16460_v22  ;;  %v20762_v10 = vld [vmem:[#allocation57_spill] sm:$0xff]  ;;  %v16459_v36 = vld [vmem:[#allocation4 + $0x508] sm:$0xff]  }
 0x3b8   : > { %15120 = vmatmul.mubr.bf16.gmra.mxu1 %v18333_v53  ;;  %5238 = vst [vmem:[#allocation3 + $0x80] sm:$0xff] %v5210_v16  ;;  %v5213_v8 = vadd.f32 %v18190_v32, %v5177_v23  ;;  %v5175_v29 = vadd.f32 %v5114_v52, %v4896_v57  ;;  %v18360_v26 = vpack.c.bf16 %v5320_v50, %v5319_v4  ;;  %v18381_v23 = vld [vmem:[#allocation4 + $0x5f8] sm:$0xff]   ;;  %v20767_v51 = vld [vmem:[#allocation34_spill] sm:$0xff]  ;;  %v20768_v44 = vld [vmem:[#allocation35_spill] sm:$0xff] }
 0x3b9   : > { %15143 = vmatprep.subr.bf16.mxu0 %v16453_v49  ;;  %v3788_v35 = vadd.f32 %v20759_v12, %v3509_v33  ;;  %v4621_v13 = vadd.f32 %v20760_v5, %v4342_v0  ;;  %v4347_v6 = vadd.f32 %v20762_v10, %v20761_v30  ;;  %v15041_v15 = vpop.f32.mrf.mxu1  ;;  %v4899_v61 = vadd.f32 %v18311_v11, %v4620_v14  ;;  %v4864_v33 = vpop.f32.mrf.mxu0  ;;  %v20769_v4 = vld [vmem:[#allocation60_spill] sm:$0xff] }
 0x3ba   : > { %15192 = vmatpush3.bf16.msra.mxu1 %v16460_v22  ;;  %5241 = vst [vmem:[#allocation3 + $0x98] sm:$0xff] %v5213_v8  ;;  %v5211_v3 = vadd.f32 %v18190_v32, %v5175_v29  ;;  %v5180_v25 = vadd.f32 %v15041_v15, %v4901_v40  ;;  %15072 = vmatmul.mubr.bf16.gmra.mxu0 %v18360_v26  ;;  %v5323_v29 = vld [vmem:[#allocation3 + $0x71] sm:$0xff] }
 0x3bb   : > { %v18369_v60 = vpack.c.bf16 %v5213_v8, %v5212_v38  ;;  %15193 = vmatprep.subr.bf16.mxu1 %v16462_v31  ;;  %v4067_v43 = vadd.f32 %v20763_v58, %v3788_v35  ;;  %v4626_v7 = vadd.f32 %v20764_v54, %v4347_v6  ;;  %v4345_v20 = vadd.f32 %v20766_v59, %v20765_v56  ;;  %v5127_v24 = vpop.f32.mrf.mxu1  ;;  %v5321_v22 = vld [vmem:[#allocation3 + $0x61] sm:$0xff]  ;;  %v5322_v14 = vld [vmem:[#allocation3 + $0x69] sm:$0xff]  ;;  %v15002_v50 = vpop.f32.mrf.mxu0 }
 0x3bc   : > { %v4902_v11 = vadd.f32 %v18328_v55, %v4623_v48  ;;  %15144 = vmatpush3.bf16.msra.mxu0 %v16453_v49  ;;  %5239 = vst [vmem:[#allocation3 + $0x88] sm:$0xff] %v5211_v3  ;;  %v5216_v27 = vadd.f32 %v18190_v32, %v5180_v25  ;;  %v5178_v38 = vadd.f32 %v5127_v24, %v4899_v61 }
 0x3bd   : > { %v18377_v62 = vpack.c.bf16 %v5322_v14, %v5321_v22  ;;  %v18379_v18 = vpack.c.bf16 %v5211_v3, %v5210_v16  ;;  %15145 = vmatprep.subr.bf16.mxu0 %v16456_v9  ;;  %v4624_v57 = vadd.f32 %v18172_v41, %v4345_v20  ;;  %v4348_v55 = vadd.f32 %v20768_v44, %v20767_v51  ;;  %v15042_v48 = vpop.f32.mrf.mxu1  ;;  %v4867_v15 = vpop.f32.mrf.mxu0 }
 0x3be   : > { %15194 = vmatpush3.bf16.msra.mxu1 %v16462_v31  ;;  %5244 = vst [vmem:[#allocation3 + $0xb0] sm:$0xff] %v5216_v27  ;;  %v5214_v49 = vadd.f32 %v18190_v32, %v5178_v38  ;;  %v5181_v0 = vadd.f32 %v15042_v48, %v4902_v11  ;;  %v4900_v16 = vadd.f32 %v18347_v21, %v4621_v13  ;;  %v16461_v21 = vld [vmem:[#allocation4 + $0x500] sm:$0xff]  }
 0x3bf   : > { %15075 = vmatprep.mubr.bf16.mxu0 %v18377_v62  ;;  %15123 = vmatprep.mubr.bf16.mxu1 %v18379_v18  ;;  %v4905_v52 = vadd.f32 %v15001_v28, %v4626_v7  ;;  %v4627_v40 = vadd.f32 %v18180_v1, %v4348_v55  ;;  %v4346_v41 = vadd.f32 %v20769_v4, %v4067_v43  ;;  %v5130_v8 = vpop.f32.mrf.mxu1  ;;  %v5324_v12 = vld [vmem:[#allocation3 + $0x79] sm:$0xff] }
 0x3c0   : > { %15124 = vmatmul.mubr.bf16.gmra.mxu1 %v18369_v60  ;;  %15146 = vmatpush3.bf16.msra.mxu0 %v16456_v9  ;;  %5242 = vst [vmem:[#allocation3 + $0xa0] sm:$0xff] %v5214_v49  ;;  %v5217_v31 = vadd.f32 %v18190_v32, %v5181_v0  ;;  %v5179_v35 = vadd.f32 %v5130_v8, %v4900_v16  ;;  %v18407_v7 = vld [vmem:[#allocation4 + $0x5b8] sm:$0xff]  }
 0x3c1   : > { %v18394_v5 = vpack.c.bf16 %v5324_v12, %v5323_v29  ;;  %15147 = vmatprep.subr.bf16.mxu0 %v16459_v36  ;;  %15267 = vmatprep.subr.bf16.mxu1 %v18381_v23  ;;  %v4903_v1 = vadd.f32 %v4864_v33, %v4624_v57  ;;  %v15045_v28 = vpop.f32.mrf.mxu1  ;;  %v4625_v13 = vadd.f32 %v18184_v46, %v4346_v41  ;;  %v5327_v11 = vld [vmem:[#allocation3 + $0x91] sm:$0xff]  ;;  %v5753_v8 = vld [vmem:[#allocation3 + $0x2] sm:$0xff] }
 0x3c2   : > { %5245 = vst [vmem:[#allocation3 + $0xb8] sm:$0xff] %v5217_v31  ;;  %v5215_v30 = vadd.f32 %v18190_v32, %v5179_v35  ;;  %v5184_v10 = vadd.f32 %v15045_v28, %v4905_v52  ;;  %v18400_v9 = vpack.c.bf16 %v5217_v31, %v5216_v27  ;;  %v4906_v6 = vadd.f32 %v15002_v50, %v4627_v40  ;;  %v16468_v50 = vld [vmem:[#allocation4 + $0x5f0] sm:$0xff]   ;;  %v5754_v29 = vld [vmem:[#allocation3 + $0xa] sm:$0xff] }
 0x3c3   : > { %15076 = vmatmul.mubr.bf16.gmra.mxu0 %v18394_v5  ;;  %v5143_v61 = vpop.f32.mrf.mxu1  ;;  %v5325_v3 = vld [vmem:[#allocation3 + $0x81] sm:$0xff]  ;;  %v5326_v25 = vld [vmem:[#allocation3 + $0x89] sm:$0xff]  ;;  %v4904_v59 = vadd.f32 %v4867_v15, %v4625_v13  ;;  %v5755_v13 = vld [vmem:[#allocation3 + $0x12] sm:$0xff] }
 0x3c4   : > { %15148 = vmatpush3.bf16.msra.mxu0 %v16459_v36  ;;  %5243 = vst [vmem:[#allocation3 + $0xa8] sm:$0xff] %v5215_v30  ;;  %v5220_v58 = vadd.f32 %v18190_v32, %v5184_v10  ;;  %v5182_v43 = vadd.f32 %v5143_v61, %v4903_v1  ;;  %v18403_v54 = vpack.c.bf16 %v5326_v25, %v5325_v3  ;;  %v16470_v31 = vld [vmem:[#allocation4 + $0x5e8] sm:$0xff]   ;;  %v5756_v35 = vld [vmem:[#allocation3 + $0x1a] sm:$0xff]  ;;  %v5757_v1 = vld [vmem:[#allocation3 + $0x22] sm:$0xff] }
 0x3c5   : > { %v18405_v46 = vpack.c.bf16 %v5215_v30, %v5214_v49  ;;  %15149 = vmatprep.subr.bf16.mxu0 %v16461_v21  ;;  %v15046_v56 = vpop.f32.mrf.mxu1  ;;  %v5758_v28 = vld [vmem:[#allocation3 + $0x2a] sm:$0xff]  ;;  %v16473_v30 = vld [vmem:[#allocation4 + $0x5d8] sm:$0xff]   ;;  %v5759_v61 = vld [vmem:[#allocation3 + $0x32] sm:$0xff] }
 0x3c6   : > { %5248 = vst [vmem:[#allocation3 + $0xd0] sm:$0xff] %v5220_v58  ;;  %v5218_v20 = vadd.f32 %v18190_v32, %v5182_v43  ;;  %v5185_v33 = vadd.f32 %v15046_v56, %v4906_v6  ;;  %15079 = vmatprep.mubr.bf16.mxu0 %v18403_v54  ;;  %v16465_v10 = vld [vmem:[#allocation4 + $0x5a8] sm:$0xff]   ;;  %v5761_v6 = vld [vmem:[#allocation3 + $0x42] sm:$0xff]  ;;  %v5764_v56 = vld [vmem:[#allocation3 + $0x5a] sm:$0xff] }
 0x3c7   : > { %15127 = vmatprep.mubr.bf16.mxu1 %v18405_v46  ;;  %v5146_v24 = vpop.f32.mrf.mxu1  ;;  %v5328_v22 = vld [vmem:[#allocation3 + $0x99] sm:$0xff]  ;;  %v5762_v15 = vld [vmem:[#allocation3 + $0x4a] sm:$0xff] }
 0x3c8   : > { %15128 = vmatmul.mubr.bf16.gmra.mxu1 %v18400_v9  ;;  %15150 = vmatpush3.bf16.msra.mxu0 %v16461_v21  ;;  %5246 = vst [vmem:[#allocation3 + $0xc0] sm:$0xff] %v5218_v20  ;;  %v5221_v14 = vadd.f32 %v18190_v32, %v5185_v33  ;;  %v5183_v27 = vadd.f32 %v5146_v24, %v4904_v59  ;;  %v16471_v21 = vld [vmem:[#allocation4 + $0x5e0] sm:$0xff]   ;;  %v16476_v43 = vld [vmem:[#allocation4 + $0x5c8] sm:$0xff]   ;;  %v16472_v24 = vld [vmem:[#allocation4 + $0x590] sm:$0xff]  }
 0x3c9   : > { %v18414_v38 = vpack.c.bf16 %v5328_v22, %v5327_v11  ;;  %15223 = vmatprep.subr.bf16.mxu0 %v18407_v7  ;;  %v5331_v49 = vld [vmem:[#allocation3 + $0xb1] sm:$0xff]  ;;  %v16466_v25 = vld [vmem:[#allocation4 + $0x5a0] sm:$0xff]   ;;  %v16483_v22 = vld [vmem:[#allocation4 + $0x678] sm:$0xff]  }
 0x3ca   : > { %5249 = vst [vmem:[#allocation3 + $0xd8] sm:$0xff] %v5221_v14  ;;  %v5219_v36 = vadd.f32 %v18190_v32, %v5183_v27  ;;  %v18419_v57 = vpack.c.bf16 %v5221_v14, %v5220_v58  ;;  %v18454_v58 = vpack.c.bf16 %v5762_v15, %v5761_v6  ;;  %v5766_v59 = vld [vmem:[#allocation3 + $0x6a] sm:$0xff]  ;;  %v5769_v27 = vld [vmem:[#allocation3 + $0x82] sm:$0xff]  ;;  %v16488_v15 = vld [vmem:[#allocation4 + $0x610] sm:$0xff]  }
 0x3cb   : > { %15080 = vmatmul.mubr.bf16.gmra.mxu0 %v18414_v38  ;;  %v5329_v51 = vld [vmem:[#allocation3 + $0xa1] sm:$0xff]  ;;  %v5330_v44 = vld [vmem:[#allocation3 + $0xa9] sm:$0xff] }
 0x3cc   : > { %5247 = vst [vmem:[#allocation3 + $0xc8] sm:$0xff] %v5219_v36  ;;  %v18421_v55 = vpack.c.bf16 %v5330_v44, %v5329_v51  ;;  %v18423_v48 = vpack.c.bf16 %v5219_v36, %v5218_v20  ;;  %v5763_v20 = vld [vmem:[#allocation3 + $0x52] sm:$0xff]  ;;  %v5770_v36 = vld [vmem:[#allocation3 + $0x8a] sm:$0xff] }
 0x3cd   : > { %v18459_v33 = vpack.c.bf16 %v5764_v56, %v5763_v20  ;;  %v16475_v14 = vld [vmem:[#allocation4 + $0x588] sm:$0xff]   ;;  %v16477_v44 = vld [vmem:[#allocation4 + $0x580] sm:$0xff]   ;;  %v6869_v20 = vld [vmem:[#allocation3 + $0x20] sm:$0xff] }
 0x3ce   : > { %15083 = vmatprep.mubr.bf16.mxu0 %v18421_v55  ;;  %15131 = vmatprep.mubr.bf16.mxu1 %v18423_v48  ;;  %v16494_v6 = vld [vmem:[#allocation4 + $0x640] sm:$0xff]  }
 0x3cf   : > { %v5332_v0 = vld [vmem:[#allocation3 + $0xb9] sm:$0xff]  ;;  %v7153_v56 = vld [vmem:[#allocation3 + $0x49] sm:$0xff] }
 0x3d0   : > { %15132 = vmatmul.mubr.bf16.gmra.mxu1 %v18419_v57  ;;  %v18428_v32 = vpack.c.bf16 %v5332_v0, %v5331_v49  ;;  %v18470_v49 = vpack.c.bf16 %v5770_v36, %v5769_v27  ;;  %v16479_v0 = vld [vmem:[#allocation4 + $0x638] sm:$0xff]   ;;  %v6871_v36 = vld [vmem:[#allocation3 + $0x30] sm:$0xff] }
 0x3d1   : > { %15195 = vmatprep.mubr.bf16.mxu1 %v18221_v42  ;;  %v5335_v4 = vld [vmem:[#allocation3 + $0xd1] sm:$0xff]  ;;  %v5336_v41 = vld [vmem:[#allocation3 + $0xd9] sm:$0xff]  ;;  %v5781_v42 = vpack.c.bf16 %v5754_v29, %v5753_v8 }
 0x3d2   : > { %v18436_v12 = vpack.c.bf16 %v5336_v41, %v5335_v4  ;;  %v5774_v4 = vld [vmem:[#allocation3 + $0xaa] sm:$0xff]  ;;  %v5776_v29 = vld [vmem:[#allocation3 + $0xba] sm:$0xff] }
 0x3d3   : > { %15084 = vmatmul.mubr.bf16.gmra.mxu0 %v18428_v32  ;;  %v5333_v16 = vld [vmem:[#allocation3 + $0xc1] sm:$0xff]  ;;  %v5334_v52 = vld [vmem:[#allocation3 + $0xc9] sm:$0xff] }
 0x3d4   : > { %v18432_v40 = vpack.c.bf16 %v5334_v52, %v5333_v16  ;;  %v5772_v16 = vld [vmem:[#allocation3 + $0x9a] sm:$0xff]  ;;  %v5773_v52 = vld [vmem:[#allocation3 + $0xa2] sm:$0xff] }
 0x3d6   : > { %15087 = vmatprep.mubr.bf16.mxu0 %v18432_v40 }
 0x3d8   : > { %15196 = vmatmul.mubr.bf16.vlgmr.msra.gmra.mxu1 %v18263_v39  ;;  %v18442_v39 = vpack.c.bf16 %v5756_v35, %v5755_v13  ;;  %v5775_v35 = vld [vmem:[#allocation3 + $0xb2] sm:$0xff] }
 0x3d9   : > { %15199 = vmatprep.mubr.bf16.mxu1 %v18255_v17  ;;  %15268 = vmatpush3.bf16.msra.mxu1 %v18381_v23  ;;  %v16464_v17 = vld [vmem:[#allocation4 + $0x5b0] sm:$0xff]   ;;  %v18445_v23 = vpack.c.bf16 %v5758_v28, %v5757_v1 }
 0x3da   : > { %15269 = vmatprep.subr.bf16.mxu1 %v16468_v50  ;;  %v5780_v1 = vld [vmem:[#allocation3 + $0xda] sm:$0xff] }
 0x3db   : > { %15088 = vmatmul.mubr.bf16.gmra.mxu0 %v18436_v12  ;;  %v16484_v28 = vld [vmem:[#allocation4 + $0x670] sm:$0xff]  }
 0x3dc   : > { %15151 = vmatprep.mubr.bf16.mxu0 %v5781_v42  ;;  %v5777_v42 = vld [vmem:[#allocation3 + $0xc2] sm:$0xff] }
 0x3dd   : > { %15270 = vmatpush3.bf16.msra.mxu1 %v16468_v50  ;;  %v16648_v50 = vld [vmem:[#allocation2 + $0xe0] sm:$0xff] }
 0x3de   : > { %15271 = vmatprep.subr.bf16.mxu1 %v16470_v31  ;;  %v18482_v8 = vpack.c.bf16 %v16648_v50, %v16648_v50  ;;  %v6878_v50 = vld [vmem:[#allocation3 + $0x68] sm:$0xff] }
 0x3e0   : > { %15200 = vmatmul.mubr.bf16.gmra.mxu1 %v18303_v63  ;;  %v5760_v63 = vld [vmem:[#allocation3 + $0x3a] sm:$0xff] }
 0x3e1   : > { %15203 = vmatprep.mubr.bf16.mxu1 %v18292_v34  ;;  %15272 = vmatpush3.bf16.msra.mxu1 %v16470_v31  ;;  %v16474_v34 = vld [vmem:[#allocation4 + $0x5d0] sm:$0xff]   ;;  %v18451_v3 = vpack.c.bf16 %v5760_v63, %v5759_v61  ;;  %v5778_v31 = vld [vmem:[#allocation3 + $0xca] sm:$0xff] }
 0x3e2   : > { %15273 = vmatprep.subr.bf16.mxu1 %v16471_v21  ;;  %v16482_v63 = vld [vmem:[#allocation4 + $0x620] sm:$0xff]  }
 0x3e3   : > { %15152 = vmatmul.mubr.bf16.vlgmr.msra.gmra.mxu0 %v18442_v39 }
 0x3e4   : > { %15155 = vmatprep.mubr.bf16.mxu0 %v18445_v23  ;;  %15224 = vmatpush3.bf16.msra.mxu0 %v18407_v7  ;;  %v16469_v7 = vld [vmem:[#allocation4 + $0x598] sm:$0xff]  }
 0x3e5   : > { %15225 = vmatprep.subr.bf16.mxu0 %v16464_v17  ;;  %15274 = vmatpush3.bf16.msra.mxu1 %v16471_v21  ;;  %v5779_v21 = vld [vmem:[#allocation3 + $0xd2] sm:$0xff] }
 0x3e6   : > { %15275 = vmatprep.subr.bf16.mxu1 %v16473_v30  ;;  %v18493_v13 = vpack.c.bf16 %v5780_v1, %v5779_v21  ;;  %v7163_v21 = vld [vmem:[#allocation3 + $0x99] sm:$0xff]  ;;  %v7164_v1 = vld [vmem:[#allocation3 + $0xa1] sm:$0xff] }
 0x3e8   : > { %15226 = vmatpush3.bf16.msra.mxu0 %v16464_v17  ;;  %15204 = vmatmul.mubr.bf16.gmra.mxu1 %v18343_v45  ;;  %v5765_v45 = vld [vmem:[#allocation3 + $0x62] sm:$0xff]  ;;  %v16486_v17 = vld [vmem:[#allocation4 + $0x668] sm:$0xff]  }
 0x3e9   : > { %15207 = vmatprep.mubr.bf16.mxu1 %v18333_v53  ;;  %15227 = vmatprep.subr.bf16.mxu0 %v16465_v10  ;;  %v16478_v53 = vld [vmem:[#allocation4 + $0x5c0] sm:$0xff]   ;;  %v18462_v11 = vpack.c.bf16 %v5766_v59, %v5765_v45 }
 0x3ea   : > { %15276 = vmatpush3.bf16.msra.mxu1 %v16473_v30  ;;  %v16480_v30 = vld [vmem:[#allocation4 + $0x630] sm:$0xff]   ;;  %v6870_v59 = vld [vmem:[#allocation3 + $0x28] sm:$0xff] }
 0x3eb   : > { %15156 = vmatmul.mubr.bf16.gmra.mxu0 %v18451_v3  ;;  %15277 = vmatprep.subr.bf16.mxu1 %v16474_v34 }
 0x3ec   : > { %15159 = vmatprep.mubr.bf16.mxu0 %v18454_v58  ;;  %15228 = vmatpush3.bf16.msra.mxu0 %v16465_v10  ;;  %v16481_v10 = vld [vmem:[#allocation4 + $0x628] sm:$0xff]  }
 0x3ed   : > { %15229 = vmatprep.subr.bf16.mxu0 %v16466_v25 }
 0x3ee   : > { %15278 = vmatpush3.bf16.msra.mxu1 %v16474_v34  ;;  %v6617_v34 = vld [vmem:[#allocation3 + $0xea] sm:$0xff] }
 0x3ef   : > { %15279 = vmatprep.subr.bf16.mxu1 %v16476_v43 }
 0x3f0   : > { %15208 = vmatmul.mubr.bf16.gmra.mxu1 %v18379_v18  ;;  %15230 = vmatpush3.bf16.msra.mxu0 %v16466_v25  ;;  %v5768_v18 = vld [vmem:[#allocation3 + $0x7a] sm:$0xff] }
 0x3f1   : > { %15211 = vmatprep.mubr.bf16.mxu1 %v18369_v60  ;;  %15231 = vmatprep.subr.bf16.mxu0 %v16469_v7  ;;  %v5767_v60 = vld [vmem:[#allocation3 + $0x72] sm:$0xff] }
 0x3f2   : > { %15280 = vmatpush3.bf16.msra.mxu1 %v16476_v43  ;;  %v18467_v51 = vpack.c.bf16 %v5768_v18, %v5767_v60  ;;  %v7151_v25 = vld [vmem:[#allocation3 + $0x39] sm:$0xff]  ;;  %v6337_v43 = vld [vmem:[#allocation3 + $0xe1] sm:$0xff] }
 0x3f3   : > { %15160 = vmatmul.mubr.bf16.gmra.mxu0 %v18459_v33  ;;  %15281 = vmatprep.subr.bf16.mxu1 %v16478_v53  ;;  %v6874_v18 = vld [vmem:[#allocation3 + $0x48] sm:$0xff] }
 0x3f4   : > { %15163 = vmatprep.mubr.bf16.mxu0 %v18462_v11  ;;  %15232 = vmatpush3.bf16.msra.mxu0 %v16469_v7  ;;  %v6338_v7 = vld [vmem:[#allocation3 + $0xe9] sm:$0xff] }
 0x3f5   : > { %15233 = vmatprep.subr.bf16.mxu0 %v16472_v24 }
 0x3f6   : > { %15282 = vmatpush3.bf16.msra.mxu1 %v16478_v53 }
 0x3f7   : > { %15355 = vmatprep.subr.bf16.mxu1 %v16483_v22 }
 0x3f8   : > { %15212 = vmatmul.mubr.bf16.gmra.mxu1 %v18405_v46  ;;  %15234 = vmatpush3.bf16.msra.mxu0 %v16472_v24  ;;  %v5771_v46 = vld [vmem:[#allocation3 + $0x92] sm:$0xff]  ;;  %v7156_v24 = vld [vmem:[#allocation3 + $0x61] sm:$0xff] }
 0x3f9   : > { %15215 = vmatprep.mubr.bf16.mxu1 %v18400_v9  ;;  %15235 = vmatprep.subr.bf16.mxu0 %v16475_v14  ;;  %v18475_v41 = vpack.c.bf16 %v5772_v16, %v5771_v46  ;;  %v18478_v9 = vpack.c.bf16 %v5774_v4, %v5773_v52  ;;  %v7160_v16 = vld [vmem:[#allocation3 + $0x81] sm:$0xff]  ;;  %v7161_v52 = vld [vmem:[#allocation3 + $0x89] sm:$0xff]  ;;  %v7158_v4 = vld [vmem:[#allocation3 + $0x71] sm:$0xff] }
 0x3fa   : > { %v16497_v46 = vld [vmem:[#allocation4 + $0x6a8] sm:$0xff]  }
 0x3fb   : > { %15164 = vmatmul.mubr.bf16.gmra.mxu0 %v18467_v51 }
 0x3fc   : > { %15167 = vmatprep.mubr.bf16.mxu0 %v18470_v49  ;;  %15236 = vmatpush3.bf16.msra.mxu0 %v16475_v14 }
 0x3fd   : > { %15237 = vmatprep.subr.bf16.mxu0 %v16477_v44 }
 0x400   : > { %15216 = vmatmul.mubr.bf16.gmra.mxu1 %v18423_v48  ;;  %15238 = vmatpush3.bf16.msra.mxu0 %v16477_v44  ;;  %v18485_v48 = vpack.c.bf16 %v5776_v29, %v5775_v35  ;;  %v16496_v44 = vld [vmem:[#allocation4 + $0x6b0] sm:$0xff]   ;;  %v7182_v29 = vpack.c.bf16 %v7161_v52, %v7160_v16  ;;  %v6877_v35 = vld [vmem:[#allocation3 + $0x60] sm:$0xff]  ;;  %v6887_v16 = vld [vmem:[#allocation3 + $0xb0] sm:$0xff] }
 0x401   : > { %15219 = vmatprep.mubr.bf16.mxu1 %v18419_v57  ;;  %15311 = vmatprep.subr.bf16.mxu0 %v16479_v0  ;;  %v18488_v57 = vpack.c.bf16 %v5778_v31, %v5777_v42  ;;  %v6875_v42 = vld [vmem:[#allocation3 + $0x50] sm:$0xff] }
 0x403   : > { %15168 = vmatmul.mubr.bf16.gmra.mxu0 %v18475_v41 }
 0x404   : > { %15171 = vmatprep.mubr.bf16.mxu0 %v18478_v9 }
 0x408   : > { %15220 = vmatmul.mubr.bf16.gmra.mxu1 %v18482_v8 }
 0x409   : > { %15283 = vmatprep.mubr.bf16.mxu1 %v18442_v39  ;;  %v16487_v39 = vld [vmem:[#allocation4 + $0x660] sm:$0xff]  }
 0x40b   : > { %15172 = vmatmul.mubr.bf16.gmra.mxu0 %v18485_v48 }
 0x40c   : > { %15175 = vmatprep.mubr.bf16.mxu0 %v18488_v57 }
 0x410   : > { %15284 = vmatmul.mubr.bf16.vlgmr.msra.gmra.mxu1 %v18445_v23  ;;  %v16489_v23 = vld [vmem:[#allocation4 + $0x658] sm:$0xff]  }
 0x411   : > { %15287 = vmatprep.mubr.bf16.mxu1 %v18451_v3  ;;  %15356 = vmatpush3.bf16.msra.mxu1 %v16483_v22  ;;  %v7149_v3 = vld [vmem:[#allocation3 + $0x29] sm:$0xff]  ;;  %v6872_v22 = vld [vmem:[#allocation3 + $0x38] sm:$0xff] }
 0x412   : > { %15357 = vmatprep.subr.bf16.mxu1 %v16484_v28  ;;  %v6898_v60 = vpack.c.bf16 %v6872_v22, %v6871_v36  ;;  %v6888_v36 = vld [vmem:[#allocation3 + $0xb8] sm:$0xff] }
 0x413   : > { %15176 = vmatmul.mubr.bf16.gmra.mxu0 %v18493_v13 }
 0x414   : > { %15239 = vmatprep.mubr.bf16.mxu0 %v18279_v37  ;;  %v16490_v37 = vld [vmem:[#allocation4 + $0x650] sm:$0xff]  }
 0x415   : > { %15358 = vmatpush3.bf16.msra.mxu1 %v16484_v28  ;;  %v7165_v28 = vld [vmem:[#allocation3 + $0xa9] sm:$0xff] }
 0x416   : > { %15359 = vmatprep.subr.bf16.mxu1 %v16486_v17 }
 0x418   : > { %15288 = vmatmul.mubr.bf16.gmra.mxu1 %v18454_v58  ;;  %v7152_v58 = vld [vmem:[#allocation3 + $0x41] sm:$0xff] }
 0x419   : > { %15291 = vmatprep.mubr.bf16.mxu1 %v18459_v33  ;;  %15360 = vmatpush3.bf16.msra.mxu1 %v16486_v17  ;;  %v7178_v53 = vpack.c.bf16 %v7153_v56, %v7152_v58  ;;  %v6897_v33 = vpack.c.bf16 %v6870_v59, %v6869_v20  ;;  %v7162_v17 = vld [vmem:[#allocation3 + $0x91] sm:$0xff]  ;;  %v16502_v20 = vld [vmem:[#allocation4 + $0x680] sm:$0xff]  }
 0x41a   : > { %15361 = vmatprep.subr.bf16.mxu1 %v16487_v39 }
 0x41b   : > { %15240 = vmatmul.mubr.bf16.vlgmr.msra.gmra.mxu0 %v18301_v19  ;;  %v16492_v19 = vld [vmem:[#allocation4 + $0x648] sm:$0xff]  }
 0x41c   : > { %15243 = vmatprep.mubr.bf16.mxu0 %v18322_v2  ;;  %15312 = vmatpush3.bf16.msra.mxu0 %v16479_v0  ;;  %v16485_v2 = vld [vmem:[#allocation4 + $0x618] sm:$0xff]  }
 0x41d   : > { %15313 = vmatprep.subr.bf16.mxu0 %v16480_v30  ;;  %15362 = vmatpush3.bf16.msra.mxu1 %v16487_v39  ;;  %v7159_v0 = vld [vmem:[#allocation3 + $0x79] sm:$0xff] }
 0x41e   : > { %15363 = vmatprep.subr.bf16.mxu1 %v16489_v23  ;;  %v16499_v39 = vld [vmem:[#allocation4 + $0x698] sm:$0xff]  }
 0x420   : > { %15314 = vmatpush3.bf16.msra.mxu0 %v16480_v30  ;;  %15292 = vmatmul.mubr.bf16.gmra.mxu1 %v18462_v11  ;;  %v7157_v11 = vld [vmem:[#allocation3 + $0x69] sm:$0xff]  ;;  %v6880_v30 = vld [vmem:[#allocation3 + $0x78] sm:$0xff] }
 0x421   : > { %15295 = vmatprep.mubr.bf16.mxu1 %v18467_v51  ;;  %15315 = vmatprep.subr.bf16.mxu0 %v16481_v10  ;;  %v7180_v27 = vpack.c.bf16 %v7157_v11, %v7156_v24  ;;  %v6873_v51 = vld [vmem:[#allocation3 + $0x40] sm:$0xff]  ;;  %v7170_v11 = vld [vmem:[#allocation3 + $0xd1] sm:$0xff] }
 0x422   : > { %15364 = vmatpush3.bf16.msra.mxu1 %v16489_v23  ;;  %v7183_v23 = vpack.c.bf16 %v7163_v21, %v7162_v17 }
 0x423   : > { %15244 = vmatmul.mubr.bf16.gmra.mxu0 %v18341_v47  ;;  %15365 = vmatprep.subr.bf16.mxu1 %v16490_v37  ;;  %v16491_v47 = vld [vmem:[#allocation4 + $0x608] sm:$0xff]  }
 0x424   : > { %15247 = vmatprep.mubr.bf16.mxu0 %v18360_v26  ;;  %15316 = vmatpush3.bf16.msra.mxu0 %v16481_v10  ;;  %v16493_v26 = vld [vmem:[#allocation4 + $0x600] sm:$0xff]  }
 0x425   : > { %15317 = vmatprep.subr.bf16.mxu0 %v16482_v63  ;;  %v6882_v10 = vld [vmem:[#allocation3 + $0x88] sm:$0xff] }
 0x426   : > { %15366 = vmatpush3.bf16.msra.mxu1 %v16490_v37  ;;  %v7184_v37 = vpack.c.bf16 %v7165_v28, %v7164_v1  ;;  %v6892_v28 = vld [vmem:[#allocation3 + $0xd8] sm:$0xff] }
 0x427   : > { %15367 = vmatprep.subr.bf16.mxu1 %v16492_v19 }
 0x428   : > { %15296 = vmatmul.mubr.bf16.gmra.mxu1 %v18470_v49  ;;  %15318 = vmatpush3.bf16.msra.mxu0 %v16482_v63  ;;  %v6899_v49 = vpack.c.bf16 %v6874_v18, %v6873_v51  ;;  %v6879_v63 = vld [vmem:[#allocation3 + $0x70] sm:$0xff] }
 0x429   : > { %15299 = vmatprep.mubr.bf16.mxu1 %v18475_v41  ;;  %15319 = vmatprep.subr.bf16.mxu0 %v16485_v2  ;;  %v6876_v41 = vld [vmem:[#allocation3 + $0x58] sm:$0xff] }
 0x42a   : > { %15368 = vmatpush3.bf16.msra.mxu1 %v16492_v19  ;;  %v6900_v31 = vpack.c.bf16 %v6876_v41, %v6875_v42  ;;  %v6889_v41 = vld [vmem:[#allocation3 + $0xc0] sm:$0xff] }
 0x42b   : > { %15248 = vmatmul.mubr.bf16.gmra.mxu0 %v18377_v62  ;;  %15369 = vmatprep.subr.bf16.mxu1 %v16494_v6  ;;  %v16495_v62 = vld [vmem:[#allocation4 + $0x6b8] sm:$0xff]  }
 0x42c   : > { %15251 = vmatprep.mubr.bf16.mxu0 %v18394_v5  ;;  %15320 = vmatpush3.bf16.msra.mxu0 %v16485_v2  ;;  %v6616_v5 = vld [vmem:[#allocation3 + $0xe2] sm:$0xff]  ;;  %v6902_v2 = vpack.c.bf16 %v6880_v30, %v6879_v63 }
 0x42d   : > { %15321 = vmatprep.subr.bf16.mxu0 %v16488_v15  ;;  %v18518_v61 = vpack.c.bf16 %v6617_v34, %v6616_v5  ;;  %v7168_v34 = vld [vmem:[#allocation3 + $0xc1] sm:$0xff] }
 0x42e   : > { %15370 = vmatpush3.bf16.msra.mxu1 %v16494_v6  ;;  %v6881_v6 = vld [vmem:[#allocation3 + $0x80] sm:$0xff] }
 0x430   : > { %15300 = vmatmul.mubr.bf16.gmra.mxu1 %v18478_v9  ;;  %15322 = vmatpush3.bf16.msra.mxu0 %v16488_v15  ;;  %v7181_v9 = vpack.c.bf16 %v7159_v0, %v7158_v4  ;;  %v16500_v15 = vld [vmem:[#allocation4 + $0x690] sm:$0xff]  }
 0x431   : > { %15303 = vmatprep.mubr.bf16.mxu1 %v18485_v48  ;;  %15323 = vmatprep.subr.bf16.mxu0 %v16491_v47  ;;  %v16498_v48 = vld [vmem:[#allocation4 + $0x6a0] sm:$0xff]  }
 0x433   : > { %15252 = vmatmul.mubr.bf16.gmra.mxu0 %v18403_v54  ;;  %v7148_v54 = vld [vmem:[#allocation3 + $0x21] sm:$0xff] }
 0x434   : > { %15255 = vmatprep.mubr.bf16.mxu0 %v18414_v38  ;;  %15324 = vmatpush3.bf16.msra.mxu0 %v16491_v47  ;;  %v7176_v38 = vpack.c.bf16 %v7149_v3, %v7148_v54  ;;  %v6903_v47 = vpack.c.bf16 %v6882_v10, %v6881_v6  ;;  %v7169_v54 = vld [vmem:[#allocation3 + $0xc9] sm:$0xff]  ;;  %v7166_v3 = vld [vmem:[#allocation3 + $0xb1] sm:$0xff] }
 0x435   : > { %15325 = vmatprep.subr.bf16.mxu0 %v16493_v26  ;;  %v7186_v56 = vpack.c.bf16 %v7169_v54, %v7168_v34  ;;  %v7428_v34 = vld [vmem:[#allocation3 + $0x2a] sm:$0xff] }
 0x438   : > { %15304 = vmatmul.mubr.bf16.gmra.mxu1 %v18488_v57  ;;  %15326 = vmatpush3.bf16.msra.mxu0 %v16493_v26  ;;  %v6901_v57 = vpack.c.bf16 %v6878_v50, %v6877_v35  ;;  %v7175_v50 = vld [vmem:[#allocation3 + $0xf9] sm:$0xff] }
 0x439   : > { %15307 = vmatprep.mubr.bf16.mxu1 %v18493_v13  ;;  %15399 = vmatprep.subr.bf16.mxu0 %v16495_v62 }
 0x43b   : > { %15256 = vmatmul.mubr.bf16.gmra.mxu0 %v18421_v55  ;;  %v7150_v55 = vld [vmem:[#allocation3 + $0x31] sm:$0xff] }
 0x43c   : > { %15259 = vmatprep.mubr.bf16.mxu0 %v18428_v32  ;;  %v7177_v45 = vpack.c.bf16 %v7151_v25, %v7150_v55  ;;  %v18523_v32 = vpack.c.bf16 %v6338_v7, %v6337_v43  ;;  %v6884_v25 = vld [vmem:[#allocation3 + $0x98] sm:$0xff]  ;;  %v6886_v7 = vld [vmem:[#allocation3 + $0xa8] sm:$0xff]  ;;  %v6883_v55 = vld [vmem:[#allocation3 + $0x90] sm:$0xff] }
 0x43d   : > { %v6904_v59 = vpack.c.bf16 %v6884_v25, %v6883_v55 }
 0x440   : > { %15308 = vmatmul.mubr.bf16.gmra.mxu1 %v18518_v61 }
 0x441   : > { %15371 = vmatprep.mubr.bf16.mxu1 %v7176_v38  ;;  %v16501_v38 = vld [vmem:[#allocation4 + $0x688] sm:$0xff]  }
 0x443   : > { %15260 = vmatmul.mubr.bf16.gmra.mxu0 %v18432_v40  ;;  %v7155_v40 = vld [vmem:[#allocation3 + $0x59] sm:$0xff] }
 0x444   : > { %15263 = vmatprep.mubr.bf16.mxu0 %v18436_v12  ;;  %v7154_v12 = vld [vmem:[#allocation3 + $0x51] sm:$0xff] }
 0x445   : > { %v7179_v14 = vpack.c.bf16 %v7155_v40, %v7154_v12  ;;  %v7171_v12 = vld [vmem:[#allocation3 + $0xd9] sm:$0xff] }
 0x446   : > { %v7187_v51 = vpack.c.bf16 %v7171_v12, %v7170_v11  ;;  %v7429_v12 = vld [vmem:[#allocation3 + $0x32] sm:$0xff] }
 0x448   : > { %15372 = vmatmul.mubr.bf16.vlgmr.msra.gmra.mxu1 %v7177_v45 }
 0x449   : > { %15375 = vmatprep.mubr.bf16.mxu1 %v7178_v53  ;;  %v6885_v53 = vld [vmem:[#allocation3 + $0xa0] sm:$0xff] }
 0x44b   : > { %15264 = vmatmul.mubr.bf16.gmra.mxu0 %v18523_v32 }
 0x44c   : > { %15327 = vmatprep.mubr.bf16.mxu0 %v6897_v33  ;;  %v6905_v33 = vpack.c.bf16 %v6886_v7, %v6885_v53  ;;  %v7430_v53 = vld [vmem:[#allocation3 + $0x3a] sm:$0xff] }
 0x450   : > { %15376 = vmatmul.mubr.bf16.gmra.mxu1 %v7179_v14 }
 0x451   : > { %15379 = vmatprep.mubr.bf16.mxu1 %v7180_v27 }
 0x453   : > { %15328 = vmatmul.mubr.bf16.vlgmr.msra.gmra.mxu0 %v6898_v60 }
 0x454   : > { %15331 = vmatprep.mubr.bf16.mxu0 %v6899_v49  ;;  %15400 = vmatpush3.bf16.msra.mxu0 %v16495_v62  ;;  %v7167_v62 = vld [vmem:[#allocation3 + $0xb9] sm:$0xff]  ;;  %v6890_v49 = vld [vmem:[#allocation3 + $0xc8] sm:$0xff] }
 0x455   : > { %15401 = vmatprep.subr.bf16.mxu0 %v16496_v44  ;;  %v7185_v43 = vpack.c.bf16 %v7167_v62, %v7166_v3 }
 0x458   : > { %15402 = vmatpush3.bf16.msra.mxu0 %v16496_v44  ;;  %15380 = vmatmul.mubr.bf16.gmra.mxu1 %v7181_v9  ;;  %v7174_v9 = vld [vmem:[#allocation3 + $0xf1] sm:$0xff] }
 0x459   : > { %15383 = vmatprep.mubr.bf16.mxu1 %v7182_v29  ;;  %15403 = vmatprep.subr.bf16.mxu0 %v16497_v46  ;;  %v6907_v29 = vpack.c.bf16 %v6890_v49, %v6889_v41  ;;  %v7434_v41 = vld [vmem:[#allocation3 + $0x5a] sm:$0xff] }
 0x45b   : > { %15332 = vmatmul.mubr.bf16.gmra.mxu0 %v6900_v31 }
 0x45c   : > { %15335 = vmatprep.mubr.bf16.mxu0 %v6901_v57  ;;  %15404 = vmatpush3.bf16.msra.mxu0 %v16497_v46  ;;  %v6906_v46 = vpack.c.bf16 %v6888_v36, %v6887_v16  ;;  %v7189_v57 = vpack.c.bf16 %v7175_v50, %v7174_v9 }
 0x45d   : > { %15405 = vmatprep.subr.bf16.mxu0 %v16498_v48 }
 0x45f   : > { %v15109_v19 = vpop.f32.mrf.mxu1 }
 0x460   : > { %15384 = vmatmul.mubr.bf16.gmra.mxu1 %v7183_v23  ;;  %15406 = vmatpush3.bf16.msra.mxu0 %v16498_v48 }
 0x461   : > { %15387 = vmatprep.mubr.bf16.mxu1 %v7184_v37  ;;  %15407 = vmatprep.subr.bf16.mxu0 %v16499_v39  ;;  %v5642_v26 = vpop.f32.mrf.mxu1 }
 0x463   : > { %15336 = vmatmul.mubr.bf16.gmra.mxu0 %v6902_v2  ;;  %v15110_v5 = vpop.f32.mrf.mxu1 }
 0x464   : > { %15339 = vmatprep.mubr.bf16.mxu0 %v6903_v47  ;;  %15408 = vmatpush3.bf16.msra.mxu0 %v16499_v39 }
 0x465   : > { %15409 = vmatprep.subr.bf16.mxu0 %v16500_v15  ;;  %v18526_v58 = vpop.f32.mrf.mxu1 }
 0x468   : > { %v15113_v45 = vpop.f32.mrf.mxu1  ;;  %15388 = vmatmul.mubr.bf16.gmra.mxu1 %v7185_v43  ;;  %15410 = vmatpush3.bf16.msra.mxu0 %v16500_v15 }
 0x469   : > { %15391 = vmatprep.mubr.bf16.mxu1 %v7186_v56  ;;  %15411 = vmatprep.subr.bf16.mxu0 %v16501_v38 }
 0x46a   : > { %v5658_v40 = vpop.f32.mrf.mxu1  ;;  %v15065_v24 = vpop.f32.mrf.mxu0 }
 0x46b   : > { %15340 = vmatmul.mubr.bf16.gmra.mxu0 %v6904_v59  ;;  %v18528_v22 = vadd.f32 %v15109_v19, %v15065_v24  ;;  %v7432_v24 = vld [vmem:[#allocation3 + $0x4a] sm:$0xff] }
 0x46c   : > { %15343 = vmatprep.mubr.bf16.mxu0 %v6905_v33  ;;  %v15114_v14 = vpop.f32.mrf.mxu1  ;;  %15412 = vmatpush3.bf16.msra.mxu0 %v16501_v38  ;;  %v5449_v18 = vpop.f32.mrf.mxu0 }
 0x46d   : > { %15413 = vmatprep.subr.bf16.mxu0 %v16502_v20  ;;  %v18530_v27 = vadd.f32 %v5642_v26, %v5449_v18 }
 0x46e   : > { %v18532_v60 = vpop.f32.mrf.mxu1  ;;  %v15066_v44 = vpop.f32.mrf.mxu0 }
 0x46f   : > { %v18534_v0 = vadd.f32 %v15110_v5, %v15066_v44  ;;  %v7427_v5 = vld [vmem:[#allocation3 + $0x22] sm:$0xff] }
 0x470   : > { %v15117_v52 = vpop.f32.mrf.mxu1  ;;  %15392 = vmatmul.mubr.bf16.gmra.mxu1 %v7187_v51  ;;  %15414 = vmatpush3.bf16.msra.mxu0 %v16502_v20  ;;  %v18536_v4 = vpop.f32.mrf.mxu0  ;;  %v7455_v25 = vpack.c.bf16 %v7428_v34, %v7427_v5  ;;  %v7439_v34 = vld [vmem:[#allocation3 + $0x82] sm:$0xff] }
 0x471   : > { %15395 = vmatprep.mubr.bf16.mxu1 %v18523_v32  ;;  %v6891_v32 = vld [vmem:[#allocation3 + $0xd0] sm:$0xff] }
 0x472   : > { %v5674_v42 = vpop.f32.mrf.mxu1  ;;  %v15069_v31 = vpop.f32.mrf.mxu0  ;;  %v6908_v37 = vpack.c.bf16 %v6892_v28, %v6891_v32 }
 0x473   : > { %15344 = vmatmul.mubr.bf16.gmra.mxu0 %v6906_v46  ;;  %v18539_v35 = vadd.f32 %v15113_v45, %v15069_v31 }
 0x474   : > { %15347 = vmatprep.mubr.bf16.mxu0 %v6907_v29  ;;  %v15118_v48 = vpop.f32.mrf.mxu1  ;;  %v5465_v21 = vpop.f32.mrf.mxu0  ;;  %v7435_v29 = vld [vmem:[#allocation3 + $0x62] sm:$0xff] }
 0x475   : > { %v18541_v1 = vadd.f32 %v5658_v40, %v5465_v21  ;;  %v7431_v40 = vld [vmem:[#allocation3 + $0x42] sm:$0xff] }
 0x476   : > { %v18543_v17 = vpop.f32.mrf.mxu1  ;;  %v15070_v39 = vpop.f32.mrf.mxu0  ;;  %v7457_v36 = vpack.c.bf16 %v7432_v24, %v7431_v40 }
 0x477   : > { %v18545_v30 = vadd.f32 %v15114_v14, %v15070_v39 }
 0x478   : > { %v15121_v23 = vpop.f32.mrf.mxu1  ;;  %15396 = vmatmul.mubr.bf16.gmra.mxu1 %v7189_v57  ;;  %v18547_v10 = vpop.f32.mrf.mxu0 }
 0x47a   : > { %v5690_v63 = vpop.f32.mrf.mxu1  ;;  %v15073_v19 = vpop.f32.mrf.mxu0 }
 0x47b   : > { %15348 = vmatmul.mubr.bf16.gmra.mxu0 %v6908_v37  ;;  %v18549_v2 = vadd.f32 %v15117_v52, %v15073_v19 }
 0x47c   : > { %15351 = vmatprep.mubr.bf16.mxu0 %v18482_v8  ;;  %v15122_v6 = vpop.f32.mrf.mxu1  ;;  %v5481_v15 = vpop.f32.mrf.mxu0 }
 0x47d   : > { %v18552_v47 = vadd.f32 %v5674_v42, %v5481_v15  ;;  %v7436_v42 = vld [vmem:[#allocation3 + $0x6a] sm:$0xff]  ;;  %v7438_v15 = vld [vmem:[#allocation3 + $0x7a] sm:$0xff] }
 0x47e   : > { %v18554_v26 = vpop.f32.mrf.mxu1  ;;  %v15074_v62 = vpop.f32.mrf.mxu0  ;;  %v7459_v39 = vpack.c.bf16 %v7436_v42, %v7435_v29 }
 0x47f   : > { %v18556_v54 = vadd.f32 %v15118_v48, %v15074_v62  ;;  %v7433_v48 = vld [vmem:[#allocation3 + $0x52] sm:$0xff] }
 0x480   : > { %v15125_v3 = vpop.f32.mrf.mxu1  ;;  %v18558_v38 = vpop.f32.mrf.mxu0  ;;  %v7458_v28 = vpack.c.bf16 %v7434_v41, %v7433_v48 }
 0x482   : > { %v5706_v43 = vpop.f32.mrf.mxu1 }
 0x483   : > { %v15077_v7 = vpop.f32.mrf.mxu0  ;;  %15352 = vmatmul.mubr.bf16.gmra.mxu0 %v18482_v8  ;;  %v7456_v8 = vpack.c.bf16 %v7430_v53, %v7429_v12 }
 0x484   : > { %v18561_v56 = vadd.f32 %v15121_v23, %v15077_v7  ;;  %15415 = vmatprep.mubr.bf16.mxu0 %v7455_v25  ;;  %v15126_v55 = vpop.f32.mrf.mxu1 }
 0x485   : > { %v5497_v45 = vpop.f32.mrf.mxu0 }
 0x486   : > { %v18563_v59 = vadd.f32 %v5690_v63, %v5497_v45  ;;  %v18565_v20 = vpop.f32.mrf.mxu1 }
 0x487   : > { %20770 = vst [vmem:[#allocation24_spill] sm:$0xff] %v18565_v20  ;;  %v15078_v33 = vpop.f32.mrf.mxu0 }
 0x488   : > { %v18567_v11 = vadd.f32 %v15122_v6, %v15078_v33  ;;  %v15129_v14 = vpop.f32.mrf.mxu1 }
 0x489   : > { %v18569_v18 = vpop.f32.mrf.mxu0 }
 0x48a   : > { %v5722_v51 = vpop.f32.mrf.mxu1 }
 0x48b   : > { %v15081_v44 = vpop.f32.mrf.mxu0  ;;  %15416 = vmatmul.mubr.bf16.vlgmr.msra.gmra.mxu0 %v7456_v8 }
 0x48c   : > { %v18571_v49 = vadd.f32 %v15125_v3, %v15081_v44  ;;  %15419 = vmatprep.mubr.bf16.mxu0 %v7457_v36  ;;  %v15130_v16 = vpop.f32.mrf.mxu1  ;;  %v7440_v3 = vld [vmem:[#allocation3 + $0x8a] sm:$0xff]  ;;  %v7442_v36 = vld [vmem:[#allocation3 + $0x9a] sm:$0xff] }
 0x48d   : > { %v5513_v52 = vpop.f32.mrf.mxu0  ;;  %v7461_v53 = vpack.c.bf16 %v7440_v3, %v7439_v34 }
 0x48e   : > { %v18573_v46 = vadd.f32 %v5706_v43, %v5513_v52  ;;  %v18575_v9 = vpop.f32.mrf.mxu1  ;;  %v7437_v43 = vld [vmem:[#allocation3 + $0x72] sm:$0xff]  ;;  %v7444_v52 = vld [vmem:[#allocation3 + $0xaa] sm:$0xff] }
 0x48f   : > { %20771 = vst [vmem:[#allocation25_spill] sm:$0xff] %v18575_v9  ;;  %v15082_v50 = vpop.f32.mrf.mxu0  ;;  %v7460_v45 = vpack.c.bf16 %v7438_v15, %v7437_v43  ;;  %v7447_v43 = vld [vmem:[#allocation3 + $0xc2] sm:$0xff] }
 0x490   : > { %v18577_v31 = vadd.f32 %v15126_v55, %v15082_v50  ;;  %v15133_v57 = vpop.f32.mrf.mxu1  ;;  %v7441_v50 = vld [vmem:[#allocation3 + $0x92] sm:$0xff] }
 0x491   : > { %v18579_v21 = vpop.f32.mrf.mxu0  ;;  %v7462_v48 = vpack.c.bf16 %v7442_v36, %v7441_v50 }
 0x492   : > { %20772 = vst [vmem:[#allocation63_spill] sm:$0xff] %v18579_v21  ;;  %v5738_v32 = vpop.f32.mrf.mxu1 }
 0x493   : > { %v15085_v23 = vpop.f32.mrf.mxu0  ;;  %15420 = vmatmul.mubr.bf16.gmra.mxu0 %v7458_v28 }
 0x494   : > { %v18581_v37 = vadd.f32 %v15129_v14, %v15085_v23  ;;  %15423 = vmatprep.mubr.bf16.mxu0 %v7459_v39  ;;  %v15134_v63 = vpop.f32.mrf.mxu1 }
 0x495   : > { %v5529_v19 = vpop.f32.mrf.mxu0 }
 0x496   : > { %v18583_v6 = vadd.f32 %v5722_v51, %v5529_v19  ;;  %v18585_v62 = vpop.f32.mrf.mxu1 }
 0x497   : > { %20773 = vst [vmem:[#allocation36_spill] sm:$0xff] %v18585_v62  ;;  %v15086_v5 = vpop.f32.mrf.mxu0 }
 0x498   : > { %v18587_v25 = vadd.f32 %v15130_v16, %v15086_v5  ;;  %v15197_v7 = vpop.f32.mrf.mxu1  ;;  %v7443_v16 = vld [vmem:[#allocation3 + $0xa2] sm:$0xff]  ;;  %v7446_v5 = vld [vmem:[#allocation3 + $0xba] sm:$0xff] }
 0x499   : > { %v18589_v55 = vpop.f32.mrf.mxu0 }
 0x49a   : > { %20774 = vst [vmem:[#allocation44_spill] sm:$0xff] %v18589_v55  ;;  %v6172_v33 = vpop.f32.mrf.mxu1 }
 0x49b   : > { %v15089_v40 = vpop.f32.mrf.mxu0  ;;  %15424 = vmatmul.mubr.bf16.gmra.mxu0 %v7460_v45  ;;  %v7448_v45 = vld [vmem:[#allocation3 + $0xca] sm:$0xff] }
 0x49c   : > { %v18591_v24 = vadd.f32 %v15133_v57, %v15089_v40  ;;  %15427 = vmatprep.mubr.bf16.mxu0 %v7461_v53  ;;  %v15198_v12 = vpop.f32.mrf.mxu1  ;;  %v7463_v57 = vpack.c.bf16 %v7444_v52, %v7443_v16  ;;  %v7445_v40 = vld [vmem:[#allocation3 + $0xb2] sm:$0xff]  ;;  %v7465_v16 = vpack.c.bf16 %v7448_v45, %v7447_v43 }
 0x49d   : > { %v5545_v14 = vpop.f32.mrf.mxu0 }
 0x49e   : > { %v18593_v8 = vadd.f32 %v5738_v32, %v5545_v14  ;;  %v18595_v51 = vpop.f32.mrf.mxu1 }
 0x49f   : > { %v15090_v44 = vpop.f32.mrf.mxu0 }
 0x4a0   : > { %v18597_v41 = vadd.f32 %v15134_v63, %v15090_v44  ;;  %v15201_v29 = vpop.f32.mrf.mxu1  ;;  %v7464_v44 = vpack.c.bf16 %v7446_v5, %v7445_v40 }
 0x4a1   : > { %v18599_v42 = vpop.f32.mrf.mxu0 }
 0x4a2   : > { %20775 = vst [vmem:[#allocation48_spill] sm:$0xff] %v18599_v42  ;;  %v6188_v28 = vpop.f32.mrf.mxu1 }
 0x4a3   : > { %v15153_v39 = vpop.f32.mrf.mxu0  ;;  %15428 = vmatmul.mubr.bf16.gmra.mxu0 %v7462_v48 }
 0x4a4   : > { %v6006_v32 = vadd.f32 %v15153_v39, %v18528_v22  ;;  %15431 = vmatprep.mubr.bf16.mxu0 %v7463_v57  ;;  %v15202_v23 = vpop.f32.mrf.mxu1  ;;  %v16503_v57 = vld [vmem:[#allocation4 + $0x738] sm:$0xff]  }
 0x4a5   : > { %v5893_v19 = vpop.f32.mrf.mxu0  ;;  %15443 = vmatprep.subr.bf16.mxu1 %v16503_v57 }
 0x4a6   : > { %v6004_v15 = vadd.f32 %v5893_v19, %v18530_v27  ;;  %v18603_v34 = vpop.f32.mrf.mxu1  ;;  %v18605_v63 = vadd.f32 %v15197_v7, %v6006_v32  ;;  %15444 = vmatpush3.bf16.msra.mxu1 %v16503_v57 }
 0x4a7   : > { %v15154_v3 = vpop.f32.mrf.mxu0 }
 0x4a8   : > { %v6007_v53 = vadd.f32 %v15154_v3, %v18534_v0  ;;  %v15205_v14 = vpop.f32.mrf.mxu1  ;;  %v18608_v36 = vadd.f32 %v6172_v33, %v6004_v15 }
 0x4a9   : > { %v18610_v22 = vpop.f32.mrf.mxu0 }
 0x4aa   : > { %v6204_v52 = vpop.f32.mrf.mxu1  ;;  %v18612_v27 = vadd.f32 %v15198_v12, %v6007_v53  ;;  %v7454_v53 = vld [vmem:[#allocation3 + $0xfa] sm:$0xff] }
 0x4ab   : > { %v15157_v50 = vpop.f32.mrf.mxu0  ;;  %15432 = vmatmul.mubr.bf16.gmra.mxu0 %v7464_v44  ;;  %v16504_v44 = vld [vmem:[#allocation4 + $0x730] sm:$0xff]  }
 0x4ac   : > { %v6010_v7 = vadd.f32 %v15157_v50, %v18539_v35  ;;  %15435 = vmatprep.mubr.bf16.mxu0 %v7465_v16  ;;  %v15206_v48 = vpop.f32.mrf.mxu1  ;;  %15445 = vmatprep.subr.bf16.mxu1 %v16504_v44 }
 0x4ad   : > { %v5909_v39 = vpop.f32.mrf.mxu0  ;;  %15446 = vmatpush3.bf16.msra.mxu1 %v16504_v44 }
 0x4ae   : > { %v6008_v0 = vadd.f32 %v5909_v39, %v18541_v1  ;;  %v18616_v32 = vpop.f32.mrf.mxu1  ;;  %v18618_v33 = vadd.f32 %v15201_v29, %v6010_v7  ;;  %v7453_v29 = vld [vmem:[#allocation3 + $0xf2] sm:$0xff] }
 0x4af   : > { %v15158_v19 = vpop.f32.mrf.mxu0  ;;  %v7468_v7 = vpack.c.bf16 %v7454_v53, %v7453_v29 }
 0x4b0   : > { %v6011_v12 = vadd.f32 %v15158_v19, %v18545_v30  ;;  %v15209_v15 = vpop.f32.mrf.mxu1  ;;  %v18621_v5 = vadd.f32 %v6188_v28, %v6008_v0  ;;  %v16505_v19 = vld [vmem:[#allocation4 + $0x728] sm:$0xff]  }
 0x4b1   : > { %v18623_v3 = vpop.f32.mrf.mxu0  ;;  %15447 = vmatprep.subr.bf16.mxu1 %v16505_v19 }
 0x4b2   : > { %v6220_v35 = vpop.f32.mrf.mxu1  ;;  %v18625_v43 = vadd.f32 %v15202_v23, %v6011_v12  ;;  %15448 = vmatpush3.bf16.msra.mxu1 %v16505_v19 }
 0x4b3   : > { %v15161_v45 = vpop.f32.mrf.mxu0  ;;  %15436 = vmatmul.mubr.bf16.gmra.mxu0 %v18493_v13 }
 0x4b4   : > { %v6014_v1 = vadd.f32 %v15161_v45, %v18549_v2  ;;  %15439 = vmatprep.mubr.bf16.mxu0 %v18518_v61  ;;  %v15210_v40 = vpop.f32.mrf.mxu1 }
 0x4b5   : > { %v5925_v30 = vpop.f32.mrf.mxu0 }
 0x4b6   : > { %v6012_v28 = vadd.f32 %v5925_v30, %v18552_v47  ;;  %v18631_v16 = vpop.f32.mrf.mxu1  ;;  %v18633_v50 = vadd.f32 %v15205_v14, %v6014_v1 }
 0x4b7   : > { %20776 = vst [vmem:[#allocation13_spill] sm:$0xff] %v18631_v16  ;;  %v15162_v23 = vpop.f32.mrf.mxu0 }
 0x4b8   : > { %v6015_v13 = vadd.f32 %v15162_v23, %v18556_v54  ;;  %v15213_v2 = vpop.f32.mrf.mxu1  ;;  %v18636_v57 = vadd.f32 %v6204_v52, %v6012_v28  ;;  %v16506_v23 = vld [vmem:[#allocation4 + $0x720] sm:$0xff]  }
 0x4b9   : > { %v18638_v61 = vpop.f32.mrf.mxu0  ;;  %15449 = vmatprep.subr.bf16.mxu1 %v16506_v23 }
 0x4ba   : > { %v6236_v39 = vpop.f32.mrf.mxu1  ;;  %v18640_v0 = vadd.f32 %v15206_v48, %v6015_v13  ;;  %15450 = vmatpush3.bf16.msra.mxu1 %v16506_v23 }
 0x4bb   : > { %v15165_v47 = vpop.f32.mrf.mxu0  ;;  %15440 = vmatmul.mubr.bf16.gmra.mxu0 %v7468_v7  ;;  %v16507_v7 = vld [vmem:[#allocation4 + $0x6f8] sm:$0xff]  }
 0x4bc   : > { %v6018_v14 = vadd.f32 %v15165_v47, %v18561_v56  ;;  %v15214_v12 = vpop.f32.mrf.mxu1  ;;  %15487 = vmatprep.subr.bf16.mxu0 %v16507_v7 }
 0x4bd   : > { %v5941_v45 = vpop.f32.mrf.mxu0  ;;  %15488 = vmatpush3.bf16.msra.mxu0 %v16507_v7 }
 0x4be   : > { %v6016_v1 = vadd.f32 %v5941_v45, %v18563_v59  ;;  %v18644_v54 = vpop.f32.mrf.mxu1  ;;  %v18646_v52 = vadd.f32 %v15209_v15, %v6018_v14  ;;  %v16508_v14 = vld [vmem:[#allocation4 + $0x6f0] sm:$0xff]  }
 0x4bf   : > { %20777 = vst [vmem:[#allocation39_spill] sm:$0xff] %v18644_v54  ;;  %v15166_v29 = vpop.f32.mrf.mxu0  ;;  %15489 = vmatprep.subr.bf16.mxu0 %v16508_v14 }
 0x4c0   : > { %v6019_v53 = vadd.f32 %v15166_v29, %v18567_v11  ;;  %v15217_v48 = vpop.f32.mrf.mxu1  ;;  %v18649_v44 = vadd.f32 %v6220_v35, %v6016_v1 }
 0x4c1   : > { %v18651_v30 = vpop.f32.mrf.mxu0  ;;  %15490 = vmatpush3.bf16.msra.mxu0 %v16508_v14 }
 0x4c2   : > { %v6252_v28 = vpop.f32.mrf.mxu1  ;;  %v18653_v56 = vadd.f32 %v15210_v40, %v6019_v53 }
 0x4c3   : > { %v15169_v13 = vpop.f32.mrf.mxu0 }
 0x4c4   : > { %v6022_v59 = vadd.f32 %v15169_v13, %v18571_v49  ;;  %v15218_v19 = vpop.f32.mrf.mxu1  ;;  %v16509_v49 = vld [vmem:[#allocation4 + $0x718] sm:$0xff]  }
 0x4c5   : > { %v5957_v15 = vpop.f32.mrf.mxu0  ;;  %15451 = vmatprep.subr.bf16.mxu1 %v16509_v49 }
 0x4c6   : > { %v6020_v11 = vadd.f32 %v5957_v15, %v18573_v46  ;;  %v18657_v35 = vpop.f32.mrf.mxu1  ;;  %v18659_v47 = vadd.f32 %v15213_v2, %v6022_v59  ;;  %v16510_v46 = vld [vmem:[#allocation4 + $0x6e8] sm:$0xff]   ;;  %15452 = vmatpush3.bf16.msra.mxu1 %v16509_v49 }
 0x4c7   : > { %20778 = vst [vmem:[#allocation21_spill] sm:$0xff] %v18657_v35  ;;  %v15170_v40 = vpop.f32.mrf.mxu0  ;;  %15491 = vmatprep.subr.bf16.mxu0 %v16510_v46 }
 0x4c8   : > { %v6023_v45 = vadd.f32 %v15170_v40, %v18577_v31  ;;  %v15221_v1 = vpop.f32.mrf.mxu1  ;;  %v18662_v29 = vadd.f32 %v6236_v39, %v6020_v11  ;;  %15492 = vmatpush3.bf16.msra.mxu0 %v16510_v46  ;;  %v16511_v40 = vld [vmem:[#allocation4 + $0x6e0] sm:$0xff]  }
 0x4c9   : > { %v18664_v53 = vpop.f32.mrf.mxu0  ;;  %15493 = vmatprep.subr.bf16.mxu0 %v16511_v40 }
 0x4ca   : > { %20779 = vst [vmem:[#allocation26_spill] sm:$0xff] %v18664_v53  ;;  %v6268_v23 = vpop.f32.mrf.mxu1  ;;  %v18666_v7 = vadd.f32 %v15214_v12, %v6023_v45 }
 0x4cb   : > { %v15173_v13 = vpop.f32.mrf.mxu0 }
 0x4cc   : > { %v6026_v2 = vadd.f32 %v15173_v13, %v18581_v37  ;;  %v15222_v59 = vpop.f32.mrf.mxu1  ;;  %15494 = vmatpush3.bf16.msra.mxu0 %v16511_v40  ;;  %v16513_v13 = vld [vmem:[#allocation4 + $0x6d8] sm:$0xff]   ;;  %v16514_v40 = vld [vmem:[#allocation4 + $0x6d0] sm:$0xff]  }
 0x4cd   : > { %v5973_v31 = vpop.f32.mrf.mxu0  ;;  %15495 = vmatprep.subr.bf16.mxu0 %v16513_v13 }
 0x4ce   : > { %v6024_v39 = vadd.f32 %v5973_v31, %v18583_v6  ;;  %v18670_v15 = vpop.f32.mrf.mxu1  ;;  %v18672_v11 = vadd.f32 %v15217_v48, %v6026_v2  ;;  %v16512_v31 = vld [vmem:[#allocation4 + $0x710] sm:$0xff]  }
 0x4cf   : > { %20780 = vst [vmem:[#allocation47_spill] sm:$0xff] %v18670_v15  ;;  %v15174_v14 = vpop.f32.mrf.mxu0  ;;  %15453 = vmatprep.subr.bf16.mxu1 %v16512_v31 }
 0x4d0   : > { %v6027_v12 = vadd.f32 %v15174_v14, %v18587_v25  ;;  %v18675_v45 = vpop.f32.mrf.mxu1  ;;  %v18677_v35 = vadd.f32 %v6252_v28, %v6024_v39  ;;  %15496 = vmatpush3.bf16.msra.mxu0 %v16513_v13  ;;  %15454 = vmatpush3.bf16.msra.mxu1 %v16512_v31  ;;  %v16516_v13 = vld [vmem:[#allocation4 + $0x6c8] sm:$0xff]  }
 0x4d1   : > { %v18679_v49 = vpop.f32.mrf.mxu0  ;;  %15497 = vmatprep.subr.bf16.mxu0 %v16514_v40 }
 0x4d2   : > { %20781 = vst [vmem:[#allocation69_spill] sm:$0xff] %v18679_v49  ;;  %v18681_v37 = vpop.f32.mrf.mxu1  ;;  %v18683_v46 = vadd.f32 %v15218_v19, %v6027_v12 }
 0x4d3   : > { %v15177_v6 = vpop.f32.mrf.mxu0 }
 0x4d4   : > { %v6030_v48 = vadd.f32 %v15177_v6, %v18591_v24  ;;  %v18686_v2 = vpop.f32.mrf.mxu1  ;;  %15498 = vmatpush3.bf16.msra.mxu0 %v16514_v40 }
 0x4d5   : > { %v5989_v25 = vpop.f32.mrf.mxu0  ;;  %15499 = vmatprep.subr.bf16.mxu0 %v16516_v13 }
 0x4d6   : > { %v6028_v28 = vadd.f32 %v5989_v25, %v18593_v8  ;;  %v18689_v39 = vpop.f32.mrf.mxu1  ;;  %v18691_v14 = vadd.f32 %v15221_v1, %v6030_v48  ;;  %v16515_v1 = vld [vmem:[#allocation4 + $0x708] sm:$0xff]  }
 0x4d7   : > { %v15178_v19 = vpop.f32.mrf.mxu0  ;;  %15455 = vmatprep.subr.bf16.mxu1 %v16515_v1 }
 0x4d8   : > { %v6031_v12 = vadd.f32 %v15178_v19, %v18597_v41  ;;  %v18694_v15 = vpop.f32.mrf.mxu1  ;;  %v18696_v24 = vadd.f32 %v6268_v23, %v6028_v28  ;;  %15456 = vmatpush3.bf16.msra.mxu1 %v16515_v1  ;;  %15500 = vmatpush3.bf16.msra.mxu0 %v16516_v13  ;;  %v16518_v19 = vld [vmem:[#allocation4 + $0x6c0] sm:$0xff]  }
 0x4d9   : > { %v18698_v6 = vpop.f32.mrf.mxu0  ;;  %15501 = vmatprep.subr.bf16.mxu0 %v16518_v19  ;;  %v16517_v1 = vld [vmem:[#allocation4 + $0x700] sm:$0xff]  }
 0x4da   : > { %20782 = vst [vmem:[#allocation61_spill] sm:$0xff] %v18698_v6  ;;  %v18700_v49 = vpop.f32.mrf.mxu1  ;;  %v18702_v8 = vadd.f32 %v15222_v59, %v6031_v12  ;;  %15457 = vmatprep.subr.bf16.mxu1 %v16517_v1 }
 0x4db   : > { %v15241_v48 = vpop.f32.mrf.mxu0 }
 0x4dc   : > { %v18705_v31 = vadd.f32 %v15241_v48, %v18605_v63  ;;  %v18707_v25 = vpop.f32.mrf.mxu1  ;;  %15502 = vmatpush3.bf16.msra.mxu0 %v16518_v19  ;;  %15458 = vmatpush3.bf16.msra.mxu1 %v16517_v1  ;;  %v18738_v19 = vld [vmem:[#allocation4 + $0x778] sm:$0xff]  }
 0x4dd   : > { %v6451_v41 = vpop.f32.mrf.mxu0  ;;  %20786 = vst [vmem:[#allocation11_spill] sm:$0xff] %v18738_v19  ;;  %15531 = vmatprep.subr.bf16.mxu1 %v18738_v19 }
 0x4de   : > { %v18710_v23 = vadd.f32 %v6451_v41, %v18608_v36  ;;  %v18712_v28 = vpop.f32.mrf.mxu1 }
 0x4df   : > { %v15242_v59 = vpop.f32.mrf.mxu0 }
 0x4e0   : > { %v18715_v40 = vadd.f32 %v15242_v59, %v18612_v27  ;;  %v18717_v12 = vpop.f32.mrf.mxu1 }
 0x4e1   : > { %v18719_v63 = vpop.f32.mrf.mxu0 }
 0x4e2   : > { %v18721_v48 = vpop.f32.mrf.mxu1 }
 0x4e3   : > { %v15245_v6 = vpop.f32.mrf.mxu0 }
 0x4e4   : > { %v18724_v36 = vadd.f32 %v15245_v6, %v18618_v33  ;;  %v18726_v41 = vpop.f32.mrf.mxu1 }
 0x4e5   : > { %20783 = vst [vmem:[#allocation53_spill] sm:$0xff] %v18726_v41  ;;  %v6467_v13 = vpop.f32.mrf.mxu0 }
 0x4e6   : > { %v18729_v27 = vadd.f32 %v6467_v13, %v18621_v5  ;;  %v18731_v59 = vpop.f32.mrf.mxu1 }
 0x4e7   : > { %20784 = vst [vmem:[#allocation37_spill] sm:$0xff] %v18731_v59  ;;  %v15246_v62 = vpop.f32.mrf.mxu0 }
 0x4e8   : > { %v18734_v42 = vadd.f32 %v15246_v62, %v18625_v43  ;;  %v18736_v54 = vpop.f32.mrf.mxu1 }
 0x4e9   : > { %20785 = vst [vmem:[#allocation51_spill] sm:$0xff] %v18736_v54  ;;  %v18740_v33 = vpop.f32.mrf.mxu0 }
 0x4ea   : > { %v18742_v6 = vpop.f32.mrf.mxu1 }
 0x4eb   : > { %20787 = vst [vmem:[#allocation72_spill] sm:$0xff] %v18742_v6  ;;  %v15249_v1 = vpop.f32.mrf.mxu0 }
 0x4ec   : > { %v18746_v5 = vadd.f32 %v15249_v1, %v18633_v50  ;;  %v18748_v13 = vpop.f32.mrf.mxu1 }
 0x4ed   : > { %20788 = vst [vmem:[#allocation40_spill] sm:$0xff] %v18748_v13  ;;  %v6483_v9 = vpop.f32.mrf.mxu0 }
 0x4ee   : > { %v18751_v62 = vadd.f32 %v6483_v9, %v18636_v57  ;;  %v18753_v43 = vpop.f32.mrf.mxu1 }
 0x4ef   : > { %20789 = vst [vmem:[#allocation64_spill] sm:$0xff] %v18753_v43  ;;  %v15250_v55 = vpop.f32.mrf.mxu0 }
 0x4f0   : > { %v18756_v53 = vadd.f32 %v15250_v55, %v18640_v0  ;;  %v18758_v54 = vpop.f32.mrf.mxu1 }
 0x4f1   : > { %20791 = vst [vmem:[#allocation15_spill] sm:$0xff] %v18758_v54  ;;  %v18760_v6 = vpop.f32.mrf.mxu0 }
 0x4f2   : > { %20790 = vst [vmem:[#allocation50_spill] sm:$0xff] %v18756_v53  ;;  %v18762_v19 = vpop.f32.mrf.mxu1 }
 0x4f3   : > { %20792 = vst [vmem:[#allocation65_spill] sm:$0xff] %v18762_v19  ;;  %v15253_v50 = vpop.f32.mrf.mxu0 }
 0x4f4   : > { %v18765_v1 = vadd.f32 %v15253_v50, %v18646_v52  ;;  %v18767_v13 = vpop.f32.mrf.mxu1  ;;  %v18783_v50 = vld [vmem:[#allocation4 + $0x7b8] sm:$0xff]  }
 0x4f5   : > { %20794 = vst [vmem:[#allocation20_spill] sm:$0xff] %v18767_v13  ;;  %v6499_v9 = vpop.f32.mrf.mxu0  ;;  %20801 = vst [vmem:[#allocation67_spill] sm:$0xff] %v18783_v50  ;;  %15575 = vmatprep.subr.bf16.mxu0 %v18783_v50 }
 0x4f6   : > { %20793 = vst [vmem:[#allocation46_spill] sm:$0xff] %v18765_v1  ;;  %v18770_v57 = vadd.f32 %v6499_v9, %v18649_v44  ;;  %v18772_v43 = vpop.f32.mrf.mxu1 }
 0x4f7   : > { %20796 = vst [vmem:[#allocation22_spill] sm:$0xff] %v18772_v43  ;;  %v15254_v55 = vpop.f32.mrf.mxu0 }
 0x4f8   : > { %20795 = vst [vmem:[#allocation10_spill] sm:$0xff] %v18770_v57  ;;  %v18775_v0 = vadd.f32 %v15254_v55, %v18653_v56  ;;  %v18777_v54 = vpop.f32.mrf.mxu1 }
 0x4f9   : > { %20798 = vst [vmem:[#allocation49_spill] sm:$0xff] %v18777_v54  ;;  %v18779_v16 = vpop.f32.mrf.mxu0 }
 0x4fa   : > { %20797 = vst [vmem:[#allocation28_spill] sm:$0xff] %v18775_v0  ;;  %20799 = vst [vmem:[#allocation66_spill] sm:$0xff] %v18779_v16  ;;  %v18781_v19 = vpop.f32.mrf.mxu1 }
 0x4fb   : > { %20800 = vst [vmem:[#allocation29_spill] sm:$0xff] %v18781_v19  ;;  %v15257_v52 = vpop.f32.mrf.mxu0 }
 0x4fc   : > { %v18786_v13 = vadd.f32 %v15257_v52, %v18659_v47  ;;  %v18788_v44 = vpop.f32.mrf.mxu1 }
 0x4fd   : > { %20803 = vst [vmem:[#allocation19_spill] sm:$0xff] %v18788_v44  ;;  %v6515_v9 = vpop.f32.mrf.mxu0 }
 0x4fe   : > { %20802 = vst [vmem:[#allocation12_spill] sm:$0xff] %v18786_v13  ;;  %v18792_v56 = vadd.f32 %v6515_v9, %v18662_v29  ;;  %v18794_v54 = vpop.f32.mrf.mxu1 }
 0x4ff   : > { %v15258_v55 = vpop.f32.mrf.mxu0  ;;  %20805 = vst [vmem:[#allocation41_spill] sm:$0xff] %v18794_v54 }
 0x500   : > { %20804 = vst [vmem:[#allocation23_spill] sm:$0xff] %v18792_v56  ;;  %v18797_v43 = vadd.f32 %v15258_v55, %v18666_v7  ;;  %v18801_v57 = vpop.f32.mrf.mxu1 }
 0x501   : > { %v18799_v19 = vpop.f32.mrf.mxu0  ;;  %20808 = vst [vmem:[#allocation68_spill] sm:$0xff] %v18801_v57 }
 0x502   : > { %20806 = vst [vmem:[#allocation38_spill] sm:$0xff] %v18797_v43  ;;  %20807 = vst [vmem:[#allocation42_spill] sm:$0xff] %v18799_v19  ;;  %v18809_v9 = vpop.f32.mrf.mxu1 }
 0x503   : > { %v15261_v0 = vpop.f32.mrf.mxu0  ;;  %20811 = vst [vmem:[#allocation70_spill] sm:$0xff] %v18809_v9 }
 0x504   : > { %v18804_v47 = vadd.f32 %v15261_v0, %v18672_v11  ;;  %v18816_v43 = vpop.f32.mrf.mxu1 }
 0x505   : > { %v6531_v52 = vpop.f32.mrf.mxu0  ;;  %20814 = vst [vmem:[#allocation71_spill] sm:$0xff] %v18816_v43 }
 0x506   : > { %20809 = vst [vmem:[#allocation54_spill] sm:$0xff] %v18804_v47  ;;  %v18807_v44 = vadd.f32 %v6531_v52, %v18677_v35  ;;  %v18824_v35 = vpop.f32.mrf.mxu1 }
 0x507   : > { %v15262_v29 = vpop.f32.mrf.mxu0  ;;  %20817 = vst [vmem:[#allocation58_spill] sm:$0xff] %v18824_v35 }
 0x508   : > { %20810 = vst [vmem:[#allocation27_spill] sm:$0xff] %v18807_v44  ;;  %v18812_v54 = vadd.f32 %v15262_v29, %v18683_v46  ;;  %v15373_v29 = vpop.f32.mrf.mxu1 }
 0x509   : > { %v18814_v7 = vpop.f32.mrf.mxu0 }
 0x50a   : > { %20812 = vst [vmem:[#allocation16_spill] sm:$0xff] %v18812_v54  ;;  %20813 = vst [vmem:[#allocation43_spill] sm:$0xff] %v18814_v7  ;;  %v7288_v7 = vpop.f32.mrf.mxu1 }
 0x50b   : > { %v15265_v55 = vpop.f32.mrf.mxu0 }
 0x50c   : > { %v18819_v57 = vadd.f32 %v15265_v55, %v18691_v14  ;;  %v18831_v14 = vpop.f32.mrf.mxu1 }
 0x50d   : > { %v6547_v11 = vpop.f32.mrf.mxu0 }
 0x50e   : > { %20815 = vst [vmem:[#allocation31_spill] sm:$0xff] %v18819_v57  ;;  %v18822_v0 = vadd.f32 %v6547_v11, %v18696_v24  ;;  %v18835_v24 = vpop.f32.mrf.mxu1 }
 0x50f   : > { %v15266_v52 = vpop.f32.mrf.mxu0 }
 0x510   : > { %20816 = vst [vmem:[#allocation30_spill] sm:$0xff] %v18822_v0  ;;  %v18827_v9 = vadd.f32 %v15266_v52, %v18702_v8  ;;  %v18841_v8 = vpop.f32.mrf.mxu1 }
 0x511   : > { %v18829_v46 = vpop.f32.mrf.mxu0 }
 0x512   : > { %20818 = vst [vmem:[#allocation73_spill] sm:$0xff] %v18827_v9  ;;  %20819 = vst [vmem:[#allocation56_spill] sm:$0xff] %v18829_v46  ;;  %v18847_v0 = vpop.f32.mrf.mxu1 }
 0x513   : > { %v15329_v54 = vpop.f32.mrf.mxu0 }
 0x514   : > { %v18853_v19 = vpop.f32.mrf.mxu1 }
 0x515   : > { %v7009_v44 = vpop.f32.mrf.mxu0 }
 0x516   : > { %v18859_v1 = vpop.f32.mrf.mxu1 }
 0x517   : > { %v15330_v43 = vpop.f32.mrf.mxu0  ;;  %20824 = vst [vmem:[#allocation55_spill] sm:$0xff] %v18859_v1 }
 0x518   : > { %v18865_v50 = vpop.f32.mrf.mxu1 }
 0x519   : > { %v7012_v47 = vpop.f32.mrf.mxu0 }
 0x51b   : > { %v15333_v55 = vpop.f32.mrf.mxu0 }
 0x51d   : > { %v18833_v57 = vpop.f32.mrf.mxu0 }
 0x51f   : > { %v18837_v11 = vpop.f32.mrf.mxu0 }
 0x521   : > { %v18839_v35 = vpop.f32.mrf.mxu0 }
 0x523   : > { %v18843_v52 = vpop.f32.mrf.mxu0 }
 0x525   : > { %v18845_v9 = vpop.f32.mrf.mxu0 }
 0x527   : > { %v18849_v46 = vpop.f32.mrf.mxu0 }
 0x528   : > { %20820 = vst [vmem:[#allocation52_spill] sm:$0xff] %v18849_v46  ;;  %v18871_v46 = vpop.f32.mrf.mxu1 }
 0x529   : > { %v18851_v56 = vpop.f32.mrf.mxu0  ;;  %20829 = vst [vmem:[#allocation59_spill] sm:$0xff] %v18871_v46 }
 0x52a   : > { %20821 = vst [vmem:[#allocation45_spill] sm:$0xff] %v18851_v56 }
 0x52b   : > { %v18855_v13 = vpop.f32.mrf.mxu0 }
 0x52c   : > { %20822 = vst [vmem:[#allocation74_spill] sm:$0xff] %v18855_v13  ;;  %v18877_v13 = vpop.f32.mrf.mxu1 }
 0x52d   : > { %v18857_v16 = vpop.f32.mrf.mxu0  ;;  %20832 = vst [vmem:[#allocation77_spill] sm:$0xff] %v18877_v13 }
 0x52e   : > { %20823 = vst [vmem:[#allocation18_spill] sm:$0xff] %v18857_v16 }
 0x52f   : > { %v18861_v20 = vpop.f32.mrf.mxu0 }
 0x530   : > { %20825 = vst [vmem:[#allocation75_spill] sm:$0xff] %v18861_v20  ;;  %v18885_v20 = vpop.f32.mrf.mxu1 }
 0x531   : > { %v18863_v21 = vpop.f32.mrf.mxu0 }
 0x532   : > { %20826 = vst [vmem:[#allocation17_spill] sm:$0xff] %v18863_v21  ;;  %v5646_v21 = vadd.f32 %v18526_v58, %v18536_v4  ;;  %v5662_v58 = vadd.f32 %v18532_v60, %v18547_v10 }
 0x533   : > { %v18867_v59 = vpop.f32.mrf.mxu0 }
 0x534   : > { %20827 = vst [vmem:[#allocation14_spill] sm:$0xff] %v18867_v59 }
 0x535   : > { %v18869_v41 = vpop.f32.mrf.mxu0 }
 0x536   : > { %20828 = vst [vmem:[#allocation76_spill] sm:$0xff] %v18869_v41  ;;  %v6005_v41 = vadd.f32 %v18610_v22, %v5646_v21  ;;  %v6841_v21 = vadd.f32 %v18681_v37, %v18710_v23  ;;  %v6009_v22 = vadd.f32 %v18623_v3, %v5662_v58  ;;  %v18919_v3 = vld [vmem:[#allocation6 + $0x2] ss:$0 sm:$0xff]  ;;  %v6851_v58 = vadd.f32 %v18717_v12, %v18746_v5 }
 0x537   : > { %v18873_v56 = vpop.f32.mrf.mxu0  ;;  %v6849_v12 = vadd.f32 %v18721_v48, %v18751_v62  ;;  %v16524_v62 = vld [vmem:[#allocation4 + $0x7b0] sm:$0xff]  }
 0x538   : > { %20830 = vst [vmem:[#allocation57_spill] sm:$0xff] %v18873_v56  ;;  %v18892_v56 = vpop.f32.mrf.mxu1  ;;  %v6284_v13 = vadd.f32 %v18595_v51, %v6005_v41  ;;  %v7120_v51 = vadd.f32 %v7009_v44, %v6841_v21 }
 0x539   : > { %v18875_v53 = vpop.f32.mrf.mxu0 }
 0x53a   : > { %20831 = vst [vmem:[#allocation62_spill] sm:$0xff] %v18875_v53  ;;  %v7399_v44 = vadd.f32 %v7288_v7, %v7120_v51 }
 0x53b   : > { %v18879_v16 = vpop.f32.mrf.mxu0 }
 0x53c   : > { %20833 = vst [vmem:[#allocation33_spill] sm:$0xff] %v18879_v16 }
 0x53d   : > { %v18881_v1 = vpop.f32.mrf.mxu0 }
 0x53e   : > { %20834 = vst [vmem:[#allocation32_spill] sm:$0xff] %v18881_v1  ;;  %v6843_v1 = vadd.f32 %v18675_v45, %v18705_v31  ;;  %v6844_v45 = vadd.f32 %v18686_v2, %v18715_v40  ;;  %v5678_v2 = vadd.f32 %v18543_v17, %v18558_v38 }
 0x53f   : > { %v18887_v59 = vpop.f32.mrf.mxu0 }
 0x540   : > { %20835 = vst [vmem:[#allocation34_spill] sm:$0xff] %v18887_v59  ;;  %v6563_v59 = vadd.f32 %v18719_v63, %v6284_v13  ;;  %v7122_v16 = vadd.f32 %v15329_v54, %v6843_v1  ;;  %v7123_v60 = vadd.f32 %v15330_v43, %v6844_v45  ;;  %v6288_v54 = vadd.f32 %v18603_v34, %v6009_v22 }
 0x541   : > { %v18890_v46 = vpop.f32.mrf.mxu0  ;;  %v6847_v13 = vadd.f32 %v18694_v15, %v18724_v36  ;;  %v6848_v36 = vadd.f32 %v18707_v25, %v18734_v42 }
 0x542   : > { %20836 = vst [vmem:[#allocation35_spill] sm:$0xff] %v18890_v46  ;;  %v18907_v46 = vpop.f32.mrf.mxu1  ;;  %v6842_v10 = vadd.f32 %v18689_v39, %v6563_v59  ;;  %v7401_v63 = vadd.f32 %v15373_v29, %v7122_v16  ;;  %v6567_v40 = vadd.f32 %v18740_v33, %v6288_v54  ;;  %v6845_v16 = vadd.f32 %v18700_v49, %v18729_v27 }
 0x543   : > { %v18894_v53 = vpop.f32.mrf.mxu0  ;;  %v7126_v39 = vadd.f32 %v15333_v55, %v6847_v13  ;;  %v6013_v29 = vadd.f32 %v18638_v61, %v5678_v2  ;;  %v7127_v7 = vadd.f32 %v18837_v11, %v6848_v36  ;;  %v20840_v13 = vld [vmem:[#allocation55_spill] sm:$0xff] }
 0x544   : > { %20837 = vst [vmem:[#allocation60_spill] sm:$0xff] %v18894_v53  ;;  %v18917_v41 = vpop.f32.mrf.mxu1  ;;  %v7121_v23 = vadd.f32 %v7012_v47, %v6842_v10  ;;  %v7402_v47 = vadd.f32 %v18831_v14, %v7123_v60  ;;  %v7124_v15 = vadd.f32 %v18833_v57, %v6845_v16  ;;  %v6846_v14 = vadd.f32 %v18712_v28, %v6567_v40 }
 0x545   : > { %v18901_v4 = vpop.f32.mrf.mxu0  ;;  %v7405_v42 = vadd.f32 %v18841_v8, %v7126_v39  ;;  %v6292_v25 = vadd.f32 %v18616_v32, %v6013_v29  ;;  %v5694_v8 = vadd.f32 %v18554_v26, %v18569_v18  ;;  %v7406_v60 = vadd.f32 %v18853_v19, %v7127_v7  ;;  %v20838_v26 = vld [vmem:[#allocation50_spill] sm:$0xff]  ;;  %v20839_v18 = vld [vmem:[#allocation53_spill] sm:$0xff] }
 0x546   : > { %v18934_v17 = vpop.f32.mrf.mxu1  ;;  %v7400_v33 = vadd.f32 %v18835_v24, %v7121_v23  ;;  %v7403_v24 = vadd.f32 %v18847_v0, %v7124_v15  ;;  %v7125_v11 = vadd.f32 %v18839_v35, %v6846_v14  ;;  %v7130_v0 = vadd.f32 %v18843_v52, %v6851_v58  ;;  %v20846_v15 = vld [vmem:[#allocation13_spill] sm:$0xff] }
 0x547   : > { %v18909_v53 = vpop.f32.mrf.mxu0  ;;  %v6571_v32 = vadd.f32 %v18760_v6, %v6292_v25  ;;  %v6017_v54 = vadd.f32 %v18651_v30, %v5694_v8  ;;  %v6852_v6 = vadd.f32 %v20839_v18, %v20838_v26  ;;  %v20842_v30 = vld [vmem:[#allocation37_spill] sm:$0xff]  ;;  %v20854_v8 = vld [vmem:[#allocation72_spill] sm:$0xff] }
 0x548   : > { %v18945_v21 = vpop.f32.mrf.mxu1  ;;  %v7409_v39 = vadd.f32 %v18865_v50, %v7130_v0 }
 0x549   : > { %v18913_v31 = vpop.f32.mrf.mxu0  ;;  %v6296_v36 = vadd.f32 %v20846_v15, %v6017_v54 }
 0x54a   : > { %v18964_v23 = vpop.f32.mrf.mxu1 }
 0x54b   : > { %v15417_v37 = vpop.f32.mrf.mxu0 }
 0x54c   : > { %v7680_v1 = vadd.f32 %v15417_v37, %v7401_v63  ;;  %v7128_v37 = vadd.f32 %v18845_v9, %v6849_v12  ;;  %v6850_v9 = vadd.f32 %v20842_v30, %v6571_v32 }
 0x54d   : > { %v7567_v34 = vpop.f32.mrf.mxu0 }
 0x54e   : > { %v7716_v59 = vadd.f32 %v18919_v3, %v7680_v1  ;;  %v7678_v43 = vadd.f32 %v7567_v34, %v7399_v44  ;;  %v7404_v1 = vadd.f32 %v20840_v13, %v7125_v11  ;;  %v20841_v44 = vld [vmem:[#allocation52_spill] sm:$0xff]  ;;  %v20852_v11 = vld [vmem:[#allocation74_spill] sm:$0xff] }
 0x54f   : > { %v15418_v38 = vpop.f32.mrf.mxu0  ;;  %v7131_v2 = vadd.f32 %v20841_v44, %v6852_v6  ;;  %v20857_v6 = vld [vmem:[#allocation18_spill] sm:$0xff]  ;;  %v20859_v13 = vld [vmem:[#allocation40_spill] sm:$0xff] }
 0x550   : > { %7744 = vst [vmem:[#allocation2 + $0x10] sm:$0xff] %v7716_v59  ;;  %v7714_v49 = vadd.f32 %v18919_v3, %v7678_v43  ;;  %v7681_v27 = vadd.f32 %v15418_v38, %v7402_v47  ;;  %v20844_v43 = vld [vmem:[#allocation63_spill] sm:$0xff]  ;;  %v20845_v47 = vld [vmem:[#allocation24_spill] sm:$0xff]  ;;  %v20847_v38 = vld [vmem:[#allocation46_spill] sm:$0xff] }
 0x551   : > { %v7570_v55 = vpop.f32.mrf.mxu0  ;;  %v5710_v29 = vadd.f32 %v20845_v47, %v20844_v43 }
 0x552   : > { %7742 = vst [vmem:[#allocation2] sm:$0xff] %v7714_v49  ;;  %v7717_v61 = vadd.f32 %v18919_v3, %v7681_v27  ;;  %v7679_v57 = vadd.f32 %v7570_v55, %v7400_v33  ;;  %v18979_v33 = vpop.f32.mrf.mxu1  ;;  %v20849_v55 = vld [vmem:[#allocation59_spill] sm:$0xff] }
 0x553   : > { %v15421_v22 = vpop.f32.mrf.mxu0  ;;  %v7407_v14 = vadd.f32 %v20849_v55, %v7128_v37  ;;  %v20864_v55 = vld [vmem:[#allocation39_spill] sm:$0xff] }
 0x554   : > { %7745 = vst [vmem:[#allocation2 + $0x18] sm:$0xff] %v7717_v61  ;;  %v7715_v28 = vadd.f32 %v18919_v3, %v7679_v57  ;;  %v7684_v51 = vadd.f32 %v15421_v22, %v7405_v42  ;;  %v18950_v45 = vpack.c.bf16 %v7717_v61, %v7716_v59  ;;  %v20843_v59 = vld [vmem:[#allocation67_spill] sm:$0xff]  ;;  %v20850_v57 = vld [vmem:[#allocation45_spill] sm:$0xff]  ;;  %v20851_v22 = vld [vmem:[#allocation66_spill] sm:$0xff]  ;;  %v18998_v44 = vpop.f32.mrf.mxu1 }
 0x555   : > { %v7583_v5 = vpop.f32.mrf.mxu0  ;;  %v16526_v61 = vld [vmem:[#allocation4 + $0x7a8] sm:$0xff]   ;;  %v7129_v42 = vadd.f32 %v20850_v57, %v6850_v9  ;;  %v20865_v57 = vld [vmem:[#allocation12_spill] sm:$0xff] }
 0x556   : > { %7743 = vst [vmem:[#allocation2 + $0x8] sm:$0xff] %v7715_v28  ;;  %v7720_v35 = vadd.f32 %v18919_v3, %v7684_v51  ;;  %v7682_v10 = vadd.f32 %v7583_v5, %v7403_v24  ;;  %v7798_v63 = vpack.c.bf16 %v7715_v28, %v7714_v49  ;;  %v20848_v49 = vld [vmem:[#allocation51_spill] sm:$0xff]  ;;  %v6575_v24 = vadd.f32 %v20851_v22, %v6296_v36  ;;  %v20853_v51 = vld [vmem:[#allocation10_spill] sm:$0xff]  ;;  %v20855_v5 = vld [vmem:[#allocation77_spill] sm:$0xff] }
 0x557   : > { %v15422_v48 = vpop.f32.mrf.mxu0  ;;  %v6855_v27 = vadd.f32 %v20848_v49, %v20847_v38  ;;  %v6853_v32 = vadd.f32 %v20854_v8, %v20853_v51  ;;  %v20862_v49 = vld [vmem:[#allocation44_spill] sm:$0xff]  ;;  %v20868_v8 = vld [vmem:[#allocation42_spill] sm:$0xff] }
 0x558   : > { %7748 = vst [vmem:[#allocation2 + $0x30] sm:$0xff] %v7720_v35  ;;  %v7718_v19 = vadd.f32 %v18919_v3, %v7682_v10  ;;  %v7685_v52 = vadd.f32 %v15422_v48, %v7406_v60  ;;  %15503 = vmatprep.mubr.bf16.mxu0 %v7798_v63  ;;  %v7410_v60 = vadd.f32 %v20855_v5, %v7131_v2 }
 0x559   : > { %v7586_v40 = vpop.f32.mrf.mxu0  ;;  %15504 = vmatmul.mubr.bf16.vlgmr.msra.gmra.mxu0 %v18950_v45  ;;  %v7134_v28 = vadd.f32 %v20852_v11, %v6855_v27  ;;  %v7132_v48 = vadd.f32 %v20857_v6, %v6853_v32  ;;  %v20863_v27 = vld [vmem:[#allocation25_spill] sm:$0xff] }
 0x55a   : > { %7746 = vst [vmem:[#allocation2 + $0x20] sm:$0xff] %v7718_v19  ;;  %v7721_v16 = vadd.f32 %v18919_v3, %v7685_v52  ;;  %v7683_v34 = vadd.f32 %v7586_v40, %v7404_v1  ;;  %15576 = vmatpush3.bf16.msra.mxu0 %v20843_v59  ;;  %v20858_v52 = vld [vmem:[#allocation28_spill] sm:$0xff]  ;;  %v16527_v40 = vld [vmem:[#allocation4 + $0x7a0] sm:$0xff]  }
 0x55b   : > { %v15425_v7 = vpop.f32.mrf.mxu0  ;;  %15577 = vmatprep.subr.bf16.mxu0 %v16524_v62  ;;  %v6856_v1 = vadd.f32 %v20859_v13, %v20858_v52  ;;  %v7831_v43 = vld [vmem:[#allocation2 + $0x11] sm:$0xff]  ;;  %v7413_v36 = vadd.f32 %v18892_v56, %v7134_v28 }
 0x55c   : > { %7749 = vst [vmem:[#allocation2 + $0x38] sm:$0xff] %v7721_v16  ;;  %v7719_v50 = vadd.f32 %v18919_v3, %v7683_v34  ;;  %v7688_v25 = vadd.f32 %v15425_v7, %v7409_v39  ;;  %v18984_v58 = vpack.c.bf16 %v7721_v16, %v7720_v35  ;;  %v20856_v35 = vld [vmem:[#allocation26_spill] sm:$0xff]  ;;  %v20861_v34 = vld [vmem:[#allocation64_spill] sm:$0xff]  ;;  %v5726_v7 = vadd.f32 %v20863_v27, %v20862_v49  ;;  %v20867_v11 = vld [vmem:[#allocation17_spill] sm:$0xff] }
 0x55d   : > { %v7599_v12 = vpop.f32.mrf.mxu0  ;;  %v7829_v0 = vld [vmem:[#allocation2 + $0x1] sm:$0xff]  ;;  %v7830_v10 = vld [vmem:[#allocation2 + $0x9] sm:$0xff]  ;;  %v6021_v18 = vadd.f32 %v20856_v35, %v5710_v29  ;;  %v6854_v39 = vadd.f32 %v20861_v34, %v6575_v24  ;;  %v7411_v24 = vadd.f32 %v18907_v46, %v7132_v48  ;;  %v16521_v13 = vld [vmem:[#allocation4 + $0x768] sm:$0xff]  }
 0x55e   : > { %7747 = vst [vmem:[#allocation2 + $0x28] sm:$0xff] %v7719_v50  ;;  %v7724_v63 = vadd.f32 %v18919_v3, %v7688_v25  ;;  %v7686_v54 = vadd.f32 %v7599_v12, %v7407_v14  ;;  %v7857_v37 = vpack.c.bf16 %v7830_v10, %v7829_v0  ;;  %v18992_v26 = vpack.c.bf16 %v7719_v50, %v7718_v19  ;;  %v19015_v25 = vpop.f32.mrf.mxu1  ;;  %v20869_v12 = vld [vmem:[#allocation14_spill] sm:$0xff]  ;;  %v20871_v0 = vld [vmem:[#allocation65_spill] sm:$0xff]  ;;  %v20872_v46 = vld [vmem:[#allocation11_spill] sm:$0xff] }
 0x55f   : > { %15578 = vmatpush3.bf16.msra.mxu0 %v16524_v62  ;;  %v15426_v2 = vpop.f32.mrf.mxu0  ;;  %v7408_v19 = vadd.f32 %v18885_v20, %v7129_v42  ;;  %v20860_v62 = vld [vmem:[#allocation75_spill] sm:$0xff]  ;;  %v6300_v14 = vadd.f32 %v20864_v55, %v6021_v18  ;;  %v7133_v56 = vadd.f32 %v20867_v11, %v6854_v39  ;;  %v20876_v39 = vld [vmem:[#allocation76_spill] sm:$0xff]  ;;  %v20879_v27 = vld [vmem:[#allocation57_spill] sm:$0xff] }
 0x560   : > { %15579 = vmatprep.subr.bf16.mxu0 %v16526_v61  ;;  %7752 = vst [vmem:[#allocation2 + $0x50] sm:$0xff] %v7724_v63  ;;  %v7722_v30 = vadd.f32 %v18919_v3, %v7686_v54  ;;  %v7689_v9 = vadd.f32 %v15426_v2, %v7410_v60  ;;  %15459 = vmatprep.mubr.bf16.mxu1 %v7857_v37  ;;  %v16520_v20 = vld [vmem:[#allocation4 + $0x770] sm:$0xff]   ;;  %v20880_v55 = vld [vmem:[#allocation22_spill] sm:$0xff] }
 0x561   : > { %15507 = vmatprep.mubr.bf16.mxu0 %v18992_v26  ;;  %v7135_v16 = vadd.f32 %v20860_v62, %v6856_v1  ;;  %v7602_v59 = vpop.f32.mrf.mxu0  ;;  %v7832_v47 = vld [vmem:[#allocation2 + $0x19] sm:$0xff]  ;;  %v6579_v32 = vadd.f32 %v20868_v8, %v6300_v14  ;;  %v16529_v1 = vld [vmem:[#allocation4 + $0x798] sm:$0xff]   ;;  %v16522_v11 = vld [vmem:[#allocation4 + $0x760] sm:$0xff]  }
 0x562   : > { %15508 = vmatmul.mubr.bf16.gmra.mxu0 %v18984_v58  ;;  %7750 = vst [vmem:[#allocation2 + $0x40] sm:$0xff] %v7722_v30  ;;  %v7725_v29 = vadd.f32 %v18919_v3, %v7689_v9  ;;  %v7687_v15 = vadd.f32 %v7602_v59, %v7408_v19  ;;  %v19008_v38 = vpack.c.bf16 %v7832_v47, %v7831_v43  ;;  %v20866_v42 = vld [vmem:[#allocation15_spill] sm:$0xff]  ;;  %v20873_v2 = vld [vmem:[#allocation48_spill] sm:$0xff]  ;;  %v20875_v62 = vld [vmem:[#allocation69_spill] sm:$0xff]  ;;  %v19040_v47 = vpop.f32.mrf.mxu1 }
 0x563   : > { %15580 = vmatpush3.bf16.msra.mxu0 %v16526_v61  ;;  %v6859_v50 = vadd.f32 %v20866_v42, %v20865_v57  ;;  %v15429_v22 = vpop.f32.mrf.mxu0  ;;  %v20870_v60 = vld [vmem:[#allocation23_spill] sm:$0xff]  ;;  %v7414_v37 = vadd.f32 %v18917_v41, %v7135_v16  ;;  %v20874_v9 = vld [vmem:[#allocation36_spill] sm:$0xff]  ;;  %v6025_v34 = vadd.f32 %v20875_v62, %v5726_v7  ;;  %v20877_v16 = vld [vmem:[#allocation38_spill] sm:$0xff]  ;;  %v6858_v14 = vadd.f32 %v20880_v55, %v6579_v32 }
 0x564   : > { %15581 = vmatprep.subr.bf16.mxu0 %v16527_v40  ;;  %7753 = vst [vmem:[#allocation2 + $0x58] sm:$0xff] %v7725_v29  ;;  %v7723_v28 = vadd.f32 %v18919_v3, %v7687_v15  ;;  %v7692_v61 = vadd.f32 %v15429_v22, %v7413_v36  ;;  %15460 = vmatmul.mubr.bf16.vlgmr.msra.gmra.mxu1 %v19008_v38  ;;  %v20878_v59 = vld [vmem:[#allocation20_spill] sm:$0xff]  ;;  %v20883_v32 = vld [vmem:[#allocation54_spill] sm:$0xff] }
 0x565   : > { %v19021_v51 = vpack.c.bf16 %v7725_v29, %v7724_v63  ;;  %v7138_v5 = vadd.f32 %v20869_v12, %v6859_v50  ;;  %v6857_v10 = vadd.f32 %v20871_v0, %v20870_v60  ;;  %v7615_v54 = vpop.f32.mrf.mxu0  ;;  %15532 = vmatpush3.bf16.msra.mxu1 %v20872_v46  ;;  %v7833_v35 = vld [vmem:[#allocation2 + $0x21] sm:$0xff]  ;;  %v7834_v18 = vld [vmem:[#allocation2 + $0x29] sm:$0xff]  ;;  %v5742_v19 = vadd.f32 %v20874_v9, %v20873_v2  ;;  %v7835_v50 = vld [vmem:[#allocation2 + $0x31] sm:$0xff] }
 0x566   : > { %7751 = vst [vmem:[#allocation2 + $0x48] sm:$0xff] %v7723_v28  ;;  %v7728_v6 = vadd.f32 %v18919_v3, %v7692_v61  ;;  %v7690_v48 = vadd.f32 %v7615_v54, %v7411_v24  ;;  %v19030_v63 = vpack.c.bf16 %v7834_v18, %v7833_v35  ;;  %15533 = vmatprep.subr.bf16.mxu1 %v16520_v20  ;;  %v16530_v49 = vld [vmem:[#allocation4 + $0x790] sm:$0xff]   ;;  %v20882_v61 = vld [vmem:[#allocation62_spill] sm:$0xff]  ;;  %v20886_v35 = vld [vmem:[#allocation33_spill] sm:$0xff] }
 0x567   : > { %v19032_v52 = vpack.c.bf16 %v7723_v28, %v7722_v30  ;;  %v7136_v41 = vadd.f32 %v20876_v39, %v6857_v10  ;;  %v6860_v43 = vadd.f32 %v20878_v59, %v20877_v16  ;;  %v15430_v29 = vpop.f32.mrf.mxu0  ;;  %15582 = vmatpush3.bf16.msra.mxu0 %v16527_v40  ;;  %v7412_v36 = vadd.f32 %v18934_v17, %v7133_v56  ;;  %v20881_v56 = vld [vmem:[#allocation21_spill] sm:$0xff]  ;;  %v20885_v46 = vld [vmem:[#allocation43_spill] sm:$0xff] }
 0x568   : > { %7756 = vst [vmem:[#allocation2 + $0x70] sm:$0xff] %v7728_v6  ;;  %v7726_v30 = vadd.f32 %v18919_v3, %v7690_v48  ;;  %v7693_v15 = vadd.f32 %v15430_v29, %v7414_v37  ;;  %15463 = vmatprep.mubr.bf16.mxu1 %v19030_v63  ;;  %v7417_v42 = vadd.f32 %v18945_v21, %v7138_v5  ;;  %v20884_v21 = vld [vmem:[#allocation49_spill] sm:$0xff]  ;;  %v19057_v5 = vpop.f32.mrf.mxu1  ;;  %v20887_v48 = vld [vmem:[#allocation27_spill] sm:$0xff] }
 0x569   : > { %15511 = vmatprep.mubr.bf16.mxu0 %v19032_v52  ;;  %v7139_v7 = vadd.f32 %v20879_v27, %v6860_v43  ;;  %v7618_v57 = vpop.f32.mrf.mxu0  ;;  %v7836_v40 = vld [vmem:[#allocation2 + $0x39] sm:$0xff]  ;;  %15534 = vmatpush3.bf16.msra.mxu1 %v16520_v20  ;;  %v6304_v28 = vadd.f32 %v20881_v56, %v6025_v34  ;;  %v7137_v8 = vadd.f32 %v20882_v61, %v6858_v14  ;;  %v20888_v2 = vld [vmem:[#allocation29_spill] sm:$0xff] }
 0x56a   : > { %15512 = vmatmul.mubr.bf16.gmra.mxu0 %v19021_v51  ;;  %7754 = vst [vmem:[#allocation2 + $0x60] sm:$0xff] %v7726_v30  ;;  %v7729_v22 = vadd.f32 %v18919_v3, %v7693_v15  ;;  %v7691_v24 = vadd.f32 %v7618_v57, %v7412_v36  ;;  %v19051_v17 = vpack.c.bf16 %v7836_v40, %v7835_v50  ;;  %v16525_v59 = vld [vmem:[#allocation4 + $0x758] sm:$0xff]   ;;  %v16532_v43 = vld [vmem:[#allocation4 + $0x788] sm:$0xff]   ;;  %v19076_v55 = vpop.f32.mrf.mxu1 }
 0x56b   : > { %15535 = vmatprep.subr.bf16.mxu1 %v16521_v13  ;;  %15583 = vmatprep.subr.bf16.mxu0 %v16529_v1  ;;  %v6863_v12 = vadd.f32 %v20884_v21, %v20883_v32  ;;  %v15433_v20 = vpop.f32.mrf.mxu0  ;;  %v7415_v60 = vadd.f32 %v18964_v23, %v7136_v41  ;;  %v6583_v37 = vadd.f32 %v20885_v46, %v6304_v28  ;;  %v20889_v29 = vld [vmem:[#allocation61_spill] sm:$0xff]  ;;  %v20890_v36 = vld [vmem:[#allocation32_spill] sm:$0xff]  ;;  %v20893_v50 = vld [vmem:[#allocation34_spill] sm:$0xff] }
 0x56c   : > { %15584 = vmatpush3.bf16.msra.mxu0 %v16529_v1  ;;  %7757 = vst [vmem:[#allocation2 + $0x78] sm:$0xff] %v7729_v22  ;;  %v7727_v0 = vadd.f32 %v18919_v3, %v7691_v24  ;;  %v7696_v10 = vadd.f32 %v15433_v20, %v7417_v42  ;;  %15464 = vmatmul.mubr.bf16.gmra.mxu1 %v19051_v17  ;;  %v15397_v56 = vpop.f32.mrf.mxu1  ;;  %v20895_v20 = vld [vmem:[#allocation47_spill] sm:$0xff] }
 0x56d   : > { %v19062_v54 = vpack.c.bf16 %v7729_v22, %v7728_v6  ;;  %15585 = vmatprep.subr.bf16.mxu0 %v16530_v49  ;;  %v7142_v18 = vadd.f32 %v20886_v35, %v6863_v12  ;;  %v6861_v9 = vadd.f32 %v20888_v2, %v20887_v48  ;;  %v7631_v62 = vpop.f32.mrf.mxu0  ;;  %v7418_v23 = vadd.f32 %v18979_v33, %v7139_v7  ;;  %v7837_v1 = vld [vmem:[#allocation2 + $0x41] sm:$0xff]  ;;  %v7838_v34 = vld [vmem:[#allocation2 + $0x49] sm:$0xff] }
 0x56e   : > { %15536 = vmatpush3.bf16.msra.mxu1 %v16521_v13  ;;  %7755 = vst [vmem:[#allocation2 + $0x68] sm:$0xff] %v7727_v0  ;;  %v7732_v39 = vadd.f32 %v18919_v3, %v7696_v10  ;;  %v7694_v41 = vadd.f32 %v7631_v62, %v7415_v60  ;;  %v19070_v6 = vpack.c.bf16 %v7838_v34, %v7837_v1  ;;  %v20891_v33 = vld [vmem:[#allocation16_spill] sm:$0xff]  ;;  %v20892_v7 = vld [vmem:[#allocation19_spill] sm:$0xff]  ;;  %v20894_v22 = vld [vmem:[#allocation41_spill] sm:$0xff] }
 0x56f   : > { %v19072_v16 = vpack.c.bf16 %v7727_v0, %v7726_v30  ;;  %15537 = vmatprep.subr.bf16.mxu1 %v16522_v11  ;;  %v6029_v15 = vadd.f32 %v20889_v29, %v5742_v19  ;;  %v7140_v27 = vadd.f32 %v20890_v36, %v6861_v9  ;;  %v6864_v13 = vadd.f32 %v20892_v7, %v20891_v33  ;;  %v15434_v14 = vpop.f32.mrf.mxu0  ;;  %v16534_v19 = vld [vmem:[#allocation4 + $0x780] sm:$0xff]   ;;  %v16528_v12 = vld [vmem:[#allocation4 + $0x750] sm:$0xff]  }
 0x570   : > { %15586 = vmatpush3.bf16.msra.mxu0 %v16530_v49  ;;  %7760 = vst [vmem:[#allocation2 + $0x90] sm:$0xff] %v7732_v39  ;;  %v7730_v57 = vadd.f32 %v18919_v3, %v7694_v41  ;;  %v7697_v42 = vadd.f32 %v15434_v14, %v7418_v23  ;;  %15467 = vmatprep.mubr.bf16.mxu1 %v19070_v6  ;;  %v7839_v49 = vld [vmem:[#allocation2 + $0x51] sm:$0xff]  ;;  %v20896_v0 = vld [vmem:[#allocation35_spill] sm:$0xff]  ;;  %v20899_v9 = vld [vmem:[#allocation56_spill] sm:$0xff] }
 0x571   : > { %v7416_v30 = vadd.f32 %v18998_v44, %v7137_v8  ;;  %15515 = vmatprep.mubr.bf16.mxu0 %v19072_v16  ;;  %v7143_v40 = vadd.f32 %v20893_v50, %v6864_v13  ;;  %v6862_v24 = vadd.f32 %v20894_v22, %v6583_v37  ;;  %v7634_v28 = vpop.f32.mrf.mxu0  ;;  %v7421_v61 = vadd.f32 %v19015_v25, %v7142_v18  ;;  %v7840_v32 = vld [vmem:[#allocation2 + $0x59] sm:$0xff]  ;;  %v20898_v25 = vld [vmem:[#allocation68_spill] sm:$0xff]  ;;  %v20903_v50 = vld [vmem:[#allocation73_spill] sm:$0xff] }
 0x572   : > { %15516 = vmatmul.mubr.bf16.gmra.mxu0 %v19062_v54  ;;  %15538 = vmatpush3.bf16.msra.mxu1 %v16522_v11  ;;  %7758 = vst [vmem:[#allocation2 + $0x80] sm:$0xff] %v7730_v57  ;;  %v7733_v21 = vadd.f32 %v18919_v3, %v7697_v42  ;;  %v19089_v8 = vpack.c.bf16 %v7840_v32, %v7839_v49  ;;  %v20897_v46 = vld [vmem:[#allocation31_spill] sm:$0xff]  ;;  %v20900_v23 = vld [vmem:[#allocation60_spill] sm:$0xff]  ;;  %v20901_v34 = vld [vmem:[#allocation30_spill] sm:$0xff] }
 0x573   : > { %v7695_v44 = vadd.f32 %v7634_v28, %v7416_v30  ;;  %15539 = vmatprep.subr.bf16.mxu1 %v16525_v59  ;;  %15587 = vmatprep.subr.bf16.mxu0 %v16532_v43  ;;  %v6308_v60 = vadd.f32 %v20895_v20, %v6029_v15  ;;  %v7141_v10 = vadd.f32 %v20896_v0, %v6862_v24  ;;  %v15437_v35 = vpop.f32.mrf.mxu0  ;;  %v20902_v41 = vld [vmem:[#allocation70_spill] sm:$0xff]  ;;  %v7384_v15 = vpop.f32.mrf.mxu1  ;;  %v19110_v42 = vld [vmem:[#allocation4 + $0x838] sm:$0xff]   ;;  %v20904_v22 = vld [vmem:[#allocation71_spill] sm:$0xff] }
 0x574   : > { %v6867_v37 = vadd.f32 %v20898_v25, %v20897_v46  ;;  %v7419_v18 = vadd.f32 %v19040_v47, %v7140_v27  ;;  %15588 = vmatpush3.bf16.msra.mxu0 %v16532_v43  ;;  %7761 = vst [vmem:[#allocation2 + $0x98] sm:$0xff] %v7733_v21  ;;  %v7700_v48 = vadd.f32 %v15437_v35, %v7421_v61  ;;  %v16531_v14 = vld [vmem:[#allocation4 + $0x748] sm:$0xff]  }
 0x575   : > { %v7731_v11 = vadd.f32 %v18919_v3, %v7695_v44  ;;  %15468 = vmatmul.mubr.bf16.gmra.mxu1 %v19089_v8  ;;  %v19098_v2 = vpack.c.bf16 %v7733_v21, %v7732_v39  ;;  %15589 = vmatprep.subr.bf16.mxu0 %v16534_v19  ;;  %v6587_v62 = vadd.f32 %v20899_v9, %v6308_v60  ;;  %v7647_v36 = vpop.f32.mrf.mxu0  ;;  %v7841_v43 = vld [vmem:[#allocation2 + $0x61] sm:$0xff]  ;;  %v7842_v27 = vld [vmem:[#allocation2 + $0x69] sm:$0xff]  ;;  %v20905_v49 = vld [vmem:[#allocation58_spill] sm:$0xff]  ;;  %v15398_v32 = vpop.f32.mrf.mxu1 }
 0x576   : > { %v7146_v1 = vadd.f32 %v20900_v23, %v6867_v37  ;;  %v6865_v29 = vadd.f32 %v20902_v41, %v20901_v34  ;;  %v7422_v47 = vadd.f32 %v19057_v5, %v7143_v40  ;;  %15540 = vmatpush3.bf16.msra.mxu1 %v16525_v59  ;;  %v7736_v33 = vadd.f32 %v18919_v3, %v7700_v48  ;;  %v7843_v44 = vld [vmem:[#allocation2 + $0x71] sm:$0xff] }
 0x577   : > { %7759 = vst [vmem:[#allocation2 + $0x88] sm:$0xff] %v7731_v11  ;;  %v7698_v39 = vadd.f32 %v7647_v36, %v7419_v18  ;;  %v19106_v7 = vpack.c.bf16 %v7842_v27, %v7841_v43  ;;  %v19108_v13 = vpack.c.bf16 %v7731_v11, %v7730_v57  ;;  %15541 = vmatprep.subr.bf16.mxu1 %v16528_v12  ;;  %v15438_v40 = vpop.f32.mrf.mxu0  ;;  %v7387_v35 = vpop.f32.mrf.mxu1 }
 0x578   : > { %v7144_v30 = vadd.f32 %v18901_v4, %v6865_v29  ;;  %v6868_v5 = vadd.f32 %v20904_v22, %v20903_v50  ;;  %15590 = vmatpush3.bf16.msra.mxu0 %v16534_v19  ;;  %7764 = vst [vmem:[#allocation2 + $0xb0] sm:$0xff] %v7736_v33  ;;  %v7701_v24 = vadd.f32 %v15438_v40, %v7422_v47 }
 0x579   : > { %v7734_v59 = vadd.f32 %v18919_v3, %v7698_v39  ;;  %15471 = vmatprep.mubr.bf16.mxu1 %v19106_v7  ;;  %v7420_v57 = vadd.f32 %v19076_v55, %v7141_v10  ;;  %15519 = vmatprep.mubr.bf16.mxu0 %v19108_v13  ;;  %v7425_v28 = vadd.f32 %v15397_v56, %v7146_v1  ;;  %v7650_v21 = vpop.f32.mrf.mxu0  ;;  %v7844_v20 = vld [vmem:[#allocation2 + $0x79] sm:$0xff]  ;;  %v16533_v55 = vld [vmem:[#allocation4 + $0x740] sm:$0xff]   ;;  %v19136_v1 = vld [vmem:[#allocation4 + $0x7f8] sm:$0xff]  }
 0x57a   : > { %v7147_v61 = vadd.f32 %v18909_v53, %v6868_v5  ;;  %v6866_v4 = vadd.f32 %v20905_v49, %v6587_v62  ;;  %15520 = vmatmul.mubr.bf16.gmra.mxu0 %v19098_v2  ;;  %15542 = vmatpush3.bf16.msra.mxu1 %v16528_v12  ;;  %v7737_v19 = vadd.f32 %v18919_v3, %v7701_v24 }
 0x57b   : > { %7762 = vst [vmem:[#allocation2 + $0xa0] sm:$0xff] %v7734_v59  ;;  %v7699_v60 = vadd.f32 %v7650_v21, %v7420_v57  ;;  %v19123_v0 = vpack.c.bf16 %v7844_v20, %v7843_v44  ;;  %15543 = vmatprep.subr.bf16.mxu1 %v16531_v14  ;;  %15663 = vmatprep.subr.bf16.mxu0 %v19110_v42  ;;  %v15441_v56 = vpop.f32.mrf.mxu0  ;;  %v7847_v47 = vld [vmem:[#allocation2 + $0x91] sm:$0xff]  ;;  %v8273_v21 = vld [vmem:[#allocation2 + $0x2] sm:$0xff] }
 0x57c   : > { %v7423_v53 = vadd.f32 %v7384_v15, %v7144_v30  ;;  %v7145_v10 = vadd.f32 %v18913_v31, %v6866_v4  ;;  %7765 = vst [vmem:[#allocation2 + $0xb8] sm:$0xff] %v7737_v19  ;;  %v7704_v25 = vadd.f32 %v15441_v56, %v7425_v28  ;;  %v19129_v12 = vpack.c.bf16 %v7737_v19, %v7736_v33  ;;  %v8274_v44 = vld [vmem:[#allocation2 + $0xa] sm:$0xff]  ;;  %v16542_v19 = vld [vmem:[#allocation4 + $0x828] sm:$0xff]  }
 0x57d   : > { %v7735_v46 = vadd.f32 %v18919_v3, %v7699_v60  ;;  %15472 = vmatmul.mubr.bf16.gmra.mxu1 %v19123_v0  ;;  %v7426_v37 = vadd.f32 %v15398_v32, %v7147_v61  ;;  %v7663_v18 = vpop.f32.mrf.mxu0  ;;  %v16540_v32 = vld [vmem:[#allocation4 + $0x830] sm:$0xff]   ;;  %v8278_v56 = vld [vmem:[#allocation2 + $0x2a] sm:$0xff] }
 0x57e   : > { %v7845_v11 = vld [vmem:[#allocation2 + $0x81] sm:$0xff]  ;;  %v7846_v48 = vld [vmem:[#allocation2 + $0x89] sm:$0xff]  ;;  %15544 = vmatpush3.bf16.msra.mxu1 %v16531_v14  ;;  %v7740_v9 = vadd.f32 %v18919_v3, %v7704_v25  ;;  %v7702_v62 = vadd.f32 %v7663_v18, %v7423_v53  ;;  %v7424_v41 = vadd.f32 %v7387_v35, %v7145_v10  ;;  %v8275_v10 = vld [vmem:[#allocation2 + $0x12] sm:$0xff] }
 0x57f   : > { %7763 = vst [vmem:[#allocation2 + $0xa8] sm:$0xff] %v7735_v46  ;;  %v19132_v23 = vpack.c.bf16 %v7846_v48, %v7845_v11  ;;  %v19134_v31 = vpack.c.bf16 %v7735_v46, %v7734_v59  ;;  %15545 = vmatprep.subr.bf16.mxu1 %v16533_v55  ;;  %v15442_v34 = vpop.f32.mrf.mxu0  ;;  %v8276_v60 = vld [vmem:[#allocation2 + $0x1a] sm:$0xff]  ;;  %v8277_v53 = vld [vmem:[#allocation2 + $0x22] sm:$0xff]  ;;  %v8282_v35 = vld [vmem:[#allocation2 + $0x4a] sm:$0xff] }
 0x580   : > { %7768 = vst [vmem:[#allocation2 + $0xd0] sm:$0xff] %v7740_v9  ;;  %v7738_v29 = vadd.f32 %v18919_v3, %v7702_v62  ;;  %v7705_v15 = vadd.f32 %v15442_v34, %v7426_v37  ;;  %v16545_v46 = vld [vmem:[#allocation4 + $0x818] sm:$0xff]   ;;  %v16537_v25 = vld [vmem:[#allocation4 + $0x7e8] sm:$0xff]   ;;  %v16538_v48 = vld [vmem:[#allocation4 + $0x7e0] sm:$0xff]  }
 0x581   : > { %15475 = vmatprep.mubr.bf16.mxu1 %v19132_v23  ;;  %15523 = vmatprep.mubr.bf16.mxu0 %v19134_v31  ;;  %v7666_v36 = vpop.f32.mrf.mxu0  ;;  %v8281_v37 = vld [vmem:[#allocation2 + $0x42] sm:$0xff]  ;;  %v8279_v18 = vld [vmem:[#allocation2 + $0x32] sm:$0xff]  ;;  %v8284_v34 = vld [vmem:[#allocation2 + $0x5a] sm:$0xff] }
 0x582   : > { %v7848_v43 = vld [vmem:[#allocation2 + $0x99] sm:$0xff]  ;;  %15524 = vmatmul.mubr.bf16.gmra.mxu0 %v19129_v12  ;;  %15546 = vmatpush3.bf16.msra.mxu1 %v16533_v55  ;;  %7766 = vst [vmem:[#allocation2 + $0xc0] sm:$0xff] %v7738_v29  ;;  %v7741_v27 = vadd.f32 %v18919_v3, %v7705_v15  ;;  %v7703_v33 = vadd.f32 %v7666_v36, %v7424_v41  ;;  %v16543_v55 = vld [vmem:[#allocation4 + $0x820] sm:$0xff]  }
 0x583   : > { %v19143_v39 = vpack.c.bf16 %v7848_v43, %v7847_v47  ;;  %15619 = vmatprep.subr.bf16.mxu1 %v19136_v1  ;;  %v7851_v59 = vld [vmem:[#allocation2 + $0xb1] sm:$0xff]  ;;  %v16544_v36 = vld [vmem:[#allocation4 + $0x7d0] sm:$0xff]   ;;  %v16555_v43 = vld [vmem:[#allocation4 + $0x8b8] sm:$0xff]  }
 0x584   : > { %7769 = vst [vmem:[#allocation2 + $0xd8] sm:$0xff] %v7741_v27  ;;  %v7739_v14 = vadd.f32 %v18919_v3, %v7703_v33  ;;  %v19148_v30 = vpack.c.bf16 %v7741_v27, %v7740_v9  ;;  %v19183_v9 = vpack.c.bf16 %v8282_v35, %v8281_v37  ;;  %v16548_v62 = vld [vmem:[#allocation4 + $0x808] sm:$0xff]   ;;  %v8286_v41 = vld [vmem:[#allocation2 + $0x6a] sm:$0xff]  ;;  %v8289_v33 = vld [vmem:[#allocation2 + $0x82] sm:$0xff] }
 0x585   : > { %15476 = vmatmul.mubr.bf16.gmra.mxu1 %v19143_v39  ;;  %v16547_v27 = vld [vmem:[#allocation4 + $0x7c8] sm:$0xff]   ;;  %v16566_v37 = vld [vmem:[#allocation4 + $0x880] sm:$0xff]   ;;  %v16560_v35 = vld [vmem:[#allocation4 + $0x850] sm:$0xff]  }
 0x586   : > { %v7849_v50 = vld [vmem:[#allocation2 + $0xa1] sm:$0xff]  ;;  %v7850_v22 = vld [vmem:[#allocation2 + $0xa9] sm:$0xff]  ;;  %7767 = vst [vmem:[#allocation2 + $0xc8] sm:$0xff] %v7739_v14  ;;  %v19152_v40 = vpack.c.bf16 %v7739_v14, %v7738_v29  ;;  %v8283_v29 = vld [vmem:[#allocation2 + $0x52] sm:$0xff] }
 0x587   : > { %v19150_v5 = vpack.c.bf16 %v7850_v22, %v7849_v50  ;;  %v19188_v15 = vpack.c.bf16 %v8284_v34, %v8283_v29  ;;  %v8290_v14 = vld [vmem:[#allocation2 + $0x8a] sm:$0xff]  ;;  %v9389_v29 = vld [vmem:[#allocation2 + $0x20] sm:$0xff] }
 0x588   : > { %15527 = vmatprep.mubr.bf16.mxu0 %v19152_v40  ;;  %v16549_v22 = vld [vmem:[#allocation4 + $0x7c0] sm:$0xff]  }
 0x589   : > { %15479 = vmatprep.mubr.bf16.mxu1 %v19150_v5  ;;  %v7852_v24 = vld [vmem:[#allocation2 + $0xb9] sm:$0xff]  ;;  %v9673_v34 = vld [vmem:[#allocation2 + $0x49] sm:$0xff] }
 0x58a   : > { %15528 = vmatmul.mubr.bf16.gmra.mxu0 %v19148_v30  ;;  %v19157_v3 = vpack.c.bf16 %v7852_v24, %v7851_v59  ;;  %v19199_v59 = vpack.c.bf16 %v8290_v14, %v8289_v33  ;;  %v16551_v24 = vld [vmem:[#allocation4 + $0x878] sm:$0xff]   ;;  %v9391_v14 = vld [vmem:[#allocation2 + $0x30] sm:$0xff] }
 0x58b   : > { %15591 = vmatprep.mubr.bf16.mxu0 %v18950_v45  ;;  %v7855_v49 = vld [vmem:[#allocation2 + $0xd1] sm:$0xff]  ;;  %v7856_v4 = vld [vmem:[#allocation2 + $0xd9] sm:$0xff]  ;;  %v8301_v45 = vpack.c.bf16 %v8274_v44, %v8273_v21 }
 0x58c   : > { %v19165_v20 = vpack.c.bf16 %v7856_v4, %v7855_v49  ;;  %v8294_v49 = vld [vmem:[#allocation2 + $0xaa] sm:$0xff]  ;;  %v8296_v44 = vld [vmem:[#allocation2 + $0xba] sm:$0xff] }
 0x58d   : > { %15480 = vmatmul.mubr.bf16.gmra.mxu1 %v19157_v3  ;;  %v7853_v57 = vld [vmem:[#allocation2 + $0xc1] sm:$0xff]  ;;  %v7854_v28 = vld [vmem:[#allocation2 + $0xc9] sm:$0xff] }
 0x58e   : > { %v19161_v61 = vpack.c.bf16 %v7854_v28, %v7853_v57  ;;  %v8292_v57 = vld [vmem:[#allocation2 + $0x9a] sm:$0xff]  ;;  %v8293_v28 = vld [vmem:[#allocation2 + $0xa2] sm:$0xff] }
 0x590   : > { %15483 = vmatprep.mubr.bf16.mxu1 %v19161_v61 }
 0x592   : > { %15592 = vmatmul.mubr.bf16.vlgmr.msra.gmra.mxu0 %v18992_v26  ;;  %v19171_v26 = vpack.c.bf16 %v8276_v60, %v8275_v10  ;;  %v8295_v60 = vld [vmem:[#allocation2 + $0xb2] sm:$0xff] }
 0x593   : > { %15595 = vmatprep.mubr.bf16.mxu0 %v18984_v58  ;;  %15664 = vmatpush3.bf16.msra.mxu0 %v19110_v42  ;;  %v16536_v58 = vld [vmem:[#allocation4 + $0x7f0] sm:$0xff]   ;;  %v19174_v42 = vpack.c.bf16 %v8278_v56, %v8277_v53 }
 0x594   : > { %15665 = vmatprep.subr.bf16.mxu0 %v16540_v32  ;;  %v8300_v53 = vld [vmem:[#allocation2 + $0xda] sm:$0xff] }
 0x595   : > { %15484 = vmatmul.mubr.bf16.gmra.mxu1 %v19165_v20  ;;  %v16556_v56 = vld [vmem:[#allocation4 + $0x8b0] sm:$0xff]  }
 0x596   : > { %15547 = vmatprep.mubr.bf16.mxu1 %v8301_v45  ;;  %v8297_v45 = vld [vmem:[#allocation2 + $0xc2] sm:$0xff] }
 0x597   : > { %15666 = vmatpush3.bf16.msra.mxu0 %v16540_v32  ;;  %v16649_v32 = vld [vmem:[#allocation2 + $0xe0] sm:$0xff] }
 0x598   : > { %15667 = vmatprep.subr.bf16.mxu0 %v16542_v19  ;;  %v19211_v21 = vpack.c.bf16 %v16649_v32, %v16649_v32  ;;  %v9398_v32 = vld [vmem:[#allocation2 + $0x68] sm:$0xff] }
 0x59a   : > { %15596 = vmatmul.mubr.bf16.gmra.mxu0 %v19032_v52  ;;  %v8280_v52 = vld [vmem:[#allocation2 + $0x3a] sm:$0xff] }
 0x59b   : > { %15599 = vmatprep.mubr.bf16.mxu0 %v19021_v51  ;;  %15668 = vmatpush3.bf16.msra.mxu0 %v16542_v19  ;;  %v16546_v51 = vld [vmem:[#allocation4 + $0x810] sm:$0xff]   ;;  %v19180_v11 = vpack.c.bf16 %v8280_v52, %v8279_v18  ;;  %v8298_v19 = vld [vmem:[#allocation2 + $0xca] sm:$0xff] }
 0x59c   : > { %15669 = vmatprep.subr.bf16.mxu0 %v16543_v55  ;;  %v16554_v52 = vld [vmem:[#allocation4 + $0x860] sm:$0xff]  }
 0x59d   : > { %15548 = vmatmul.mubr.bf16.vlgmr.msra.gmra.mxu1 %v19171_v26 }
 0x59e   : > { %15551 = vmatprep.mubr.bf16.mxu1 %v19174_v42  ;;  %15620 = vmatpush3.bf16.msra.mxu1 %v19136_v1  ;;  %v16541_v1 = vld [vmem:[#allocation4 + $0x7d8] sm:$0xff]  }
 0x59f   : > { %15621 = vmatprep.subr.bf16.mxu1 %v16536_v58  ;;  %15670 = vmatpush3.bf16.msra.mxu0 %v16543_v55  ;;  %v8299_v55 = vld [vmem:[#allocation2 + $0xd2] sm:$0xff] }
 0x5a0   : > { %15671 = vmatprep.subr.bf16.mxu0 %v16545_v46  ;;  %v19222_v10 = vpack.c.bf16 %v8300_v53, %v8299_v55  ;;  %v9683_v55 = vld [vmem:[#allocation2 + $0x99] sm:$0xff]  ;;  %v9684_v53 = vld [vmem:[#allocation2 + $0xa1] sm:$0xff] }
 0x5a2   : > { %15622 = vmatpush3.bf16.msra.mxu1 %v16536_v58  ;;  %15600 = vmatmul.mubr.bf16.gmra.mxu0 %v19072_v16  ;;  %v8285_v16 = vld [vmem:[#allocation2 + $0x62] sm:$0xff]  ;;  %v16558_v58 = vld [vmem:[#allocation4 + $0x8a8] sm:$0xff]  }
 0x5a3   : > { %15603 = vmatprep.mubr.bf16.mxu0 %v19062_v54  ;;  %15623 = vmatprep.subr.bf16.mxu1 %v16537_v25  ;;  %v16550_v54 = vld [vmem:[#allocation4 + $0x800] sm:$0xff]   ;;  %v19191_v47 = vpack.c.bf16 %v8286_v41, %v8285_v16  ;;  %v9390_v41 = vld [vmem:[#allocation2 + $0x28] sm:$0xff] }
 0x5a4   : > { %15672 = vmatpush3.bf16.msra.mxu0 %v16545_v46  ;;  %v16552_v46 = vld [vmem:[#allocation4 + $0x870] sm:$0xff]  }
 0x5a5   : > { %15552 = vmatmul.mubr.bf16.gmra.mxu1 %v19180_v11  ;;  %15673 = vmatprep.subr.bf16.mxu0 %v16546_v51 }
 0x5a6   : > { %15555 = vmatprep.mubr.bf16.mxu1 %v19183_v9  ;;  %15624 = vmatpush3.bf16.msra.mxu1 %v16537_v25  ;;  %v16553_v25 = vld [vmem:[#allocation4 + $0x868] sm:$0xff]  }
 0x5a7   : > { %15625 = vmatprep.subr.bf16.mxu1 %v16538_v48 }
 0x5a8   : > { %15674 = vmatpush3.bf16.msra.mxu0 %v16546_v51  ;;  %v9137_v51 = vld [vmem:[#allocation2 + $0xea] sm:$0xff] }
 0x5a9   : > { %15675 = vmatprep.subr.bf16.mxu0 %v16548_v62 }
 0x5aa   : > { %15604 = vmatmul.mubr.bf16.gmra.mxu0 %v19108_v13  ;;  %15626 = vmatpush3.bf16.msra.mxu1 %v16538_v48  ;;  %v8288_v13 = vld [vmem:[#allocation2 + $0x7a] sm:$0xff] }
 0x5ab   : > { %15607 = vmatprep.mubr.bf16.mxu0 %v19098_v2  ;;  %15627 = vmatprep.subr.bf16.mxu1 %v16541_v1  ;;  %v8287_v2 = vld [vmem:[#allocation2 + $0x72] sm:$0xff] }
 0x5ac   : > { %15676 = vmatpush3.bf16.msra.mxu0 %v16548_v62  ;;  %v19196_v50 = vpack.c.bf16 %v8288_v13, %v8287_v2  ;;  %v9671_v48 = vld [vmem:[#allocation2 + $0x39] sm:$0xff]  ;;  %v8857_v62 = vld [vmem:[#allocation2 + $0xe1] sm:$0xff] }
 0x5ad   : > { %15556 = vmatmul.mubr.bf16.gmra.mxu1 %v19188_v15  ;;  %15677 = vmatprep.subr.bf16.mxu0 %v16550_v54  ;;  %v9394_v13 = vld [vmem:[#allocation2 + $0x48] sm:$0xff] }
 0x5ae   : > { %15559 = vmatprep.mubr.bf16.mxu1 %v19191_v47  ;;  %15628 = vmatpush3.bf16.msra.mxu1 %v16541_v1  ;;  %v8858_v1 = vld [vmem:[#allocation2 + $0xe9] sm:$0xff] }
 0x5af   : > { %15629 = vmatprep.subr.bf16.mxu1 %v16544_v36 }
 0x5b0   : > { %15678 = vmatpush3.bf16.msra.mxu0 %v16550_v54 }
 0x5b1   : > { %15751 = vmatprep.subr.bf16.mxu0 %v16555_v43 }
 0x5b2   : > { %15608 = vmatmul.mubr.bf16.gmra.mxu0 %v19134_v31  ;;  %15630 = vmatpush3.bf16.msra.mxu1 %v16544_v36  ;;  %v8291_v31 = vld [vmem:[#allocation2 + $0x92] sm:$0xff]  ;;  %v9676_v36 = vld [vmem:[#allocation2 + $0x61] sm:$0xff] }
 0x5b3   : > { %15611 = vmatprep.mubr.bf16.mxu0 %v19129_v12  ;;  %15631 = vmatprep.subr.bf16.mxu1 %v16547_v27  ;;  %v19204_v4 = vpack.c.bf16 %v8292_v57, %v8291_v31  ;;  %v19207_v12 = vpack.c.bf16 %v8294_v49, %v8293_v28  ;;  %v9680_v57 = vld [vmem:[#allocation2 + $0x81] sm:$0xff]  ;;  %v9681_v28 = vld [vmem:[#allocation2 + $0x89] sm:$0xff]  ;;  %v9678_v49 = vld [vmem:[#allocation2 + $0x71] sm:$0xff] }
 0x5b4   : > { %v16569_v31 = vld [vmem:[#allocation4 + $0x8e8] sm:$0xff]  }
 0x5b5   : > { %15560 = vmatmul.mubr.bf16.gmra.mxu1 %v19196_v50 }
 0x5b6   : > { %15563 = vmatprep.mubr.bf16.mxu1 %v19199_v59  ;;  %15632 = vmatpush3.bf16.msra.mxu1 %v16547_v27 }
 0x5b7   : > { %15633 = vmatprep.subr.bf16.mxu1 %v16549_v22 }
 0x5ba   : > { %15612 = vmatmul.mubr.bf16.gmra.mxu0 %v19152_v40  ;;  %15634 = vmatpush3.bf16.msra.mxu1 %v16549_v22  ;;  %v19214_v40 = vpack.c.bf16 %v8296_v44, %v8295_v60  ;;  %v16568_v22 = vld [vmem:[#allocation4 + $0x8f0] sm:$0xff]   ;;  %v9702_v44 = vpack.c.bf16 %v9681_v28, %v9680_v57  ;;  %v9407_v57 = vld [vmem:[#allocation2 + $0xb0] sm:$0xff] }
 0x5bb   : > { %15615 = vmatprep.mubr.bf16.mxu0 %v19148_v30  ;;  %15707 = vmatprep.subr.bf16.mxu1 %v16551_v24  ;;  %v19217_v30 = vpack.c.bf16 %v8298_v19, %v8297_v45  ;;  %v9395_v45 = vld [vmem:[#allocation2 + $0x50] sm:$0xff]  ;;  %v9397_v60 = vld [vmem:[#allocation2 + $0x60] sm:$0xff] }
 0x5bd   : > { %15564 = vmatmul.mubr.bf16.gmra.mxu1 %v19204_v4 }
 0x5be   : > { %15567 = vmatprep.mubr.bf16.mxu1 %v19207_v12 }
 0x5c2   : > { %15616 = vmatmul.mubr.bf16.gmra.mxu0 %v19211_v21 }
 0x5c3   : > { %15679 = vmatprep.mubr.bf16.mxu0 %v19171_v26  ;;  %v16559_v26 = vld [vmem:[#allocation4 + $0x8a0] sm:$0xff]  }
 0x5c5   : > { %15568 = vmatmul.mubr.bf16.gmra.mxu1 %v19214_v40 }
 0x5c6   : > { %15571 = vmatprep.mubr.bf16.mxu1 %v19217_v30 }
 0x5ca   : > { %15680 = vmatmul.mubr.bf16.vlgmr.msra.gmra.mxu0 %v19174_v42  ;;  %v16561_v42 = vld [vmem:[#allocation4 + $0x898] sm:$0xff]  }
 0x5cb   : > { %15683 = vmatprep.mubr.bf16.mxu0 %v19180_v11  ;;  %15752 = vmatpush3.bf16.msra.mxu0 %v16555_v43  ;;  %v9669_v11 = vld [vmem:[#allocation2 + $0x29] sm:$0xff]  ;;  %v9392_v43 = vld [vmem:[#allocation2 + $0x38] sm:$0xff] }
 0x5cc   : > { %15753 = vmatprep.subr.bf16.mxu0 %v16556_v56  ;;  %v9418_v2 = vpack.c.bf16 %v9392_v43, %v9391_v14  ;;  %v9408_v14 = vld [vmem:[#allocation2 + $0xb8] sm:$0xff] }
 0x5cd   : > { %15572 = vmatmul.mubr.bf16.gmra.mxu1 %v19222_v10 }
 0x5ce   : > { %15635 = vmatprep.mubr.bf16.mxu1 %v19008_v38  ;;  %v16562_v38 = vld [vmem:[#allocation4 + $0x890] sm:$0xff]  }
 0x5cf   : > { %15754 = vmatpush3.bf16.msra.mxu0 %v16556_v56  ;;  %v9685_v56 = vld [vmem:[#allocation2 + $0xa9] sm:$0xff] }
 0x5d0   : > { %15755 = vmatprep.subr.bf16.mxu0 %v16558_v58 }
 0x5d2   : > { %15684 = vmatmul.mubr.bf16.gmra.mxu0 %v19183_v9  ;;  %v9672_v9 = vld [vmem:[#allocation2 + $0x41] sm:$0xff] }
 0x5d3   : > { %15687 = vmatprep.mubr.bf16.mxu0 %v19188_v15  ;;  %15756 = vmatpush3.bf16.msra.mxu0 %v16558_v58  ;;  %v9698_v54 = vpack.c.bf16 %v9673_v34, %v9672_v9  ;;  %v9417_v15 = vpack.c.bf16 %v9390_v41, %v9389_v29  ;;  %v9682_v58 = vld [vmem:[#allocation2 + $0x91] sm:$0xff] }
 0x5d4   : > { %15757 = vmatprep.subr.bf16.mxu0 %v16559_v26  ;;  %v16574_v29 = vld [vmem:[#allocation4 + $0x8c0] sm:$0xff]  }
 0x5d5   : > { %15636 = vmatmul.mubr.bf16.vlgmr.msra.gmra.mxu1 %v19030_v63  ;;  %v16564_v63 = vld [vmem:[#allocation4 + $0x888] sm:$0xff]  }
 0x5d6   : > { %15639 = vmatprep.mubr.bf16.mxu1 %v19051_v17  ;;  %15708 = vmatpush3.bf16.msra.mxu1 %v16551_v24  ;;  %v16557_v17 = vld [vmem:[#allocation4 + $0x858] sm:$0xff]   ;;  %v9679_v24 = vld [vmem:[#allocation2 + $0x79] sm:$0xff] }
 0x5d7   : > { %15709 = vmatprep.subr.bf16.mxu1 %v16552_v46  ;;  %15758 = vmatpush3.bf16.msra.mxu0 %v16559_v26  ;;  %v16571_v26 = vld [vmem:[#allocation4 + $0x8d8] sm:$0xff]  }
 0x5d8   : > { %15759 = vmatprep.subr.bf16.mxu0 %v16561_v42 }
 0x5da   : > { %15710 = vmatpush3.bf16.msra.mxu1 %v16552_v46  ;;  %15688 = vmatmul.mubr.bf16.gmra.mxu0 %v19191_v47  ;;  %v9677_v47 = vld [vmem:[#allocation2 + $0x69] sm:$0xff]  ;;  %v9400_v46 = vld [vmem:[#allocation2 + $0x78] sm:$0xff] }
 0x5db   : > { %15691 = vmatprep.mubr.bf16.mxu0 %v19196_v50  ;;  %15711 = vmatprep.subr.bf16.mxu1 %v16553_v25  ;;  %v9700_v33 = vpack.c.bf16 %v9677_v47, %v9676_v36  ;;  %v9393_v50 = vld [vmem:[#allocation2 + $0x40] sm:$0xff]  ;;  %v9690_v47 = vld [vmem:[#allocation2 + $0xd1] sm:$0xff] }
 0x5dc   : > { %15760 = vmatpush3.bf16.msra.mxu0 %v16561_v42  ;;  %v9703_v42 = vpack.c.bf16 %v9683_v55, %v9682_v58 }
 0x5dd   : > { %15640 = vmatmul.mubr.bf16.gmra.mxu1 %v19070_v6  ;;  %15761 = vmatprep.subr.bf16.mxu0 %v16562_v38  ;;  %v16563_v6 = vld [vmem:[#allocation4 + $0x848] sm:$0xff]  }
 0x5de   : > { %15643 = vmatprep.mubr.bf16.mxu1 %v19089_v8  ;;  %15712 = vmatpush3.bf16.msra.mxu1 %v16553_v25  ;;  %v16565_v8 = vld [vmem:[#allocation4 + $0x840] sm:$0xff]   ;;  %v9402_v25 = vld [vmem:[#allocation2 + $0x88] sm:$0xff] }
 0x5df   : > { %15713 = vmatprep.subr.bf16.mxu1 %v16554_v52 }
 0x5e0   : > { %15762 = vmatpush3.bf16.msra.mxu0 %v16562_v38  ;;  %v9704_v38 = vpack.c.bf16 %v9685_v56, %v9684_v53  ;;  %v9412_v56 = vld [vmem:[#allocation2 + $0xd8] sm:$0xff] }
 0x5e1   : > { %15763 = vmatprep.subr.bf16.mxu0 %v16564_v63 }
 0x5e2   : > { %15692 = vmatmul.mubr.bf16.gmra.mxu0 %v19199_v59  ;;  %15714 = vmatpush3.bf16.msra.mxu1 %v16554_v52  ;;  %v9419_v59 = vpack.c.bf16 %v9394_v13, %v9393_v50  ;;  %v9399_v52 = vld [vmem:[#allocation2 + $0x70] sm:$0xff] }
 0x5e3   : > { %15695 = vmatprep.mubr.bf16.mxu0 %v19204_v4  ;;  %15715 = vmatprep.subr.bf16.mxu1 %v16557_v17  ;;  %v9396_v4 = vld [vmem:[#allocation2 + $0x58] sm:$0xff] }
 0x5e4   : > { %15764 = vmatpush3.bf16.msra.mxu0 %v16564_v63  ;;  %v9420_v19 = vpack.c.bf16 %v9396_v4, %v9395_v45  ;;  %v9409_v4 = vld [vmem:[#allocation2 + $0xc0] sm:$0xff] }
 0x5e5   : > { %15644 = vmatmul.mubr.bf16.gmra.mxu1 %v19106_v7  ;;  %15765 = vmatprep.subr.bf16.mxu0 %v16566_v37  ;;  %v16567_v7 = vld [vmem:[#allocation4 + $0x8f8] sm:$0xff]  }
 0x5e6   : > { %15647 = vmatprep.mubr.bf16.mxu1 %v19123_v0  ;;  %15716 = vmatpush3.bf16.msra.mxu1 %v16557_v17  ;;  %v9136_v0 = vld [vmem:[#allocation2 + $0xe2] sm:$0xff]  ;;  %v9422_v17 = vpack.c.bf16 %v9400_v46, %v9399_v52 }
 0x5e7   : > { %15717 = vmatprep.subr.bf16.mxu1 %v16560_v35  ;;  %v19247_v18 = vpack.c.bf16 %v9137_v51, %v9136_v0  ;;  %v9688_v51 = vld [vmem:[#allocation2 + $0xc1] sm:$0xff] }
 0x5e8   : > { %15766 = vmatpush3.bf16.msra.mxu0 %v16566_v37  ;;  %v9401_v37 = vld [vmem:[#allocation2 + $0x80] sm:$0xff] }
 0x5ea   : > { %15696 = vmatmul.mubr.bf16.gmra.mxu0 %v19207_v12  ;;  %15718 = vmatpush3.bf16.msra.mxu1 %v16560_v35  ;;  %v9701_v12 = vpack.c.bf16 %v9679_v24, %v9678_v49  ;;  %v16572_v35 = vld [vmem:[#allocation4 + $0x8d0] sm:$0xff]  }
 0x5eb   : > { %15699 = vmatprep.mubr.bf16.mxu0 %v19214_v40  ;;  %15719 = vmatprep.subr.bf16.mxu1 %v16563_v6  ;;  %v16570_v40 = vld [vmem:[#allocation4 + $0x8e0] sm:$0xff]  }
 0x5ed   : > { %15648 = vmatmul.mubr.bf16.gmra.mxu1 %v19132_v23  ;;  %v9668_v23 = vld [vmem:[#allocation2 + $0x21] sm:$0xff] }
 0x5ee   : > { %15651 = vmatprep.mubr.bf16.mxu1 %v19143_v39  ;;  %15720 = vmatpush3.bf16.msra.mxu1 %v16563_v6  ;;  %v9696_v39 = vpack.c.bf16 %v9669_v11, %v9668_v23  ;;  %v9423_v6 = vpack.c.bf16 %v9402_v25, %v9401_v37  ;;  %v9689_v23 = vld [vmem:[#allocation2 + $0xc9] sm:$0xff]  ;;  %v9686_v11 = vld [vmem:[#allocation2 + $0xb1] sm:$0xff] }
 0x5ef   : > { %15721 = vmatprep.subr.bf16.mxu1 %v16565_v8  ;;  %v9706_v34 = vpack.c.bf16 %v9689_v23, %v9688_v51  ;;  %v9948_v51 = vld [vmem:[#allocation2 + $0x2a] sm:$0xff] }
 0x5f2   : > { %15700 = vmatmul.mubr.bf16.gmra.mxu0 %v19217_v30  ;;  %15722 = vmatpush3.bf16.msra.mxu1 %v16565_v8  ;;  %v9421_v30 = vpack.c.bf16 %v9398_v32, %v9397_v60  ;;  %v9695_v32 = vld [vmem:[#allocation2 + $0xf9] sm:$0xff] }
 0x5f3   : > { %15703 = vmatprep.mubr.bf16.mxu0 %v19222_v10  ;;  %15795 = vmatprep.subr.bf16.mxu1 %v16567_v7 }
 0x5f5   : > { %15652 = vmatmul.mubr.bf16.gmra.mxu1 %v19150_v5  ;;  %v9670_v5 = vld [vmem:[#allocation2 + $0x31] sm:$0xff] }
 0x5f6   : > { %15655 = vmatprep.mubr.bf16.mxu1 %v19157_v3  ;;  %v9697_v16 = vpack.c.bf16 %v9671_v48, %v9670_v5  ;;  %v19252_v3 = vpack.c.bf16 %v8858_v1, %v8857_v62  ;;  %v9404_v48 = vld [vmem:[#allocation2 + $0x98] sm:$0xff]  ;;  %v9406_v1 = vld [vmem:[#allocation2 + $0xa8] sm:$0xff]  ;;  %v9403_v5 = vld [vmem:[#allocation2 + $0x90] sm:$0xff] }
 0x5f7   : > { %v9424_v41 = vpack.c.bf16 %v9404_v48, %v9403_v5 }
 0x5fa   : > { %15704 = vmatmul.mubr.bf16.gmra.mxu0 %v19247_v18 }
 0x5fb   : > { %15767 = vmatprep.mubr.bf16.mxu0 %v9696_v39  ;;  %v16573_v39 = vld [vmem:[#allocation4 + $0x8c8] sm:$0xff]  }
 0x5fd   : > { %15656 = vmatmul.mubr.bf16.gmra.mxu1 %v19161_v61  ;;  %v9675_v61 = vld [vmem:[#allocation2 + $0x59] sm:$0xff] }
 0x5fe   : > { %15659 = vmatprep.mubr.bf16.mxu1 %v19165_v20  ;;  %v9674_v20 = vld [vmem:[#allocation2 + $0x51] sm:$0xff] }
 0x5ff   : > { %v9699_v27 = vpack.c.bf16 %v9675_v61, %v9674_v20  ;;  %v9691_v20 = vld [vmem:[#allocation2 + $0xd9] sm:$0xff] }
 0x600   : > { %v9707_v50 = vpack.c.bf16 %v9691_v20, %v9690_v47  ;;  %v9949_v20 = vld [vmem:[#allocation2 + $0x32] sm:$0xff] }
 0x602   : > { %15768 = vmatmul.mubr.bf16.vlgmr.msra.gmra.mxu0 %v9697_v16 }
 0x603   : > { %15771 = vmatprep.mubr.bf16.mxu0 %v9698_v54  ;;  %v9405_v54 = vld [vmem:[#allocation2 + $0xa0] sm:$0xff] }
 0x605   : > { %15660 = vmatmul.mubr.bf16.gmra.mxu1 %v19252_v3 }
 0x606   : > { %15723 = vmatprep.mubr.bf16.mxu1 %v9417_v15  ;;  %v9425_v15 = vpack.c.bf16 %v9406_v1, %v9405_v54  ;;  %v9950_v54 = vld [vmem:[#allocation2 + $0x3a] sm:$0xff] }
 0x60a   : > { %15772 = vmatmul.mubr.bf16.gmra.mxu0 %v9699_v27 }
 0x60b   : > { %15775 = vmatprep.mubr.bf16.mxu0 %v9700_v33 }
 0x60d   : > { %15724 = vmatmul.mubr.bf16.vlgmr.msra.gmra.mxu1 %v9418_v2 }
 0x60e   : > { %15727 = vmatprep.mubr.bf16.mxu1 %v9419_v59  ;;  %15796 = vmatpush3.bf16.msra.mxu1 %v16567_v7  ;;  %v9687_v7 = vld [vmem:[#allocation2 + $0xb9] sm:$0xff]  ;;  %v9410_v59 = vld [vmem:[#allocation2 + $0xc8] sm:$0xff] }
 0x60f   : > { %15797 = vmatprep.subr.bf16.mxu1 %v16568_v22  ;;  %v9705_v62 = vpack.c.bf16 %v9687_v7, %v9686_v11 }
 0x612   : > { %15798 = vmatpush3.bf16.msra.mxu1 %v16568_v22  ;;  %15776 = vmatmul.mubr.bf16.gmra.mxu0 %v9701_v12  ;;  %v9694_v12 = vld [vmem:[#allocation2 + $0xf1] sm:$0xff] }
 0x613   : > { %15779 = vmatprep.mubr.bf16.mxu0 %v9702_v44  ;;  %15799 = vmatprep.subr.bf16.mxu1 %v16569_v31  ;;  %v9427_v44 = vpack.c.bf16 %v9410_v59, %v9409_v4  ;;  %v9954_v4 = vld [vmem:[#allocation2 + $0x5a] sm:$0xff] }
 0x615   : > { %15728 = vmatmul.mubr.bf16.gmra.mxu1 %v9420_v19 }
 0x616   : > { %15731 = vmatprep.mubr.bf16.mxu1 %v9421_v30  ;;  %15800 = vmatpush3.bf16.msra.mxu1 %v16569_v31  ;;  %v9426_v31 = vpack.c.bf16 %v9408_v14, %v9407_v57  ;;  %v9709_v30 = vpack.c.bf16 %v9695_v32, %v9694_v12 }
 0x617   : > { %15801 = vmatprep.subr.bf16.mxu1 %v16570_v40 }
 0x619   : > { %v15505_v63 = vpop.f32.mrf.mxu0 }
 0x61a   : > { %15780 = vmatmul.mubr.bf16.gmra.mxu0 %v9703_v42  ;;  %15802 = vmatpush3.bf16.msra.mxu1 %v16570_v40 }
 0x61b   : > { %15783 = vmatprep.mubr.bf16.mxu0 %v9704_v38  ;;  %15803 = vmatprep.subr.bf16.mxu1 %v16571_v26  ;;  %v8162_v8 = vpop.f32.mrf.mxu0 }
 0x61d   : > { %15732 = vmatmul.mubr.bf16.gmra.mxu1 %v9422_v17  ;;  %v15506_v0 = vpop.f32.mrf.mxu0 }
 0x61e   : > { %15735 = vmatprep.mubr.bf16.mxu1 %v9423_v6  ;;  %15804 = vmatpush3.bf16.msra.mxu1 %v16571_v26 }
 0x61f   : > { %15805 = vmatprep.subr.bf16.mxu1 %v16572_v35  ;;  %v19255_v9 = vpop.f32.mrf.mxu0 }
 0x622   : > { %v15509_v16 = vpop.f32.mrf.mxu0  ;;  %15784 = vmatmul.mubr.bf16.gmra.mxu0 %v9705_v62  ;;  %15806 = vmatpush3.bf16.msra.mxu1 %v16572_v35 }
 0x623   : > { %15787 = vmatprep.mubr.bf16.mxu0 %v9706_v34  ;;  %15807 = vmatprep.subr.bf16.mxu1 %v16573_v39 }
 0x624   : > { %v8178_v61 = vpop.f32.mrf.mxu0  ;;  %v15461_v36 = vpop.f32.mrf.mxu1 }
 0x625   : > { %15736 = vmatmul.mubr.bf16.gmra.mxu1 %v9424_v41  ;;  %v19257_v43 = vadd.f32 %v15505_v63, %v15461_v36  ;;  %v9952_v36 = vld [vmem:[#allocation2 + $0x4a] sm:$0xff] }
 0x626   : > { %15739 = vmatprep.mubr.bf16.mxu1 %v9425_v15  ;;  %v15510_v27 = vpop.f32.mrf.mxu0  ;;  %15808 = vmatpush3.bf16.msra.mxu1 %v16573_v39  ;;  %v7969_v13 = vpop.f32.mrf.mxu1 }
 0x627   : > { %15809 = vmatprep.subr.bf16.mxu1 %v16574_v29  ;;  %v19259_v33 = vadd.f32 %v8162_v8, %v7969_v13 }
 0x628   : > { %v19261_v2 = vpop.f32.mrf.mxu0  ;;  %v15462_v22 = vpop.f32.mrf.mxu1 }
 0x629   : > { %v19263_v24 = vadd.f32 %v15506_v0, %v15462_v22  ;;  %v9947_v0 = vld [vmem:[#allocation2 + $0x22] sm:$0xff] }
 0x62a   : > { %v15513_v28 = vpop.f32.mrf.mxu0  ;;  %15788 = vmatmul.mubr.bf16.gmra.mxu0 %v9707_v50  ;;  %15810 = vmatpush3.bf16.msra.mxu1 %v16574_v29  ;;  %v19265_v49 = vpop.f32.mrf.mxu1  ;;  %v9975_v48 = vpack.c.bf16 %v9948_v51, %v9947_v0  ;;  %v9959_v51 = vld [vmem:[#allocation2 + $0x82] sm:$0xff] }
 0x62b   : > { %15791 = vmatprep.mubr.bf16.mxu0 %v19252_v3  ;;  %v9411_v3 = vld [vmem:[#allocation2 + $0xd0] sm:$0xff] }
 0x62c   : > { %v8194_v45 = vpop.f32.mrf.mxu0  ;;  %v15465_v19 = vpop.f32.mrf.mxu1  ;;  %v9428_v38 = vpack.c.bf16 %v9412_v56, %v9411_v3 }
 0x62d   : > { %15740 = vmatmul.mubr.bf16.gmra.mxu1 %v9426_v31  ;;  %v19268_v60 = vadd.f32 %v15509_v16, %v15465_v19 }
 0x62e   : > { %15743 = vmatprep.mubr.bf16.mxu1 %v9427_v44  ;;  %v15514_v40 = vpop.f32.mrf.mxu0  ;;  %v7985_v55 = vpop.f32.mrf.mxu1  ;;  %v9955_v44 = vld [vmem:[#allocation2 + $0x62] sm:$0xff] }
 0x62f   : > { %v19270_v53 = vadd.f32 %v8178_v61, %v7985_v55  ;;  %v9951_v61 = vld [vmem:[#allocation2 + $0x42] sm:$0xff] }
 0x630   : > { %v19272_v58 = vpop.f32.mrf.mxu0  ;;  %v15466_v26 = vpop.f32.mrf.mxu1  ;;  %v9977_v14 = vpack.c.bf16 %v9952_v36, %v9951_v61 }
 0x631   : > { %v19274_v46 = vadd.f32 %v15510_v27, %v15466_v26 }
 0x632   : > { %v15517_v42 = vpop.f32.mrf.mxu0  ;;  %15792 = vmatmul.mubr.bf16.gmra.mxu0 %v9709_v30  ;;  %v19276_v25 = vpop.f32.mrf.mxu1 }
 0x634   : > { %v8210_v52 = vpop.f32.mrf.mxu0 }
 0x635   : > { %v15469_v63 = vpop.f32.mrf.mxu1  ;;  %15744 = vmatmul.mubr.bf16.gmra.mxu1 %v9428_v38 }
 0x636   : > { %v19278_v17 = vadd.f32 %v15513_v28, %v15469_v63  ;;  %15747 = vmatprep.mubr.bf16.mxu1 %v19211_v21  ;;  %v15518_v37 = vpop.f32.mrf.mxu0 }
 0x637   : > { %v8001_v35 = vpop.f32.mrf.mxu1 }
 0x638   : > { %v19281_v6 = vadd.f32 %v8194_v45, %v8001_v35  ;;  %v19283_v8 = vpop.f32.mrf.mxu0  ;;  %v9956_v45 = vld [vmem:[#allocation2 + $0x6a] sm:$0xff]  ;;  %v9958_v35 = vld [vmem:[#allocation2 + $0x7a] sm:$0xff] }
 0x639   : > { %v15470_v7 = vpop.f32.mrf.mxu1  ;;  %v9979_v26 = vpack.c.bf16 %v9956_v45, %v9955_v44 }
 0x63a   : > { %v19285_v23 = vadd.f32 %v15514_v40, %v15470_v7  ;;  %v15521_v11 = vpop.f32.mrf.mxu0  ;;  %v9953_v40 = vld [vmem:[#allocation2 + $0x52] sm:$0xff] }
 0x63b   : > { %v19287_v39 = vpop.f32.mrf.mxu1  ;;  %v9978_v56 = vpack.c.bf16 %v9954_v4, %v9953_v40 }
 0x63c   : > { %v8226_v62 = vpop.f32.mrf.mxu0 }
 0x63d   : > { %v15473_v1 = vpop.f32.mrf.mxu1  ;;  %15748 = vmatmul.mubr.bf16.gmra.mxu1 %v19211_v21  ;;  %v9976_v21 = vpack.c.bf16 %v9950_v54, %v9949_v20 }
 0x63e   : > { %v19290_v34 = vadd.f32 %v15517_v42, %v15473_v1  ;;  %15811 = vmatprep.mubr.bf16.mxu1 %v9975_v48  ;;  %v15522_v5 = vpop.f32.mrf.mxu0 }
 0x63f   : > { %v8017_v16 = vpop.f32.mrf.mxu1 }
 0x640   : > { %v19292_v41 = vadd.f32 %v8210_v52, %v8017_v16  ;;  %v19294_v29 = vpop.f32.mrf.mxu0 }
 0x641   : > { %20906 = vst [vmem:[#allocation50_spill] sm:$0xff] %v19294_v29  ;;  %v15474_v15 = vpop.f32.mrf.mxu1 }
 0x642   : > { %v19296_v47 = vadd.f32 %v15518_v37, %v15474_v15  ;;  %v15525_v27 = vpop.f32.mrf.mxu0 }
 0x643   : > { %v19298_v13 = vpop.f32.mrf.mxu1 }
 0x644   : > { %v8242_v50 = vpop.f32.mrf.mxu0 }
 0x645   : > { %v15477_v22 = vpop.f32.mrf.mxu1  ;;  %15812 = vmatmul.mubr.bf16.vlgmr.msra.gmra.mxu1 %v9976_v21 }
 0x646   : > { %v19300_v59 = vadd.f32 %v15521_v11, %v15477_v22  ;;  %15815 = vmatprep.mubr.bf16.mxu1 %v9977_v14  ;;  %v15526_v57 = vpop.f32.mrf.mxu0  ;;  %v9960_v11 = vld [vmem:[#allocation2 + $0x8a] sm:$0xff]  ;;  %v9962_v14 = vld [vmem:[#allocation2 + $0x9a] sm:$0xff] }
 0x647   : > { %v8033_v28 = vpop.f32.mrf.mxu1  ;;  %v9981_v54 = vpack.c.bf16 %v9960_v11, %v9959_v51 }
 0x648   : > { %v19302_v31 = vadd.f32 %v8226_v62, %v8033_v28  ;;  %v19304_v12 = vpop.f32.mrf.mxu0  ;;  %v9957_v62 = vld [vmem:[#allocation2 + $0x72] sm:$0xff]  ;;  %v9964_v28 = vld [vmem:[#allocation2 + $0xaa] sm:$0xff] }
 0x649   : > { %20907 = vst [vmem:[#allocation53_spill] sm:$0xff] %v19304_v12  ;;  %v15478_v32 = vpop.f32.mrf.mxu1  ;;  %v9980_v16 = vpack.c.bf16 %v9958_v35, %v9957_v62  ;;  %v9967_v62 = vld [vmem:[#allocation2 + $0xc2] sm:$0xff] }
 0x64a   : > { %v19306_v19 = vadd.f32 %v15522_v5, %v15478_v32  ;;  %v15529_v30 = vpop.f32.mrf.mxu0  ;;  %v9961_v32 = vld [vmem:[#allocation2 + $0x92] sm:$0xff] }
 0x64b   : > { %v19308_v55 = vpop.f32.mrf.mxu1  ;;  %v9982_v40 = vpack.c.bf16 %v9962_v14, %v9961_v32 }
 0x64c   : > { %20908 = vst [vmem:[#allocation55_spill] sm:$0xff] %v19308_v55  ;;  %v8258_v3 = vpop.f32.mrf.mxu0 }
 0x64d   : > { %v15481_v42 = vpop.f32.mrf.mxu1  ;;  %15816 = vmatmul.mubr.bf16.gmra.mxu1 %v9978_v56 }
 0x64e   : > { %v19310_v38 = vadd.f32 %v15525_v27, %v15481_v42  ;;  %15819 = vmatprep.mubr.bf16.mxu1 %v9979_v26  ;;  %v15530_v52 = vpop.f32.mrf.mxu0 }
 0x64f   : > { %v8049_v63 = vpop.f32.mrf.mxu1 }
 0x650   : > { %v19312_v37 = vadd.f32 %v8242_v50, %v8049_v63  ;;  %v19314_v7 = vpop.f32.mrf.mxu0 }
 0x651   : > { %20909 = vst [vmem:[#allocation52_spill] sm:$0xff] %v19314_v7  ;;  %v15482_v0 = vpop.f32.mrf.mxu1 }
 0x652   : > { %v19316_v48 = vadd.f32 %v15526_v57, %v15482_v0  ;;  %v15593_v1 = vpop.f32.mrf.mxu0  ;;  %v9963_v57 = vld [vmem:[#allocation2 + $0xa2] sm:$0xff]  ;;  %v9966_v0 = vld [vmem:[#allocation2 + $0xba] sm:$0xff] }
 0x653   : > { %v19318_v5 = vpop.f32.mrf.mxu1 }
 0x654   : > { %20910 = vst [vmem:[#allocation37_spill] sm:$0xff] %v19318_v5  ;;  %v8692_v15 = vpop.f32.mrf.mxu0 }
 0x655   : > { %v15485_v61 = vpop.f32.mrf.mxu1  ;;  %15820 = vmatmul.mubr.bf16.gmra.mxu1 %v9980_v16  ;;  %v9968_v16 = vld [vmem:[#allocation2 + $0xca] sm:$0xff] }
 0x656   : > { %v19320_v36 = vadd.f32 %v15529_v30, %v15485_v61  ;;  %15823 = vmatprep.mubr.bf16.mxu1 %v9981_v54  ;;  %v15594_v20 = vpop.f32.mrf.mxu0  ;;  %v9983_v30 = vpack.c.bf16 %v9964_v28, %v9963_v57  ;;  %v9965_v61 = vld [vmem:[#allocation2 + $0xb2] sm:$0xff]  ;;  %v9985_v57 = vpack.c.bf16 %v9968_v16, %v9967_v62 }
 0x657   : > { %v8065_v27 = vpop.f32.mrf.mxu1 }
 0x658   : > { %v19322_v21 = vadd.f32 %v8258_v3, %v8065_v27  ;;  %v19324_v50 = vpop.f32.mrf.mxu0 }
 0x659   : > { %v15486_v22 = vpop.f32.mrf.mxu1 }
 0x65a   : > { %v19326_v4 = vadd.f32 %v15530_v52, %v15486_v22  ;;  %v15597_v44 = vpop.f32.mrf.mxu0  ;;  %v9984_v22 = vpack.c.bf16 %v9966_v0, %v9965_v61 }
 0x65b   : > { %v19328_v45 = vpop.f32.mrf.mxu1 }
 0x65c   : > { %20911 = vst [vmem:[#allocation67_spill] sm:$0xff] %v19328_v45  ;;  %v8708_v56 = vpop.f32.mrf.mxu0 }
 0x65d   : > { %v15549_v26 = vpop.f32.mrf.mxu1  ;;  %15824 = vmatmul.mubr.bf16.gmra.mxu1 %v9982_v40 }
 0x65e   : > { %v8526_v3 = vadd.f32 %v15549_v26, %v19257_v43  ;;  %15827 = vmatprep.mubr.bf16.mxu1 %v9983_v30  ;;  %v15598_v42 = vpop.f32.mrf.mxu0  ;;  %v16575_v30 = vld [vmem:[#allocation4 + $0x978] sm:$0xff]  }
 0x65f   : > { %v8413_v63 = vpop.f32.mrf.mxu1  ;;  %15839 = vmatprep.subr.bf16.mxu0 %v16575_v30 }
 0x660   : > { %v8524_v35 = vadd.f32 %v8413_v63, %v19259_v33  ;;  %v19332_v51 = vpop.f32.mrf.mxu0  ;;  %v19334_v52 = vadd.f32 %v15593_v1, %v8526_v3  ;;  %15840 = vmatpush3.bf16.msra.mxu0 %v16575_v30 }
 0x661   : > { %v15550_v11 = vpop.f32.mrf.mxu1 }
 0x662   : > { %v8527_v54 = vadd.f32 %v15550_v11, %v19263_v24  ;;  %v15601_v27 = vpop.f32.mrf.mxu0  ;;  %v19337_v14 = vadd.f32 %v8692_v15, %v8524_v35 }
 0x663   : > { %v19339_v43 = vpop.f32.mrf.mxu1 }
 0x664   : > { %v8724_v28 = vpop.f32.mrf.mxu0  ;;  %v19341_v33 = vadd.f32 %v15594_v20, %v8527_v54  ;;  %v9974_v54 = vld [vmem:[#allocation2 + $0xfa] sm:$0xff] }
 0x665   : > { %v15553_v32 = vpop.f32.mrf.mxu1  ;;  %15828 = vmatmul.mubr.bf16.gmra.mxu1 %v9984_v22  ;;  %v16576_v22 = vld [vmem:[#allocation4 + $0x970] sm:$0xff]  }
 0x666   : > { %v8530_v1 = vadd.f32 %v15553_v32, %v19268_v60  ;;  %15831 = vmatprep.mubr.bf16.mxu1 %v9985_v57  ;;  %v15602_v40 = vpop.f32.mrf.mxu0  ;;  %15841 = vmatprep.subr.bf16.mxu0 %v16576_v22 }
 0x667   : > { %v8429_v26 = vpop.f32.mrf.mxu1  ;;  %15842 = vmatpush3.bf16.msra.mxu0 %v16576_v22 }
 0x668   : > { %v8528_v24 = vadd.f32 %v8429_v26, %v19270_v53  ;;  %v19345_v3 = vpop.f32.mrf.mxu0  ;;  %v19347_v15 = vadd.f32 %v15597_v44, %v8530_v1  ;;  %v9973_v44 = vld [vmem:[#allocation2 + $0xf2] sm:$0xff] }
 0x669   : > { %v15554_v63 = vpop.f32.mrf.mxu1  ;;  %v9988_v1 = vpack.c.bf16 %v9974_v54, %v9973_v44 }
 0x66a   : > { %v8531_v20 = vadd.f32 %v15554_v63, %v19274_v46  ;;  %v15605_v35 = vpop.f32.mrf.mxu0  ;;  %v19350_v0 = vadd.f32 %v8708_v56, %v8528_v24  ;;  %v16577_v63 = vld [vmem:[#allocation4 + $0x968] sm:$0xff]  }
 0x66b   : > { %v19352_v11 = vpop.f32.mrf.mxu1  ;;  %15843 = vmatprep.subr.bf16.mxu0 %v16577_v63 }
 0x66c   : > { %v8740_v60 = vpop.f32.mrf.mxu0  ;;  %v19354_v62 = vadd.f32 %v15598_v42, %v8531_v20  ;;  %15844 = vmatpush3.bf16.msra.mxu0 %v16577_v63 }
 0x66d   : > { %v15557_v16 = vpop.f32.mrf.mxu1  ;;  %15832 = vmatmul.mubr.bf16.gmra.mxu1 %v19222_v10 }
 0x66e   : > { %v8534_v53 = vadd.f32 %v15557_v16, %v19278_v17  ;;  %15835 = vmatprep.mubr.bf16.mxu1 %v19247_v18  ;;  %v15606_v61 = vpop.f32.mrf.mxu0 }
 0x66f   : > { %v8445_v46 = vpop.f32.mrf.mxu1 }
 0x670   : > { %v8532_v56 = vadd.f32 %v8445_v46, %v19281_v6  ;;  %v19360_v57 = vpop.f32.mrf.mxu0  ;;  %v19362_v32 = vadd.f32 %v15601_v27, %v8534_v53 }
 0x671   : > { %20912 = vst [vmem:[#allocation63_spill] sm:$0xff] %v19360_v57  ;;  %v15558_v42 = vpop.f32.mrf.mxu1 }
 0x672   : > { %v8535_v10 = vadd.f32 %v15558_v42, %v19285_v23  ;;  %v15609_v17 = vpop.f32.mrf.mxu0  ;;  %v19365_v30 = vadd.f32 %v8724_v28, %v8532_v56  ;;  %v16578_v42 = vld [vmem:[#allocation4 + $0x960] sm:$0xff]  }
 0x673   : > { %v19367_v18 = vpop.f32.mrf.mxu1  ;;  %15845 = vmatprep.subr.bf16.mxu0 %v16578_v42 }
 0x674   : > { %v8756_v26 = vpop.f32.mrf.mxu0  ;;  %v19369_v24 = vadd.f32 %v15602_v40, %v8535_v10  ;;  %15846 = vmatpush3.bf16.msra.mxu0 %v16578_v42 }
 0x675   : > { %v15561_v6 = vpop.f32.mrf.mxu1  ;;  %15836 = vmatmul.mubr.bf16.gmra.mxu1 %v9988_v1  ;;  %v16579_v1 = vld [vmem:[#allocation4 + $0x938] sm:$0xff]  }
 0x676   : > { %v8538_v27 = vadd.f32 %v15561_v6, %v19290_v34  ;;  %v15610_v20 = vpop.f32.mrf.mxu0  ;;  %15883 = vmatprep.subr.bf16.mxu1 %v16579_v1 }
 0x677   : > { %v8461_v16 = vpop.f32.mrf.mxu1  ;;  %15884 = vmatpush3.bf16.msra.mxu1 %v16579_v1 }
 0x678   : > { %v8536_v53 = vadd.f32 %v8461_v16, %v19292_v41  ;;  %v19373_v23 = vpop.f32.mrf.mxu0  ;;  %v19375_v28 = vadd.f32 %v15605_v35, %v8538_v27  ;;  %v16580_v27 = vld [vmem:[#allocation4 + $0x930] sm:$0xff]  }
 0x679   : > { %20913 = vst [vmem:[#allocation24_spill] sm:$0xff] %v19373_v23  ;;  %v15562_v44 = vpop.f32.mrf.mxu1  ;;  %15885 = vmatprep.subr.bf16.mxu1 %v16580_v27 }
 0x67a   : > { %v8539_v54 = vadd.f32 %v15562_v44, %v19296_v47  ;;  %v15613_v40 = vpop.f32.mrf.mxu0  ;;  %v19378_v22 = vadd.f32 %v8740_v60, %v8536_v53 }
 0x67b   : > { %v19380_v46 = vpop.f32.mrf.mxu1  ;;  %15886 = vmatpush3.bf16.msra.mxu1 %v16580_v27 }
 0x67c   : > { %v8772_v56 = vpop.f32.mrf.mxu0  ;;  %v19382_v34 = vadd.f32 %v15606_v61, %v8539_v54 }
 0x67d   : > { %v15565_v10 = vpop.f32.mrf.mxu1 }
 0x67e   : > { %v8542_v41 = vadd.f32 %v15565_v10, %v19300_v59  ;;  %v15614_v63 = vpop.f32.mrf.mxu0  ;;  %v16581_v59 = vld [vmem:[#allocation4 + $0x958] sm:$0xff]  }
 0x67f   : > { %v8477_v35 = vpop.f32.mrf.mxu1  ;;  %15847 = vmatprep.subr.bf16.mxu0 %v16581_v59 }
 0x680   : > { %v8540_v47 = vadd.f32 %v8477_v35, %v19302_v31  ;;  %v19386_v60 = vpop.f32.mrf.mxu0  ;;  %v19388_v6 = vadd.f32 %v15609_v17, %v8542_v41  ;;  %v16582_v31 = vld [vmem:[#allocation4 + $0x928] sm:$0xff]   ;;  %15848 = vmatpush3.bf16.msra.mxu0 %v16581_v59  ;;  %v16583_v59 = vld [vmem:[#allocation4 + $0x920] sm:$0xff]  }
 0x681   : > { %20914 = vst [vmem:[#allocation13_spill] sm:$0xff] %v19386_v60  ;;  %v15566_v61 = vpop.f32.mrf.mxu1  ;;  %15887 = vmatprep.subr.bf16.mxu1 %v16582_v31 }
 0x682   : > { %v8543_v16 = vadd.f32 %v15566_v61, %v19306_v19  ;;  %v15617_v53 = vpop.f32.mrf.mxu0  ;;  %v19391_v44 = vadd.f32 %v8756_v26, %v8540_v47  ;;  %15888 = vmatpush3.bf16.msra.mxu1 %v16582_v31 }
 0x683   : > { %v19393_v54 = vpop.f32.mrf.mxu1  ;;  %15889 = vmatprep.subr.bf16.mxu1 %v16583_v59 }
 0x684   : > { %20915 = vst [vmem:[#allocation46_spill] sm:$0xff] %v19393_v54  ;;  %v8788_v42 = vpop.f32.mrf.mxu0  ;;  %v19395_v1 = vadd.f32 %v15610_v20, %v8543_v16 }
 0x685   : > { %v15569_v10 = vpop.f32.mrf.mxu1 }
 0x686   : > { %v8546_v17 = vadd.f32 %v15569_v10, %v19310_v38  ;;  %v15618_v41 = vpop.f32.mrf.mxu0  ;;  %15890 = vmatpush3.bf16.msra.mxu1 %v16583_v59 }
 0x687   : > { %v8493_v19 = vpop.f32.mrf.mxu1 }
 0x688   : > { %v8544_v26 = vadd.f32 %v8493_v19, %v19312_v37  ;;  %v19399_v35 = vpop.f32.mrf.mxu0  ;;  %v19401_v47 = vadd.f32 %v15613_v40, %v8546_v17  ;;  %v16584_v17 = vld [vmem:[#allocation4 + $0x950] sm:$0xff]  }
 0x689   : > { %20916 = vst [vmem:[#allocation51_spill] sm:$0xff] %v19399_v35  ;;  %v15570_v27 = vpop.f32.mrf.mxu1  ;;  %15849 = vmatprep.subr.bf16.mxu0 %v16584_v17 }
 0x68a   : > { %v8547_v20 = vadd.f32 %v15570_v27, %v19316_v48  ;;  %v19404_v61 = vpop.f32.mrf.mxu0  ;;  %v19406_v16 = vadd.f32 %v8772_v56, %v8544_v26  ;;  %v16585_v48 = vld [vmem:[#allocation4 + $0x918] sm:$0xff]   ;;  %15850 = vmatpush3.bf16.msra.mxu0 %v16584_v17 }
 0x68b   : > { %v19408_v60 = vpop.f32.mrf.mxu1  ;;  %15891 = vmatprep.subr.bf16.mxu1 %v16585_v48 }
 0x68c   : > { %20917 = vst [vmem:[#allocation59_spill] sm:$0xff] %v19408_v60  ;;  %v19410_v38 = vpop.f32.mrf.mxu0  ;;  %v19412_v10 = vadd.f32 %v15614_v63, %v8547_v20  ;;  %15892 = vmatpush3.bf16.msra.mxu1 %v16585_v48 }
 0x68d   : > { %v15573_v37 = vpop.f32.mrf.mxu1 }
 0x68e   : > { %v8550_v40 = vadd.f32 %v15573_v37, %v19320_v36  ;;  %v19415_v31 = vpop.f32.mrf.mxu0  ;;  %v16586_v37 = vld [vmem:[#allocation4 + $0x910] sm:$0xff]  }
 0x68f   : > { %v8509_v19 = vpop.f32.mrf.mxu1  ;;  %15893 = vmatprep.subr.bf16.mxu1 %v16586_v37 }
 0x690   : > { %v8548_v56 = vadd.f32 %v8509_v19, %v19322_v21  ;;  %v19418_v26 = vpop.f32.mrf.mxu0  ;;  %v19420_v27 = vadd.f32 %v15617_v53, %v8550_v40  ;;  %v16587_v53 = vld [vmem:[#allocation4 + $0x948] sm:$0xff]   ;;  %15894 = vmatpush3.bf16.msra.mxu1 %v16586_v37 }
 0x691   : > { %v15574_v63 = vpop.f32.mrf.mxu1  ;;  %15851 = vmatprep.subr.bf16.mxu0 %v16587_v53 }
 0x692   : > { %v8551_v20 = vadd.f32 %v15574_v63, %v19326_v4  ;;  %v19423_v59 = vpop.f32.mrf.mxu0  ;;  %v19425_v36 = vadd.f32 %v8788_v42, %v8548_v56  ;;  %v16588_v4 = vld [vmem:[#allocation4 + $0x908] sm:$0xff]   ;;  %15852 = vmatpush3.bf16.msra.mxu0 %v16587_v53 }
 0x693   : > { %v19427_v35 = vpop.f32.mrf.mxu1  ;;  %15895 = vmatprep.subr.bf16.mxu1 %v16588_v4 }
 0x694   : > { %20918 = vst [vmem:[#allocation45_spill] sm:$0xff] %v19427_v35  ;;  %v19429_v60 = vpop.f32.mrf.mxu0  ;;  %v19431_v21 = vadd.f32 %v15618_v41, %v8551_v20  ;;  %15896 = vmatpush3.bf16.msra.mxu1 %v16588_v4  ;;  %v16589_v35 = vld [vmem:[#allocation4 + $0x940] sm:$0xff]  }
 0x695   : > { %v15637_v40 = vpop.f32.mrf.mxu1  ;;  %15853 = vmatprep.subr.bf16.mxu0 %v16589_v35 }
 0x696   : > { %v19434_v17 = vadd.f32 %v15637_v40, %v19334_v52  ;;  %v19436_v48 = vpop.f32.mrf.mxu0  ;;  %v16590_v52 = vld [vmem:[#allocation4 + $0x900] sm:$0xff]   ;;  %15854 = vmatpush3.bf16.msra.mxu0 %v16589_v35 }
 0x697   : > { %v8971_v42 = vpop.f32.mrf.mxu1  ;;  %15897 = vmatprep.subr.bf16.mxu1 %v16590_v52 }
 0x698   : > { %v19439_v19 = vadd.f32 %v8971_v42, %v19337_v14  ;;  %v19441_v56 = vpop.f32.mrf.mxu0  ;;  %15898 = vmatpush3.bf16.msra.mxu1 %v16590_v52  ;;  %v19467_v52 = vld [vmem:[#allocation4 + $0x9b8] sm:$0xff]  }
 0x699   : > { %v15638_v41 = vpop.f32.mrf.mxu1  ;;  %20922 = vst [vmem:[#allocation72_spill] sm:$0xff] %v19467_v52  ;;  %15927 = vmatprep.subr.bf16.mxu0 %v19467_v52 }
 0x69a   : > { %v19444_v63 = vadd.f32 %v15638_v41, %v19341_v33  ;;  %v19446_v20 = vpop.f32.mrf.mxu0 }
 0x69b   : > { %v19448_v37 = vpop.f32.mrf.mxu1 }
 0x69c   : > { %v19450_v40 = vpop.f32.mrf.mxu0 }
 0x69d   : > { %v15641_v53 = vpop.f32.mrf.mxu1 }
 0x69e   : > { %v19453_v14 = vadd.f32 %v15641_v53, %v19347_v15  ;;  %v19455_v42 = vpop.f32.mrf.mxu0 }
 0x69f   : > { %20919 = vst [vmem:[#allocation66_spill] sm:$0xff] %v19455_v42  ;;  %v8987_v4 = vpop.f32.mrf.mxu1 }
 0x6a0   : > { %v19458_v33 = vadd.f32 %v8987_v4, %v19350_v0  ;;  %v19460_v41 = vpop.f32.mrf.mxu0 }
 0x6a1   : > { %20920 = vst [vmem:[#allocation74_spill] sm:$0xff] %v19460_v41  ;;  %v15642_v7 = vpop.f32.mrf.mxu1 }
 0x6a2   : > { %v19463_v45 = vadd.f32 %v15642_v7, %v19354_v62  ;;  %v19465_v23 = vpop.f32.mrf.mxu0 }
 0x6a3   : > { %20921 = vst [vmem:[#allocation10_spill] sm:$0xff] %v19465_v23  ;;  %v19469_v15 = vpop.f32.mrf.mxu1 }
 0x6a4   : > { %v19471_v53 = vpop.f32.mrf.mxu0 }
 0x6a5   : > { %20923 = vst [vmem:[#allocation77_spill] sm:$0xff] %v19471_v53  ;;  %v15645_v35 = vpop.f32.mrf.mxu1 }
 0x6a6   : > { %v19475_v0 = vadd.f32 %v15645_v35, %v19362_v32  ;;  %v19477_v4 = vpop.f32.mrf.mxu0 }
 0x6a7   : > { %20924 = vst [vmem:[#allocation26_spill] sm:$0xff] %v19477_v4  ;;  %v9003_v12 = vpop.f32.mrf.mxu1 }
 0x6a8   : > { %v19480_v7 = vadd.f32 %v9003_v12, %v19365_v30  ;;  %v19482_v62 = vpop.f32.mrf.mxu0 }
 0x6a9   : > { %20925 = vst [vmem:[#allocation18_spill] sm:$0xff] %v19482_v62  ;;  %v15646_v5 = vpop.f32.mrf.mxu1 }
 0x6aa   : > { %v19485_v54 = vadd.f32 %v15646_v5, %v19369_v24  ;;  %v19487_v23 = vpop.f32.mrf.mxu0 }
 0x6ab   : > { %20927 = vst [vmem:[#allocation40_spill] sm:$0xff] %v19487_v23  ;;  %v19489_v53 = vpop.f32.mrf.mxu1 }
 0x6ac   : > { %20926 = vst [vmem:[#allocation28_spill] sm:$0xff] %v19485_v54  ;;  %v19491_v52 = vpop.f32.mrf.mxu0 }
 0x6ad   : > { %20928 = vst [vmem:[#allocation75_spill] sm:$0xff] %v19491_v52  ;;  %v15649_v32 = vpop.f32.mrf.mxu1 }
 0x6ae   : > { %v19494_v35 = vadd.f32 %v15649_v32, %v19375_v28  ;;  %v19496_v4 = vpop.f32.mrf.mxu0 }
 0x6af   : > { %20930 = vst [vmem:[#allocation44_spill] sm:$0xff] %v19496_v4  ;;  %v9019_v12 = vpop.f32.mrf.mxu1 }
 0x6b0   : > { %20929 = vst [vmem:[#allocation64_spill] sm:$0xff] %v19494_v35  ;;  %v19499_v30 = vadd.f32 %v9019_v12, %v19378_v22  ;;  %v19501_v62 = vpop.f32.mrf.mxu0  ;;  %v19517_v22 = vld [vmem:[#allocation4 + $0x9f8] sm:$0xff]  }
 0x6b1   : > { %20932 = vst [vmem:[#allocation39_spill] sm:$0xff] %v19501_v62  ;;  %v15650_v5 = vpop.f32.mrf.mxu1  ;;  %20939 = vst [vmem:[#allocation65_spill] sm:$0xff] %v19517_v22  ;;  %15971 = vmatprep.subr.bf16.mxu1 %v19517_v22 }
 0x6b2   : > { %20931 = vst [vmem:[#allocation25_spill] sm:$0xff] %v19499_v30  ;;  %v19504_v24 = vadd.f32 %v15650_v5, %v19382_v34  ;;  %v19506_v23 = vpop.f32.mrf.mxu0 }
 0x6b3   : > { %20934 = vst [vmem:[#allocation15_spill] sm:$0xff] %v19506_v23  ;;  %v19508_v57 = vpop.f32.mrf.mxu1 }
 0x6b4   : > { %20933 = vst [vmem:[#allocation12_spill] sm:$0xff] %v19504_v24  ;;  %20935 = vst [vmem:[#allocation17_spill] sm:$0xff] %v19508_v57  ;;  %v19510_v52 = vpop.f32.mrf.mxu0 }
 0x6b5   : > { %20936 = vst [vmem:[#allocation42_spill] sm:$0xff] %v19510_v52  ;;  %v15653_v28 = vpop.f32.mrf.mxu1 }
 0x6b6   : > { %v19513_v32 = vadd.f32 %v15653_v28, %v19388_v6  ;;  %v19515_v4 = vpop.f32.mrf.mxu0 }
 0x6b7   : > { %20938 = vst [vmem:[#allocation23_spill] sm:$0xff] %v19515_v4  ;;  %v9035_v12 = vpop.f32.mrf.mxu1 }
 0x6b8   : > { %20937 = vst [vmem:[#allocation14_spill] sm:$0xff] %v19513_v32  ;;  %v19520_v62 = vadd.f32 %v9035_v12, %v19391_v44  ;;  %v19523_v5 = vpop.f32.mrf.mxu0 }
 0x6b9   : > { %v15654_v34 = vpop.f32.mrf.mxu1  ;;  %20941 = vst [vmem:[#allocation48_spill] sm:$0xff] %v19523_v5 }
 0x6ba   : > { %20940 = vst [vmem:[#allocation11_spill] sm:$0xff] %v19520_v62  ;;  %v19526_v23 = vadd.f32 %v15654_v34, %v19395_v1  ;;  %v19530_v28 = vpop.f32.mrf.mxu0 }
 0x6bb   : > { %v19528_v52 = vpop.f32.mrf.mxu1  ;;  %20944 = vst [vmem:[#allocation76_spill] sm:$0xff] %v19530_v28 }
 0x6bc   : > { %20942 = vst [vmem:[#allocation36_spill] sm:$0xff] %v19526_v23  ;;  %20943 = vst [vmem:[#allocation69_spill] sm:$0xff] %v19528_v52  ;;  %v19538_v62 = vpop.f32.mrf.mxu0 }
 0x6bd   : > { %v15657_v6 = vpop.f32.mrf.mxu1  ;;  %20947 = vst [vmem:[#allocation57_spill] sm:$0xff] %v19538_v62 }
 0x6be   : > { %v19533_v4 = vadd.f32 %v15657_v6, %v19401_v47  ;;  %v19545_v23 = vpop.f32.mrf.mxu0 }
 0x6bf   : > { %v9051_v32 = vpop.f32.mrf.mxu1  ;;  %20950 = vst [vmem:[#allocation62_spill] sm:$0xff] %v19545_v23 }
 0x6c0   : > { %20945 = vst [vmem:[#allocation38_spill] sm:$0xff] %v19533_v4  ;;  %v19536_v44 = vadd.f32 %v9051_v32, %v19406_v16  ;;  %v19553_v16 = vpop.f32.mrf.mxu0 }
 0x6c1   : > { %v15658_v12 = vpop.f32.mrf.mxu1  ;;  %20953 = vst [vmem:[#allocation43_spill] sm:$0xff] %v19553_v16 }
 0x6c2   : > { %20946 = vst [vmem:[#allocation20_spill] sm:$0xff] %v19536_v44  ;;  %v19541_v5 = vadd.f32 %v15658_v12, %v19412_v10  ;;  %v15769_v12 = vpop.f32.mrf.mxu0 }
 0x6c3   : > { %v19543_v1 = vpop.f32.mrf.mxu1 }
 0x6c4   : > { %20948 = vst [vmem:[#allocation22_spill] sm:$0xff] %v19541_v5  ;;  %20949 = vst [vmem:[#allocation21_spill] sm:$0xff] %v19543_v1  ;;  %v9808_v1 = vpop.f32.mrf.mxu0 }
 0x6c5   : > { %v15661_v34 = vpop.f32.mrf.mxu1 }
 0x6c6   : > { %v19548_v28 = vadd.f32 %v15661_v34, %v19420_v27  ;;  %v19560_v27 = vpop.f32.mrf.mxu0 }
 0x6c7   : > { %v9067_v47 = vpop.f32.mrf.mxu1 }
 0x6c8   : > { %20951 = vst [vmem:[#allocation54_spill] sm:$0xff] %v19548_v28  ;;  %v19551_v6 = vadd.f32 %v9067_v47, %v19425_v36  ;;  %v19564_v36 = vpop.f32.mrf.mxu0 }
 0x6c9   : > { %v15662_v32 = vpop.f32.mrf.mxu1 }
 0x6ca   : > { %20952 = vst [vmem:[#allocation49_spill] sm:$0xff] %v19551_v6  ;;  %v19556_v62 = vadd.f32 %v15662_v32, %v19431_v21  ;;  %v19570_v21 = vpop.f32.mrf.mxu0 }
 0x6cb   : > { %v19558_v10 = vpop.f32.mrf.mxu1 }
 0x6cc   : > { %20954 = vst [vmem:[#allocation33_spill] sm:$0xff] %v19556_v62  ;;  %20955 = vst [vmem:[#allocation27_spill] sm:$0xff] %v19558_v10  ;;  %v19576_v6 = vpop.f32.mrf.mxu0 }
 0x6cd   : > { %v15725_v5 = vpop.f32.mrf.mxu1 }
 0x6ce   : > { %v19582_v24 = vpop.f32.mrf.mxu0 }
 0x6cf   : > { %v9529_v44 = vpop.f32.mrf.mxu1 }
 0x6d0   : > { %v19588_v35 = vpop.f32.mrf.mxu0 }
 0x6d1   : > { %v15726_v23 = vpop.f32.mrf.mxu1  ;;  %20960 = vst [vmem:[#allocation19_spill] sm:$0xff] %v19588_v35 }
 0x6d2   : > { %v19594_v22 = vpop.f32.mrf.mxu0 }
 0x6d3   : > { %v9532_v4 = vpop.f32.mrf.mxu1 }
 0x6d5   : > { %v15729_v34 = vpop.f32.mrf.mxu1 }
 0x6d7   : > { %v19562_v28 = vpop.f32.mrf.mxu1 }
 0x6d9   : > { %v19566_v47 = vpop.f32.mrf.mxu1 }
 0x6db   : > { %v19568_v16 = vpop.f32.mrf.mxu1 }
 0x6dd   : > { %v19572_v32 = vpop.f32.mrf.mxu1 }
 0x6df   : > { %v19574_v62 = vpop.f32.mrf.mxu1 }
 0x6e1   : > { %v19578_v10 = vpop.f32.mrf.mxu1 }
 0x6e2   : > { %20956 = vst [vmem:[#allocation29_spill] sm:$0xff] %v19578_v10  ;;  %v19600_v10 = vpop.f32.mrf.mxu0 }
 0x6e3   : > { %v19580_v52 = vpop.f32.mrf.mxu1  ;;  %20965 = vst [vmem:[#allocation31_spill] sm:$0xff] %v19600_v10 }
 0x6e4   : > { %20957 = vst [vmem:[#allocation61_spill] sm:$0xff] %v19580_v52 }
 0x6e5   : > { %v19584_v30 = vpop.f32.mrf.mxu1 }
 0x6e6   : > { %20958 = vst [vmem:[#allocation32_spill] sm:$0xff] %v19584_v30  ;;  %v19606_v30 = vpop.f32.mrf.mxu0 }
 0x6e7   : > { %v19586_v57 = vpop.f32.mrf.mxu1  ;;  %20968 = vst [vmem:[#allocation60_spill] sm:$0xff] %v19606_v30 }
 0x6e8   : > { %20959 = vst [vmem:[#allocation16_spill] sm:$0xff] %v19586_v57 }
 0x6e9   : > { %v19590_v29 = vpop.f32.mrf.mxu1 }
 0x6ea   : > { %20961 = vst [vmem:[#allocation34_spill] sm:$0xff] %v19590_v29  ;;  %v19614_v29 = vpop.f32.mrf.mxu0 }
 0x6eb   : > { %v19592_v55 = vpop.f32.mrf.mxu1 }
 0x6ec   : > { %20962 = vst [vmem:[#allocation41_spill] sm:$0xff] %v19592_v55  ;;  %v8166_v55 = vadd.f32 %v19255_v9, %v19265_v49  ;;  %v8182_v9 = vadd.f32 %v19261_v2, %v19276_v25 }
 0x6ed   : > { %v19596_v41 = vpop.f32.mrf.mxu1 }
 0x6ee   : > { %20963 = vst [vmem:[#allocation47_spill] sm:$0xff] %v19596_v41 }
 0x6ef   : > { %v19598_v42 = vpop.f32.mrf.mxu1 }
 0x6f0   : > { %20964 = vst [vmem:[#allocation35_spill] sm:$0xff] %v19598_v42  ;;  %v8525_v42 = vadd.f32 %v19339_v43, %v8166_v55  ;;  %v9361_v55 = vadd.f32 %v19410_v38, %v19439_v19  ;;  %v8529_v43 = vadd.f32 %v19352_v11, %v8182_v9  ;;  %v19648_v11 = vld [vmem:[#allocation6 + $0x3] ss:$0 sm:$0xff]  ;;  %v9371_v9 = vadd.f32 %v19446_v20, %v19475_v0 }
 0x6f1   : > { %v19602_v52 = vpop.f32.mrf.mxu1  ;;  %v9369_v20 = vadd.f32 %v19450_v40, %v19480_v7  ;;  %v16596_v7 = vld [vmem:[#allocation4 + $0x9f0] sm:$0xff]  }
 0x6f2   : > { %20966 = vst [vmem:[#allocation68_spill] sm:$0xff] %v19602_v52  ;;  %v19621_v52 = vpop.f32.mrf.mxu0  ;;  %v8804_v30 = vadd.f32 %v19324_v50, %v8525_v42  ;;  %v9640_v50 = vadd.f32 %v9529_v44, %v9361_v55  ;;  %v8808_v42 = vadd.f32 %v19332_v51, %v8529_v43 }
 0x6f3   : > { %v19604_v54 = vpop.f32.mrf.mxu1 }
 0x6f4   : > { %20967 = vst [vmem:[#allocation56_spill] sm:$0xff] %v19604_v54  ;;  %v9919_v44 = vadd.f32 %v9808_v1, %v9640_v50 }
 0x6f5   : > { %v19608_v57 = vpop.f32.mrf.mxu1 }
 0x6f6   : > { %20969 = vst [vmem:[#allocation30_spill] sm:$0xff] %v19608_v57 }
 0x6f7   : > { %v19610_v35 = vpop.f32.mrf.mxu1 }
 0x6f8   : > { %20970 = vst [vmem:[#allocation70_spill] sm:$0xff] %v19610_v35  ;;  %v9363_v35 = vadd.f32 %v19404_v61, %v19434_v17  ;;  %v9364_v61 = vadd.f32 %v19415_v31, %v19444_v63  ;;  %v8198_v31 = vadd.f32 %v19272_v58, %v19287_v39 }
 0x6f9   : > { %v19616_v41 = vpop.f32.mrf.mxu1 }
 0x6fa   : > { %20971 = vst [vmem:[#allocation73_spill] sm:$0xff] %v19616_v41  ;;  %v9083_v41 = vadd.f32 %v19448_v37, %v8804_v30  ;;  %v9642_v57 = vadd.f32 %v15725_v5, %v9363_v35  ;;  %v9643_v2 = vadd.f32 %v15726_v23, %v9364_v61  ;;  %v9367_v30 = vadd.f32 %v19423_v59, %v19453_v14 }
 0x6fb   : > { %v19619_v10 = vpop.f32.mrf.mxu1  ;;  %v9087_v23 = vadd.f32 %v19469_v15, %v8808_v42  ;;  %v9368_v14 = vadd.f32 %v19436_v48, %v19463_v45 }
 0x6fc   : > { %20972 = vst [vmem:[#allocation71_spill] sm:$0xff] %v19619_v10  ;;  %v19636_v10 = vpop.f32.mrf.mxu0  ;;  %v9362_v25 = vadd.f32 %v19418_v26, %v9083_v41  ;;  %v9921_v37 = vadd.f32 %v15769_v12, %v9642_v57  ;;  %v9365_v57 = vadd.f32 %v19429_v60, %v19458_v33  ;;  %v9646_v26 = vadd.f32 %v15729_v34, %v9367_v30  ;;  %v20976_v30 = vld [vmem:[#allocation19_spill] sm:$0xff] }
 0x6fd   : > { %v19623_v54 = vpop.f32.mrf.mxu1  ;;  %v8533_v12 = vadd.f32 %v19367_v18, %v8198_v31  ;;  %v9647_v1 = vadd.f32 %v19566_v47, %v9368_v14 }
 0x6fe   : > { %20973 = vst [vmem:[#allocation58_spill] sm:$0xff] %v19623_v54  ;;  %v19646_v35 = vpop.f32.mrf.mxu0  ;;  %v9641_v19 = vadd.f32 %v9532_v4, %v9362_v25  ;;  %v9922_v4 = vadd.f32 %v19560_v27, %v9643_v2  ;;  %v9644_v59 = vadd.f32 %v19562_v28, %v9365_v57  ;;  %v9366_v27 = vadd.f32 %v19441_v56, %v9087_v23 }
 0x6ff   : > { %v19630_v49 = vpop.f32.mrf.mxu1  ;;  %v9925_v45 = vadd.f32 %v19570_v21, %v9646_v26  ;;  %v8812_v48 = vadd.f32 %v19345_v3, %v8533_v12  ;;  %v8214_v21 = vadd.f32 %v19283_v8, %v19298_v13  ;;  %v9926_v2 = vadd.f32 %v19582_v24, %v9647_v1  ;;  %v20974_v8 = vld [vmem:[#allocation28_spill] sm:$0xff]  ;;  %v20975_v13 = vld [vmem:[#allocation66_spill] sm:$0xff] }
 0x700   : > { %v19663_v58 = vpop.f32.mrf.mxu0  ;;  %v9920_v15 = vadd.f32 %v19564_v36, %v9641_v19  ;;  %v9923_v36 = vadd.f32 %v19576_v6, %v9644_v59  ;;  %v9645_v47 = vadd.f32 %v19568_v16, %v9366_v27  ;;  %v9650_v6 = vadd.f32 %v19572_v32, %v9371_v9  ;;  %v20982_v59 = vld [vmem:[#allocation63_spill] sm:$0xff] }
 0x701   : > { %v19638_v54 = vpop.f32.mrf.mxu1  ;;  %v9091_v3 = vadd.f32 %v19489_v53, %v8812_v48  ;;  %v8537_v42 = vadd.f32 %v19380_v46, %v8214_v21  ;;  %v9372_v53 = vadd.f32 %v20975_v13, %v20974_v8  ;;  %v20978_v46 = vld [vmem:[#allocation74_spill] sm:$0xff]  ;;  %v20990_v21 = vld [vmem:[#allocation77_spill] sm:$0xff] }
 0x702   : > { %v19674_v55 = vpop.f32.mrf.mxu0  ;;  %v9929_v26 = vadd.f32 %v19594_v22, %v9650_v6 }
 0x703   : > { %v19642_v17 = vpop.f32.mrf.mxu1  ;;  %v8816_v14 = vadd.f32 %v20982_v59, %v8537_v42 }
 0x704   : > { %v19693_v19 = vpop.f32.mrf.mxu0 }
 0x705   : > { %v15813_v38 = vpop.f32.mrf.mxu1 }
 0x706   : > { %v10200_v5 = vadd.f32 %v15813_v38, %v9921_v37  ;;  %v9648_v38 = vadd.f32 %v19574_v62, %v9369_v20  ;;  %v9370_v62 = vadd.f32 %v20978_v46, %v9091_v3 }
 0x707   : > { %v10087_v51 = vpop.f32.mrf.mxu1 }
 0x708   : > { %v10236_v63 = vadd.f32 %v19648_v11, %v10200_v5  ;;  %v10198_v41 = vadd.f32 %v10087_v51, %v9919_v44  ;;  %v9924_v5 = vadd.f32 %v20976_v30, %v9645_v47  ;;  %v20977_v44 = vld [vmem:[#allocation29_spill] sm:$0xff]  ;;  %v20988_v47 = vld [vmem:[#allocation32_spill] sm:$0xff]  ;;  %v20995_v30 = vld [vmem:[#allocation26_spill] sm:$0xff] }
 0x709   : > { %v15814_v39 = vpop.f32.mrf.mxu1  ;;  %v9651_v31 = vadd.f32 %v20977_v44, %v9372_v53  ;;  %v20993_v53 = vld [vmem:[#allocation16_spill] sm:$0xff] }
 0x70a   : > { %10264 = vst [vmem:[#allocation3 + $0x10] sm:$0xff] %v10236_v63  ;;  %v10234_v60 = vadd.f32 %v19648_v11, %v10198_v41  ;;  %v10201_v33 = vadd.f32 %v15814_v39, %v9922_v4  ;;  %v20980_v41 = vld [vmem:[#allocation55_spill] sm:$0xff]  ;;  %v20981_v4 = vld [vmem:[#allocation50_spill] sm:$0xff]  ;;  %v20983_v39 = vld [vmem:[#allocation64_spill] sm:$0xff] }
 0x70b   : > { %v10090_v34 = vpop.f32.mrf.mxu1  ;;  %v8230_v12 = vadd.f32 %v20981_v4, %v20980_v41 }
 0x70c   : > { %10262 = vst [vmem:[#allocation3] sm:$0xff] %v10234_v60  ;;  %v10237_v18 = vadd.f32 %v19648_v11, %v10201_v33  ;;  %v10199_v28 = vadd.f32 %v10090_v34, %v9920_v15  ;;  %v19708_v15 = vpop.f32.mrf.mxu0  ;;  %v20985_v34 = vld [vmem:[#allocation31_spill] sm:$0xff] }
 0x70d   : > { %v15817_v43 = vpop.f32.mrf.mxu1  ;;  %v9927_v27 = vadd.f32 %v20985_v34, %v9648_v38  ;;  %v21000_v34 = vld [vmem:[#allocation24_spill] sm:$0xff] }
 0x70e   : > { %10265 = vst [vmem:[#allocation3 + $0x18] sm:$0xff] %v10237_v18  ;;  %v10235_v56 = vadd.f32 %v19648_v11, %v10199_v28  ;;  %v10204_v50 = vadd.f32 %v15817_v43, %v9925_v45  ;;  %v19679_v61 = vpack.c.bf16 %v10237_v18, %v10236_v63  ;;  %v20979_v63 = vld [vmem:[#allocation65_spill] sm:$0xff]  ;;  %v16598_v18 = vld [vmem:[#allocation4 + $0x9e8] sm:$0xff]   ;;  %v19727_v44 = vpop.f32.mrf.mxu0 }
 0x70f   : > { %v10103_v0 = vpop.f32.mrf.mxu1  ;;  %v20986_v28 = vld [vmem:[#allocation61_spill] sm:$0xff] }
 0x710   : > { %10263 = vst [vmem:[#allocation3 + $0x8] sm:$0xff] %v10235_v56  ;;  %v10240_v16 = vadd.f32 %v19648_v11, %v10204_v50  ;;  %v10202_v25 = vadd.f32 %v10103_v0, %v9923_v36  ;;  %v10318_v37 = vpack.c.bf16 %v10235_v56, %v10234_v60  ;;  %v20984_v60 = vld [vmem:[#allocation10_spill] sm:$0xff]  ;;  %v9649_v45 = vadd.f32 %v20986_v28, %v9370_v62  ;;  %v20987_v43 = vld [vmem:[#allocation17_spill] sm:$0xff]  ;;  %v20991_v0 = vld [vmem:[#allocation60_spill] sm:$0xff] }
 0x711   : > { %v15818_v40 = vpop.f32.mrf.mxu1  ;;  %v9375_v33 = vadd.f32 %v20984_v60, %v20983_v39  ;;  %v9095_v36 = vadd.f32 %v20987_v43, %v8816_v14  ;;  %v20989_v50 = vld [vmem:[#allocation25_spill] sm:$0xff]  ;;  %v21001_v28 = vld [vmem:[#allocation14_spill] sm:$0xff] }
 0x712   : > { %10268 = vst [vmem:[#allocation3 + $0x30] sm:$0xff] %v10240_v16  ;;  %v10238_v24 = vadd.f32 %v19648_v11, %v10202_v25  ;;  %v10205_v32 = vadd.f32 %v15818_v40, %v9926_v2  ;;  %15899 = vmatprep.mubr.bf16.mxu1 %v10318_v37  ;;  %v9373_v3 = vadd.f32 %v20990_v21, %v20989_v50  ;;  %v20998_v60 = vld [vmem:[#allocation37_spill] sm:$0xff] }
 0x713   : > { %v10106_v23 = vpop.f32.mrf.mxu1  ;;  %15900 = vmatmul.mubr.bf16.vlgmr.msra.gmra.mxu1 %v19679_v61  ;;  %v9654_v56 = vadd.f32 %v20988_v47, %v9375_v33  ;;  %v9930_v2 = vadd.f32 %v20991_v0, %v9651_v31  ;;  %v20999_v33 = vld [vmem:[#allocation53_spill] sm:$0xff] }
 0x714   : > { %10266 = vst [vmem:[#allocation3 + $0x20] sm:$0xff] %v10238_v24  ;;  %v10241_v57 = vadd.f32 %v19648_v11, %v10205_v32  ;;  %v10203_v51 = vadd.f32 %v10106_v23, %v9924_v5  ;;  %15972 = vmatpush3.bf16.msra.mxu1 %v20979_v63  ;;  %v9652_v40 = vadd.f32 %v20993_v53, %v9373_v3  ;;  %v20994_v32 = vld [vmem:[#allocation12_spill] sm:$0xff]  ;;  %v16599_v23 = vld [vmem:[#allocation4 + $0x9e0] sm:$0xff]  }
 0x715   : > { %v15821_v1 = vpop.f32.mrf.mxu1  ;;  %15973 = vmatprep.subr.bf16.mxu1 %v16596_v7  ;;  %v9376_v5 = vadd.f32 %v20995_v30, %v20994_v32  ;;  %v10351_v41 = vld [vmem:[#allocation3 + $0x11] sm:$0xff]  ;;  %v9933_v14 = vadd.f32 %v19621_v52, %v9654_v56  ;;  %v21003_v47 = vld [vmem:[#allocation41_spill] sm:$0xff] }
 0x716   : > { %10269 = vst [vmem:[#allocation3 + $0x38] sm:$0xff] %v10241_v57  ;;  %v10239_v22 = vadd.f32 %v19648_v11, %v10203_v51  ;;  %v10208_v48 = vadd.f32 %v15821_v1, %v9929_v26  ;;  %v19713_v9 = vpack.c.bf16 %v10241_v57, %v10240_v16  ;;  %v20992_v16 = vld [vmem:[#allocation46_spill] sm:$0xff]  ;;  %v8246_v1 = vadd.f32 %v20999_v33, %v20998_v60  ;;  %v21004_v21 = vld [vmem:[#allocation69_spill] sm:$0xff]  ;;  %v16602_v60 = vld [vmem:[#allocation4 + $0x9d0] sm:$0xff]  }
 0x717   : > { %v10119_v20 = vpop.f32.mrf.mxu1  ;;  %v10349_v6 = vld [vmem:[#allocation3 + $0x1] sm:$0xff]  ;;  %v10350_v25 = vld [vmem:[#allocation3 + $0x9] sm:$0xff]  ;;  %v8541_v13 = vadd.f32 %v20992_v16, %v8230_v12 }
 0x718   : > { %10267 = vst [vmem:[#allocation3 + $0x28] sm:$0xff] %v10239_v22  ;;  %v10244_v37 = vadd.f32 %v19648_v11, %v10208_v48  ;;  %v10206_v42 = vadd.f32 %v10119_v20, %v9927_v27  ;;  %v10377_v38 = vpack.c.bf16 %v10350_v25, %v10349_v6  ;;  %v19721_v8 = vpack.c.bf16 %v10239_v22, %v10238_v24  ;;  %v20997_v51 = vld [vmem:[#allocation18_spill] sm:$0xff]  ;;  %v19744_v48 = vpop.f32.mrf.mxu0  ;;  %v21005_v20 = vld [vmem:[#allocation47_spill] sm:$0xff]  ;;  %v21015_v33 = vld [vmem:[#allocation68_spill] sm:$0xff] }
 0x719   : > { %15974 = vmatpush3.bf16.msra.mxu1 %v16596_v7  ;;  %v15822_v31 = vpop.f32.mrf.mxu1  ;;  %v9928_v24 = vadd.f32 %v19614_v29, %v9649_v45  ;;  %v20996_v7 = vld [vmem:[#allocation34_spill] sm:$0xff]  ;;  %v9374_v26 = vadd.f32 %v20997_v51, %v9095_v36  ;;  %v16592_v29 = vld [vmem:[#allocation4 + $0x9b0] sm:$0xff]   ;;  %v8820_v27 = vadd.f32 %v21000_v34, %v8541_v13  ;;  %v9931_v36 = vadd.f32 %v19636_v10, %v9652_v40 }
 0x71a   : > { %15975 = vmatprep.subr.bf16.mxu1 %v16598_v18  ;;  %10272 = vst [vmem:[#allocation3 + $0x50] sm:$0xff] %v10244_v37  ;;  %v10242_v46 = vadd.f32 %v19648_v11, %v10206_v42  ;;  %v10209_v62 = vadd.f32 %v15822_v31, %v9930_v2  ;;  %15855 = vmatprep.mubr.bf16.mxu0 %v10377_v38  ;;  %v21002_v45 = vld [vmem:[#allocation40_spill] sm:$0xff]  ;;  %v21006_v2 = vld [vmem:[#allocation11_spill] sm:$0xff] }
 0x71b   : > { %15903 = vmatprep.mubr.bf16.mxu1 %v19721_v8  ;;  %v9655_v57 = vadd.f32 %v20996_v7, %v9376_v5  ;;  %v10122_v63 = vpop.f32.mrf.mxu1  ;;  %v10352_v4 = vld [vmem:[#allocation3 + $0x19] sm:$0xff]  ;;  %v9379_v22 = vadd.f32 %v21002_v45, %v21001_v28  ;;  %v9653_v52 = vadd.f32 %v21003_v47, %v9374_v26  ;;  %v9099_v3 = vadd.f32 %v21004_v21, %v8820_v27  ;;  %v16593_v30 = vld [vmem:[#allocation4 + $0x9a8] sm:$0xff]   ;;  %v16594_v47 = vld [vmem:[#allocation4 + $0x9a0] sm:$0xff]  }
 0x71c   : > { %15904 = vmatmul.mubr.bf16.gmra.mxu1 %v19713_v9  ;;  %10270 = vst [vmem:[#allocation3 + $0x40] sm:$0xff] %v10242_v46  ;;  %v10245_v12 = vadd.f32 %v19648_v11, %v10209_v62  ;;  %v10207_v59 = vadd.f32 %v10122_v63, %v9928_v24  ;;  %v19737_v39 = vpack.c.bf16 %v10352_v4, %v10351_v41  ;;  %v21007_v6 = vld [vmem:[#allocation75_spill] sm:$0xff]  ;;  %v21008_v10 = vld [vmem:[#allocation72_spill] sm:$0xff]  ;;  %v19769_v4 = vpop.f32.mrf.mxu0 }
 0x71d   : > { %15976 = vmatpush3.bf16.msra.mxu1 %v16598_v18  ;;  %v15825_v43 = vpop.f32.mrf.mxu1  ;;  %v9658_v0 = vadd.f32 %v21005_v20, %v9379_v22  ;;  %v9377_v25 = vadd.f32 %v21007_v6, %v21006_v2  ;;  %v9934_v38 = vadd.f32 %v19646_v35, %v9655_v57  ;;  %v16601_v5 = vld [vmem:[#allocation4 + $0x9d8] sm:$0xff]   ;;  %v21009_v31 = vld [vmem:[#allocation67_spill] sm:$0xff] }
 0x71e   : > { %15977 = vmatprep.subr.bf16.mxu1 %v16599_v23  ;;  %10273 = vst [vmem:[#allocation3 + $0x58] sm:$0xff] %v10245_v12  ;;  %v10243_v56 = vadd.f32 %v19648_v11, %v10207_v59  ;;  %v10212_v18 = vadd.f32 %v15825_v43, %v9933_v14  ;;  %15856 = vmatmul.mubr.bf16.vlgmr.msra.gmra.mxu0 %v19737_v39  ;;  %v21010_v62 = vld [vmem:[#allocation52_spill] sm:$0xff]  ;;  %v21011_v7 = vld [vmem:[#allocation59_spill] sm:$0xff] }
 0x71f   : > { %v19750_v50 = vpack.c.bf16 %v10245_v12, %v10244_v37  ;;  %v10135_v42 = vpop.f32.mrf.mxu1  ;;  %15928 = vmatpush3.bf16.msra.mxu0 %v21008_v10  ;;  %v10353_v16 = vld [vmem:[#allocation3 + $0x21] sm:$0xff]  ;;  %v10354_v13 = vld [vmem:[#allocation3 + $0x29] sm:$0xff]  ;;  %v8262_v24 = vadd.f32 %v21010_v62, %v21009_v31  ;;  %v8545_v51 = vadd.f32 %v21011_v7, %v8246_v1  ;;  %v21012_v26 = vld [vmem:[#allocation35_spill] sm:$0xff]  ;;  %v9932_v14 = vadd.f32 %v19663_v58, %v9653_v52 }
 0x720   : > { %10271 = vst [vmem:[#allocation3 + $0x48] sm:$0xff] %v10243_v56  ;;  %v10248_v53 = vadd.f32 %v19648_v11, %v10212_v18  ;;  %v10210_v40 = vadd.f32 %v10135_v42, %v9931_v36  ;;  %v19759_v37 = vpack.c.bf16 %v10354_v13, %v10353_v16  ;;  %15929 = vmatprep.subr.bf16.mxu0 %v16592_v29  ;;  %v21013_v57 = vld [vmem:[#allocation36_spill] sm:$0xff]  ;;  %v21016_v34 = vld [vmem:[#allocation39_spill] sm:$0xff]  ;;  %v21017_v52 = vld [vmem:[#allocation13_spill] sm:$0xff] }
 0x721   : > { %v19761_v32 = vpack.c.bf16 %v10243_v56, %v10242_v46  ;;  %v9656_v35 = vadd.f32 %v21012_v26, %v9377_v25  ;;  %v21014_v63 = vld [vmem:[#allocation44_spill] sm:$0xff]  ;;  %v15826_v12 = vpop.f32.mrf.mxu1  ;;  %15978 = vmatpush3.bf16.msra.mxu1 %v16599_v23  ;;  %v9378_v27 = vadd.f32 %v21016_v34, %v9099_v3  ;;  %v9937_v45 = vadd.f32 %v19674_v55, %v9658_v0  ;;  %v10355_v22 = vld [vmem:[#allocation3 + $0x31] sm:$0xff]  ;;  %v19786_v0 = vpop.f32.mrf.mxu0  ;;  %v21021_v10 = vld [vmem:[#allocation21_spill] sm:$0xff] }
 0x722   : > { %v9380_v41 = vadd.f32 %v21014_v63, %v21013_v57  ;;  %10276 = vst [vmem:[#allocation3 + $0x70] sm:$0xff] %v10248_v53  ;;  %v10246_v46 = vadd.f32 %v19648_v11, %v10210_v40  ;;  %v10213_v59 = vadd.f32 %v15826_v12, %v9934_v38  ;;  %15859 = vmatprep.mubr.bf16.mxu0 %v19759_v37  ;;  %v21018_v18 = vld [vmem:[#allocation56_spill] sm:$0xff]  ;;  %v21019_v3 = vld [vmem:[#allocation38_spill] sm:$0xff]  ;;  %v21020_v55 = vld [vmem:[#allocation15_spill] sm:$0xff] }
 0x723   : > { %15907 = vmatprep.mubr.bf16.mxu1 %v19761_v32  ;;  %v10138_v28 = vpop.f32.mrf.mxu1  ;;  %v10356_v23 = vld [vmem:[#allocation3 + $0x39] sm:$0xff]  ;;  %15930 = vmatpush3.bf16.msra.mxu0 %v16592_v29  ;;  %v8824_v56 = vadd.f32 %v21017_v52, %v8545_v51  ;;  %v9657_v21 = vadd.f32 %v21018_v18, %v9378_v27  ;;  %v9383_v20 = vadd.f32 %v21020_v55, %v21019_v3  ;;  %v21022_v16 = vld [vmem:[#allocation30_spill] sm:$0xff]  ;;  %v21025_v12 = vld [vmem:[#allocation45_spill] sm:$0xff]  ;;  %v19805_v34 = vpop.f32.mrf.mxu0 }
 0x724   : > { %v9659_v1 = vadd.f32 %v21015_v33, %v9380_v41  ;;  %15908 = vmatmul.mubr.bf16.gmra.mxu1 %v19750_v50  ;;  %10274 = vst [vmem:[#allocation3 + $0x60] sm:$0xff] %v10246_v46  ;;  %v10249_v43 = vadd.f32 %v19648_v11, %v10213_v59  ;;  %v10211_v36 = vadd.f32 %v10138_v28, %v9932_v14  ;;  %v21023_v40 = vld [vmem:[#allocation20_spill] sm:$0xff]  ;;  %v21024_v31 = vld [vmem:[#allocation42_spill] sm:$0xff] }
 0x725   : > { %v19780_v58 = vpack.c.bf16 %v10356_v23, %v10355_v22  ;;  %15931 = vmatprep.subr.bf16.mxu0 %v16593_v30  ;;  %15979 = vmatprep.subr.bf16.mxu1 %v16601_v5  ;;  %v15829_v29 = vpop.f32.mrf.mxu1  ;;  %v9935_v2 = vadd.f32 %v19693_v19, %v9656_v35  ;;  %v9103_v38 = vadd.f32 %v21021_v10, %v8824_v56  ;;  %v16597_v63 = vld [vmem:[#allocation4 + $0x998] sm:$0xff]   ;;  %v16604_v41 = vld [vmem:[#allocation4 + $0x9c8] sm:$0xff]   ;;  %v15793_v52 = vpop.f32.mrf.mxu0 }
 0x726   : > { %15980 = vmatpush3.bf16.msra.mxu1 %v16601_v5  ;;  %10277 = vst [vmem:[#allocation3 + $0x78] sm:$0xff] %v10249_v43  ;;  %v10247_v6 = vadd.f32 %v19648_v11, %v10211_v36  ;;  %v10216_v25 = vadd.f32 %v15829_v29, %v9937_v45  ;;  %v19791_v42 = vpack.c.bf16 %v10249_v43, %v10248_v53  ;;  %v21026_v14 = vld [vmem:[#allocation70_spill] sm:$0xff]  ;;  %v21029_v22 = vld [vmem:[#allocation73_spill] sm:$0xff]  ;;  %v21030_v43 = vld [vmem:[#allocation48_spill] sm:$0xff] }
 0x727   : > { %15860 = vmatmul.mubr.bf16.gmra.mxu0 %v19780_v58  ;;  %15981 = vmatprep.subr.bf16.mxu1 %v16602_v60  ;;  %v9662_v13 = vadd.f32 %v21022_v16, %v9383_v20  ;;  %v9381_v62 = vadd.f32 %v21024_v31, %v21023_v40  ;;  %v10151_v7 = vpop.f32.mrf.mxu1  ;;  %v9938_v19 = vadd.f32 %v19708_v15, %v9659_v1  ;;  %v10357_v5 = vld [vmem:[#allocation3 + $0x41] sm:$0xff]  ;;  %v10358_v51 = vld [vmem:[#allocation3 + $0x49] sm:$0xff]  ;;  %v21028_v1 = vld [vmem:[#allocation23_spill] sm:$0xff] }
 0x728   : > { %15932 = vmatpush3.bf16.msra.mxu0 %v16593_v30  ;;  %10275 = vst [vmem:[#allocation3 + $0x68] sm:$0xff] %v10247_v6  ;;  %v10252_v26 = vadd.f32 %v19648_v11, %v10216_v25  ;;  %v10214_v35 = vadd.f32 %v10151_v7, %v9935_v2  ;;  %v19799_v53 = vpack.c.bf16 %v10358_v51, %v10357_v5  ;;  %v21027_v15 = vld [vmem:[#allocation22_spill] sm:$0xff]  ;;  %v16600_v20 = vld [vmem:[#allocation4 + $0x990] sm:$0xff]   ;;  %v21037_v51 = vld [vmem:[#allocation49_spill] sm:$0xff] }
 0x729   : > { %v19801_v57 = vpack.c.bf16 %v10247_v6, %v10246_v46  ;;  %15933 = vmatprep.subr.bf16.mxu0 %v16594_v47  ;;  %v8549_v59 = vadd.f32 %v21025_v12, %v8262_v24  ;;  %v9660_v33 = vadd.f32 %v21026_v14, %v9381_v62  ;;  %v9384_v30 = vadd.f32 %v21028_v1, %v21027_v15  ;;  %v15830_v27 = vpop.f32.mrf.mxu1  ;;  %v16606_v24 = vld [vmem:[#allocation4 + $0x9c0] sm:$0xff]   ;;  %v21031_v29 = vld [vmem:[#allocation51_spill] sm:$0xff] }
 0x72a   : > { %15982 = vmatpush3.bf16.msra.mxu1 %v16602_v60  ;;  %10280 = vst [vmem:[#allocation3 + $0x90] sm:$0xff] %v10252_v26  ;;  %v10250_v28 = vadd.f32 %v19648_v11, %v10214_v35  ;;  %v10217_v45 = vadd.f32 %v15830_v27, %v9938_v19  ;;  %15863 = vmatprep.mubr.bf16.mxu0 %v19799_v53  ;;  %v10359_v60 = vld [vmem:[#allocation3 + $0x51] sm:$0xff]  ;;  %v21038_v35 = vld [vmem:[#allocation57_spill] sm:$0xff] }
 0x72b   : > { %v9936_v46 = vadd.f32 %v19727_v44, %v9657_v21  ;;  %15911 = vmatprep.mubr.bf16.mxu1 %v19801_v57  ;;  %v9663_v23 = vadd.f32 %v21029_v22, %v9384_v30  ;;  %v9382_v36 = vadd.f32 %v21030_v43, %v9103_v38  ;;  %v10154_v56 = vpop.f32.mrf.mxu1  ;;  %v9941_v18 = vadd.f32 %v19744_v48, %v9662_v13  ;;  %v10360_v3 = vld [vmem:[#allocation3 + $0x59] sm:$0xff]  ;;  %v21033_v10 = vld [vmem:[#allocation54_spill] sm:$0xff]  ;;  %v21039_v22 = vld [vmem:[#allocation33_spill] sm:$0xff] }
 0x72c   : > { %15912 = vmatmul.mubr.bf16.gmra.mxu1 %v19791_v42  ;;  %15934 = vmatpush3.bf16.msra.mxu0 %v16594_v47  ;;  %10278 = vst [vmem:[#allocation3 + $0x80] sm:$0xff] %v10250_v28  ;;  %v10253_v55 = vadd.f32 %v19648_v11, %v10217_v45  ;;  %v19818_v21 = vpack.c.bf16 %v10360_v3, %v10359_v60  ;;  %v21032_v6 = vld [vmem:[#allocation71_spill] sm:$0xff]  ;;  %v21034_v48 = vld [vmem:[#allocation76_spill] sm:$0xff]  ;;  %v21036_v19 = vld [vmem:[#allocation58_spill] sm:$0xff] }
 0x72d   : > { %v10215_v44 = vadd.f32 %v10154_v56, %v9936_v46  ;;  %15935 = vmatprep.subr.bf16.mxu0 %v16597_v63  ;;  %15983 = vmatprep.subr.bf16.mxu1 %v16604_v41  ;;  %v8828_v2 = vadd.f32 %v21031_v29, %v8549_v59  ;;  %v9661_v25 = vadd.f32 %v21032_v6, %v9382_v36  ;;  %v15833_v16 = vpop.f32.mrf.mxu1  ;;  %v21035_v62 = vld [vmem:[#allocation27_spill] sm:$0xff]  ;;  %v9904_v59 = vpop.f32.mrf.mxu0  ;;  %v19839_v45 = vld [vmem:[#allocation4 + $0xa78] sm:$0xff]   ;;  %v21040_v43 = vld [vmem:[#allocation62_spill] sm:$0xff] }
 0x72e   : > { %v9387_v38 = vadd.f32 %v21034_v48, %v21033_v10  ;;  %v9939_v13 = vadd.f32 %v19769_v4, %v9660_v33  ;;  %15984 = vmatpush3.bf16.msra.mxu1 %v16604_v41  ;;  %10281 = vst [vmem:[#allocation3 + $0x98] sm:$0xff] %v10253_v55  ;;  %v10220_v40 = vadd.f32 %v15833_v16, %v9941_v18  ;;  %v16603_v27 = vld [vmem:[#allocation4 + $0x988] sm:$0xff]  }
 0x72f   : > { %v10251_v47 = vadd.f32 %v19648_v11, %v10215_v44  ;;  %15864 = vmatmul.mubr.bf16.gmra.mxu0 %v19818_v21  ;;  %v19827_v31 = vpack.c.bf16 %v10253_v55, %v10252_v26  ;;  %15985 = vmatprep.subr.bf16.mxu1 %v16606_v24  ;;  %v9107_v7 = vadd.f32 %v21035_v62, %v8828_v2  ;;  %v10167_v14 = vpop.f32.mrf.mxu1  ;;  %v10361_v41 = vld [vmem:[#allocation3 + $0x61] sm:$0xff]  ;;  %v10362_v33 = vld [vmem:[#allocation3 + $0x69] sm:$0xff]  ;;  %v21041_v60 = vld [vmem:[#allocation43_spill] sm:$0xff]  ;;  %v15794_v3 = vpop.f32.mrf.mxu0 }
 0x730   : > { %v9666_v5 = vadd.f32 %v21036_v19, %v9387_v38  ;;  %v9385_v12 = vadd.f32 %v21038_v35, %v21037_v51  ;;  %v9942_v4 = vadd.f32 %v19786_v0, %v9663_v23  ;;  %15936 = vmatpush3.bf16.msra.mxu0 %v16597_v63  ;;  %v10256_v15 = vadd.f32 %v19648_v11, %v10220_v40  ;;  %v10363_v44 = vld [vmem:[#allocation3 + $0x71] sm:$0xff] }
 0x731   : > { %10279 = vst [vmem:[#allocation3 + $0x88] sm:$0xff] %v10251_v47  ;;  %v10218_v26 = vadd.f32 %v10167_v14, %v9939_v13  ;;  %v19835_v1 = vpack.c.bf16 %v10362_v33, %v10361_v41  ;;  %v19837_v30 = vpack.c.bf16 %v10251_v47, %v10250_v28  ;;  %15937 = vmatprep.subr.bf16.mxu0 %v16600_v20  ;;  %v15834_v23 = vpop.f32.mrf.mxu1  ;;  %v9907_v16 = vpop.f32.mrf.mxu0 }
 0x732   : > { %v9664_v46 = vadd.f32 %v19630_v49, %v9385_v12  ;;  %v9388_v0 = vadd.f32 %v21040_v43, %v21039_v22  ;;  %15986 = vmatpush3.bf16.msra.mxu1 %v16606_v24  ;;  %10284 = vst [vmem:[#allocation3 + $0xb0] sm:$0xff] %v10256_v15  ;;  %v10221_v36 = vadd.f32 %v15834_v23, %v9942_v4 }
 0x733   : > { %v10254_v63 = vadd.f32 %v19648_v11, %v10218_v26  ;;  %15867 = vmatprep.mubr.bf16.mxu0 %v19835_v1  ;;  %v9940_v28 = vadd.f32 %v19805_v34, %v9661_v25  ;;  %15915 = vmatprep.mubr.bf16.mxu1 %v19837_v30  ;;  %v9945_v56 = vadd.f32 %v15793_v52, %v9666_v5  ;;  %v10170_v55 = vpop.f32.mrf.mxu1  ;;  %v10364_v29 = vld [vmem:[#allocation3 + $0x79] sm:$0xff]  ;;  %v16605_v34 = vld [vmem:[#allocation4 + $0x980] sm:$0xff]  }
 0x734   : > { %v9667_v18 = vadd.f32 %v19638_v54, %v9388_v0  ;;  %v9386_v49 = vadd.f32 %v21041_v60, %v9107_v7  ;;  %15916 = vmatmul.mubr.bf16.gmra.mxu1 %v19827_v31  ;;  %15938 = vmatpush3.bf16.msra.mxu0 %v16600_v20  ;;  %v10257_v24 = vadd.f32 %v19648_v11, %v10221_v36  ;;  %v19865_v5 = vld [vmem:[#allocation4 + $0xa38] sm:$0xff]  }
 0x735   : > { %10282 = vst [vmem:[#allocation3 + $0xa0] sm:$0xff] %v10254_v63  ;;  %v10219_v2 = vadd.f32 %v10170_v55, %v9940_v28  ;;  %v19852_v6 = vpack.c.bf16 %v10364_v29, %v10363_v44  ;;  %15939 = vmatprep.subr.bf16.mxu0 %v16603_v27  ;;  %16059 = vmatprep.subr.bf16.mxu1 %v19839_v45  ;;  %v15837_v52 = vpop.f32.mrf.mxu1  ;;  %v10367_v4 = vld [vmem:[#allocation3 + $0x91] sm:$0xff]  ;;  %v10793_v55 = vld [vmem:[#allocation3 + $0x2] sm:$0xff] }
 0x736   : > { %v9943_v54 = vadd.f32 %v9904_v59, %v9664_v46  ;;  %v9665_v25 = vadd.f32 %v19642_v17, %v9386_v49  ;;  %10285 = vst [vmem:[#allocation3 + $0xb8] sm:$0xff] %v10257_v24  ;;  %v10224_v48 = vadd.f32 %v15837_v52, %v9945_v56  ;;  %v19858_v20 = vpack.c.bf16 %v10257_v24, %v10256_v15  ;;  %v10794_v44 = vld [vmem:[#allocation3 + $0xa] sm:$0xff] }
 0x737   : > { %v10255_v10 = vadd.f32 %v19648_v11, %v10219_v2  ;;  %15868 = vmatmul.mubr.bf16.gmra.mxu0 %v19852_v6  ;;  %v9946_v38 = vadd.f32 %v15794_v3, %v9667_v18  ;;  %v10183_v13 = vpop.f32.mrf.mxu1  ;;  %v16612_v3 = vld [vmem:[#allocation4 + $0xa70] sm:$0xff]   ;;  %v16614_v24 = vld [vmem:[#allocation4 + $0xa68] sm:$0xff]  }
 0x738   : > { %v10365_v47 = vld [vmem:[#allocation3 + $0x81] sm:$0xff]  ;;  %v10366_v40 = vld [vmem:[#allocation3 + $0x89] sm:$0xff]  ;;  %15940 = vmatpush3.bf16.msra.mxu0 %v16603_v27  ;;  %v10260_v62 = vadd.f32 %v19648_v11, %v10224_v48  ;;  %v10222_v7 = vadd.f32 %v10183_v13, %v9943_v54  ;;  %v9944_v35 = vadd.f32 %v9907_v16, %v9665_v25  ;;  %v10795_v25 = vld [vmem:[#allocation3 + $0x12] sm:$0xff] }
 0x739   : > { %10283 = vst [vmem:[#allocation3 + $0xa8] sm:$0xff] %v10255_v10  ;;  %v19861_v19 = vpack.c.bf16 %v10366_v40, %v10365_v47  ;;  %v19863_v17 = vpack.c.bf16 %v10255_v10, %v10254_v63  ;;  %15941 = vmatprep.subr.bf16.mxu0 %v16605_v34  ;;  %v15838_v51 = vpop.f32.mrf.mxu1  ;;  %v10796_v2 = vld [vmem:[#allocation3 + $0x1a] sm:$0xff]  ;;  %v10797_v54 = vld [vmem:[#allocation3 + $0x22] sm:$0xff]  ;;  %v10798_v52 = vld [vmem:[#allocation3 + $0x2a] sm:$0xff] }
 0x73a   : > { %10288 = vst [vmem:[#allocation3 + $0xd0] sm:$0xff] %v10260_v62  ;;  %v10258_v12 = vadd.f32 %v19648_v11, %v10222_v7  ;;  %v10225_v59 = vadd.f32 %v15838_v51, %v9946_v38  ;;  %v16617_v10 = vld [vmem:[#allocation4 + $0xa58] sm:$0xff]   ;;  %v16609_v48 = vld [vmem:[#allocation4 + $0xa28] sm:$0xff]   ;;  %v16610_v40 = vld [vmem:[#allocation4 + $0xa20] sm:$0xff]  }
 0x73b   : > { %15871 = vmatprep.mubr.bf16.mxu0 %v19861_v19  ;;  %15919 = vmatprep.mubr.bf16.mxu1 %v19863_v17  ;;  %v10186_v14 = vpop.f32.mrf.mxu1  ;;  %v10801_v38 = vld [vmem:[#allocation3 + $0x42] sm:$0xff]  ;;  %v10802_v16 = vld [vmem:[#allocation3 + $0x4a] sm:$0xff]  ;;  %v10799_v13 = vld [vmem:[#allocation3 + $0x32] sm:$0xff] }
 0x73c   : > { %v10368_v41 = vld [vmem:[#allocation3 + $0x99] sm:$0xff]  ;;  %15920 = vmatmul.mubr.bf16.gmra.mxu1 %v19858_v20  ;;  %15942 = vmatpush3.bf16.msra.mxu0 %v16605_v34  ;;  %10286 = vst [vmem:[#allocation3 + $0xc0] sm:$0xff] %v10258_v12  ;;  %v10261_v33 = vadd.f32 %v19648_v11, %v10225_v59  ;;  %v10223_v15 = vadd.f32 %v10186_v14, %v9944_v35  ;;  %v16615_v34 = vld [vmem:[#allocation4 + $0xa60] sm:$0xff]   ;;  %v16620_v7 = vld [vmem:[#allocation4 + $0xa48] sm:$0xff]  }
 0x73d   : > { %v19872_v26 = vpack.c.bf16 %v10368_v41, %v10367_v4  ;;  %16015 = vmatprep.subr.bf16.mxu0 %v19865_v5  ;;  %v10371_v63 = vld [vmem:[#allocation3 + $0xb1] sm:$0xff]  ;;  %v10804_v51 = vld [vmem:[#allocation3 + $0x5a] sm:$0xff] }
 0x73e   : > { %10289 = vst [vmem:[#allocation3 + $0xd8] sm:$0xff] %v10261_v33  ;;  %v10259_v27 = vadd.f32 %v19648_v11, %v10223_v15  ;;  %v19877_v46 = vpack.c.bf16 %v10261_v33, %v10260_v62  ;;  %v19912_v62 = vpack.c.bf16 %v10802_v16, %v10801_v38  ;;  %v10806_v35 = vld [vmem:[#allocation3 + $0x6a] sm:$0xff]  ;;  %v16616_v14 = vld [vmem:[#allocation4 + $0xa10] sm:$0xff]   ;;  %v16627_v41 = vld [vmem:[#allocation4 + $0xaf8] sm:$0xff]  }
 0x73f   : > { %15872 = vmatmul.mubr.bf16.gmra.mxu0 %v19872_v26  ;;  %v16619_v33 = vld [vmem:[#allocation4 + $0xa08] sm:$0xff]   ;;  %v10809_v15 = vld [vmem:[#allocation3 + $0x82] sm:$0xff]  ;;  %v16632_v16 = vld [vmem:[#allocation4 + $0xa90] sm:$0xff]  }
 0x740   : > { %v10369_v22 = vld [vmem:[#allocation3 + $0xa1] sm:$0xff]  ;;  %v10370_v43 = vld [vmem:[#allocation3 + $0xa9] sm:$0xff]  ;;  %10287 = vst [vmem:[#allocation3 + $0xc8] sm:$0xff] %v10259_v27  ;;  %v19881_v23 = vpack.c.bf16 %v10259_v27, %v10258_v12  ;;  %v10803_v12 = vld [vmem:[#allocation3 + $0x52] sm:$0xff] }
 0x741   : > { %v19879_v0 = vpack.c.bf16 %v10370_v43, %v10369_v22  ;;  %v19917_v59 = vpack.c.bf16 %v10804_v51, %v10803_v12  ;;  %v10810_v27 = vld [vmem:[#allocation3 + $0x8a] sm:$0xff]  ;;  %v11909_v12 = vld [vmem:[#allocation3 + $0x20] sm:$0xff] }
 0x742   : > { %15923 = vmatprep.mubr.bf16.mxu1 %v19881_v23  ;;  %v16621_v43 = vld [vmem:[#allocation4 + $0xa00] sm:$0xff]  }
 0x743   : > { %15875 = vmatprep.mubr.bf16.mxu0 %v19879_v0  ;;  %v10372_v36 = vld [vmem:[#allocation3 + $0xb9] sm:$0xff]  ;;  %v16638_v38 = vld [vmem:[#allocation4 + $0xac0] sm:$0xff]  }
 0x744   : > { %15924 = vmatmul.mubr.bf16.gmra.mxu1 %v19877_v46  ;;  %v19886_v11 = vpack.c.bf16 %v10372_v36, %v10371_v63  ;;  %v19928_v63 = vpack.c.bf16 %v10810_v27, %v10809_v15  ;;  %v16623_v36 = vld [vmem:[#allocation4 + $0xab8] sm:$0xff]   ;;  %v12193_v51 = vld [vmem:[#allocation3 + $0x49] sm:$0xff] }
 0x745   : > { %15987 = vmatprep.mubr.bf16.mxu1 %v19679_v61  ;;  %v10375_v60 = vld [vmem:[#allocation3 + $0xd1] sm:$0xff]  ;;  %v10376_v49 = vld [vmem:[#allocation3 + $0xd9] sm:$0xff]  ;;  %v10821_v61 = vpack.c.bf16 %v10794_v44, %v10793_v55 }
 0x746   : > { %v19894_v29 = vpack.c.bf16 %v10376_v49, %v10375_v60  ;;  %v10814_v60 = vld [vmem:[#allocation3 + $0xaa] sm:$0xff]  ;;  %v10816_v44 = vld [vmem:[#allocation3 + $0xba] sm:$0xff] }
 0x747   : > { %15876 = vmatmul.mubr.bf16.gmra.mxu0 %v19886_v11  ;;  %v10373_v28 = vld [vmem:[#allocation3 + $0xc1] sm:$0xff]  ;;  %v10374_v56 = vld [vmem:[#allocation3 + $0xc9] sm:$0xff] }
 0x748   : > { %v19890_v18 = vpack.c.bf16 %v10374_v56, %v10373_v28  ;;  %v10812_v28 = vld [vmem:[#allocation3 + $0x9a] sm:$0xff]  ;;  %v10813_v56 = vld [vmem:[#allocation3 + $0xa2] sm:$0xff]  ;;  %v11911_v27 = vld [vmem:[#allocation3 + $0x30] sm:$0xff] }
 0x74a   : > { %15879 = vmatprep.mubr.bf16.mxu0 %v19890_v18 }
 0x74c   : > { %15988 = vmatmul.mubr.bf16.vlgmr.msra.gmra.mxu1 %v19721_v8  ;;  %v19900_v8 = vpack.c.bf16 %v10796_v2, %v10795_v25  ;;  %v10815_v2 = vld [vmem:[#allocation3 + $0xb2] sm:$0xff] }
 0x74d   : > { %15991 = vmatprep.mubr.bf16.mxu1 %v19713_v9  ;;  %16060 = vmatpush3.bf16.msra.mxu1 %v19839_v45  ;;  %v16608_v9 = vld [vmem:[#allocation4 + $0xa30] sm:$0xff]   ;;  %v19903_v45 = vpack.c.bf16 %v10798_v52, %v10797_v54 }
 0x74e   : > { %16061 = vmatprep.subr.bf16.mxu1 %v16612_v3  ;;  %v10820_v54 = vld [vmem:[#allocation3 + $0xda] sm:$0xff] }
 0x74f   : > { %15880 = vmatmul.mubr.bf16.gmra.mxu0 %v19894_v29  ;;  %v16628_v52 = vld [vmem:[#allocation4 + $0xaf0] sm:$0xff]  }
 0x750   : > { %15943 = vmatprep.mubr.bf16.mxu0 %v10821_v61  ;;  %v10817_v61 = vld [vmem:[#allocation3 + $0xc2] sm:$0xff] }
 0x751   : > { %16062 = vmatpush3.bf16.msra.mxu1 %v16612_v3  ;;  %v16650_v3 = vld [vmem:[#allocation2 + $0xe0] sm:$0xff] }
 0x752   : > { %16063 = vmatprep.subr.bf16.mxu1 %v16614_v24  ;;  %v19940_v55 = vpack.c.bf16 %v16650_v3, %v16650_v3  ;;  %v11918_v3 = vld [vmem:[#allocation3 + $0x68] sm:$0xff] }
 0x754   : > { %15992 = vmatmul.mubr.bf16.gmra.mxu1 %v19761_v32  ;;  %v10800_v32 = vld [vmem:[#allocation3 + $0x3a] sm:$0xff] }
 0x755   : > { %15995 = vmatprep.mubr.bf16.mxu1 %v19750_v50  ;;  %16064 = vmatpush3.bf16.msra.mxu1 %v16614_v24  ;;  %v16618_v50 = vld [vmem:[#allocation4 + $0xa50] sm:$0xff]   ;;  %v19909_v47 = vpack.c.bf16 %v10800_v32, %v10799_v13  ;;  %v10818_v24 = vld [vmem:[#allocation3 + $0xca] sm:$0xff] }
 0x756   : > { %16065 = vmatprep.subr.bf16.mxu1 %v16615_v34  ;;  %v16626_v32 = vld [vmem:[#allocation4 + $0xaa0] sm:$0xff]  }
 0x757   : > { %15944 = vmatmul.mubr.bf16.vlgmr.msra.gmra.mxu0 %v19900_v8 }
 0x758   : > { %15947 = vmatprep.mubr.bf16.mxu0 %v19903_v45  ;;  %16016 = vmatpush3.bf16.msra.mxu0 %v19865_v5  ;;  %v16613_v5 = vld [vmem:[#allocation4 + $0xa18] sm:$0xff]  }
 0x759   : > { %16017 = vmatprep.subr.bf16.mxu0 %v16608_v9  ;;  %16066 = vmatpush3.bf16.msra.mxu1 %v16615_v34  ;;  %v10819_v34 = vld [vmem:[#allocation3 + $0xd2] sm:$0xff] }
 0x75a   : > { %16067 = vmatprep.subr.bf16.mxu1 %v16617_v10  ;;  %v19951_v25 = vpack.c.bf16 %v10820_v54, %v10819_v34  ;;  %v12203_v34 = vld [vmem:[#allocation3 + $0x99] sm:$0xff]  ;;  %v12204_v54 = vld [vmem:[#allocation3 + $0xa1] sm:$0xff] }
 0x75c   : > { %16018 = vmatpush3.bf16.msra.mxu0 %v16608_v9  ;;  %15996 = vmatmul.mubr.bf16.gmra.mxu1 %v19801_v57  ;;  %v10805_v57 = vld [vmem:[#allocation3 + $0x62] sm:$0xff]  ;;  %v16630_v9 = vld [vmem:[#allocation4 + $0xae8] sm:$0xff]  }
 0x75d   : > { %15999 = vmatprep.mubr.bf16.mxu1 %v19791_v42  ;;  %16019 = vmatprep.subr.bf16.mxu0 %v16609_v48  ;;  %v16622_v42 = vld [vmem:[#allocation4 + $0xa40] sm:$0xff]   ;;  %v19920_v4 = vpack.c.bf16 %v10806_v35, %v10805_v57 }
 0x75e   : > { %16068 = vmatpush3.bf16.msra.mxu1 %v16617_v10  ;;  %v16624_v10 = vld [vmem:[#allocation4 + $0xab0] sm:$0xff]   ;;  %v11910_v35 = vld [vmem:[#allocation3 + $0x28] sm:$0xff] }
 0x75f   : > { %15948 = vmatmul.mubr.bf16.gmra.mxu0 %v19909_v47  ;;  %16069 = vmatprep.subr.bf16.mxu1 %v16618_v50 }
 0x760   : > { %15951 = vmatprep.mubr.bf16.mxu0 %v19912_v62  ;;  %16020 = vmatpush3.bf16.msra.mxu0 %v16609_v48  ;;  %v16625_v48 = vld [vmem:[#allocation4 + $0xaa8] sm:$0xff]  }
 0x761   : > { %16021 = vmatprep.subr.bf16.mxu0 %v16610_v40 }
 0x762   : > { %16070 = vmatpush3.bf16.msra.mxu1 %v16618_v50  ;;  %v11657_v50 = vld [vmem:[#allocation3 + $0xea] sm:$0xff] }
 0x763   : > { %16071 = vmatprep.subr.bf16.mxu1 %v16620_v7 }
 0x764   : > { %16000 = vmatmul.mubr.bf16.gmra.mxu1 %v19837_v30  ;;  %16022 = vmatpush3.bf16.msra.mxu0 %v16610_v40  ;;  %v10808_v30 = vld [vmem:[#allocation3 + $0x7a] sm:$0xff] }
 0x765   : > { %16003 = vmatprep.mubr.bf16.mxu1 %v19827_v31  ;;  %16023 = vmatprep.subr.bf16.mxu0 %v16613_v5  ;;  %v10807_v31 = vld [vmem:[#allocation3 + $0x72] sm:$0xff] }
 0x766   : > { %16072 = vmatpush3.bf16.msra.mxu1 %v16620_v7  ;;  %v19925_v22 = vpack.c.bf16 %v10808_v30, %v10807_v31  ;;  %v12191_v40 = vld [vmem:[#allocation3 + $0x39] sm:$0xff]  ;;  %v11377_v7 = vld [vmem:[#allocation3 + $0xe1] sm:$0xff] }
 0x767   : > { %15952 = vmatmul.mubr.bf16.gmra.mxu0 %v19917_v59  ;;  %16073 = vmatprep.subr.bf16.mxu1 %v16622_v42  ;;  %v11914_v30 = vld [vmem:[#allocation3 + $0x48] sm:$0xff] }
 0x768   : > { %15955 = vmatprep.mubr.bf16.mxu0 %v19920_v4  ;;  %16024 = vmatpush3.bf16.msra.mxu0 %v16613_v5  ;;  %v11378_v5 = vld [vmem:[#allocation3 + $0xe9] sm:$0xff] }
 0x769   : > { %16025 = vmatprep.subr.bf16.mxu0 %v16616_v14 }
 0x76a   : > { %16074 = vmatpush3.bf16.msra.mxu1 %v16622_v42 }
 0x76b   : > { %16147 = vmatprep.subr.bf16.mxu1 %v16627_v41 }
 0x76c   : > { %16004 = vmatmul.mubr.bf16.gmra.mxu1 %v19863_v17  ;;  %16026 = vmatpush3.bf16.msra.mxu0 %v16616_v14  ;;  %v10811_v17 = vld [vmem:[#allocation3 + $0x92] sm:$0xff]  ;;  %v12196_v14 = vld [vmem:[#allocation3 + $0x61] sm:$0xff] }
 0x76d   : > { %16007 = vmatprep.mubr.bf16.mxu1 %v19858_v20  ;;  %16027 = vmatprep.subr.bf16.mxu0 %v16619_v33  ;;  %v19933_v49 = vpack.c.bf16 %v10812_v28, %v10811_v17  ;;  %v19936_v20 = vpack.c.bf16 %v10814_v60, %v10813_v56  ;;  %v12200_v28 = vld [vmem:[#allocation3 + $0x81] sm:$0xff]  ;;  %v12201_v56 = vld [vmem:[#allocation3 + $0x89] sm:$0xff]  ;;  %v12198_v60 = vld [vmem:[#allocation3 + $0x71] sm:$0xff] }
 0x76e   : > { %v16641_v17 = vld [vmem:[#allocation4 + $0xb28] sm:$0xff]  }
 0x76f   : > { %15956 = vmatmul.mubr.bf16.gmra.mxu0 %v19925_v22 }
 0x770   : > { %15959 = vmatprep.mubr.bf16.mxu0 %v19928_v63  ;;  %16028 = vmatpush3.bf16.msra.mxu0 %v16619_v33 }
 0x771   : > { %16029 = vmatprep.subr.bf16.mxu0 %v16621_v43 }
 0x774   : > { %16008 = vmatmul.mubr.bf16.gmra.mxu1 %v19881_v23  ;;  %16030 = vmatpush3.bf16.msra.mxu0 %v16621_v43  ;;  %v19943_v23 = vpack.c.bf16 %v10816_v44, %v10815_v2  ;;  %v16640_v43 = vld [vmem:[#allocation4 + $0xb30] sm:$0xff]   ;;  %v12222_v44 = vpack.c.bf16 %v12201_v56, %v12200_v28  ;;  %v11917_v2 = vld [vmem:[#allocation3 + $0x60] sm:$0xff]  ;;  %v11927_v28 = vld [vmem:[#allocation3 + $0xb0] sm:$0xff] }
 0x775   : > { %16011 = vmatprep.mubr.bf16.mxu1 %v19877_v46  ;;  %16103 = vmatprep.subr.bf16.mxu0 %v16623_v36  ;;  %v19946_v46 = vpack.c.bf16 %v10818_v24, %v10817_v61  ;;  %v11915_v61 = vld [vmem:[#allocation3 + $0x50] sm:$0xff] }
 0x777   : > { %15960 = vmatmul.mubr.bf16.gmra.mxu0 %v19933_v49 }
 0x778   : > { %15963 = vmatprep.mubr.bf16.mxu0 %v19936_v20 }
 0x77c   : > { %16012 = vmatmul.mubr.bf16.gmra.mxu1 %v19940_v55 }
 0x77d   : > { %16075 = vmatprep.mubr.bf16.mxu1 %v19900_v8  ;;  %v16631_v8 = vld [vmem:[#allocation4 + $0xae0] sm:$0xff]  }
 0x77f   : > { %15964 = vmatmul.mubr.bf16.gmra.mxu0 %v19943_v23 }
 0x780   : > { %15967 = vmatprep.mubr.bf16.mxu0 %v19946_v46 }
 0x784   : > { %16076 = vmatmul.mubr.bf16.vlgmr.msra.gmra.mxu1 %v19903_v45  ;;  %v16633_v45 = vld [vmem:[#allocation4 + $0xad8] sm:$0xff]  }
 0x785   : > { %16079 = vmatprep.mubr.bf16.mxu1 %v19909_v47  ;;  %16148 = vmatpush3.bf16.msra.mxu1 %v16627_v41  ;;  %v12189_v47 = vld [vmem:[#allocation3 + $0x29] sm:$0xff]  ;;  %v11912_v41 = vld [vmem:[#allocation3 + $0x38] sm:$0xff] }
 0x786   : > { %16149 = vmatprep.subr.bf16.mxu1 %v16628_v52  ;;  %v11938_v31 = vpack.c.bf16 %v11912_v41, %v11911_v27  ;;  %v11928_v27 = vld [vmem:[#allocation3 + $0xb8] sm:$0xff] }
 0x787   : > { %15968 = vmatmul.mubr.bf16.gmra.mxu0 %v19951_v25 }
 0x788   : > { %16031 = vmatprep.mubr.bf16.mxu0 %v19737_v39  ;;  %v16634_v39 = vld [vmem:[#allocation4 + $0xad0] sm:$0xff]  }
 0x789   : > { %16150 = vmatpush3.bf16.msra.mxu1 %v16628_v52  ;;  %v12205_v52 = vld [vmem:[#allocation3 + $0xa9] sm:$0xff] }
 0x78a   : > { %16151 = vmatprep.subr.bf16.mxu1 %v16630_v9 }
 0x78c   : > { %16080 = vmatmul.mubr.bf16.gmra.mxu1 %v19912_v62  ;;  %v12192_v62 = vld [vmem:[#allocation3 + $0x41] sm:$0xff] }
 0x78d   : > { %16083 = vmatprep.mubr.bf16.mxu1 %v19917_v59  ;;  %16152 = vmatpush3.bf16.msra.mxu1 %v16630_v9  ;;  %v12218_v42 = vpack.c.bf16 %v12193_v51, %v12192_v62  ;;  %v11937_v59 = vpack.c.bf16 %v11910_v35, %v11909_v12  ;;  %v12202_v9 = vld [vmem:[#allocation3 + $0x91] sm:$0xff]  ;;  %v16646_v12 = vld [vmem:[#allocation4 + $0xb00] sm:$0xff]  }
 0x78e   : > { %16153 = vmatprep.subr.bf16.mxu1 %v16631_v8 }
 0x78f   : > { %16032 = vmatmul.mubr.bf16.vlgmr.msra.gmra.mxu0 %v19759_v37  ;;  %v16636_v37 = vld [vmem:[#allocation4 + $0xac8] sm:$0xff]  }
 0x790   : > { %16035 = vmatprep.mubr.bf16.mxu0 %v19780_v58  ;;  %16104 = vmatpush3.bf16.msra.mxu0 %v16623_v36  ;;  %v16629_v58 = vld [vmem:[#allocation4 + $0xa98] sm:$0xff]  }
 0x791   : > { %16105 = vmatprep.subr.bf16.mxu0 %v16624_v10  ;;  %16154 = vmatpush3.bf16.msra.mxu1 %v16631_v8  ;;  %v12199_v36 = vld [vmem:[#allocation3 + $0x79] sm:$0xff] }
 0x792   : > { %16155 = vmatprep.subr.bf16.mxu1 %v16633_v45  ;;  %v16643_v8 = vld [vmem:[#allocation4 + $0xb18] sm:$0xff]  }
 0x794   : > { %16106 = vmatpush3.bf16.msra.mxu0 %v16624_v10  ;;  %16084 = vmatmul.mubr.bf16.gmra.mxu1 %v19920_v4  ;;  %v12197_v4 = vld [vmem:[#allocation3 + $0x69] sm:$0xff]  ;;  %v11920_v10 = vld [vmem:[#allocation3 + $0x78] sm:$0xff] }
 0x795   : > { %16087 = vmatprep.mubr.bf16.mxu1 %v19925_v22  ;;  %16107 = vmatprep.subr.bf16.mxu0 %v16625_v48  ;;  %v12220_v15 = vpack.c.bf16 %v12197_v4, %v12196_v14  ;;  %v11913_v22 = vld [vmem:[#allocation3 + $0x40] sm:$0xff]  ;;  %v12210_v4 = vld [vmem:[#allocation3 + $0xd1] sm:$0xff] }
 0x796   : > { %16156 = vmatpush3.bf16.msra.mxu1 %v16633_v45  ;;  %v12223_v45 = vpack.c.bf16 %v12203_v34, %v12202_v9  ;;  %v11932_v9 = vld [vmem:[#allocation3 + $0xd8] sm:$0xff] }
 0x797   : > { %16036 = vmatmul.mubr.bf16.gmra.mxu0 %v19799_v53  ;;  %16157 = vmatprep.subr.bf16.mxu1 %v16634_v39  ;;  %v16635_v53 = vld [vmem:[#allocation4 + $0xa88] sm:$0xff]  }
 0x798   : > { %16039 = vmatprep.mubr.bf16.mxu0 %v19818_v21  ;;  %16108 = vmatpush3.bf16.msra.mxu0 %v16625_v48  ;;  %v16637_v21 = vld [vmem:[#allocation4 + $0xa80] sm:$0xff]  }
 0x799   : > { %16109 = vmatprep.subr.bf16.mxu0 %v16626_v32  ;;  %v11922_v48 = vld [vmem:[#allocation3 + $0x88] sm:$0xff] }
 0x79a   : > { %16158 = vmatpush3.bf16.msra.mxu1 %v16634_v39  ;;  %v12224_v39 = vpack.c.bf16 %v12205_v52, %v12204_v54 }
 0x79b   : > { %16159 = vmatprep.subr.bf16.mxu1 %v16636_v37 }
 0x79c   : > { %16088 = vmatmul.mubr.bf16.gmra.mxu1 %v19928_v63  ;;  %16110 = vmatpush3.bf16.msra.mxu0 %v16626_v32  ;;  %v11939_v63 = vpack.c.bf16 %v11914_v30, %v11913_v22  ;;  %v11919_v32 = vld [vmem:[#allocation3 + $0x70] sm:$0xff] }
 0x79d   : > { %16091 = vmatprep.mubr.bf16.mxu1 %v19933_v49  ;;  %16111 = vmatprep.subr.bf16.mxu0 %v16629_v58  ;;  %v11916_v49 = vld [vmem:[#allocation3 + $0x58] sm:$0xff] }
 0x79e   : > { %16160 = vmatpush3.bf16.msra.mxu1 %v16636_v37  ;;  %v11940_v24 = vpack.c.bf16 %v11916_v49, %v11915_v61  ;;  %v11929_v49 = vld [vmem:[#allocation3 + $0xc0] sm:$0xff] }
 0x79f   : > { %16040 = vmatmul.mubr.bf16.gmra.mxu0 %v19835_v1  ;;  %16161 = vmatprep.subr.bf16.mxu1 %v16638_v38  ;;  %v16639_v1 = vld [vmem:[#allocation4 + $0xb38] sm:$0xff]  }
 0x7a0   : > { %16043 = vmatprep.mubr.bf16.mxu0 %v19852_v6  ;;  %16112 = vmatpush3.bf16.msra.mxu0 %v16629_v58  ;;  %v11656_v6 = vld [vmem:[#allocation3 + $0xe2] sm:$0xff]  ;;  %v11942_v58 = vpack.c.bf16 %v11920_v10, %v11919_v32 }
 0x7a1   : > { %16113 = vmatprep.subr.bf16.mxu0 %v16632_v16  ;;  %v19976_v13 = vpack.c.bf16 %v11657_v50, %v11656_v6  ;;  %v12208_v50 = vld [vmem:[#allocation3 + $0xc1] sm:$0xff] }
 0x7a2   : > { %16162 = vmatpush3.bf16.msra.mxu1 %v16638_v38  ;;  %v11921_v38 = vld [vmem:[#allocation3 + $0x80] sm:$0xff] }
 0x7a4   : > { %16092 = vmatmul.mubr.bf16.gmra.mxu1 %v19936_v20  ;;  %16114 = vmatpush3.bf16.msra.mxu0 %v16632_v16  ;;  %v12221_v20 = vpack.c.bf16 %v12199_v36, %v12198_v60  ;;  %v16644_v16 = vld [vmem:[#allocation4 + $0xb10] sm:$0xff]  }
 0x7a5   : > { %16095 = vmatprep.mubr.bf16.mxu1 %v19943_v23  ;;  %16115 = vmatprep.subr.bf16.mxu0 %v16635_v53  ;;  %v16642_v23 = vld [vmem:[#allocation4 + $0xb20] sm:$0xff]  }
 0x7a7   : > { %16044 = vmatmul.mubr.bf16.gmra.mxu0 %v19861_v19  ;;  %v12188_v19 = vld [vmem:[#allocation3 + $0x21] sm:$0xff] }
 0x7a8   : > { %16047 = vmatprep.mubr.bf16.mxu0 %v19872_v26  ;;  %16116 = vmatpush3.bf16.msra.mxu0 %v16635_v53  ;;  %v12216_v26 = vpack.c.bf16 %v12189_v47, %v12188_v19  ;;  %v11943_v53 = vpack.c.bf16 %v11922_v48, %v11921_v38  ;;  %v12209_v19 = vld [vmem:[#allocation3 + $0xc9] sm:$0xff]  ;;  %v12206_v47 = vld [vmem:[#allocation3 + $0xb1] sm:$0xff] }
 0x7a9   : > { %16117 = vmatprep.subr.bf16.mxu0 %v16637_v21  ;;  %v12226_v51 = vpack.c.bf16 %v12209_v19, %v12208_v50  ;;  %v12467_v19 = vld [vmem:[#allocation3 + $0x22] sm:$0xff] }
 0x7ac   : > { %16096 = vmatmul.mubr.bf16.gmra.mxu1 %v19946_v46  ;;  %16118 = vmatpush3.bf16.msra.mxu0 %v16637_v21  ;;  %v11941_v46 = vpack.c.bf16 %v11918_v3, %v11917_v2  ;;  %v12215_v3 = vld [vmem:[#allocation3 + $0xf9] sm:$0xff] }
 0x7ad   : > { %16099 = vmatprep.mubr.bf16.mxu1 %v19951_v25  ;;  %16191 = vmatprep.subr.bf16.mxu0 %v16639_v1 }
 0x7af   : > { %16048 = vmatmul.mubr.bf16.gmra.mxu0 %v19879_v0  ;;  %v12190_v0 = vld [vmem:[#allocation3 + $0x31] sm:$0xff] }
 0x7b0   : > { %16051 = vmatprep.mubr.bf16.mxu0 %v19886_v11  ;;  %v12217_v57 = vpack.c.bf16 %v12191_v40, %v12190_v0  ;;  %v19981_v11 = vpack.c.bf16 %v11378_v5, %v11377_v7  ;;  %v11924_v40 = vld [vmem:[#allocation3 + $0x98] sm:$0xff]  ;;  %v11926_v5 = vld [vmem:[#allocation3 + $0xa8] sm:$0xff]  ;;  %v11923_v0 = vld [vmem:[#allocation3 + $0x90] sm:$0xff] }
 0x7b1   : > { %v11944_v35 = vpack.c.bf16 %v11924_v40, %v11923_v0 }
 0x7b4   : > { %16100 = vmatmul.mubr.bf16.gmra.mxu1 %v19976_v13 }
 0x7b5   : > { %16163 = vmatprep.mubr.bf16.mxu1 %v12216_v26  ;;  %v16645_v26 = vld [vmem:[#allocation4 + $0xb08] sm:$0xff]  }
 0x7b7   : > { %16052 = vmatmul.mubr.bf16.gmra.mxu0 %v19890_v18  ;;  %v12195_v18 = vld [vmem:[#allocation3 + $0x59] sm:$0xff] }
 0x7b8   : > { %16055 = vmatprep.mubr.bf16.mxu0 %v19894_v29  ;;  %v12194_v29 = vld [vmem:[#allocation3 + $0x51] sm:$0xff] }
 0x7b9   : > { %v12219_v33 = vpack.c.bf16 %v12195_v18, %v12194_v29  ;;  %v12211_v29 = vld [vmem:[#allocation3 + $0xd9] sm:$0xff] }
 0x7ba   : > { %v12227_v22 = vpack.c.bf16 %v12211_v29, %v12210_v4  ;;  %v12471_v4 = vld [vmem:[#allocation3 + $0x42] sm:$0xff]  ;;  %v12472_v29 = vld [vmem:[#allocation3 + $0x4a] sm:$0xff] }
 0x7bc   : > { %16164 = vmatmul.mubr.bf16.vlgmr.msra.gmra.mxu1 %v12217_v57 }
 0x7bd   : > { %16167 = vmatprep.mubr.bf16.mxu1 %v12218_v42  ;;  %v11925_v42 = vld [vmem:[#allocation3 + $0xa0] sm:$0xff] }
 0x7bf   : > { %16056 = vmatmul.mubr.bf16.gmra.mxu0 %v19981_v11 }
 0x7c0   : > { %16119 = vmatprep.mubr.bf16.mxu0 %v11937_v59  ;;  %v11945_v59 = vpack.c.bf16 %v11926_v5, %v11925_v42 }
 0x7c4   : > { %16168 = vmatmul.mubr.bf16.gmra.mxu1 %v12219_v33 }
 0x7c5   : > { %16171 = vmatprep.mubr.bf16.mxu1 %v12220_v15 }
 0x7c7   : > { %16120 = vmatmul.mubr.bf16.vlgmr.msra.gmra.mxu0 %v11938_v31 }
 0x7c8   : > { %16123 = vmatprep.mubr.bf16.mxu0 %v11939_v63  ;;  %16192 = vmatpush3.bf16.msra.mxu0 %v16639_v1  ;;  %v12207_v1 = vld [vmem:[#allocation3 + $0xb9] sm:$0xff]  ;;  %v11930_v63 = vld [vmem:[#allocation3 + $0xc8] sm:$0xff] }
 0x7c9   : > { %16193 = vmatprep.subr.bf16.mxu0 %v16640_v43  ;;  %v12225_v7 = vpack.c.bf16 %v12207_v1, %v12206_v47  ;;  %v11947_v61 = vpack.c.bf16 %v11930_v63, %v11929_v49  ;;  %v12468_v47 = vld [vmem:[#allocation3 + $0x2a] sm:$0xff] }
 0x7ca   : > { %v12495_v5 = vpack.c.bf16 %v12468_v47, %v12467_v19  ;;  %v12479_v19 = vld [vmem:[#allocation3 + $0x82] sm:$0xff]  ;;  %v12480_v47 = vld [vmem:[#allocation3 + $0x8a] sm:$0xff] }
 0x7cc   : > { %16194 = vmatpush3.bf16.msra.mxu0 %v16640_v43  ;;  %16172 = vmatmul.mubr.bf16.gmra.mxu1 %v12221_v20  ;;  %v12214_v20 = vld [vmem:[#allocation3 + $0xf1] sm:$0xff] }
 0x7cd   : > { %16175 = vmatprep.mubr.bf16.mxu1 %v12222_v44  ;;  %16195 = vmatprep.subr.bf16.mxu0 %v16641_v17  ;;  %v12229_v34 = vpack.c.bf16 %v12215_v3, %v12214_v20  ;;  %v12474_v20 = vld [vmem:[#allocation3 + $0x5a] sm:$0xff] }
 0x7cf   : > { %16124 = vmatmul.mubr.bf16.gmra.mxu0 %v11940_v24 }
 0x7d0   : > { %16127 = vmatprep.mubr.bf16.mxu0 %v11941_v46  ;;  %16196 = vmatpush3.bf16.msra.mxu0 %v16641_v17  ;;  %v11946_v17 = vpack.c.bf16 %v11928_v27, %v11927_v28 }
 0x7d1   : > { %16197 = vmatprep.subr.bf16.mxu0 %v16642_v23 }
 0x7d3   : > { %v15901_v37 = vpop.f32.mrf.mxu1 }
 0x7d4   : > { %16176 = vmatmul.mubr.bf16.gmra.mxu1 %v12223_v45  ;;  %16198 = vmatpush3.bf16.msra.mxu0 %v16642_v23  ;;  %v11931_v45 = vld [vmem:[#allocation3 + $0xd0] sm:$0xff] }
 0x7d5   : > { %16179 = vmatprep.mubr.bf16.mxu1 %v12224_v39  ;;  %16199 = vmatprep.subr.bf16.mxu0 %v16643_v8  ;;  %v10682_v21 = vpop.f32.mrf.mxu1  ;;  %v11948_v32 = vpack.c.bf16 %v11932_v9, %v11931_v45 }
 0x7d7   : > { %16128 = vmatmul.mubr.bf16.gmra.mxu0 %v11942_v58  ;;  %v15902_v6 = vpop.f32.mrf.mxu1 }
 0x7d8   : > { %16131 = vmatprep.mubr.bf16.mxu0 %v11943_v53  ;;  %16200 = vmatpush3.bf16.msra.mxu0 %v16643_v8 }
 0x7d9   : > { %16201 = vmatprep.subr.bf16.mxu0 %v16644_v16  ;;  %v10685_v62 = vpop.f32.mrf.mxu1 }
 0x7dc   : > { %v15905_v57 = vpop.f32.mrf.mxu1  ;;  %16180 = vmatmul.mubr.bf16.gmra.mxu1 %v12225_v7  ;;  %16202 = vmatpush3.bf16.msra.mxu0 %v16644_v16 }
 0x7dd   : > { %16183 = vmatprep.mubr.bf16.mxu1 %v12226_v51  ;;  %16203 = vmatprep.subr.bf16.mxu0 %v16645_v26 }
 0x7de   : > { %v10698_v18 = vpop.f32.mrf.mxu1  ;;  %v15857_v14 = vpop.f32.mrf.mxu0 }
 0x7df   : > { %16132 = vmatmul.mubr.bf16.gmra.mxu0 %v11944_v35  ;;  %v19984_v41 = vadd.f32 %v15901_v37, %v15857_v14 }
 0x7e0   : > { %16135 = vmatprep.mubr.bf16.mxu0 %v11945_v59  ;;  %v15906_v33 = vpop.f32.mrf.mxu1  ;;  %16204 = vmatpush3.bf16.msra.mxu0 %v16645_v26  ;;  %v10489_v30 = vpop.f32.mrf.mxu0  ;;  %v12470_v59 = vld [vmem:[#allocation3 + $0x3a] sm:$0xff] }
 0x7e1   : > { %16205 = vmatprep.subr.bf16.mxu0 %v16646_v12  ;;  %v19986_v15 = vadd.f32 %v10682_v21, %v10489_v30  ;;  %v12469_v30 = vld [vmem:[#allocation3 + $0x32] sm:$0xff] }
 0x7e2   : > { %v10701_v31 = vpop.f32.mrf.mxu1  ;;  %v15858_v43 = vpop.f32.mrf.mxu0 }
 0x7e3   : > { %v19988_v36 = vadd.f32 %v15902_v6, %v15858_v43 }
 0x7e4   : > { %v15909_v56 = vpop.f32.mrf.mxu1  ;;  %16184 = vmatmul.mubr.bf16.gmra.mxu1 %v12227_v22  ;;  %16206 = vmatpush3.bf16.msra.mxu0 %v16646_v12  ;;  %v10492_v60 = vpop.f32.mrf.mxu0  ;;  %v12496_v22 = vpack.c.bf16 %v12470_v59, %v12469_v30 }
 0x7e5   : > { %16187 = vmatprep.mubr.bf16.mxu1 %v19981_v11  ;;  %v19991_v44 = vadd.f32 %v10685_v62, %v10492_v60 }
 0x7e6   : > { %v10714_v24 = vpop.f32.mrf.mxu1 }
 0x7e7   : > { %v15861_v2 = vpop.f32.mrf.mxu0  ;;  %16136 = vmatmul.mubr.bf16.gmra.mxu0 %v11946_v17 }
 0x7e8   : > { %v19993_v23 = vadd.f32 %v15905_v57, %v15861_v2  ;;  %16139 = vmatprep.mubr.bf16.mxu0 %v11947_v61  ;;  %v15910_v46 = vpop.f32.mrf.mxu1  ;;  %v12476_v2 = vld [vmem:[#allocation3 + $0x6a] sm:$0xff] }
 0x7e9   : > { %v10505_v54 = vpop.f32.mrf.mxu0 }
 0x7ea   : > { %v19995_v52 = vadd.f32 %v10698_v18, %v10505_v54  ;;  %v10717_v8 = vpop.f32.mrf.mxu1 }
 0x7eb   : > { %v15862_v10 = vpop.f32.mrf.mxu0 }
 0x7ec   : > { %v19997_v11 = vadd.f32 %v15906_v33, %v15862_v10  ;;  %v15913_v48 = vpop.f32.mrf.mxu1  ;;  %16188 = vmatmul.mubr.bf16.gmra.mxu1 %v12229_v34  ;;  %v12473_v34 = vld [vmem:[#allocation3 + $0x52] sm:$0xff] }
 0x7ed   : > { %v10508_v39 = vpop.f32.mrf.mxu0 }
 0x7ee   : > { %v19999_v37 = vadd.f32 %v10701_v31, %v10508_v39  ;;  %v10730_v58 = vpop.f32.mrf.mxu1 }
 0x7ef   : > { %v15865_v38 = vpop.f32.mrf.mxu0  ;;  %16140 = vmatmul.mubr.bf16.gmra.mxu0 %v11948_v32 }
 0x7f0   : > { %v20001_v16 = vadd.f32 %v15909_v56, %v15865_v38  ;;  %16143 = vmatprep.mubr.bf16.mxu0 %v19940_v55  ;;  %v15914_v53 = vpop.f32.mrf.mxu1 }
 0x7f1   : > { %v10521_v21 = vpop.f32.mrf.mxu0 }
 0x7f2   : > { %v20004_v1 = vadd.f32 %v10714_v24, %v10521_v21  ;;  %v10733_v6 = vpop.f32.mrf.mxu1  ;;  %v12475_v24 = vld [vmem:[#allocation3 + $0x62] sm:$0xff]  ;;  %v12478_v21 = vld [vmem:[#allocation3 + $0x7a] sm:$0xff] }
 0x7f3   : > { %v15866_v50 = vpop.f32.mrf.mxu0  ;;  %v12499_v45 = vpack.c.bf16 %v12476_v2, %v12475_v24 }
 0x7f4   : > { %v20006_v26 = vadd.f32 %v15910_v46, %v15866_v50  ;;  %v15917_v40 = vpop.f32.mrf.mxu1 }
 0x7f5   : > { %v10524_v62 = vpop.f32.mrf.mxu0 }
 0x7f6   : > { %v20008_v7 = vadd.f32 %v10717_v8, %v10524_v62  ;;  %v10746_v51 = vpop.f32.mrf.mxu1  ;;  %v12498_v8 = vpack.c.bf16 %v12474_v20, %v12473_v34  ;;  %v12477_v62 = vld [vmem:[#allocation3 + $0x72] sm:$0xff] }
 0x7f7   : > { %v15869_v0 = vpop.f32.mrf.mxu0  ;;  %16144 = vmatmul.mubr.bf16.gmra.mxu0 %v19940_v55  ;;  %v12497_v55 = vpack.c.bf16 %v12472_v29, %v12471_v4 }
 0x7f8   : > { %v20011_v57 = vadd.f32 %v15913_v48, %v15869_v0  ;;  %16207 = vmatprep.mubr.bf16.mxu0 %v12495_v5  ;;  %v15918_v35 = vpop.f32.mrf.mxu1  ;;  %v12500_v0 = vpack.c.bf16 %v12478_v21, %v12477_v62  ;;  %v12487_v21 = vld [vmem:[#allocation3 + $0xc2] sm:$0xff] }
 0x7f9   : > { %v10537_v42 = vpop.f32.mrf.mxu0 }
 0x7fa   : > { %v20013_v12 = vadd.f32 %v10730_v58, %v10537_v42  ;;  %v10749_v18 = vpop.f32.mrf.mxu1  ;;  %v12501_v42 = vpack.c.bf16 %v12480_v47, %v12479_v19  ;;  %v12485_v19 = vld [vmem:[#allocation3 + $0xb2] sm:$0xff] }
 0x7fb   : > { %v15870_v14 = vpop.f32.mrf.mxu0 }
 0x7fc   : > { %v20015_v33 = vadd.f32 %v15914_v53, %v15870_v14  ;;  %v15921_v27 = vpop.f32.mrf.mxu1 }
 0x7fd   : > { %v10540_v31 = vpop.f32.mrf.mxu0 }
 0x7fe   : > { %v20017_v43 = vadd.f32 %v10733_v6, %v10540_v31  ;;  %v10762_v63 = vpop.f32.mrf.mxu1 }
 0x7ff   : > { %v15873_v28 = vpop.f32.mrf.mxu0  ;;  %16208 = vmatmul.mubr.bf16.vlgmr.msra.gmra.mxu0 %v12496_v22 }
 0x800   : > { %v20019_v56 = vadd.f32 %v15917_v40, %v15873_v28  ;;  %16211 = vmatprep.mubr.bf16.mxu0 %v12497_v55  ;;  %v15922_v60 = vpop.f32.mrf.mxu1  ;;  %v12483_v55 = vld [vmem:[#allocation3 + $0xa2] sm:$0xff] }
 0x801   : > { %v10553_v17 = vpop.f32.mrf.mxu0 }
 0x802   : > { %v20021_v49 = vadd.f32 %v10746_v51, %v10553_v17  ;;  %v10765_v3 = vpop.f32.mrf.mxu1 }
 0x803   : > { %v15874_v61 = vpop.f32.mrf.mxu0 }
 0x804   : > { %v20023_v46 = vadd.f32 %v15918_v35, %v15874_v61  ;;  %v15925_v54 = vpop.f32.mrf.mxu1 }
 0x805   : > { %v10556_v9 = vpop.f32.mrf.mxu0 }
 0x806   : > { %v20025_v10 = vadd.f32 %v10749_v18, %v10556_v9  ;;  %v10778_v48 = vpop.f32.mrf.mxu1 }
 0x807   : > { %v15877_v39 = vpop.f32.mrf.mxu0  ;;  %16212 = vmatmul.mubr.bf16.gmra.mxu0 %v12498_v8 }
 0x808   : > { %v20027_v32 = vadd.f32 %v15921_v27, %v15877_v39  ;;  %16215 = vmatprep.mubr.bf16.mxu0 %v12499_v45  ;;  %v15926_v58 = vpop.f32.mrf.mxu1  ;;  %v12482_v27 = vld [vmem:[#allocation3 + $0x9a] sm:$0xff] }
 0x809   : > { %v10569_v38 = vpop.f32.mrf.mxu0 }
 0x80a   : > { %v20029_v53 = vadd.f32 %v10762_v63, %v10569_v38  ;;  %v10781_v6 = vpop.f32.mrf.mxu1  ;;  %v12484_v63 = vld [vmem:[#allocation3 + $0xaa] sm:$0xff] }
 0x80b   : > { %v15878_v50 = vpop.f32.mrf.mxu0  ;;  %v12503_v24 = vpack.c.bf16 %v12484_v63, %v12483_v55 }
 0x80c   : > { %v20031_v40 = vadd.f32 %v15922_v60, %v15878_v50  ;;  %v15989_v5 = vpop.f32.mrf.mxu1  ;;  %v12481_v60 = vld [vmem:[#allocation3 + $0x92] sm:$0xff]  ;;  %v12488_v50 = vld [vmem:[#allocation3 + $0xca] sm:$0xff] }
 0x80d   : > { %v10572_v51 = vpop.f32.mrf.mxu0 }
 0x80e   : > { %v20033_v35 = vadd.f32 %v10765_v3, %v10572_v51  ;;  %v11212_v59 = vpop.f32.mrf.mxu1  ;;  %v12502_v3 = vpack.c.bf16 %v12482_v27, %v12481_v60 }
 0x80f   : > { %v15881_v18 = vpop.f32.mrf.mxu0  ;;  %16216 = vmatmul.mubr.bf16.gmra.mxu0 %v12500_v0 }
 0x810   : > { %v20035_v14 = vadd.f32 %v15925_v54, %v15881_v18  ;;  %16219 = vmatprep.mubr.bf16.mxu0 %v12501_v42  ;;  %v15990_v4 = vpop.f32.mrf.mxu1  ;;  %v12505_v42 = vpack.c.bf16 %v12488_v50, %v12487_v21 }
 0x811   : > { %v10585_v29 = vpop.f32.mrf.mxu0 }
 0x812   : > { %v20037_v30 = vadd.f32 %v10778_v48, %v10585_v29  ;;  %v11215_v31 = vpop.f32.mrf.mxu1  ;;  %v12486_v48 = vld [vmem:[#allocation3 + $0xba] sm:$0xff] }
 0x813   : > { %v15882_v22 = vpop.f32.mrf.mxu0 }
 0x814   : > { %v20039_v28 = vadd.f32 %v15926_v58, %v15882_v22  ;;  %v15993_v17 = vpop.f32.mrf.mxu1 }
 0x815   : > { %v10588_v20 = vpop.f32.mrf.mxu0 }
 0x816   : > { %v20041_v61 = vadd.f32 %v10781_v6, %v10588_v20  ;;  %v11228_v2 = vpop.f32.mrf.mxu1 }
 0x817   : > { %v15945_v34 = vpop.f32.mrf.mxu0  ;;  %16220 = vmatmul.mubr.bf16.gmra.mxu0 %v12502_v3 }
 0x818   : > { %v11046_v54 = vadd.f32 %v15945_v34, %v19984_v41  ;;  %16223 = vmatprep.mubr.bf16.mxu0 %v12503_v24  ;;  %v15994_v9 = vpop.f32.mrf.mxu1  ;;  %v12504_v41 = vpack.c.bf16 %v12486_v48, %v12485_v19 }
 0x819   : > { %v10933_v8 = vpop.f32.mrf.mxu0 }
 0x81a   : > { %v11044_v45 = vadd.f32 %v10933_v8, %v19986_v15  ;;  %v11231_v39 = vpop.f32.mrf.mxu1  ;;  %v20045_v58 = vadd.f32 %v15989_v5, %v11046_v54  ;;  %v12494_v54 = vld [vmem:[#allocation3 + $0xfa] sm:$0xff] }
 0x81b   : > { %v15946_v38 = vpop.f32.mrf.mxu0 }
 0x81c   : > { %v11047_v6 = vadd.f32 %v15946_v38, %v19988_v36  ;;  %v15997_v47 = vpop.f32.mrf.mxu1  ;;  %v20048_v62 = vadd.f32 %v11212_v59, %v11044_v45 }
 0x81d   : > { %v10936_v51 = vpop.f32.mrf.mxu0 }
 0x81e   : > { %v11045_v0 = vadd.f32 %v10936_v51, %v19991_v44  ;;  %v11244_v18 = vpop.f32.mrf.mxu1  ;;  %v20051_v15 = vadd.f32 %v15990_v4, %v11047_v6 }
 0x81f   : > { %v15949_v29 = vpop.f32.mrf.mxu0  ;;  %16224 = vmatmul.mubr.bf16.gmra.mxu0 %v12504_v41 }
 0x820   : > { %v11050_v5 = vadd.f32 %v15949_v29, %v19993_v23  ;;  %16227 = vmatprep.mubr.bf16.mxu0 %v12505_v42  ;;  %v15998_v27 = vpop.f32.mrf.mxu1  ;;  %v20054_v22 = vadd.f32 %v11215_v31, %v11045_v0 }
 0x821   : > { %v10949_v36 = vpop.f32.mrf.mxu0 }
 0x822   : > { %v11048_v59 = vadd.f32 %v10949_v36, %v19995_v52  ;;  %v11247_v55 = vpop.f32.mrf.mxu1  ;;  %v20057_v63 = vadd.f32 %v15993_v17, %v11050_v5  ;;  %v12493_v17 = vld [vmem:[#allocation3 + $0xf2] sm:$0xff] }
 0x823   : > { %v15950_v60 = vpop.f32.mrf.mxu0  ;;  %v12508_v38 = vpack.c.bf16 %v12494_v54, %v12493_v17 }
 0x824   : > { %v11051_v44 = vadd.f32 %v15950_v60, %v19997_v11  ;;  %v16001_v20 = vpop.f32.mrf.mxu1  ;;  %v20060_v4 = vadd.f32 %v11228_v2, %v11048_v59 }
 0x825   : > { %v10952_v3 = vpop.f32.mrf.mxu0 }
 0x826   : > { %v11049_v24 = vadd.f32 %v10952_v3, %v19999_v37  ;;  %v11260_v23 = vpop.f32.mrf.mxu1  ;;  %v20063_v34 = vadd.f32 %v15994_v9, %v11051_v44 }
 0x827   : > { %v15953_v31 = vpop.f32.mrf.mxu0  ;;  %16228 = vmatmul.mubr.bf16.gmra.mxu0 %v19951_v25 }
 0x828   : > { %v11054_v52 = vadd.f32 %v15953_v31, %v20001_v16  ;;  %16231 = vmatprep.mubr.bf16.mxu0 %v19976_v13  ;;  %v16002_v8 = vpop.f32.mrf.mxu1  ;;  %v20068_v11 = vadd.f32 %v11231_v39, %v11049_v24 }
 0x829   : > { %v10965_v2 = vpop.f32.mrf.mxu0 }
 0x82a   : > { %v11052_v45 = vadd.f32 %v10965_v2, %v20004_v1  ;;  %v11263_v48 = vpop.f32.mrf.mxu1  ;;  %v20071_v37 = vadd.f32 %v15997_v47, %v11054_v52 }
 0x82b   : > { %v15954_v9 = vpop.f32.mrf.mxu0 }
 0x82c   : > { %v11055_v21 = vadd.f32 %v15954_v9, %v20006_v26  ;;  %v16005_v25 = vpop.f32.mrf.mxu1  ;;  %v20074_v50 = vadd.f32 %v11244_v18, %v11052_v45 }
 0x82d   : > { %v10968_v16 = vpop.f32.mrf.mxu0 }
 0x82e   : > { %v11053_v13 = vadd.f32 %v10968_v16, %v20008_v7  ;;  %v11276_v6 = vpop.f32.mrf.mxu1  ;;  %v20077_v19 = vadd.f32 %v15998_v27, %v11055_v21 }
 0x82f   : > { %v15957_v39 = vpop.f32.mrf.mxu0  ;;  %16232 = vmatmul.mubr.bf16.gmra.mxu0 %v12508_v38 }
 0x830   : > { %v11058_v1 = vadd.f32 %v15957_v39, %v20011_v57  ;;  %v16006_v51 = vpop.f32.mrf.mxu1  ;;  %v20080_v47 = vadd.f32 %v11247_v55, %v11053_v13 }
 0x831   : > { %v10981_v41 = vpop.f32.mrf.mxu0 }
 0x832   : > { %v11056_v0 = vadd.f32 %v10981_v41, %v20013_v12  ;;  %v11279_v26 = vpop.f32.mrf.mxu1  ;;  %v20083_v42 = vadd.f32 %v16001_v20, %v11058_v1 }
 0x833   : > { %v15958_v18 = vpop.f32.mrf.mxu0 }
 0x834   : > { %v11059_v29 = vadd.f32 %v15958_v18, %v20015_v33  ;;  %v16009_v7 = vpop.f32.mrf.mxu1  ;;  %v20086_v5 = vadd.f32 %v11260_v23, %v11056_v0 }
 0x835   : > { %v10984_v27 = vpop.f32.mrf.mxu0 }
 0x836   : > { %v11057_v36 = vadd.f32 %v10984_v27, %v20017_v43  ;;  %v11292_v59 = vpop.f32.mrf.mxu1  ;;  %v20089_v57 = vadd.f32 %v16002_v8, %v11059_v29 }
 0x837   : > { %v15961_v55 = vpop.f32.mrf.mxu0 }
 0x838   : > { %v11062_v60 = vadd.f32 %v15961_v55, %v20019_v56  ;;  %v16010_v44 = vpop.f32.mrf.mxu1  ;;  %v20092_v12 = vadd.f32 %v11263_v48, %v11057_v36 }
 0x839   : > { %v10997_v20 = vpop.f32.mrf.mxu0 }
 0x83a   : > { %v11060_v3 = vadd.f32 %v10997_v20, %v20021_v49  ;;  %v11295_v24 = vpop.f32.mrf.mxu1  ;;  %v20095_v33 = vadd.f32 %v16005_v25, %v11062_v60 }
 0x83b   : > { %v15962_v23 = vpop.f32.mrf.mxu0 }
 0x83c   : > { %v11063_v31 = vadd.f32 %v15962_v23, %v20023_v46  ;;  %v16013_v52 = vpop.f32.mrf.mxu1  ;;  %v20098_v43 = vadd.f32 %v11276_v6, %v11060_v3 }
 0x83d   : > { %v11000_v17 = vpop.f32.mrf.mxu0 }
 0x83e   : > { %v11061_v54 = vadd.f32 %v11000_v17, %v20025_v10  ;;  %v11308_v8 = vpop.f32.mrf.mxu1  ;;  %v20101_v56 = vadd.f32 %v16006_v51, %v11063_v31 }
 0x83f   : > { %v15965_v2 = vpop.f32.mrf.mxu0 }
 0x840   : > { %v11066_v45 = vadd.f32 %v15965_v2, %v20027_v32  ;;  %v16014_v48 = vpop.f32.mrf.mxu1  ;;  %v20104_v49 = vadd.f32 %v11279_v26, %v11061_v54 }
 0x841   : > { %v11013_v9 = vpop.f32.mrf.mxu0 }
 0x842   : > { %v11064_v38 = vadd.f32 %v11013_v9, %v20029_v53  ;;  %v11311_v21 = vpop.f32.mrf.mxu1  ;;  %v20107_v46 = vadd.f32 %v16009_v7, %v11066_v45 }
 0x843   : > { %v15966_v25 = vpop.f32.mrf.mxu0 }
 0x844   : > { %v11067_v16 = vadd.f32 %v15966_v25, %v20031_v40  ;;  %v20110_v13 = vpop.f32.mrf.mxu1  ;;  %v20112_v10 = vadd.f32 %v11292_v59, %v11064_v38 }
 0x845   : > { %v11016_v6 = vpop.f32.mrf.mxu0 }
 0x846   : > { %v11065_v39 = vadd.f32 %v11016_v6, %v20033_v35  ;;  %v20115_v32 = vpop.f32.mrf.mxu1  ;;  %v20117_v1 = vadd.f32 %v16010_v44, %v11067_v16 }
 0x847   : > { %v15969_v51 = vpop.f32.mrf.mxu0 }
 0x848   : > { %v11070_v53 = vadd.f32 %v15969_v51, %v20035_v14  ;;  %v20120_v41 = vpop.f32.mrf.mxu1  ;;  %v20122_v0 = vadd.f32 %v11295_v24, %v11065_v39 }
 0x849   : > { %v11029_v26 = vpop.f32.mrf.mxu0 }
 0x84a   : > { %v11068_v40 = vadd.f32 %v11029_v26, %v20037_v30  ;;  %v20125_v18 = vpop.f32.mrf.mxu1  ;;  %v20127_v29 = vadd.f32 %v16013_v52, %v11070_v53 }
 0x84b   : > { %v15970_v7 = vpop.f32.mrf.mxu0 }
 0x84c   : > { %v11071_v35 = vadd.f32 %v15970_v7, %v20039_v28  ;;  %v20130_v27 = vpop.f32.mrf.mxu1  ;;  %v20132_v36 = vadd.f32 %v11308_v8, %v11068_v40 }
 0x84d   : > { %v11032_v59 = vpop.f32.mrf.mxu0 }
 0x84e   : > { %v11069_v14 = vadd.f32 %v11032_v59, %v20041_v61  ;;  %v20135_v55 = vpop.f32.mrf.mxu1  ;;  %v20137_v60 = vadd.f32 %v16014_v48, %v11071_v35 }
 0x84f   : > { %v16033_v44 = vpop.f32.mrf.mxu0 }
 0x850   : > { %v20140_v30 = vadd.f32 %v16033_v44, %v20045_v58  ;;  %v20142_v20 = vpop.f32.mrf.mxu1  ;;  %v20144_v3 = vadd.f32 %v11311_v21, %v11069_v14 }
 0x851   : > { %v11491_v28 = vpop.f32.mrf.mxu0 }
 0x852   : > { %v20147_v24 = vadd.f32 %v11491_v28, %v20048_v62  ;;  %v20149_v23 = vpop.f32.mrf.mxu1 }
 0x853   : > { %v16034_v31 = vpop.f32.mrf.mxu0 }
 0x854   : > { %v20152_v61 = vadd.f32 %v16034_v31, %v20051_v15  ;;  %v20154_v52 = vpop.f32.mrf.mxu1 }
 0x855   : > { %v11494_v17 = vpop.f32.mrf.mxu0 }
 0x856   : > { %v20157_v58 = vadd.f32 %v11494_v17, %v20054_v22  ;;  %v20159_v54 = vpop.f32.mrf.mxu1 }
 0x857   : > { %v16037_v8 = vpop.f32.mrf.mxu0 }
 0x858   : > { %v20162_v2 = vadd.f32 %v16037_v8, %v20057_v63  ;;  %v20164_v62 = vpop.f32.mrf.mxu1 }
 0x859   : > { %v11507_v45 = vpop.f32.mrf.mxu0 }
 0x85a   : > { %v20167_v48 = vadd.f32 %v11507_v45, %v20060_v4  ;;  %v20169_v15 = vpop.f32.mrf.mxu1 }
 0x85b   : > { %v16038_v9 = vpop.f32.mrf.mxu0 }
 0x85c   : > { %v20172_v38 = vadd.f32 %v16038_v9, %v20063_v34  ;;  %v20174_v22 = vpop.f32.mrf.mxu1 }
 0x85d   : > { %v11510_v21 = vpop.f32.mrf.mxu0 }
 0x85e   : > { %v20177_v25 = vadd.f32 %v11510_v21, %v20068_v11  ;;  %v20179_v63 = vpop.f32.mrf.mxu1 }
 0x85f   : > { %v16041_v16 = vpop.f32.mrf.mxu0 }
 0x860   : > { %v20182_v6 = vadd.f32 %v16041_v16, %v20071_v37  ;;  %v20184_v4 = vpop.f32.mrf.mxu1 }
 0x861   : > { %v11523_v39 = vpop.f32.mrf.mxu0 }
 0x862   : > { %v20187_v51 = vadd.f32 %v11523_v39, %v20074_v50  ;;  %v20189_v34 = vpop.f32.mrf.mxu1 }
 0x863   : > { %21042 = vst [vmem:[#allocation28_spill] sm:$0xff] %v20189_v34  ;;  %v16042_v53 = vpop.f32.mrf.mxu0 }
 0x864   : > { %v20192_v26 = vadd.f32 %v16042_v53, %v20077_v19  ;;  %v20194_v11 = vpop.f32.mrf.mxu1 }
 0x865   : > { %21043 = vst [vmem:[#allocation66_spill] sm:$0xff] %v20194_v11  ;;  %v11526_v40 = vpop.f32.mrf.mxu0 }
 0x866   : > { %v20197_v7 = vadd.f32 %v11526_v40, %v20080_v47  ;;  %v20199_v37 = vpop.f32.mrf.mxu1 }
 0x867   : > { %21044 = vst [vmem:[#allocation19_spill] sm:$0xff] %v20199_v37  ;;  %v16045_v35 = vpop.f32.mrf.mxu0 }
 0x868   : > { %v20202_v59 = vadd.f32 %v16045_v35, %v20083_v42  ;;  %v20204_v50 = vpop.f32.mrf.mxu1 }
 0x869   : > { %21045 = vst [vmem:[#allocation29_spill] sm:$0xff] %v20204_v50  ;;  %v11539_v14 = vpop.f32.mrf.mxu0 }
 0x86a   : > { %v20207_v44 = vadd.f32 %v11539_v14, %v20086_v5  ;;  %v20209_v19 = vpop.f32.mrf.mxu1 }
 0x86b   : > { %21046 = vst [vmem:[#allocation74_spill] sm:$0xff] %v20209_v19  ;;  %v16046_v28 = vpop.f32.mrf.mxu0 }
 0x86c   : > { %v20212_v31 = vadd.f32 %v16046_v28, %v20089_v57  ;;  %v20214_v47 = vpop.f32.mrf.mxu1 }
 0x86d   : > { %21047 = vst [vmem:[#allocation65_spill] sm:$0xff] %v20214_v47  ;;  %v11542_v17 = vpop.f32.mrf.mxu0 }
 0x86e   : > { %v20217_v8 = vadd.f32 %v11542_v17, %v20092_v12  ;;  %v20219_v42 = vpop.f32.mrf.mxu1 }
 0x86f   : > { %21049 = vst [vmem:[#allocation50_spill] sm:$0xff] %v20219_v42  ;;  %v16049_v45 = vpop.f32.mrf.mxu0 }
 0x870   : > { %21048 = vst [vmem:[#allocation55_spill] sm:$0xff] %v20217_v8  ;;  %v20222_v9 = vadd.f32 %v16049_v45, %v20095_v33  ;;  %v20224_v5 = vpop.f32.mrf.mxu1 }
 0x871   : > { %21051 = vst [vmem:[#allocation64_spill] sm:$0xff] %v20224_v5  ;;  %v11555_v21 = vpop.f32.mrf.mxu0 }
 0x872   : > { %21050 = vst [vmem:[#allocation63_spill] sm:$0xff] %v20222_v9  ;;  %v20227_v16 = vadd.f32 %v11555_v21, %v20098_v43  ;;  %v20229_v39 = vpop.f32.mrf.mxu1 }
 0x873   : > { %v16050_v57 = vpop.f32.mrf.mxu0  ;;  %21053 = vst [vmem:[#allocation31_spill] sm:$0xff] %v20229_v39 }
 0x874   : > { %21052 = vst [vmem:[#allocation10_spill] sm:$0xff] %v20227_v16  ;;  %v20232_v53 = vadd.f32 %v16050_v57, %v20101_v56  ;;  %v20237_v14 = vpop.f32.mrf.mxu1 }
 0x875   : > { %v11558_v12 = vpop.f32.mrf.mxu0  ;;  %21056 = vst [vmem:[#allocation32_spill] sm:$0xff] %v20237_v14 }
 0x876   : > { %21054 = vst [vmem:[#allocation61_spill] sm:$0xff] %v20232_v53  ;;  %v20235_v40 = vadd.f32 %v11558_v12, %v20104_v49  ;;  %v20245_v45 = vpop.f32.mrf.mxu1 }
 0x877   : > { %v16053_v35 = vpop.f32.mrf.mxu0  ;;  %21059 = vst [vmem:[#allocation60_spill] sm:$0xff] %v20245_v45 }
 0x878   : > { %21055 = vst [vmem:[#allocation17_spill] sm:$0xff] %v20235_v40  ;;  %v20240_v33 = vadd.f32 %v16053_v35, %v20107_v46  ;;  %v20253_v12 = vpop.f32.mrf.mxu1 }
 0x879   : > { %v11571_v28 = vpop.f32.mrf.mxu0  ;;  %21062 = vst [vmem:[#allocation12_spill] sm:$0xff] %v20253_v12 }
 0x87a   : > { %21057 = vst [vmem:[#allocation25_spill] sm:$0xff] %v20240_v33  ;;  %v20243_v43 = vadd.f32 %v11571_v28, %v20112_v10  ;;  %v20261_v28 = vpop.f32.mrf.mxu1 }
 0x87b   : > { %v16054_v17 = vpop.f32.mrf.mxu0  ;;  %21065 = vst [vmem:[#allocation18_spill] sm:$0xff] %v20261_v28 }
 0x87c   : > { %21058 = vst [vmem:[#allocation77_spill] sm:$0xff] %v20243_v43  ;;  %v20248_v56 = vadd.f32 %v16054_v17, %v20117_v1 }
 0x87d   : > { %v11574_v21 = vpop.f32.mrf.mxu0 }
 0x87e   : > { %21060 = vst [vmem:[#allocation46_spill] sm:$0xff] %v20248_v56  ;;  %v20251_v49 = vadd.f32 %v11574_v21, %v20122_v0  ;;  %v16165_v21 = vpop.f32.mrf.mxu1 }
 0x87f   : > { %v16057_v57 = vpop.f32.mrf.mxu0 }
 0x880   : > { %21061 = vst [vmem:[#allocation16_spill] sm:$0xff] %v20251_v49  ;;  %v20256_v46 = vadd.f32 %v16057_v57, %v20127_v29  ;;  %v12328_v39 = vpop.f32.mrf.mxu1 }
 0x881   : > { %v11587_v35 = vpop.f32.mrf.mxu0 }
 0x882   : > { %21063 = vst [vmem:[#allocation26_spill] sm:$0xff] %v20256_v46  ;;  %v20259_v10 = vadd.f32 %v11587_v35, %v20132_v36  ;;  %v16166_v46 = vpop.f32.mrf.mxu1 }
 0x883   : > { %v16058_v45 = vpop.f32.mrf.mxu0 }
 0x884   : > { %21064 = vst [vmem:[#allocation34_spill] sm:$0xff] %v20259_v10  ;;  %v20264_v1 = vadd.f32 %v16058_v45, %v20137_v60  ;;  %v20269_v35 = vpop.f32.mrf.mxu1 }
 0x885   : > { %v11590_v17 = vpop.f32.mrf.mxu0 }
 0x886   : > { %21066 = vst [vmem:[#allocation37_spill] sm:$0xff] %v20264_v1  ;;  %v20267_v0 = vadd.f32 %v11590_v17, %v20144_v3  ;;  %v20275_v60 = vpop.f32.mrf.mxu1 }
 0x887   : > { %v16121_v14 = vpop.f32.mrf.mxu0 }
 0x888   : > { %21067 = vst [vmem:[#allocation53_spill] sm:$0xff] %v20267_v0  ;;  %v20281_v17 = vpop.f32.mrf.mxu1 }
 0x889   : > { %v12049_v12 = vpop.f32.mrf.mxu0 }
 0x88a   : > { %v20287_v5 = vpop.f32.mrf.mxu1 }
 0x88b   : > { %v16122_v29 = vpop.f32.mrf.mxu0 }
 0x88c   : > { %v20293_v43 = vpop.f32.mrf.mxu1 }
 0x88d   : > { %v12052_v57 = vpop.f32.mrf.mxu0 }
 0x88e   : > { %v20299_v19 = vpop.f32.mrf.mxu1 }
 0x88f   : > { %v16125_v49 = vpop.f32.mrf.mxu0 }
 0x890   : > { %v20305_v53 = vpop.f32.mrf.mxu1 }
 0x891   : > { %v12065_v36 = vpop.f32.mrf.mxu0 }
 0x892   : > { %v20311_v11 = vpop.f32.mrf.mxu1 }
 0x893   : > { %v20271_v28 = vpop.f32.mrf.mxu0 }
 0x895   : > { %v20273_v10 = vpop.f32.mrf.mxu0 }
 0x897   : > { %v20277_v45 = vpop.f32.mrf.mxu0 }
 0x899   : > { %v20279_v3 = vpop.f32.mrf.mxu0 }
 0x89b   : > { %v20283_v0 = vpop.f32.mrf.mxu0 }
 0x89d   : > { %v20285_v1 = vpop.f32.mrf.mxu0 }
 0x89f   : > { %v20289_v56 = vpop.f32.mrf.mxu0 }
 0x8a1   : > { %v20291_v42 = vpop.f32.mrf.mxu0 }
 0x8a2   : > { %21068 = vst [vmem:[#allocation24_spill] sm:$0xff] %v20291_v42 }
 0x8a3   : > { %v20295_v47 = vpop.f32.mrf.mxu0 }
 0x8a4   : > { %21069 = vst [vmem:[#allocation14_spill] sm:$0xff] %v20295_v47 }
 0x8a5   : > { %v20297_v33 = vpop.f32.mrf.mxu0 }
 0x8a6   : > { %21070 = vst [vmem:[#allocation40_spill] sm:$0xff] %v20297_v33  ;;  %v20317_v33 = vpop.f32.mrf.mxu1 }
 0x8a7   : > { %v20301_v40 = vpop.f32.mrf.mxu0  ;;  %21077 = vst [vmem:[#allocation67_spill] sm:$0xff] %v20317_v33 }
 0x8a8   : > { %21071 = vst [vmem:[#allocation41_spill] sm:$0xff] %v20301_v40 }
 0x8a9   : > { %v20303_v50 = vpop.f32.mrf.mxu0 }
 0x8aa   : > { %21072 = vst [vmem:[#allocation69_spill] sm:$0xff] %v20303_v50  ;;  %v20323_v50 = vpop.f32.mrf.mxu1 }
 0x8ab   : > { %v20307_v37 = vpop.f32.mrf.mxu0  ;;  %21080 = vst [vmem:[#allocation35_spill] sm:$0xff] %v20323_v50 }
 0x8ac   : > { %21073 = vst [vmem:[#allocation47_spill] sm:$0xff] %v20307_v37 }
 0x8ad   : > { %v20309_v16 = vpop.f32.mrf.mxu0 }
 0x8ae   : > { %21074 = vst [vmem:[#allocation11_spill] sm:$0xff] %v20309_v16  ;;  %v11883_v16 = vadd.f32 %v20110_v13, %v20140_v30  ;;  %v11882_v13 = vadd.f32 %v20125_v18, %v20157_v58 }
 0x8af   : > { %v20313_v9 = vpop.f32.mrf.mxu0 }
 0x8b0   : > { %21075 = vst [vmem:[#allocation75_spill] sm:$0xff] %v20313_v9  ;;  %v12162_v42 = vadd.f32 %v16121_v14, %v11883_v16  ;;  %v11881_v9 = vadd.f32 %v20115_v32, %v20147_v24  ;;  %v20346_v32 = vld [vmem:[#allocation6 + $0x4] ss:$0 sm:$0xff]  ;;  %v12161_v24 = vadd.f32 %v12052_v57, %v11882_v13  ;;  %v11889_v13 = vadd.f32 %v20159_v54, %v20187_v51 }
 0x8b1   : > { %v20315_v47 = vpop.f32.mrf.mxu0 }
 0x8b2   : > { %21076 = vst [vmem:[#allocation72_spill] sm:$0xff] %v20315_v47  ;;  %v20333_v47 = vpop.f32.mrf.mxu1  ;;  %v12441_v30 = vadd.f32 %v16165_v21, %v12162_v42  ;;  %v12440_v21 = vadd.f32 %v20269_v35, %v12161_v24 }
 0x8b3   : > { %v20319_v34 = vpop.f32.mrf.mxu0 }
 0x8b4   : > { %21078 = vst [vmem:[#allocation52_spill] sm:$0xff] %v20319_v34  ;;  %v12160_v34 = vadd.f32 %v12049_v12, %v11881_v9  ;;  %v20344_v16 = vpop.f32.mrf.mxu1  ;;  %v11887_v9 = vadd.f32 %v20130_v27, %v20162_v2  ;;  %v11888_v27 = vadd.f32 %v20142_v20, %v20172_v38 }
 0x8b5   : > { %v20321_v40 = vpop.f32.mrf.mxu0 }
 0x8b6   : > { %21079 = vst [vmem:[#allocation59_spill] sm:$0xff] %v20321_v40  ;;  %v11884_v40 = vadd.f32 %v20120_v41, %v20152_v61  ;;  %v11885_v41 = vadd.f32 %v20135_v55, %v20167_v48  ;;  %v12166_v61 = vadd.f32 %v16125_v49, %v11887_v9  ;;  %v20360_v2 = vpop.f32.mrf.mxu1  ;;  %v11886_v49 = vadd.f32 %v20149_v23, %v20177_v25 }
 0x8b7   : > { %v20325_v8 = vpop.f32.mrf.mxu0 }
 0x8b8   : > { %21081 = vst [vmem:[#allocation36_spill] sm:$0xff] %v20325_v8  ;;  %v12163_v8 = vadd.f32 %v16122_v29, %v11884_v40  ;;  %v12164_v55 = vadd.f32 %v12065_v36, %v11885_v41  ;;  %v20373_v57 = vpop.f32.mrf.mxu1  ;;  %v12165_v35 = vadd.f32 %v20273_v10, %v11886_v49  ;;  %v21086_v49 = vld [vmem:[#allocation28_spill] sm:$0xff] }
 0x8b9   : > { %v20329_v37 = vpop.f32.mrf.mxu0 }
 0x8ba   : > { %v12442_v40 = vadd.f32 %v16166_v46, %v12163_v8  ;;  %v12167_v8 = vadd.f32 %v20271_v28, %v11888_v27  ;;  %v11891_v46 = vadd.f32 %v20154_v52, %v20182_v6  ;;  %v12443_v28 = vadd.f32 %v20281_v17, %v12164_v55  ;;  %v20387_v24 = vpop.f32.mrf.mxu1 }
 0x8bb   : > { %v20335_v33 = vpop.f32.mrf.mxu0  ;;  %v12168_v17 = vadd.f32 %v20279_v3, %v11889_v13  ;;  %v11896_v27 = vadd.f32 %v20184_v4, %v20212_v31 }
 0x8bc   : > { %21082 = vst [vmem:[#allocation44_spill] sm:$0xff] %v20335_v33  ;;  %v12439_v33 = vadd.f32 %v12328_v39, %v12160_v34  ;;  %v12446_v10 = vadd.f32 %v20287_v5, %v12167_v8 }
 0x8bd   : > { %v20339_v50 = vpop.f32.mrf.mxu0 }
 0x8bf   : > { %v16209_v14 = vpop.f32.mrf.mxu0 }
 0x8c0   : > { %v12720_v12 = vadd.f32 %v16209_v14, %v12441_v30  ;;  %v11892_v14 = vadd.f32 %v20164_v62, %v20192_v26 }
 0x8c1   : > { %v12607_v18 = vpop.f32.mrf.mxu0 }
 0x8c2   : > { %v12756_v58 = vadd.f32 %v20346_v32, %v12720_v12  ;;  %v12718_v42 = vadd.f32 %v12607_v18, %v12439_v33  ;;  %v12445_v33 = vadd.f32 %v20275_v60, %v12166_v61  ;;  %v12170_v60 = vadd.f32 %v20277_v45, %v11891_v46  ;;  %v20401_v61 = vpop.f32.mrf.mxu1  ;;  %v21089_v46 = vld [vmem:[#allocation63_spill] sm:$0xff] }
 0x8c3   : > { %v16210_v34 = vpop.f32.mrf.mxu0  ;;  %v12444_v45 = vadd.f32 %v20293_v43, %v12165_v35  ;;  %v11890_v12 = vadd.f32 %v20169_v15, %v20197_v7  ;;  %v12171_v5 = vadd.f32 %v20283_v0, %v11892_v14  ;;  %v11895_v18 = vadd.f32 %v20174_v22, %v20202_v59 }
 0x8c4   : > { %12784 = vst [vmem:[%s20355_s11 + $0x10] sm:$0xff] %v12756_v58  ;;  %v12754_v48 = vadd.f32 %v20346_v32, %v12718_v42  ;;  %v12721_v39 = vadd.f32 %v16210_v34, %v12442_v40  ;;  %v12449_v3 = vadd.f32 %v20299_v19, %v12170_v60  ;;  %v12447_v0 = vadd.f32 %v20305_v53, %v12168_v17  ;;  %v20415_v34 = vpop.f32.mrf.mxu1  ;;  %v21083_v53 = vld [vmem:[#allocation24_spill] sm:$0xff]  ;;  %v21094_v17 = vld [vmem:[#allocation41_spill] sm:$0xff] }
 0x8c5   : > { %v12610_v29 = vpop.f32.mrf.mxu0  ;;  %v12169_v43 = vadd.f32 %v20285_v1, %v11890_v12  ;;  %v11893_v42 = vadd.f32 %v20179_v63, %v20207_v44  ;;  %v12174_v19 = vadd.f32 %v20289_v56, %v11895_v18  ;;  %v12450_v1 = vadd.f32 %v20311_v11, %v12171_v5  ;;  %v21084_v56 = vld [vmem:[#allocation67_spill] sm:$0xff]  ;;  %v21087_v11 = vld [vmem:[#allocation14_spill] sm:$0xff]  ;;  %v21096_v5 = vld [vmem:[#allocation29_spill] sm:$0xff] }
 0x8c6   : > { %12782 = vst [vmem:[%s20355_s11] sm:$0xff] %v12754_v48  ;;  %v12757_v20 = vadd.f32 %v20346_v32, %v12721_v39  ;;  %v12719_v38 = vadd.f32 %v12610_v29, %v12440_v21  ;;  %v21085_v21 = vld [vmem:[#allocation55_spill] sm:$0xff]  ;;  %v21097_v18 = vld [vmem:[#allocation69_spill] sm:$0xff] }
 0x8c7   : > { %v16213_v36 = vpop.f32.mrf.mxu0  ;;  %v12172_v48 = vadd.f32 %v21083_v53, %v11893_v42  ;;  %v12448_v39 = vadd.f32 %v21084_v56, %v12169_v43  ;;  %v11894_v29 = vadd.f32 %v21086_v49, %v21085_v21  ;;  %v21104_v49 = vld [vmem:[#allocation77_spill] sm:$0xff] }
 0x8c8   : > { %12785 = vst [vmem:[%s20355_s11 + $0x18] sm:$0xff] %v12757_v20  ;;  %v12755_v23 = vadd.f32 %v20346_v32, %v12719_v38  ;;  %v12724_v25 = vadd.f32 %v16213_v36, %v12445_v33  ;;  %v12175_v20 = vadd.f32 %v21087_v11, %v11896_v27  ;;  %v21088_v38 = vld [vmem:[#allocation35_spill] sm:$0xff]  ;;  %v21090_v36 = vld [vmem:[#allocation66_spill] sm:$0xff]  ;;  %v21101_v27 = vld [vmem:[#allocation25_spill] sm:$0xff] }
 0x8c9   : > { %v12623_v30 = vpop.f32.mrf.mxu0  ;;  %v12453_v33 = vadd.f32 %v21088_v38, %v12174_v19  ;;  %v11899_v35 = vadd.f32 %v21090_v36, %v21089_v46  ;;  %v21100_v19 = vld [vmem:[#allocation47_spill] sm:$0xff]  ;;  %v21107_v46 = vld [vmem:[#allocation46_spill] sm:$0xff]  ;;  %v21108_v36 = vld [vmem:[#allocation64_spill] sm:$0xff] }
 0x8ca   : > { %12783 = vst [vmem:[%s20355_s11 + $0x8] sm:$0xff] %v12755_v23  ;;  %v12760_v52 = vadd.f32 %v20346_v32, %v12724_v25  ;;  %v12722_v6 = vadd.f32 %v12623_v30, %v12443_v28  ;;  %v16185_v23 = vpop.f32.mrf.mxu1  ;;  %v21091_v28 = vld [vmem:[#allocation40_spill] sm:$0xff]  ;;  %v12454_v12 = vadd.f32 %v20344_v16, %v12175_v20  ;;  %v21106_v20 = vld [vmem:[#allocation75_spill] sm:$0xff] }
 0x8cb   : > { %v16214_v9 = vpop.f32.mrf.mxu0  ;;  %v12173_v13 = vadd.f32 %v21091_v28, %v11894_v29  ;;  %v21105_v29 = vld [vmem:[#allocation50_spill] sm:$0xff]  ;;  %v21109_v28 = vld [vmem:[#allocation72_spill] sm:$0xff] }
 0x8cc   : > { %12788 = vst [vmem:[%s20355_s11 + $0x30] sm:$0xff] %v12760_v52  ;;  %v12758_v54 = vadd.f32 %v20346_v32, %v12722_v6  ;;  %v12725_v51 = vadd.f32 %v16214_v9, %v12446_v10  ;;  %v12451_v52 = vadd.f32 %v20333_v47, %v12172_v48  ;;  %v21092_v6 = vld [vmem:[#allocation10_spill] sm:$0xff]  ;;  %v21093_v10 = vld [vmem:[#allocation19_spill] sm:$0xff] }
 0x8cd   : > { %v12626_v41 = vpop.f32.mrf.mxu0  ;;  %v11897_v14 = vadd.f32 %v21093_v10, %v21092_v6  ;;  %v21111_v6 = vld [vmem:[#allocation31_spill] sm:$0xff] }
 0x8ce   : > { %12786 = vst [vmem:[%s20355_s11 + $0x20] sm:$0xff] %v12758_v54  ;;  %v12761_v62 = vadd.f32 %v20346_v32, %v12725_v51  ;;  %v12723_v26 = vadd.f32 %v12626_v41, %v12444_v45  ;;  %v12178_v54 = vadd.f32 %v21094_v17, %v11899_v35  ;;  %v21095_v41 = vld [vmem:[#allocation61_spill] sm:$0xff]  ;;  %v11904_v35 = vadd.f32 %v21108_v36, %v21107_v46 }
 0x8cf   : > { %v16217_v58 = vpop.f32.mrf.mxu0  ;;  %v12176_v47 = vadd.f32 %v21097_v18, %v11897_v14 }
 0x8d0   : > { %12789 = vst [vmem:[%s20355_s11 + $0x38] sm:$0xff] %v12761_v62  ;;  %v12759_v15 = vadd.f32 %v20346_v32, %v12723_v26  ;;  %v12728_v7 = vadd.f32 %v16217_v58, %v12449_v3  ;;  %v11900_v62 = vadd.f32 %v21096_v5, %v21095_v41  ;;  %v12408_v26 = vpop.f32.mrf.mxu1  ;;  %v21114_v41 = vld [vmem:[#allocation32_spill] sm:$0xff] }
 0x8d1   : > { %v12639_v40 = vpop.f32.mrf.mxu0  ;;  %v12455_v21 = vadd.f32 %v20387_v24, %v12176_v47 }
 0x8d2   : > { %12787 = vst [vmem:[%s20355_s11 + $0x28] sm:$0xff] %v12759_v15  ;;  %v12764_v22 = vadd.f32 %v20346_v32, %v12728_v7  ;;  %v12726_v59 = vadd.f32 %v12639_v40, %v12447_v0  ;;  %v12452_v15 = vadd.f32 %v20360_v2, %v12173_v13  ;;  %v21098_v7 = vld [vmem:[#allocation17_spill] sm:$0xff]  ;;  %v21099_v0 = vld [vmem:[#allocation74_spill] sm:$0xff]  ;;  %v12179_v16 = vadd.f32 %v21100_v19, %v11900_v62  ;;  %v16186_v48 = vpop.f32.mrf.mxu1 }
 0x8d3   : > { %v16218_v55 = vpop.f32.mrf.mxu0  ;;  %v11898_v42 = vadd.f32 %v21099_v0, %v21098_v7 }
 0x8d4   : > { %12792 = vst [vmem:[%s20355_s11 + $0x50] sm:$0xff] %v12764_v22  ;;  %v12762_v63 = vadd.f32 %v20346_v32, %v12726_v59  ;;  %v12729_v44 = vadd.f32 %v16218_v55, %v12450_v1  ;;  %v12457_v1 = vadd.f32 %v20373_v57, %v12178_v54  ;;  %v21102_v55 = vld [vmem:[#allocation65_spill] sm:$0xff]  ;;  %v12458_v38 = vadd.f32 %v20401_v61, %v12179_v16  ;;  %v21112_v61 = vld [vmem:[#allocation52_spill] sm:$0xff] }
 0x8d5   : > { %v12642_v8 = vpop.f32.mrf.mxu0  ;;  %v11903_v53 = vadd.f32 %v21102_v55, %v21101_v27  ;;  %v12183_v17 = vadd.f32 %v21112_v61, %v11904_v35 }
 0x8d6   : > { %12790 = vst [vmem:[%s20355_s11 + $0x40] sm:$0xff] %v12762_v63  ;;  %v12765_v4 = vadd.f32 %v20346_v32, %v12729_v44  ;;  %v12727_v31 = vadd.f32 %v12642_v8, %v12448_v39  ;;  %v21103_v44 = vld [vmem:[#allocation11_spill] sm:$0xff]  ;;  %v11901_v8 = vadd.f32 %v21105_v29, %v21104_v49 }
 0x8d7   : > { %v16221_v25 = vpop.f32.mrf.mxu0  ;;  %v12177_v2 = vadd.f32 %v21103_v44, %v11898_v42  ;;  %v12182_v57 = vadd.f32 %v21106_v20, %v11903_v53 }
 0x8d8   : > { %12793 = vst [vmem:[%s20355_s11 + $0x58] sm:$0xff] %v12765_v4  ;;  %v12763_v30 = vadd.f32 %v20346_v32, %v12727_v31  ;;  %v12732_v60 = vadd.f32 %v16221_v25, %v12453_v33  ;;  %v12411_v33 = vpop.f32.mrf.mxu1  ;;  %v12180_v24 = vadd.f32 %v21109_v28, %v11901_v8 }
 0x8d9   : > { %v12655_v9 = vpop.f32.mrf.mxu0 }
 0x8da   : > { %12791 = vst [vmem:[%s20355_s11 + $0x48] sm:$0xff] %v12763_v30  ;;  %v12768_v51 = vadd.f32 %v20346_v32, %v12732_v60  ;;  %v12730_v45 = vadd.f32 %v12655_v9, %v12451_v52  ;;  %v12456_v60 = vadd.f32 %v20415_v34, %v12177_v2  ;;  %v21110_v52 = vld [vmem:[#allocation16_spill] sm:$0xff]  ;;  %v16189_v14 = vpop.f32.mrf.mxu1  ;;  %v21121_v2 = vld [vmem:[#allocation53_spill] sm:$0xff] }
 0x8db   : > { %v16222_v3 = vpop.f32.mrf.mxu0  ;;  %v11902_v10 = vadd.f32 %v21111_v6, %v21110_v52 }
 0x8dc   : > { %12796 = vst [vmem:[%s20355_s11 + $0x70] sm:$0xff] %v12768_v51  ;;  %v12766_v58 = vadd.f32 %v20346_v32, %v12730_v45  ;;  %v12733_v43 = vadd.f32 %v16222_v3, %v12454_v12  ;;  %v12461_v45 = vadd.f32 %v16185_v23, %v12182_v57  ;;  %v21113_v12 = vld [vmem:[#allocation26_spill] sm:$0xff]  ;;  %v21115_v3 = vld [vmem:[#allocation59_spill] sm:$0xff]  ;;  %v12424_v0 = vpop.f32.mrf.mxu1 }
 0x8dd   : > { %v12658_v40 = vpop.f32.mrf.mxu0  ;;  %v11907_v5 = vadd.f32 %v21114_v41, %v21113_v12  ;;  %v12181_v18 = vadd.f32 %v21115_v3, %v11902_v10 }
 0x8de   : > { %12794 = vst [vmem:[%s20355_s11 + $0x60] sm:$0xff] %v12766_v58  ;;  %v12769_v22 = vadd.f32 %v20346_v32, %v12733_v43  ;;  %v12731_v59 = vadd.f32 %v12658_v40, %v12452_v15  ;;  %v12459_v58 = vadd.f32 %v12408_v26, %v12180_v24  ;;  %v21116_v43 = vld [vmem:[#allocation34_spill] sm:$0xff]  ;;  %v21117_v15 = vld [vmem:[#allocation60_spill] sm:$0xff] }
 0x8df   : > { %v16225_v63 = vpop.f32.mrf.mxu0  ;;  %v11905_v7 = vadd.f32 %v21117_v15, %v21116_v43  ;;  %v21118_v40 = vld [vmem:[#allocation36_spill] sm:$0xff]  ;;  %v12460_v44 = vadd.f32 %v12411_v33, %v12181_v18 }
 0x8e0   : > { %12797 = vst [vmem:[%s20355_s11 + $0x78] sm:$0xff] %v12769_v22  ;;  %v12767_v56 = vadd.f32 %v20346_v32, %v12731_v59  ;;  %v12736_v39 = vadd.f32 %v16225_v63, %v12457_v1  ;;  %v12186_v19 = vadd.f32 %v21118_v40, %v11907_v5  ;;  %v12462_v22 = vadd.f32 %v16186_v48, %v12183_v17  ;;  %v21119_v59 = vld [vmem:[#allocation37_spill] sm:$0xff]  ;;  %v21120_v1 = vld [vmem:[#allocation12_spill] sm:$0xff] }
 0x8e1   : > { %v12671_v11 = vpop.f32.mrf.mxu0  ;;  %v11908_v27 = vadd.f32 %v21120_v1, %v21119_v59  ;;  %v12184_v53 = vadd.f32 %v20329_v37, %v11905_v7  ;;  %v21123_v48 = vld [vmem:[#allocation44_spill] sm:$0xff] }
 0x8e2   : > { %12795 = vst [vmem:[%s20355_s11 + $0x68] sm:$0xff] %v12767_v56  ;;  %v12772_v4 = vadd.f32 %v20346_v32, %v12736_v39  ;;  %v12734_v31 = vadd.f32 %v12671_v11, %v12455_v21  ;;  %v21122_v56 = vld [vmem:[#allocation18_spill] sm:$0xff]  ;;  %v16190_v21 = vpop.f32.mrf.mxu1  ;;  %v12465_v29 = vadd.f32 %v16189_v14, %v12186_v19 }
 0x8e3   : > { %v16226_v25 = vpop.f32.mrf.mxu0  ;;  %v11906_v39 = vadd.f32 %v21122_v56, %v21121_v2  ;;  %v12187_v8 = vadd.f32 %v21123_v48, %v11908_v27  ;;  %v12463_v57 = vadd.f32 %v12424_v0, %v12184_v53 }
 0x8e4   : > { %12800 = vst [vmem:[%s20355_s11 + $0x90] sm:$0xff] %v12772_v4  ;;  %v12770_v13 = vadd.f32 %v20346_v32, %v12734_v31  ;;  %v12737_v30 = vadd.f32 %v16226_v25, %v12458_v38  ;;  %v12427_v33 = vpop.f32.mrf.mxu1 }
 0x8e5   : > { %v12674_v9 = vpop.f32.mrf.mxu0  ;;  %v12185_v4 = vadd.f32 %v20339_v50, %v11906_v39  ;;  %v12466_v36 = vadd.f32 %v16190_v21, %v12187_v8 }
 0x8e6   : > { %12798 = vst [vmem:[%s20355_s11 + $0x80] sm:$0xff] %v12770_v13  ;;  %v12773_v54 = vadd.f32 %v20346_v32, %v12737_v30  ;;  %v12735_v51 = vadd.f32 %v12674_v9, %v12456_v60 }
 0x8e7   : > { %v16229_v62 = vpop.f32.mrf.mxu0  ;;  %v12464_v24 = vadd.f32 %v12427_v33, %v12185_v4 }
 0x8e8   : > { %12801 = vst [vmem:[%s20355_s11 + $0x98] sm:$0xff] %v12773_v54  ;;  %v12771_v34 = vadd.f32 %v20346_v32, %v12735_v51  ;;  %v12740_v47 = vadd.f32 %v16229_v62, %v12461_v45 }
 0x8e9   : > { %v12687_v42 = vpop.f32.mrf.mxu0 }
 0x8ea   : > { %12799 = vst [vmem:[%s20355_s11 + $0x88] sm:$0xff] %v12771_v34  ;;  %v12776_v23 = vadd.f32 %v20346_v32, %v12740_v47  ;;  %v12738_v16 = vadd.f32 %v12687_v42, %v12459_v58 }
 0x8eb   : > { %v16230_v55 = vpop.f32.mrf.mxu0 }
 0x8ec   : > { %12804 = vst [vmem:[%s20355_s11 + $0xb0] sm:$0xff] %v12776_v23  ;;  %v12774_v26 = vadd.f32 %v20346_v32, %v12738_v16  ;;  %v12741_v63 = vadd.f32 %v16230_v55, %v12462_v22 }
 0x8ed   : > { %v12690_v49 = vpop.f32.mrf.mxu0 }
 0x8ee   : > { %12802 = vst [vmem:[%s20355_s11 + $0xa0] sm:$0xff] %v12774_v26  ;;  %v12777_v11 = vadd.f32 %v20346_v32, %v12741_v63  ;;  %v12739_v37 = vadd.f32 %v12690_v49, %v12460_v44 }
 0x8ef   : > { %v16233_v20 = vpop.f32.mrf.mxu0 }
 0x8f0   : > { %12805 = vst [vmem:[%s20355_s11 + $0xb8] sm:$0xff] %v12777_v11  ;;  %v12775_v31 = vadd.f32 %v20346_v32, %v12739_v37  ;;  %v12744_v38 = vadd.f32 %v16233_v20, %v12465_v29 }
 0x8f1   : > { %v12703_v46 = vpop.f32.mrf.mxu0 }
 0x8f2   : > { %12803 = vst [vmem:[%s20355_s11 + $0xa8] sm:$0xff] %v12775_v31  ;;  %v12780_v35 = vadd.f32 %v20346_v32, %v12744_v38  ;;  %v12742_v25 = vadd.f32 %v12703_v46, %v12463_v57 }
 0x8f3   : > { %v16234_v28 = vpop.f32.mrf.mxu0 }
 0x8f4   : > { %12808 = vst [vmem:[%s20355_s11 + $0xd0] sm:$0xff] %v12780_v35  ;;  %v12778_v13 = vadd.f32 %v20346_v32, %v12742_v25  ;;  %v12745_v50 = vadd.f32 %v16234_v28, %v12466_v36 }
 0x8f5   : > { %v12706_v30 = vpop.f32.mrf.mxu0 }
 0x8f6   : > { %12806 = vst [vmem:[%s20355_s11 + $0xc0] sm:$0xff] %v12778_v13  ;;  %v12781_v60 = vadd.f32 %v20346_v32, %v12745_v50  ;;  %v12743_v52 = vadd.f32 %v12706_v30, %v12464_v24 }
 0x8f8   : > { %12809 = vst [vmem:[%s20355_s11 + $0xd8] sm:$0xff] %v12781_v60  ;;  %v12779_v6 = vadd.f32 %v20346_v32, %v12743_v52 }
 0x8fa   : > { %12807 = vst [vmem:[%s20355_s11 + $0xc8] sm:$0xff] %v12779_v6 }
 0x8fb PF: > { %s15_s12 = sadd.s32 1, %s16717_s12  }
 0x8fc   : > { %p12_p2 = scmp.ge.s32.totalorder %s15_s12, 4  }
 0x8fe   :  { %14 = sbr.rel (!%p12_p2) target bundleno = 2 (0x2), region = 79 }
 0x903   :  { %12831 = vsyncpa [#allocation5], 1 }
 0x904   :  { %12833 = vsyncpa [#allocation5 + $0x1], 1 }
 0x905   :  { %12834 = vsyncpa [#allocation7], 1 }

</bundles_post_ra>
